<compile_context>
chip_gen: v7x
topology: tpu7x:2x2x1
jax: 0.10.0
libtpu: 0.0.40
codegen_flags: <defaults>
</compile_context>

<pallas_src>
import jax
import jax.numpy as jnp
import numpy as np
from jax import lax
from jax.experimental import pallas as pl
from jax.experimental.pallas import tpu as pltpu

# ---- synthetic config (stands in for config['CNN'] of the torch module) ----
# fc1 expects in_channels * 7 * 7 features => input spatial 28x28, two pools.
CONFIG = {
    "input_channels": 1,
    "num_classes": 10,
    "conv_layers": [(8, 3), (16, 3)],  # (out_channels, kernel_size)
    "fc_units": 32,
}


# --------------------------- fused Pallas kernel ------------------------------
def fused_cnn_kernel(x_ref, w1_ref, b1_ref, w2_ref, b2_ref,
                     wf1_ref, bf1_ref, wf2_ref, bf2_ref,
                     o_ref, y1q_ref, slab2_ref, flat_ref):
    # Shapes (bt = batch tile):
    #   x_ref:     (bt, 784, 9*Cin)  layer-1 im2col slab; rows ordered
    #              (pool r,s | parity pi,pj | ih,jh), cols (dy,dx,ci)
    #   w1_ref:    (9*Cin, C1)   b1_ref: (1, C1)
    #   w2_ref:    (9*C1, C2)    b2_ref: (1, C2)
    #   wf1_ref:   (49*C2, U)    bf1_ref: (1, U)   (NCHW-flatten baked in)
    #   wf2_ref:   (U, NC)       bf2_ref: (1, NC)
    #   o_ref:     (1, bt, NC)
    #   y1q_ref:   (bt, 4, 9, 9, C1)    zero-padded, parity-split pool-1 output
    #   slab2_ref: (4, bt, 7, 7, 9*C1)  layer-2 im2col slab assembled in VMEM
    #   flat_ref:  (bt, 49*C2)          flattened pool-2 output for fc1
    bt = x_ref.shape[0]
    k1 = x_ref.shape[2]
    c1 = w1_ref.shape[1]
    c2 = w2_ref.shape[1]

    # ---- layer 1: conv3x3 (single K=9*Cin matmul) + bias + relu + 2x2 maxpool
    a = x_ref[...].reshape(bt * 784, k1)
    z = jnp.dot(a, w1_ref[...], preferred_element_type=jnp.float32)
    z = jnp.maximum(z + b1_ref[...], 0.0)
    z = z.reshape(bt, 4, 196, c1)                      # axis 1 = pool position
    y1 = jnp.maximum(jnp.maximum(z[:, 0], z[:, 1]),
                     jnp.maximum(z[:, 2], z[:, 3]))    # (bt, 196, c1)

    # pooled layer-1 output is already parity-ordered (pi, pj, ih, jh); drop it
    # into a zero-padded parity-split scratch so layer-2's im2col is contiguous
    y1q_ref[...] = jnp.zeros(y1q_ref.shape, jnp.float32)
    y1q_ref[:, :, 1:8, 1:8, :] = y1.reshape(bt, 4, 7, 7, c1)

    # ---- layer-2 im2col: 36 contiguous VMEM->VMEM copies (no HBM, no strides)
    for r in range(2):
        for s in range(2):
            p2 = r * 2 + s
            for dy in range(3):
                for dx in range(3):
                    aa = r + dy
                    cc = s + dx
                    q = ((aa + 1) % 2) * 2 + ((cc + 1) % 2)   # parity slot
                    oa = (aa + 1) // 2                        # row offset
                    oc = (cc + 1) // 2                        # col offset
                    t = dy * 3 + dx
                    slab2_ref[p2, :, :, :, t * c1:(t + 1) * c1] = (
                        y1q_ref[:, q, oa:oa + 7, oc:oc + 7, :])

    # ---- layer 2: single K=9*C1 matmul + bias + relu + 2x2 maxpool
    s2 = slab2_ref[...].reshape(4 * bt * 49, 9 * c1)
    z2 = jnp.dot(s2, w2_ref[...], preferred_element_type=jnp.float32)
    z2 = jnp.maximum(z2 + b2_ref[...], 0.0)
    z2 = z2.reshape(4, bt * 49, c2)
    y2 = jnp.maximum(jnp.maximum(z2[0], z2[1]),
                     jnp.maximum(z2[2], z2[3]))        # (bt*49, c2)

    # ---- flatten (spatial-major, channel-minor) via contiguous VMEM stores;
    #      fc1's weights were permuted in the wrapper to match this order.
    y2r = y2.reshape(bt, 49, c2)
    for p in range(49):
        flat_ref[:, p * c2:(p + 1) * c2] = y2r[:, p, :]

    # ---- classifier head: fc1 + relu + fc2 (kept in VMEM, single tiny store)
    h = jnp.dot(flat_ref[...], wf1_ref[...], preferred_element_type=jnp.float32)
    h = jnp.maximum(h + bf1_ref[...], 0.0)
    out = jnp.dot(h, wf2_ref[...], preferred_element_type=jnp.float32) + bf2_ref[...]
    o_ref[0] = out.astype(o_ref.dtype)


# --------------------------- wrapper ------------------------------------------
def cnn_forward(x_nchw, params):
    """Matches CNN.forward.  x_nchw: (B, Cin, 28, 28) float32 -> (B, num_classes)."""
    x = jnp.transpose(x_nchw, (0, 2, 3, 1)).astype(jnp.float32)   # NHWC
    B, H, W, Cin = x.shape
    assert H == 28 and W == 28, "fc1 of the reference module implies 28x28 inputs"
    assert len(params["conv"]) == 2, "kernel is specialized to the 2-conv config"
    (w1, b1), (w2, b2) = params["conv"]
    C1, C2 = w1.shape[0], w2.shape[0]
    U, NC = params["fc1_w"].shape[0], params["fc2_w"].shape[0]
    K1, K2, F = 9 * Cin, 9 * C1, 49 * C2

    # layer-1 im2col slab (XLA side; tiny: 9*Cin columns, no channel padding).
    # Rows are ordered (r, s, pi, pj, ih, jh) so the pooled layer-1 output comes
    # out of the kernel already parity-split for the in-VMEM layer-2 im2col.
    xp = jnp.pad(x, ((0, 0), (1, 1), (1, 1), (0, 0)))             # (B, 30, 30, Cin)
    blocks = []
    for r in range(2):
        for s in range(2):
            for pi in range(2):
                for pj in range(2):
                    taps = []
                    for dy in range(3):
                        for dx in range(3):
                            u0 = 2 * pi + r + dy                  # 0..5
                            v0 = 2 * pj + s + dx
                            taps.append(xp[:, u0:u0 + 25:4, v0:v0 + 25:4, :])
                    blocks.append(jnp.concatenate(taps, axis=-1).reshape(B, 49, K1))
    slab1 = jnp.concatenate(blocks, axis=1)                        # (B, 784, 9*Cin)

    # weights in matmul layout (tap-major, channel-minor on K; out-channel on N)
    w1m = jnp.transpose(w1, (2, 3, 1, 0)).reshape(K1, C1)
    w2m = jnp.transpose(w2, (2, 3, 1, 0)).reshape(K2, C2)
    # bake PyTorch's NCHW flatten (c*49 + p) into fc1 (kernel flattens as (p, c))
    wf1 = jnp.transpose(params["fc1_w"].reshape(U, C2, 49), (2, 1, 0)).reshape(F, U)
    wf2 = params["fc2_w"].T
    b1m, b2m = b1.reshape(1, C1), b2.reshape(1, C2)
    bf1, bf2 = params["fc1_b"].reshape(1, U), params["fc2_b"].reshape(1, NC)

    # batch blocking: >=2 grid steps whenever B>=2 (v7x has 2 TensorCores);
    # tiles stay far under VMEM limits on v5e/v6e/v7x.
    bt = 1 if B < 8 else 8
    nb = -(-B // bt)
    Bp = nb * bt
    if Bp != B:
        slab1 = jnp.pad(slab1, ((0, Bp - B), (0, 0), (0, 0)))

    out = pl.pallas_call(
        fused_cnn_kernel,
        out_shape=jax.ShapeDtypeStruct((nb, bt, NC), jnp.float32),
        grid=(nb,),
        in_specs=[
            pl.BlockSpec((bt, 784, K1), lambda i: (i, 0, 0)),
            pl.BlockSpec((K1, C1), lambda i: (0, 0)),
            pl.BlockSpec((1, C1), lambda i: (0, 0)),
            pl.BlockSpec((K2, C2), lambda i: (0, 0)),
            pl.BlockSpec((1, C2), lambda i: (0, 0)),
            pl.BlockSpec((F, U), lambda i: (0, 0)),
            pl.BlockSpec((1, U), lambda i: (0, 0)),
            pl.BlockSpec((U, NC), lambda i: (0, 0)),
            pl.BlockSpec((1, NC), lambda i: (0, 0)),
        ],
        out_specs=pl.BlockSpec((1, bt, NC), lambda i: (i, 0, 0)),
        scratch_shapes=[
            pltpu.VMEM((bt, 4, 9, 9, C1), jnp.float32),     # parity-split pool-1 out
            pltpu.VMEM((4, bt, 7, 7, K2), jnp.float32),     # layer-2 im2col slab
            pltpu.VMEM((bt, F), jnp.float32),               # flattened features
        ],
        compiler_params=pltpu.CompilerParams(dimension_semantics=("parallel",)),
    )(slab1, w1m, b1m, w2m, b2m, wf1, bf1, wf2, bf2)
    return out.reshape(Bp, NC)[:B]


# --------------------------- params & reference -------------------------------
def init_params(key):
    params = {"conv": []}
    in_ch = CONFIG["input_channels"]
    k = key
    for out_ch, ks in CONFIG["conv_layers"]:
        assert ks == 3, "kernel implements 3x3 / pad=1 convs"
        k, k1, k2 = jax.random.split(k, 3)
        fan_in = in_ch * ks * ks
        w = jax.random.normal(k1, (out_ch, in_ch, ks, ks), jnp.float32) / np.sqrt(fan_in)
        b = 0.1 * jax.random.normal(k2, (out_ch,), jnp.float32)
        params["conv"].append((w, b))
        in_ch = out_ch
    feat = in_ch * 7 * 7
    k, k1, k2, k3, k4 = jax.random.split(k, 5)
    params["fc1_w"] = jax.random.normal(k1, (CONFIG["fc_units"], feat), jnp.float32) / np.sqrt(feat)
    params["fc1_b"] = 0.1 * jax.random.normal(k2, (CONFIG["fc_units"],), jnp.float32)
    params["fc2_w"] = jax.random.normal(
        k3, (CONFIG["num_classes"], CONFIG["fc_units"]), jnp.float32
    ) / np.sqrt(CONFIG["fc_units"])
    params["fc2_b"] = 0.1 * jax.random.normal(k4, (CONFIG["num_classes"],), jnp.float32)
    return params


def reference_forward(x_nchw, params):
    x = x_nchw
    for (w, b) in params["conv"]:
        x = lax.conv_general_dilated(
            x, w, (1, 1), ((1, 1), (1, 1)), dimension_numbers=("NCHW", "OIHW", "NCHW")
        )
        x = jnp.maximum(x + b[None, :, None, None], 0.0)
        x = lax.reduce_window(x, -jnp.inf, lax.max, (1, 1, 2, 2), (1, 1, 2, 2), "VALID")
    flat = x.reshape(x.shape[0], -1)
    h = jnp.maximum(flat @ params["fc1_w"].T + params["fc1_b"], 0.0)
    return h @ params["fc2_w"].T + params["fc2_b"]


# --------------------------- main ----------------------------------------------
if __name__ == "__main__":
    key = jax.random.PRNGKey(0)
    kp, kx = jax.random.split(key)
    params = init_params(kp)
    x = jax.random.normal(kx, (2, CONFIG["input_channels"], 28, 28), jnp.float32)

    fwd = jax.jit(cnn_forward)
    out = jax.block_until_ready(fwd(x, params))
    ref = jax.block_until_ready(reference_forward(x, params))

    assert out.shape == (2, CONFIG["num_classes"])
    np.testing.assert_allclose(np.asarray(out), np.asarray(ref), rtol=5e-2, atol=5e-2)
    print("KERNEL_OK")
</pallas_src>

<mosaic_0001>
module attributes {stable_mosaic.version = 11 : i64} {
  func.func @fused_cnn_kernel(%arg0: i32, %arg1: memref<1x784x9xf32, #tpu.memory_space<vmem>>, %arg2: memref<9x8xf32, #tpu.memory_space<vmem>>, %arg3: memref<1x8xf32, #tpu.memory_space<vmem>>, %arg4: memref<72x16xf32, #tpu.memory_space<vmem>>, %arg5: memref<1x16xf32, #tpu.memory_space<vmem>>, %arg6: memref<784x32xf32, #tpu.memory_space<vmem>>, %arg7: memref<1x32xf32, #tpu.memory_space<vmem>>, %arg8: memref<32x10xf32, #tpu.memory_space<vmem>>, %arg9: memref<1x10xf32, #tpu.memory_space<vmem>>, %arg10: memref<1x1x10xf32, #tpu.memory_space<vmem>>, %arg11: memref<1x4x9x9x8xf32, #tpu.memory_space<vmem>>, %arg12: memref<4x1x7x7x72xf32, #tpu.memory_space<vmem>>, %arg13: memref<1x784xf32, #tpu.memory_space<vmem>>) attributes {dimension_semantics = [#tpu.dimension_semantics<parallel>], iteration_bounds = array<i64: 2>, scalar_prefetch = 0 : i64, scratch_operands = 3 : i64, tpu.core_type = #tpu.core_type<tc>, window_params = [{transform_indices = @transform_0, window_bounds = array<i64: 1, 784, 9>}, {pipeline_mode = #tpu.pipeline_mode<synchronous>, transform_indices = @transform_1, window_bounds = array<i64: 9, 8>}, {pipeline_mode = #tpu.pipeline_mode<synchronous>, transform_indices = @transform_2, window_bounds = array<i64: 1, 8>}, {pipeline_mode = #tpu.pipeline_mode<synchronous>, transform_indices = @transform_3, window_bounds = array<i64: 72, 16>}, {pipeline_mode = #tpu.pipeline_mode<synchronous>, transform_indices = @transform_4, window_bounds = array<i64: 1, 16>}, {pipeline_mode = #tpu.pipeline_mode<synchronous>, transform_indices = @transform_5, window_bounds = array<i64: 784, 32>}, {pipeline_mode = #tpu.pipeline_mode<synchronous>, transform_indices = @transform_6, window_bounds = array<i64: 1, 32>}, {pipeline_mode = #tpu.pipeline_mode<synchronous>, transform_indices = @transform_7, window_bounds = array<i64: 32, 10>}, {pipeline_mode = #tpu.pipeline_mode<synchronous>, transform_indices = @transform_8, window_bounds = array<i64: 1, 10>}, {transform_indices = @transform_9, window_bounds = array<i64: 1, 1, 10>}]} {
    %c0 = arith.constant 0 : index
    %c0_0 = arith.constant 0 : index
    %c0_1 = arith.constant 0 : index
    %0 = vector.load %arg1[%c0, %c0_0, %c0_1] : memref<1x784x9xf32, #tpu.memory_space<vmem>>, vector<1x784x9xf32>
    %1 = vector.shape_cast %0 : vector<1x784x9xf32> to vector<784x9xf32>
    %c0_2 = arith.constant 0 : index
    %c0_3 = arith.constant 0 : index
    %2 = vector.load %arg2[%c0_2, %c0_3] : memref<9x8xf32, #tpu.memory_space<vmem>>, vector<9x8xf32>
    %cst = arith.constant dense<0.000000e+00> : vector<784x8xf32>
    %3 = tpu.matmul %1, %2, %cst {dimension_numbers = #tpu.dot_dimension_numbers<[1], [0], [0], [1], [0, 0, 1, 1], [], []>} : vector<784x9xf32>, vector<9x8xf32>, vector<784x8xf32> -> vector<784x8xf32>
    %c0_4 = arith.constant 0 : index
    %c0_5 = arith.constant 0 : index
    %4 = vector.load %arg3[%c0_4, %c0_5] : memref<1x8xf32, #tpu.memory_space<vmem>>, vector<1x8xf32>
    %5 = vector.broadcast %4 : vector<1x8xf32> to vector<784x8xf32>
    %6 = arith.addf %3, %5 : vector<784x8xf32>
    %cst_6 = arith.constant 0.000000e+00 : f32
    %7 = vector.broadcast %cst_6 : f32 to vector<784x8xf32>
    %8 = arith.maximumf %6, %7 : vector<784x8xf32>
    %9 = vector.shape_cast %8 : vector<784x8xf32> to vector<1x4x196x8xf32>
    %10 = vector.extract_strided_slice %9 {offsets = [0, 0, 0, 0], sizes = [1, 1, 196, 8], strides = [1, 1, 1, 1]} : vector<1x4x196x8xf32> to vector<1x1x196x8xf32>
    %11 = vector.shape_cast %10 : vector<1x1x196x8xf32> to vector<1x196x8xf32>
    %12 = vector.extract_strided_slice %9 {offsets = [0, 1, 0, 0], sizes = [1, 1, 196, 8], strides = [1, 1, 1, 1]} : vector<1x4x196x8xf32> to vector<1x1x196x8xf32>
    %13 = vector.shape_cast %12 : vector<1x1x196x8xf32> to vector<1x196x8xf32>
    %14 = arith.maximumf %11, %13 : vector<1x196x8xf32>
    %15 = vector.extract_strided_slice %9 {offsets = [0, 2, 0, 0], sizes = [1, 1, 196, 8], strides = [1, 1, 1, 1]} : vector<1x4x196x8xf32> to vector<1x1x196x8xf32>
    %16 = vector.shape_cast %15 : vector<1x1x196x8xf32> to vector<1x196x8xf32>
    %17 = vector.extract_strided_slice %9 {offsets = [0, 3, 0, 0], sizes = [1, 1, 196, 8], strides = [1, 1, 1, 1]} : vector<1x4x196x8xf32> to vector<1x1x196x8xf32>
    %18 = vector.shape_cast %17 : vector<1x1x196x8xf32> to vector<1x196x8xf32>
    %19 = arith.maximumf %16, %18 : vector<1x196x8xf32>
    %20 = arith.maximumf %14, %19 : vector<1x196x8xf32>
    %cst_7 = arith.constant 0.000000e+00 : f32
    %21 = vector.broadcast %cst_7 : f32 to vector<1x4x9x9x8xf32>
    %c0_8 = arith.constant 0 : index
    %c0_9 = arith.constant 0 : index
    %c0_10 = arith.constant 0 : index
    %c0_11 = arith.constant 0 : index
    %c0_12 = arith.constant 0 : index
    %22 = vector.load %arg11[%c0_8, %c0_9, %c0_10, %c0_11, %c0_12] : memref<1x4x9x9x8xf32, #tpu.memory_space<vmem>>, vector<1x4x9x9x8xf32>
    tpu.vector_store %arg11[%c0_8, %c0_9, %c0_10, %c0_11, %c0_12], %21 {strides = array<i32>} : memref<1x4x9x9x8xf32, #tpu.memory_space<vmem>>, vector<1x4x9x9x8xf32>,
    %23 = vector.shape_cast %20 : vector<1x196x8xf32> to vector<1x4x7x7x8xf32>
    %c0_13 = arith.constant 0 : index
    %c0_14 = arith.constant 0 : index
    %c1 = arith.constant 1 : index
    %c1_15 = arith.constant 1 : index
    %c0_16 = arith.constant 0 : index
    %24 = vector.load %arg11[%c0_13, %c0_14, %c1, %c1_15, %c0_16] : memref<1x4x9x9x8xf32, #tpu.memory_space<vmem>>, vector<1x4x7x7x8xf32>
    tpu.vector_store %arg11[%c0_13, %c0_14, %c1, %c1_15, %c0_16], %23 {strides = array<i32>} : memref<1x4x9x9x8xf32, #tpu.memory_space<vmem>>, vector<1x4x7x7x8xf32>,
    %c0_17 = arith.constant 0 : index
    %c3 = arith.constant 3 : index
    %c0_18 = arith.constant 0 : index
    %c0_19 = arith.constant 0 : index
    %c0_20 = arith.constant 0 : index
    %25 = vector.load %arg11[%c0_17, %c3, %c0_18, %c0_19, %c0_20] : memref<1x4x9x9x8xf32, #tpu.memory_space<vmem>>, vector<1x1x7x7x8xf32>
    %26 = vector.shape_cast %25 : vector<1x1x7x7x8xf32> to vector<1x7x7x8xf32>
    %c0_21 = arith.constant 0 : index
    %c0_22 = arith.constant 0 : index
    %c0_23 = arith.constant 0 : index
    %c0_24 = arith.constant 0 : index
    %c0_25 = arith.constant 0 : index
    %27 = vector.load %arg12[%c0_21, %c0_22, %c0_23, %c0_24, %c0_25] : memref<4x1x7x7x72xf32, #tpu.memory_space<vmem>>, vector<1x1x7x7x8xf32>
    %28 = vector.shape_cast %27 : vector<1x1x7x7x8xf32> to vector<1x7x7x8xf32>
    %29 = vector.shape_cast %26 : vector<1x7x7x8xf32> to vector<1x1x7x7x8xf32>
    tpu.vector_store %arg12[%c0_21, %c0_22, %c0_23, %c0_24, %c0_25], %29 {strides = array<i32>} : memref<4x1x7x7x72xf32, #tpu.memory_space<vmem>>, vector<1x1x7x7x8xf32>,
    %c0_26 = arith.constant 0 : index
    %c2 = arith.constant 2 : index
    %c0_27 = arith.constant 0 : index
    %c1_28 = arith.constant 1 : index
    %c0_29 = arith.constant 0 : index
    %30 = vector.load %arg11[%c0_26, %c2, %c0_27, %c1_28, %c0_29] : memref<1x4x9x9x8xf32, #tpu.memory_space<vmem>>, vector<1x1x7x7x8xf32>
    %31 = vector.shape_cast %30 : vector<1x1x7x7x8xf32> to vector<1x7x7x8xf32>
    %c0_30 = arith.constant 0 : index
    %c0_31 = arith.constant 0 : index
    %c0_32 = arith.constant 0 : index
    %c0_33 = arith.constant 0 : index
    %c8 = arith.constant 8 : index
    %32 = vector.load %arg12[%c0_30, %c0_31, %c0_32, %c0_33, %c8] : memref<4x1x7x7x72xf32, #tpu.memory_space<vmem>>, vector<1x1x7x7x8xf32>
    %33 = vector.shape_cast %32 : vector<1x1x7x7x8xf32> to vector<1x7x7x8xf32>
    %34 = vector.shape_cast %31 : vector<1x7x7x8xf32> to vector<1x1x7x7x8xf32>
    tpu.vector_store %arg12[%c0_30, %c0_31, %c0_32, %c0_33, %c8], %34 {strides = array<i32>} : memref<4x1x7x7x72xf32, #tpu.memory_space<vmem>>, vector<1x1x7x7x8xf32>,
    %c0_34 = arith.constant 0 : index
    %c3_35 = arith.constant 3 : index
    %c0_36 = arith.constant 0 : index
    %c1_37 = arith.constant 1 : index
    %c0_38 = arith.constant 0 : index
    %35 = vector.load %arg11[%c0_34, %c3_35, %c0_36, %c1_37, %c0_38] : memref<1x4x9x9x8xf32, #tpu.memory_space<vmem>>, vector<1x1x7x7x8xf32>
    %36 = vector.shape_cast %35 : vector<1x1x7x7x8xf32> to vector<1x7x7x8xf32>
    %c0_39 = arith.constant 0 : index
    %c0_40 = arith.constant 0 : index
    %c0_41 = arith.constant 0 : index
    %c0_42 = arith.constant 0 : index
    %c16 = arith.constant 16 : index
    %37 = vector.load %arg12[%c0_39, %c0_40, %c0_41, %c0_42, %c16] : memref<4x1x7x7x72xf32, #tpu.memory_space<vmem>>, vector<1x1x7x7x8xf32>
    %38 = vector.shape_cast %37 : vector<1x1x7x7x8xf32> to vector<1x7x7x8xf32>
    %39 = vector.shape_cast %36 : vector<1x7x7x8xf32> to vector<1x1x7x7x8xf32>
    tpu.vector_store %arg12[%c0_39, %c0_40, %c0_41, %c0_42, %c16], %39 {strides = array<i32>} : memref<4x1x7x7x72xf32, #tpu.memory_space<vmem>>, vector<1x1x7x7x8xf32>,
    %c0_43 = arith.constant 0 : index
    %c1_44 = arith.constant 1 : index
    %c1_45 = arith.constant 1 : index
    %c0_46 = arith.constant 0 : index
    %c0_47 = arith.constant 0 : index
    %40 = vector.load %arg11[%c0_43, %c1_44, %c1_45, %c0_46, %c0_47] : memref<1x4x9x9x8xf32, #tpu.memory_space<vmem>>, vector<1x1x7x7x8xf32>
    %41 = vector.shape_cast %40 : vector<1x1x7x7x8xf32> to vector<1x7x7x8xf32>
    %c0_48 = arith.constant 0 : index
    %c0_49 = arith.constant 0 : index
    %c0_50 = arith.constant 0 : index
    %c0_51 = arith.constant 0 : index
    %c24 = arith.constant 24 : index
    %42 = vector.load %arg12[%c0_48, %c0_49, %c0_50, %c0_51, %c24] : memref<4x1x7x7x72xf32, #tpu.memory_space<vmem>>, vector<1x1x7x7x8xf32>
    %43 = vector.shape_cast %42 : vector<1x1x7x7x8xf32> to vector<1x7x7x8xf32>
    %44 = vector.shape_cast %41 : vector<1x7x7x8xf32> to vector<1x1x7x7x8xf32>
    tpu.vector_store %arg12[%c0_48, %c0_49, %c0_50, %c0_51, %c24], %44 {strides = array<i32>} : memref<4x1x7x7x72xf32, #tpu.memory_space<vmem>>, vector<1x1x7x7x8xf32>,
    %c0_52 = arith.constant 0 : index
    %c0_53 = arith.constant 0 : index
    %c1_54 = arith.constant 1 : index
    %c1_55 = arith.constant 1 : index
    %c0_56 = arith.constant 0 : index
    %45 = vector.load %arg11[%c0_52, %c0_53, %c1_54, %c1_55, %c0_56] : memref<1x4x9x9x8xf32, #tpu.memory_space<vmem>>, vector<1x1x7x7x8xf32>
    %46 = vector.shape_cast %45 : vector<1x1x7x7x8xf32> to vector<1x7x7x8xf32>
    %c0_57 = arith.constant 0 : index
    %c0_58 = arith.constant 0 : index
    %c0_59 = arith.constant 0 : index
    %c0_60 = arith.constant 0 : index
    %c32 = arith.constant 32 : index
    %47 = vector.load %arg12[%c0_57, %c0_58, %c0_59, %c0_60, %c32] : memref<4x1x7x7x72xf32, #tpu.memory_space<vmem>>, vector<1x1x7x7x8xf32>
    %48 = vector.shape_cast %47 : vector<1x1x7x7x8xf32> to vector<1x7x7x8xf32>
    %49 = vector.shape_cast %46 : vector<1x7x7x8xf32> to vector<1x1x7x7x8xf32>
    tpu.vector_store %arg12[%c0_57, %c0_58, %c0_59, %c0_60, %c32], %49 {strides = array<i32>} : memref<4x1x7x7x72xf32, #tpu.memory_space<vmem>>, vector<1x1x7x7x8xf32>,
    %c0_61 = arith.constant 0 : index
    %c1_62 = arith.constant 1 : index
    %c1_63 = arith.constant 1 : index
    %c1_64 = arith.constant 1 : index
    %c0_65 = arith.constant 0 : index
    %50 = vector.load %arg11[%c0_61, %c1_62, %c1_63, %c1_64, %c0_65] : memref<1x4x9x9x8xf32, #tpu.memory_space<vmem>>, vector<1x1x7x7x8xf32>
    %51 = vector.shape_cast %50 : vector<1x1x7x7x8xf32> to vector<1x7x7x8xf32>
    %c0_66 = arith.constant 0 : index
    %c0_67 = arith.constant 0 : index
    %c0_68 = arith.constant 0 : index
    %c0_69 = arith.constant 0 : index
    %c40 = arith.constant 40 : index
    %52 = vector.load %arg12[%c0_66, %c0_67, %c0_68, %c0_69, %c40] : memref<4x1x7x7x72xf32, #tpu.memory_space<vmem>>, vector<1x1x7x7x8xf32>
    %53 = vector.shape_cast %52 : vector<1x1x7x7x8xf32> to vector<1x7x7x8xf32>
    %54 = vector.shape_cast %51 : vector<1x7x7x8xf32> to vector<1x1x7x7x8xf32>
    tpu.vector_store %arg12[%c0_66, %c0_67, %c0_68, %c0_69, %c40], %54 {strides = array<i32>} : memref<4x1x7x7x72xf32, #tpu.memory_space<vmem>>, vector<1x1x7x7x8xf32>,
    %c0_70 = arith.constant 0 : index
    %c3_71 = arith.constant 3 : index
    %c1_72 = arith.constant 1 : index
    %c0_73 = arith.constant 0 : index
    %c0_74 = arith.constant 0 : index
    %55 = vector.load %arg11[%c0_70, %c3_71, %c1_72, %c0_73, %c0_74] : memref<1x4x9x9x8xf32, #tpu.memory_space<vmem>>, vector<1x1x7x7x8xf32>
    %56 = vector.shape_cast %55 : vector<1x1x7x7x8xf32> to vector<1x7x7x8xf32>
    %c0_75 = arith.constant 0 : index
    %c0_76 = arith.constant 0 : index
    %c0_77 = arith.constant 0 : index
    %c0_78 = arith.constant 0 : index
    %c48 = arith.constant 48 : index
    %57 = vector.load %arg12[%c0_75, %c0_76, %c0_77, %c0_78, %c48] : memref<4x1x7x7x72xf32, #tpu.memory_space<vmem>>, vector<1x1x7x7x8xf32>
    %58 = vector.shape_cast %57 : vector<1x1x7x7x8xf32> to vector<1x7x7x8xf32>
    %59 = vector.shape_cast %56 : vector<1x7x7x8xf32> to vector<1x1x7x7x8xf32>
    tpu.vector_store %arg12[%c0_75, %c0_76, %c0_77, %c0_78, %c48], %59 {strides = array<i32>} : memref<4x1x7x7x72xf32, #tpu.memory_space<vmem>>, vector<1x1x7x7x8xf32>,
    %c0_79 = arith.constant 0 : index
    %c2_80 = arith.constant 2 : index
    %c1_81 = arith.constant 1 : index
    %c1_82 = arith.constant 1 : index
    %c0_83 = arith.constant 0 : index
    %60 = vector.load %arg11[%c0_79, %c2_80, %c1_81, %c1_82, %c0_83] : memref<1x4x9x9x8xf32, #tpu.memory_space<vmem>>, vector<1x1x7x7x8xf32>
    %61 = vector.shape_cast %60 : vector<1x1x7x7x8xf32> to vector<1x7x7x8xf32>
    %c0_84 = arith.constant 0 : index
    %c0_85 = arith.constant 0 : index
    %c0_86 = arith.constant 0 : index
    %c0_87 = arith.constant 0 : index
    %c56 = arith.constant 56 : index
    %62 = vector.load %arg12[%c0_84, %c0_85, %c0_86, %c0_87, %c56] : memref<4x1x7x7x72xf32, #tpu.memory_space<vmem>>, vector<1x1x7x7x8xf32>
    %63 = vector.shape_cast %62 : vector<1x1x7x7x8xf32> to vector<1x7x7x8xf32>
    %64 = vector.shape_cast %61 : vector<1x7x7x8xf32> to vector<1x1x7x7x8xf32>
    tpu.vector_store %arg12[%c0_84, %c0_85, %c0_86, %c0_87, %c56], %64 {strides = array<i32>} : memref<4x1x7x7x72xf32, #tpu.memory_space<vmem>>, vector<1x1x7x7x8xf32>,
    %c0_88 = arith.constant 0 : index
    %c3_89 = arith.constant 3 : index
    %c1_90 = arith.constant 1 : index
    %c1_91 = arith.constant 1 : index
    %c0_92 = arith.constant 0 : index
    %65 = vector.load %arg11[%c0_88, %c3_89, %c1_90, %c1_91, %c0_92] : memref<1x4x9x9x8xf32, #tpu.memory_space<vmem>>, vector<1x1x7x7x8xf32>
    %66 = vector.shape_cast %65 : vector<1x1x7x7x8xf32> to vector<1x7x7x8xf32>
    %c0_93 = arith.constant 0 : index
    %c0_94 = arith.constant 0 : index
    %c0_95 = arith.constant 0 : index
    %c0_96 = arith.constant 0 : index
    %c64 = arith.constant 64 : index
    %67 = vector.load %arg12[%c0_93, %c0_94, %c0_95, %c0_96, %c64] : memref<4x1x7x7x72xf32, #tpu.memory_space<vmem>>, vector<1x1x7x7x8xf32>
    %68 = vector.shape_cast %67 : vector<1x1x7x7x8xf32> to vector<1x7x7x8xf32>
    %69 = vector.shape_cast %66 : vector<1x7x7x8xf32> to vector<1x1x7x7x8xf32>
    tpu.vector_store %arg12[%c0_93, %c0_94, %c0_95, %c0_96, %c64], %69 {strides = array<i32>} : memref<4x1x7x7x72xf32, #tpu.memory_space<vmem>>, vector<1x1x7x7x8xf32>,
    %c0_97 = arith.constant 0 : index
    %c2_98 = arith.constant 2 : index
    %c0_99 = arith.constant 0 : index
    %c1_100 = arith.constant 1 : index
    %c0_101 = arith.constant 0 : index
    %70 = vector.load %arg11[%c0_97, %c2_98, %c0_99, %c1_100, %c0_101] : memref<1x4x9x9x8xf32, #tpu.memory_space<vmem>>, vector<1x1x7x7x8xf32>
    %71 = vector.shape_cast %70 : vector<1x1x7x7x8xf32> to vector<1x7x7x8xf32>
    %c1_102 = arith.constant 1 : index
    %c0_103 = arith.constant 0 : index
    %c0_104 = arith.constant 0 : index
    %c0_105 = arith.constant 0 : index
    %c0_106 = arith.constant 0 : index
    %72 = vector.load %arg12[%c1_102, %c0_103, %c0_104, %c0_105, %c0_106] : memref<4x1x7x7x72xf32, #tpu.memory_space<vmem>>, vector<1x1x7x7x8xf32>
    %73 = vector.shape_cast %72 : vector<1x1x7x7x8xf32> to vector<1x7x7x8xf32>
    %74 = vector.shape_cast %71 : vector<1x7x7x8xf32> to vector<1x1x7x7x8xf32>
    tpu.vector_store %arg12[%c1_102, %c0_103, %c0_104, %c0_105, %c0_106], %74 {strides = array<i32>} : memref<4x1x7x7x72xf32, #tpu.memory_space<vmem>>, vector<1x1x7x7x8xf32>,
    %c0_107 = arith.constant 0 : index
    %c3_108 = arith.constant 3 : index
    %c0_109 = arith.constant 0 : index
    %c1_110 = arith.constant 1 : index
    %c0_111 = arith.constant 0 : index
    %75 = vector.load %arg11[%c0_107, %c3_108, %c0_109, %c1_110, %c0_111] : memref<1x4x9x9x8xf32, #tpu.memory_space<vmem>>, vector<1x1x7x7x8xf32>
    %76 = vector.shape_cast %75 : vector<1x1x7x7x8xf32> to vector<1x7x7x8xf32>
    %c1_112 = arith.constant 1 : index
    %c0_113 = arith.constant 0 : index
    %c0_114 = arith.constant 0 : index
    %c0_115 = arith.constant 0 : index
    %c8_116 = arith.constant 8 : index
    %77 = vector.load %arg12[%c1_112, %c0_113, %c0_114, %c0_115, %c8_116] : memref<4x1x7x7x72xf32, #tpu.memory_space<vmem>>, vector<1x1x7x7x8xf32>
    %78 = vector.shape_cast %77 : vector<1x1x7x7x8xf32> to vector<1x7x7x8xf32>
    %79 = vector.shape_cast %76 : vector<1x7x7x8xf32> to vector<1x1x7x7x8xf32>
    tpu.vector_store %arg12[%c1_112, %c0_113, %c0_114, %c0_115, %c8_116], %79 {strides = array<i32>} : memref<4x1x7x7x72xf32, #tpu.memory_space<vmem>>, vector<1x1x7x7x8xf32>,
    %c0_117 = arith.constant 0 : index
    %c2_118 = arith.constant 2 : index
    %c0_119 = arith.constant 0 : index
    %c2_120 = arith.constant 2 : index
    %c0_121 = arith.constant 0 : index
    %80 = vector.load %arg11[%c0_117, %c2_118, %c0_119, %c2_120, %c0_121] : memref<1x4x9x9x8xf32, #tpu.memory_space<vmem>>, vector<1x1x7x7x8xf32>
    %81 = vector.shape_cast %80 : vector<1x1x7x7x8xf32> to vector<1x7x7x8xf32>
    %c1_122 = arith.constant 1 : index
    %c0_123 = arith.constant 0 : index
    %c0_124 = arith.constant 0 : index
    %c0_125 = arith.constant 0 : index
    %c16_126 = arith.constant 16 : index
    %82 = vector.load %arg12[%c1_122, %c0_123, %c0_124, %c0_125, %c16_126] : memref<4x1x7x7x72xf32, #tpu.memory_space<vmem>>, vector<1x1x7x7x8xf32>
    %83 = vector.shape_cast %82 : vector<1x1x7x7x8xf32> to vector<1x7x7x8xf32>
    %84 = vector.shape_cast %81 : vector<1x7x7x8xf32> to vector<1x1x7x7x8xf32>
    tpu.vector_store %arg12[%c1_122, %c0_123, %c0_124, %c0_125, %c16_126], %84 {strides = array<i32>} : memref<4x1x7x7x72xf32, #tpu.memory_space<vmem>>, vector<1x1x7x7x8xf32>,
    %c0_127 = arith.constant 0 : index
    %c0_128 = arith.constant 0 : index
    %c1_129 = arith.constant 1 : index
    %c1_130 = arith.constant 1 : index
    %c0_131 = arith.constant 0 : index
    %85 = vector.load %arg11[%c0_127, %c0_128, %c1_129, %c1_130, %c0_131] : memref<1x4x9x9x8xf32, #tpu.memory_space<vmem>>, vector<1x1x7x7x8xf32>
    %86 = vector.shape_cast %85 : vector<1x1x7x7x8xf32> to vector<1x7x7x8xf32>
    %c1_132 = arith.constant 1 : index
    %c0_133 = arith.constant 0 : index
    %c0_134 = arith.constant 0 : index
    %c0_135 = arith.constant 0 : index
    %c24_136 = arith.constant 24 : index
    %87 = vector.load %arg12[%c1_132, %c0_133, %c0_134, %c0_135, %c24_136] : memref<4x1x7x7x72xf32, #tpu.memory_space<vmem>>, vector<1x1x7x7x8xf32>
    %88 = vector.shape_cast %87 : vector<1x1x7x7x8xf32> to vector<1x7x7x8xf32>
    %89 = vector.shape_cast %86 : vector<1x7x7x8xf32> to vector<1x1x7x7x8xf32>
    tpu.vector_store %arg12[%c1_132, %c0_133, %c0_134, %c0_135, %c24_136], %89 {strides = array<i32>} : memref<4x1x7x7x72xf32, #tpu.memory_space<vmem>>, vector<1x1x7x7x8xf32>,
    %c0_137 = arith.constant 0 : index
    %c1_138 = arith.constant 1 : index
    %c1_139 = arith.constant 1 : index
    %c1_140 = arith.constant 1 : index
    %c0_141 = arith.constant 0 : index
    %90 = vector.load %arg11[%c0_137, %c1_138, %c1_139, %c1_140, %c0_141] : memref<1x4x9x9x8xf32, #tpu.memory_space<vmem>>, vector<1x1x7x7x8xf32>
    %91 = vector.shape_cast %90 : vector<1x1x7x7x8xf32> to vector<1x7x7x8xf32>
    %c1_142 = arith.constant 1 : index
    %c0_143 = arith.constant 0 : index
    %c0_144 = arith.constant 0 : index
    %c0_145 = arith.constant 0 : index
    %c32_146 = arith.constant 32 : index
    %92 = vector.load %arg12[%c1_142, %c0_143, %c0_144, %c0_145, %c32_146] : memref<4x1x7x7x72xf32, #tpu.memory_space<vmem>>, vector<1x1x7x7x8xf32>
    %93 = vector.shape_cast %92 : vector<1x1x7x7x8xf32> to vector<1x7x7x8xf32>
    %94 = vector.shape_cast %91 : vector<1x7x7x8xf32> to vector<1x1x7x7x8xf32>
    tpu.vector_store %arg12[%c1_142, %c0_143, %c0_144, %c0_145, %c32_146], %94 {strides = array<i32>} : memref<4x1x7x7x72xf32, #tpu.memory_space<vmem>>, vector<1x1x7x7x8xf32>,
    %c0_147 = arith.constant 0 : index
    %c0_148 = arith.constant 0 : index
    %c1_149 = arith.constant 1 : index
    %c2_150 = arith.constant 2 : index
    %c0_151 = arith.constant 0 : index
    %95 = vector.load %arg11[%c0_147, %c0_148, %c1_149, %c2_150, %c0_151] : memref<1x4x9x9x8xf32, #tpu.memory_space<vmem>>, vector<1x1x7x7x8xf32>
    %96 = vector.shape_cast %95 : vector<1x1x7x7x8xf32> to vector<1x7x7x8xf32>
    %c1_152 = arith.constant 1 : index
    %c0_153 = arith.constant 0 : index
    %c0_154 = arith.constant 0 : index
    %c0_155 = arith.constant 0 : index
    %c40_156 = arith.constant 40 : index
    %97 = vector.load %arg12[%c1_152, %c0_153, %c0_154, %c0_155, %c40_156] : memref<4x1x7x7x72xf32, #tpu.memory_space<vmem>>, vector<1x1x7x7x8xf32>
    %98 = vector.shape_cast %97 : vector<1x1x7x7x8xf32> to vector<1x7x7x8xf32>
    %99 = vector.shape_cast %96 : vector<1x7x7x8xf32> to vector<1x1x7x7x8xf32>
    tpu.vector_store %arg12[%c1_152, %c0_153, %c0_154, %c0_155, %c40_156], %99 {strides = array<i32>} : memref<4x1x7x7x72xf32, #tpu.memory_space<vmem>>, vector<1x1x7x7x8xf32>,
    %c0_157 = arith.constant 0 : index
    %c2_158 = arith.constant 2 : index
    %c1_159 = arith.constant 1 : index
    %c1_160 = arith.constant 1 : index
    %c0_161 = arith.constant 0 : index
    %100 = vector.load %arg11[%c0_157, %c2_158, %c1_159, %c1_160, %c0_161] : memref<1x4x9x9x8xf32, #tpu.memory_space<vmem>>, vector<1x1x7x7x8xf32>
    %101 = vector.shape_cast %100 : vector<1x1x7x7x8xf32> to vector<1x7x7x8xf32>
    %c1_162 = arith.constant 1 : index
    %c0_163 = arith.constant 0 : index
    %c0_164 = arith.constant 0 : index
    %c0_165 = arith.constant 0 : index
    %c48_166 = arith.constant 48 : index
    %102 = vector.load %arg12[%c1_162, %c0_163, %c0_164, %c0_165, %c48_166] : memref<4x1x7x7x72xf32, #tpu.memory_space<vmem>>, vector<1x1x7x7x8xf32>
    %103 = vector.shape_cast %102 : vector<1x1x7x7x8xf32> to vector<1x7x7x8xf32>
    %104 = vector.shape_cast %101 : vector<1x7x7x8xf32> to vector<1x1x7x7x8xf32>
    tpu.vector_store %arg12[%c1_162, %c0_163, %c0_164, %c0_165, %c48_166], %104 {strides = array<i32>} : memref<4x1x7x7x72xf32, #tpu.memory_space<vmem>>, vector<1x1x7x7x8xf32>,
    %c0_167 = arith.constant 0 : index
    %c3_168 = arith.constant 3 : index
    %c1_169 = arith.constant 1 : index
    %c1_170 = arith.constant 1 : index
    %c0_171 = arith.constant 0 : index
    %105 = vector.load %arg11[%c0_167, %c3_168, %c1_169, %c1_170, %c0_171] : memref<1x4x9x9x8xf32, #tpu.memory_space<vmem>>, vector<1x1x7x7x8xf32>
    %106 = vector.shape_cast %105 : vector<1x1x7x7x8xf32> to vector<1x7x7x8xf32>
    %c1_172 = arith.constant 1 : index
    %c0_173 = arith.constant 0 : index
    %c0_174 = arith.constant 0 : index
    %c0_175 = arith.constant 0 : index
    %c56_176 = arith.constant 56 : index
    %107 = vector.load %arg12[%c1_172, %c0_173, %c0_174, %c0_175, %c56_176] : memref<4x1x7x7x72xf32, #tpu.memory_space<vmem>>, vector<1x1x7x7x8xf32>
    %108 = vector.shape_cast %107 : vector<1x1x7x7x8xf32> to vector<1x7x7x8xf32>
    %109 = vector.shape_cast %106 : vector<1x7x7x8xf32> to vector<1x1x7x7x8xf32>
    tpu.vector_store %arg12[%c1_172, %c0_173, %c0_174, %c0_175, %c56_176], %109 {strides = array<i32>} : memref<4x1x7x7x72xf32, #tpu.memory_space<vmem>>, vector<1x1x7x7x8xf32>,
    %c0_177 = arith.constant 0 : index
    %c2_178 = arith.constant 2 : index
    %c1_179 = arith.constant 1 : index
    %c2_180 = arith.constant 2 : index
    %c0_181 = arith.constant 0 : index
    %110 = vector.load %arg11[%c0_177, %c2_178, %c1_179, %c2_180, %c0_181] : memref<1x4x9x9x8xf32, #tpu.memory_space<vmem>>, vector<1x1x7x7x8xf32>
    %111 = vector.shape_cast %110 : vector<1x1x7x7x8xf32> to vector<1x7x7x8xf32>
    %c1_182 = arith.constant 1 : index
    %c0_183 = arith.constant 0 : index
    %c0_184 = arith.constant 0 : index
    %c0_185 = arith.constant 0 : index
    %c64_186 = arith.constant 64 : index
    %112 = vector.load %arg12[%c1_182, %c0_183, %c0_184, %c0_185, %c64_186] : memref<4x1x7x7x72xf32, #tpu.memory_space<vmem>>, vector<1x1x7x7x8xf32>
    %113 = vector.shape_cast %112 : vector<1x1x7x7x8xf32> to vector<1x7x7x8xf32>
    %114 = vector.shape_cast %111 : vector<1x7x7x8xf32> to vector<1x1x7x7x8xf32>
    tpu.vector_store %arg12[%c1_182, %c0_183, %c0_184, %c0_185, %c64_186], %114 {strides = array<i32>} : memref<4x1x7x7x72xf32, #tpu.memory_space<vmem>>, vector<1x1x7x7x8xf32>,
    %c0_187 = arith.constant 0 : index
    %c1_188 = arith.constant 1 : index
    %c1_189 = arith.constant 1 : index
    %c0_190 = arith.constant 0 : index
    %c0_191 = arith.constant 0 : index
    %115 = vector.load %arg11[%c0_187, %c1_188, %c1_189, %c0_190, %c0_191] : memref<1x4x9x9x8xf32, #tpu.memory_space<vmem>>, vector<1x1x7x7x8xf32>
    %116 = vector.shape_cast %115 : vector<1x1x7x7x8xf32> to vector<1x7x7x8xf32>
    %c2_192 = arith.constant 2 : index
    %c0_193 = arith.constant 0 : index
    %c0_194 = arith.constant 0 : index
    %c0_195 = arith.constant 0 : index
    %c0_196 = arith.constant 0 : index
    %117 = vector.load %arg12[%c2_192, %c0_193, %c0_194, %c0_195, %c0_196] : memref<4x1x7x7x72xf32, #tpu.memory_space<vmem>>, vector<1x1x7x7x8xf32>
    %118 = vector.shape_cast %117 : vector<1x1x7x7x8xf32> to vector<1x7x7x8xf32>
    %119 = vector.shape_cast %116 : vector<1x7x7x8xf32> to vector<1x1x7x7x8xf32>
    tpu.vector_store %arg12[%c2_192, %c0_193, %c0_194, %c0_195, %c0_196], %119 {strides = array<i32>} : memref<4x1x7x7x72xf32, #tpu.memory_space<vmem>>, vector<1x1x7x7x8xf32>,
    %c0_197 = arith.constant 0 : index
    %c0_198 = arith.constant 0 : index
    %c1_199 = arith.constant 1 : index
    %c1_200 = arith.constant 1 : index
    %c0_201 = arith.constant 0 : index
    %120 = vector.load %arg11[%c0_197, %c0_198, %c1_199, %c1_200, %c0_201] : memref<1x4x9x9x8xf32, #tpu.memory_space<vmem>>, vector<1x1x7x7x8xf32>
    %121 = vector.shape_cast %120 : vector<1x1x7x7x8xf32> to vector<1x7x7x8xf32>
    %c2_202 = arith.constant 2 : index
    %c0_203 = arith.constant 0 : index
    %c0_204 = arith.constant 0 : index
    %c0_205 = arith.constant 0 : index
    %c8_206 = arith.constant 8 : index
    %122 = vector.load %arg12[%c2_202, %c0_203, %c0_204, %c0_205, %c8_206] : memref<4x1x7x7x72xf32, #tpu.memory_space<vmem>>, vector<1x1x7x7x8xf32>
    %123 = vector.shape_cast %122 : vector<1x1x7x7x8xf32> to vector<1x7x7x8xf32>
    %124 = vector.shape_cast %121 : vector<1x7x7x8xf32> to vector<1x1x7x7x8xf32>
    tpu.vector_store %arg12[%c2_202, %c0_203, %c0_204, %c0_205, %c8_206], %124 {strides = array<i32>} : memref<4x1x7x7x72xf32, #tpu.memory_space<vmem>>, vector<1x1x7x7x8xf32>,
    %c0_207 = arith.constant 0 : index
    %c1_208 = arith.constant 1 : index
    %c1_209 = arith.constant 1 : index
    %c1_210 = arith.constant 1 : index
    %c0_211 = arith.constant 0 : index
    %125 = vector.load %arg11[%c0_207, %c1_208, %c1_209, %c1_210, %c0_211] : memref<1x4x9x9x8xf32, #tpu.memory_space<vmem>>, vector<1x1x7x7x8xf32>
    %126 = vector.shape_cast %125 : vector<1x1x7x7x8xf32> to vector<1x7x7x8xf32>
    %c2_212 = arith.constant 2 : index
    %c0_213 = arith.constant 0 : index
    %c0_214 = arith.constant 0 : index
    %c0_215 = arith.constant 0 : index
    %c16_216 = arith.constant 16 : index
    %127 = vector.load %arg12[%c2_212, %c0_213, %c0_214, %c0_215, %c16_216] : memref<4x1x7x7x72xf32, #tpu.memory_space<vmem>>, vector<1x1x7x7x8xf32>
    %128 = vector.shape_cast %127 : vector<1x1x7x7x8xf32> to vector<1x7x7x8xf32>
    %129 = vector.shape_cast %126 : vector<1x7x7x8xf32> to vector<1x1x7x7x8xf32>
    tpu.vector_store %arg12[%c2_212, %c0_213, %c0_214, %c0_215, %c16_216], %129 {strides = array<i32>} : memref<4x1x7x7x72xf32, #tpu.memory_space<vmem>>, vector<1x1x7x7x8xf32>,
    %c0_217 = arith.constant 0 : index
    %c3_218 = arith.constant 3 : index
    %c1_219 = arith.constant 1 : index
    %c0_220 = arith.constant 0 : index
    %c0_221 = arith.constant 0 : index
    %130 = vector.load %arg11[%c0_217, %c3_218, %c1_219, %c0_220, %c0_221] : memref<1x4x9x9x8xf32, #tpu.memory_space<vmem>>, vector<1x1x7x7x8xf32>
    %131 = vector.shape_cast %130 : vector<1x1x7x7x8xf32> to vector<1x7x7x8xf32>
    %c2_222 = arith.constant 2 : index
    %c0_223 = arith.constant 0 : index
    %c0_224 = arith.constant 0 : index
    %c0_225 = arith.constant 0 : index
    %c24_226 = arith.constant 24 : index
    %132 = vector.load %arg12[%c2_222, %c0_223, %c0_224, %c0_225, %c24_226] : memref<4x1x7x7x72xf32, #tpu.memory_space<vmem>>, vector<1x1x7x7x8xf32>
    %133 = vector.shape_cast %132 : vector<1x1x7x7x8xf32> to vector<1x7x7x8xf32>
    %134 = vector.shape_cast %131 : vector<1x7x7x8xf32> to vector<1x1x7x7x8xf32>
    tpu.vector_store %arg12[%c2_222, %c0_223, %c0_224, %c0_225, %c24_226], %134 {strides = array<i32>} : memref<4x1x7x7x72xf32, #tpu.memory_space<vmem>>, vector<1x1x7x7x8xf32>,
    %c0_227 = arith.constant 0 : index
    %c2_228 = arith.constant 2 : index
    %c1_229 = arith.constant 1 : index
    %c1_230 = arith.constant 1 : index
    %c0_231 = arith.constant 0 : index
    %135 = vector.load %arg11[%c0_227, %c2_228, %c1_229, %c1_230, %c0_231] : memref<1x4x9x9x8xf32, #tpu.memory_space<vmem>>, vector<1x1x7x7x8xf32>
    %136 = vector.shape_cast %135 : vector<1x1x7x7x8xf32> to vector<1x7x7x8xf32>
    %c2_232 = arith.constant 2 : index
    %c0_233 = arith.constant 0 : index
    %c0_234 = arith.constant 0 : index
    %c0_235 = arith.constant 0 : index
    %c32_236 = arith.constant 32 : index
    %137 = vector.load %arg12[%c2_232, %c0_233, %c0_234, %c0_235, %c32_236] : memref<4x1x7x7x72xf32, #tpu.memory_space<vmem>>, vector<1x1x7x7x8xf32>
    %138 = vector.shape_cast %137 : vector<1x1x7x7x8xf32> to vector<1x7x7x8xf32>
    %139 = vector.shape_cast %136 : vector<1x7x7x8xf32> to vector<1x1x7x7x8xf32>
    tpu.vector_store %arg12[%c2_232, %c0_233, %c0_234, %c0_235, %c32_236], %139 {strides = array<i32>} : memref<4x1x7x7x72xf32, #tpu.memory_space<vmem>>, vector<1x1x7x7x8xf32>,
    %c0_237 = arith.constant 0 : index
    %c3_238 = arith.constant 3 : index
    %c1_239 = arith.constant 1 : index
    %c1_240 = arith.constant 1 : index
    %c0_241 = arith.constant 0 : index
    %140 = vector.load %arg11[%c0_237, %c3_238, %c1_239, %c1_240, %c0_241] : memref<1x4x9x9x8xf32, #tpu.memory_space<vmem>>, vector<1x1x7x7x8xf32>
    %141 = vector.shape_cast %140 : vector<1x1x7x7x8xf32> to vector<1x7x7x8xf32>
    %c2_242 = arith.constant 2 : index
    %c0_243 = arith.constant 0 : index
    %c0_244 = arith.constant 0 : index
    %c0_245 = arith.constant 0 : index
    %c40_246 = arith.constant 40 : index
    %142 = vector.load %arg12[%c2_242, %c0_243, %c0_244, %c0_245, %c40_246] : memref<4x1x7x7x72xf32, #tpu.memory_space<vmem>>, vector<1x1x7x7x8xf32>
    %143 = vector.shape_cast %142 : vector<1x1x7x7x8xf32> to vector<1x7x7x8xf32>
    %144 = vector.shape_cast %141 : vector<1x7x7x8xf32> to vector<1x1x7x7x8xf32>
    tpu.vector_store %arg12[%c2_242, %c0_243, %c0_244, %c0_245, %c40_246], %144 {strides = array<i32>} : memref<4x1x7x7x72xf32, #tpu.memory_space<vmem>>, vector<1x1x7x7x8xf32>,
    %c0_247 = arith.constant 0 : index
    %c1_248 = arith.constant 1 : index
    %c2_249 = arith.constant 2 : index
    %c0_250 = arith.constant 0 : index
    %c0_251 = arith.constant 0 : index
    %145 = vector.load %arg11[%c0_247, %c1_248, %c2_249, %c0_250, %c0_251] : memref<1x4x9x9x8xf32, #tpu.memory_space<vmem>>, vector<1x1x7x7x8xf32>
    %146 = vector.shape_cast %145 : vector<1x1x7x7x8xf32> to vector<1x7x7x8xf32>
    %c2_252 = arith.constant 2 : index
    %c0_253 = arith.constant 0 : index
    %c0_254 = arith.constant 0 : index
    %c0_255 = arith.constant 0 : index
    %c48_256 = arith.constant 48 : index
    %147 = vector.load %arg12[%c2_252, %c0_253, %c0_254, %c0_255, %c48_256] : memref<4x1x7x7x72xf32, #tpu.memory_space<vmem>>, vector<1x1x7x7x8xf32>
    %148 = vector.shape_cast %147 : vector<1x1x7x7x8xf32> to vector<1x7x7x8xf32>
    %149 = vector.shape_cast %146 : vector<1x7x7x8xf32> to vector<1x1x7x7x8xf32>
    tpu.vector_store %arg12[%c2_252, %c0_253, %c0_254, %c0_255, %c48_256], %149 {strides = array<i32>} : memref<4x1x7x7x72xf32, #tpu.memory_space<vmem>>, vector<1x1x7x7x8xf32>,
    %c0_257 = arith.constant 0 : index
    %c0_258 = arith.constant 0 : index
    %c2_259 = arith.constant 2 : index
    %c1_260 = arith.constant 1 : index
    %c0_261 = arith.constant 0 : index
    %150 = vector.load %arg11[%c0_257, %c0_258, %c2_259, %c1_260, %c0_261] : memref<1x4x9x9x8xf32, #tpu.memory_space<vmem>>, vector<1x1x7x7x8xf32>
    %151 = vector.shape_cast %150 : vector<1x1x7x7x8xf32> to vector<1x7x7x8xf32>
    %c2_262 = arith.constant 2 : index
    %c0_263 = arith.constant 0 : index
    %c0_264 = arith.constant 0 : index
    %c0_265 = arith.constant 0 : index
    %c56_266 = arith.constant 56 : index
    %152 = vector.load %arg12[%c2_262, %c0_263, %c0_264, %c0_265, %c56_266] : memref<4x1x7x7x72xf32, #tpu.memory_space<vmem>>, vector<1x1x7x7x8xf32>
    %153 = vector.shape_cast %152 : vector<1x1x7x7x8xf32> to vector<1x7x7x8xf32>
    %154 = vector.shape_cast %151 : vector<1x7x7x8xf32> to vector<1x1x7x7x8xf32>
    tpu.vector_store %arg12[%c2_262, %c0_263, %c0_264, %c0_265, %c56_266], %154 {strides = array<i32>} : memref<4x1x7x7x72xf32, #tpu.memory_space<vmem>>, vector<1x1x7x7x8xf32>,
    %c0_267 = arith.constant 0 : index
    %c1_268 = arith.constant 1 : index
    %c2_269 = arith.constant 2 : index
    %c1_270 = arith.constant 1 : index
    %c0_271 = arith.constant 0 : index
    %155 = vector.load %arg11[%c0_267, %c1_268, %c2_269, %c1_270, %c0_271] : memref<1x4x9x9x8xf32, #tpu.memory_space<vmem>>, vector<1x1x7x7x8xf32>
    %156 = vector.shape_cast %155 : vector<1x1x7x7x8xf32> to vector<1x7x7x8xf32>
    %c2_272 = arith.constant 2 : index
    %c0_273 = arith.constant 0 : index
    %c0_274 = arith.constant 0 : index
    %c0_275 = arith.constant 0 : index
    %c64_276 = arith.constant 64 : index
    %157 = vector.load %arg12[%c2_272, %c0_273, %c0_274, %c0_275, %c64_276] : memref<4x1x7x7x72xf32, #tpu.memory_space<vmem>>, vector<1x1x7x7x8xf32>
    %158 = vector.shape_cast %157 : vector<1x1x7x7x8xf32> to vector<1x7x7x8xf32>
    %159 = vector.shape_cast %156 : vector<1x7x7x8xf32> to vector<1x1x7x7x8xf32>
    tpu.vector_store %arg12[%c2_272, %c0_273, %c0_274, %c0_275, %c64_276], %159 {strides = array<i32>} : memref<4x1x7x7x72xf32, #tpu.memory_space<vmem>>, vector<1x1x7x7x8xf32>,
    %c0_277 = arith.constant 0 : index
    %c0_278 = arith.constant 0 : index
    %c1_279 = arith.constant 1 : index
    %c1_280 = arith.constant 1 : index
    %c0_281 = arith.constant 0 : index
    %160 = vector.load %arg11[%c0_277, %c0_278, %c1_279, %c1_280, %c0_281] : memref<1x4x9x9x8xf32, #tpu.memory_space<vmem>>, vector<1x1x7x7x8xf32>
    %161 = vector.shape_cast %160 : vector<1x1x7x7x8xf32> to vector<1x7x7x8xf32>
    %c3_282 = arith.constant 3 : index
    %c0_283 = arith.constant 0 : index
    %c0_284 = arith.constant 0 : index
    %c0_285 = arith.constant 0 : index
    %c0_286 = arith.constant 0 : index
    %162 = vector.load %arg12[%c3_282, %c0_283, %c0_284, %c0_285, %c0_286] : memref<4x1x7x7x72xf32, #tpu.memory_space<vmem>>, vector<1x1x7x7x8xf32>
    %163 = vector.shape_cast %162 : vector<1x1x7x7x8xf32> to vector<1x7x7x8xf32>
    %164 = vector.shape_cast %161 : vector<1x7x7x8xf32> to vector<1x1x7x7x8xf32>
    tpu.vector_store %arg12[%c3_282, %c0_283, %c0_284, %c0_285, %c0_286], %164 {strides = array<i32>} : memref<4x1x7x7x72xf32, #tpu.memory_space<vmem>>, vector<1x1x7x7x8xf32>,
    %c0_287 = arith.constant 0 : index
    %c1_288 = arith.constant 1 : index
    %c1_289 = arith.constant 1 : index
    %c1_290 = arith.constant 1 : index
    %c0_291 = arith.constant 0 : index
    %165 = vector.load %arg11[%c0_287, %c1_288, %c1_289, %c1_290, %c0_291] : memref<1x4x9x9x8xf32, #tpu.memory_space<vmem>>, vector<1x1x7x7x8xf32>
    %166 = vector.shape_cast %165 : vector<1x1x7x7x8xf32> to vector<1x7x7x8xf32>
    %c3_292 = arith.constant 3 : index
    %c0_293 = arith.constant 0 : index
    %c0_294 = arith.constant 0 : index
    %c0_295 = arith.constant 0 : index
    %c8_296 = arith.constant 8 : index
    %167 = vector.load %arg12[%c3_292, %c0_293, %c0_294, %c0_295, %c8_296] : memref<4x1x7x7x72xf32, #tpu.memory_space<vmem>>, vector<1x1x7x7x8xf32>
    %168 = vector.shape_cast %167 : vector<1x1x7x7x8xf32> to vector<1x7x7x8xf32>
    %169 = vector.shape_cast %166 : vector<1x7x7x8xf32> to vector<1x1x7x7x8xf32>
    tpu.vector_store %arg12[%c3_292, %c0_293, %c0_294, %c0_295, %c8_296], %169 {strides = array<i32>} : memref<4x1x7x7x72xf32, #tpu.memory_space<vmem>>, vector<1x1x7x7x8xf32>,
    %c0_297 = arith.constant 0 : index
    %c0_298 = arith.constant 0 : index
    %c1_299 = arith.constant 1 : index
    %c2_300 = arith.constant 2 : index
    %c0_301 = arith.constant 0 : index
    %170 = vector.load %arg11[%c0_297, %c0_298, %c1_299, %c2_300, %c0_301] : memref<1x4x9x9x8xf32, #tpu.memory_space<vmem>>, vector<1x1x7x7x8xf32>
    %171 = vector.shape_cast %170 : vector<1x1x7x7x8xf32> to vector<1x7x7x8xf32>
    %c3_302 = arith.constant 3 : index
    %c0_303 = arith.constant 0 : index
    %c0_304 = arith.constant 0 : index
    %c0_305 = arith.constant 0 : index
    %c16_306 = arith.constant 16 : index
    %172 = vector.load %arg12[%c3_302, %c0_303, %c0_304, %c0_305, %c16_306] : memref<4x1x7x7x72xf32, #tpu.memory_space<vmem>>, vector<1x1x7x7x8xf32>
    %173 = vector.shape_cast %172 : vector<1x1x7x7x8xf32> to vector<1x7x7x8xf32>
    %174 = vector.shape_cast %171 : vector<1x7x7x8xf32> to vector<1x1x7x7x8xf32>
    tpu.vector_store %arg12[%c3_302, %c0_303, %c0_304, %c0_305, %c16_306], %174 {strides = array<i32>} : memref<4x1x7x7x72xf32, #tpu.memory_space<vmem>>, vector<1x1x7x7x8xf32>,
    %c0_307 = arith.constant 0 : index
    %c2_308 = arith.constant 2 : index
    %c1_309 = arith.constant 1 : index
    %c1_310 = arith.constant 1 : index
    %c0_311 = arith.constant 0 : index
    %175 = vector.load %arg11[%c0_307, %c2_308, %c1_309, %c1_310, %c0_311] : memref<1x4x9x9x8xf32, #tpu.memory_space<vmem>>, vector<1x1x7x7x8xf32>
    %176 = vector.shape_cast %175 : vector<1x1x7x7x8xf32> to vector<1x7x7x8xf32>
    %c3_312 = arith.constant 3 : index
    %c0_313 = arith.constant 0 : index
    %c0_314 = arith.constant 0 : index
    %c0_315 = arith.constant 0 : index
    %c24_316 = arith.constant 24 : index
    %177 = vector.load %arg12[%c3_312, %c0_313, %c0_314, %c0_315, %c24_316] : memref<4x1x7x7x72xf32, #tpu.memory_space<vmem>>, vector<1x1x7x7x8xf32>
    %178 = vector.shape_cast %177 : vector<1x1x7x7x8xf32> to vector<1x7x7x8xf32>
    %179 = vector.shape_cast %176 : vector<1x7x7x8xf32> to vector<1x1x7x7x8xf32>
    tpu.vector_store %arg12[%c3_312, %c0_313, %c0_314, %c0_315, %c24_316], %179 {strides = array<i32>} : memref<4x1x7x7x72xf32, #tpu.memory_space<vmem>>, vector<1x1x7x7x8xf32>,
    %c0_317 = arith.constant 0 : index
    %c3_318 = arith.constant 3 : index
    %c1_319 = arith.constant 1 : index
    %c1_320 = arith.constant 1 : index
    %c0_321 = arith.constant 0 : index
    %180 = vector.load %arg11[%c0_317, %c3_318, %c1_319, %c1_320, %c0_321] : memref<1x4x9x9x8xf32, #tpu.memory_space<vmem>>, vector<1x1x7x7x8xf32>
    %181 = vector.shape_cast %180 : vector<1x1x7x7x8xf32> to vector<1x7x7x8xf32>
    %c3_322 = arith.constant 3 : index
    %c0_323 = arith.constant 0 : index
    %c0_324 = arith.constant 0 : index
    %c0_325 = arith.constant 0 : index
    %c32_326 = arith.constant 32 : index
    %182 = vector.load %arg12[%c3_322, %c0_323, %c0_324, %c0_325, %c32_326] : memref<4x1x7x7x72xf32, #tpu.memory_space<vmem>>, vector<1x1x7x7x8xf32>
    %183 = vector.shape_cast %182 : vector<1x1x7x7x8xf32> to vector<1x7x7x8xf32>
    %184 = vector.shape_cast %181 : vector<1x7x7x8xf32> to vector<1x1x7x7x8xf32>
    tpu.vector_store %arg12[%c3_322, %c0_323, %c0_324, %c0_325, %c32_326], %184 {strides = array<i32>} : memref<4x1x7x7x72xf32, #tpu.memory_space<vmem>>, vector<1x1x7x7x8xf32>,
    %c0_327 = arith.constant 0 : index
    %c2_328 = arith.constant 2 : index
    %c1_329 = arith.constant 1 : index
    %c2_330 = arith.constant 2 : index
    %c0_331 = arith.constant 0 : index
    %185 = vector.load %arg11[%c0_327, %c2_328, %c1_329, %c2_330, %c0_331] : memref<1x4x9x9x8xf32, #tpu.memory_space<vmem>>, vector<1x1x7x7x8xf32>
    %186 = vector.shape_cast %185 : vector<1x1x7x7x8xf32> to vector<1x7x7x8xf32>
    %c3_332 = arith.constant 3 : index
    %c0_333 = arith.constant 0 : index
    %c0_334 = arith.constant 0 : index
    %c0_335 = arith.constant 0 : index
    %c40_336 = arith.constant 40 : index
    %187 = vector.load %arg12[%c3_332, %c0_333, %c0_334, %c0_335, %c40_336] : memref<4x1x7x7x72xf32, #tpu.memory_space<vmem>>, vector<1x1x7x7x8xf32>
    %188 = vector.shape_cast %187 : vector<1x1x7x7x8xf32> to vector<1x7x7x8xf32>
    %189 = vector.shape_cast %186 : vector<1x7x7x8xf32> to vector<1x1x7x7x8xf32>
    tpu.vector_store %arg12[%c3_332, %c0_333, %c0_334, %c0_335, %c40_336], %189 {strides = array<i32>} : memref<4x1x7x7x72xf32, #tpu.memory_space<vmem>>, vector<1x1x7x7x8xf32>,
    %c0_337 = arith.constant 0 : index
    %c0_338 = arith.constant 0 : index
    %c2_339 = arith.constant 2 : index
    %c1_340 = arith.constant 1 : index
    %c0_341 = arith.constant 0 : index
    %190 = vector.load %arg11[%c0_337, %c0_338, %c2_339, %c1_340, %c0_341] : memref<1x4x9x9x8xf32, #tpu.memory_space<vmem>>, vector<1x1x7x7x8xf32>
    %191 = vector.shape_cast %190 : vector<1x1x7x7x8xf32> to vector<1x7x7x8xf32>
    %c3_342 = arith.constant 3 : index
    %c0_343 = arith.constant 0 : index
    %c0_344 = arith.constant 0 : index
    %c0_345 = arith.constant 0 : index
    %c48_346 = arith.constant 48 : index
    %192 = vector.load %arg12[%c3_342, %c0_343, %c0_344, %c0_345, %c48_346] : memref<4x1x7x7x72xf32, #tpu.memory_space<vmem>>, vector<1x1x7x7x8xf32>
    %193 = vector.shape_cast %192 : vector<1x1x7x7x8xf32> to vector<1x7x7x8xf32>
    %194 = vector.shape_cast %191 : vector<1x7x7x8xf32> to vector<1x1x7x7x8xf32>
    tpu.vector_store %arg12[%c3_342, %c0_343, %c0_344, %c0_345, %c48_346], %194 {strides = array<i32>} : memref<4x1x7x7x72xf32, #tpu.memory_space<vmem>>, vector<1x1x7x7x8xf32>,
    %c0_347 = arith.constant 0 : index
    %c1_348 = arith.constant 1 : index
    %c2_349 = arith.constant 2 : index
    %c1_350 = arith.constant 1 : index
    %c0_351 = arith.constant 0 : index
    %195 = vector.load %arg11[%c0_347, %c1_348, %c2_349, %c1_350, %c0_351] : memref<1x4x9x9x8xf32, #tpu.memory_space<vmem>>, vector<1x1x7x7x8xf32>
    %196 = vector.shape_cast %195 : vector<1x1x7x7x8xf32> to vector<1x7x7x8xf32>
    %c3_352 = arith.constant 3 : index
    %c0_353 = arith.constant 0 : index
    %c0_354 = arith.constant 0 : index
    %c0_355 = arith.constant 0 : index
    %c56_356 = arith.constant 56 : index
    %197 = vector.load %arg12[%c3_352, %c0_353, %c0_354, %c0_355, %c56_356] : memref<4x1x7x7x72xf32, #tpu.memory_space<vmem>>, vector<1x1x7x7x8xf32>
    %198 = vector.shape_cast %197 : vector<1x1x7x7x8xf32> to vector<1x7x7x8xf32>
    %199 = vector.shape_cast %196 : vector<1x7x7x8xf32> to vector<1x1x7x7x8xf32>
    tpu.vector_store %arg12[%c3_352, %c0_353, %c0_354, %c0_355, %c56_356], %199 {strides = array<i32>} : memref<4x1x7x7x72xf32, #tpu.memory_space<vmem>>, vector<1x1x7x7x8xf32>,
    %c0_357 = arith.constant 0 : index
    %c0_358 = arith.constant 0 : index
    %c2_359 = arith.constant 2 : index
    %c2_360 = arith.constant 2 : index
    %c0_361 = arith.constant 0 : index
    %200 = vector.load %arg11[%c0_357, %c0_358, %c2_359, %c2_360, %c0_361] : memref<1x4x9x9x8xf32, #tpu.memory_space<vmem>>, vector<1x1x7x7x8xf32>
    %201 = vector.shape_cast %200 : vector<1x1x7x7x8xf32> to vector<1x7x7x8xf32>
    %c3_362 = arith.constant 3 : index
    %c0_363 = arith.constant 0 : index
    %c0_364 = arith.constant 0 : index
    %c0_365 = arith.constant 0 : index
    %c64_366 = arith.constant 64 : index
    %202 = vector.load %arg12[%c3_362, %c0_363, %c0_364, %c0_365, %c64_366] : memref<4x1x7x7x72xf32, #tpu.memory_space<vmem>>, vector<1x1x7x7x8xf32>
    %203 = vector.shape_cast %202 : vector<1x1x7x7x8xf32> to vector<1x7x7x8xf32>
    %204 = vector.shape_cast %201 : vector<1x7x7x8xf32> to vector<1x1x7x7x8xf32>
    tpu.vector_store %arg12[%c3_362, %c0_363, %c0_364, %c0_365, %c64_366], %204 {strides = array<i32>} : memref<4x1x7x7x72xf32, #tpu.memory_space<vmem>>, vector<1x1x7x7x8xf32>,
    %c0_367 = arith.constant 0 : index
    %c0_368 = arith.constant 0 : index
    %c0_369 = arith.constant 0 : index
    %c0_370 = arith.constant 0 : index
    %c0_371 = arith.constant 0 : index
    %205 = vector.load %arg12[%c0_367, %c0_368, %c0_369, %c0_370, %c0_371] : memref<4x1x7x7x72xf32, #tpu.memory_space<vmem>>, vector<4x1x7x7x72xf32>
    %206 = vector.shape_cast %205 : vector<4x1x7x7x72xf32> to vector<196x72xf32>
    %c0_372 = arith.constant 0 : index
    %c0_373 = arith.constant 0 : index
    %207 = vector.load %arg4[%c0_372, %c0_373] : memref<72x16xf32, #tpu.memory_space<vmem>>, vector<72x16xf32>
    %cst_374 = arith.constant dense<0.000000e+00> : vector<196x16xf32>
    %208 = tpu.matmul %206, %207, %cst_374 {dimension_numbers = #tpu.dot_dimension_numbers<[1], [0], [0], [1], [0, 0, 1, 1], [], []>} : vector<196x72xf32>, vector<72x16xf32>, vector<196x16xf32> -> vector<196x16xf32>
    %c0_375 = arith.constant 0 : index
    %c0_376 = arith.constant 0 : index
    %209 = vector.load %arg5[%c0_375, %c0_376] : memref<1x16xf32, #tpu.memory_space<vmem>>, vector<1x16xf32>
    %210 = vector.broadcast %209 : vector<1x16xf32> to vector<196x16xf32>
    %211 = arith.addf %208, %210 : vector<196x16xf32>
    %cst_377 = arith.constant 0.000000e+00 : f32
    %212 = vector.broadcast %cst_377 : f32 to vector<196x16xf32>
    %213 = arith.maximumf %211, %212 : vector<196x16xf32>
    %214 = vector.shape_cast %213 : vector<196x16xf32> to vector<4x49x16xf32>
    %215 = vector.extract_strided_slice %214 {offsets = [0, 0, 0], sizes = [1, 49, 16], strides = [1, 1, 1]} : vector<4x49x16xf32> to vector<1x49x16xf32>
    %216 = vector.shape_cast %215 : vector<1x49x16xf32> to vector<49x16xf32>
    %217 = vector.extract_strided_slice %214 {offsets = [1, 0, 0], sizes = [1, 49, 16], strides = [1, 1, 1]} : vector<4x49x16xf32> to vector<1x49x16xf32>
    %218 = vector.shape_cast %217 : vector<1x49x16xf32> to vector<49x16xf32>
    %219 = arith.maximumf %216, %218 : vector<49x16xf32>
    %220 = vector.extract_strided_slice %214 {offsets = [2, 0, 0], sizes = [1, 49, 16], strides = [1, 1, 1]} : vector<4x49x16xf32> to vector<1x49x16xf32>
    %221 = vector.shape_cast %220 : vector<1x49x16xf32> to vector<49x16xf32>
    %222 = vector.extract_strided_slice %214 {offsets = [3, 0, 0], sizes = [1, 49, 16], strides = [1, 1, 1]} : vector<4x49x16xf32> to vector<1x49x16xf32>
    %223 = vector.shape_cast %222 : vector<1x49x16xf32> to vector<49x16xf32>
    %224 = arith.maximumf %221, %223 : vector<49x16xf32>
    %225 = arith.maximumf %219, %224 : vector<49x16xf32>
    %226 = vector.shape_cast %225 : vector<49x16xf32> to vector<1x49x16xf32>
    %227 = vector.extract_strided_slice %226 {offsets = [0, 0, 0], sizes = [1, 1, 16], strides = [1, 1, 1]} : vector<1x49x16xf32> to vector<1x1x16xf32>
    %228 = vector.shape_cast %227 : vector<1x1x16xf32> to vector<1x16xf32>
    %c0_378 = arith.constant 0 : index
    %c0_379 = arith.constant 0 : index
    %229 = vector.load %arg13[%c0_378, %c0_379] : memref<1x784xf32, #tpu.memory_space<vmem>>, vector<1x16xf32>
    tpu.vector_store %arg13[%c0_378, %c0_379], %228 {strides = array<i32>} : memref<1x784xf32, #tpu.memory_space<vmem>>, vector<1x16xf32>,
    %230 = vector.extract_strided_slice %226 {offsets = [0, 1, 0], sizes = [1, 1, 16], strides = [1, 1, 1]} : vector<1x49x16xf32> to vector<1x1x16xf32>
    %231 = vector.shape_cast %230 : vector<1x1x16xf32> to vector<1x16xf32>
    %c0_380 = arith.constant 0 : index
    %c16_381 = arith.constant 16 : index
    %232 = vector.load %arg13[%c0_380, %c16_381] : memref<1x784xf32, #tpu.memory_space<vmem>>, vector<1x16xf32>
    tpu.vector_store %arg13[%c0_380, %c16_381], %231 {strides = array<i32>} : memref<1x784xf32, #tpu.memory_space<vmem>>, vector<1x16xf32>,
    %233 = vector.extract_strided_slice %226 {offsets = [0, 2, 0], sizes = [1, 1, 16], strides = [1, 1, 1]} : vector<1x49x16xf32> to vector<1x1x16xf32>
    %234 = vector.shape_cast %233 : vector<1x1x16xf32> to vector<1x16xf32>
    %c0_382 = arith.constant 0 : index
    %c32_383 = arith.constant 32 : index
    %235 = vector.load %arg13[%c0_382, %c32_383] : memref<1x784xf32, #tpu.memory_space<vmem>>, vector<1x16xf32>
    tpu.vector_store %arg13[%c0_382, %c32_383], %234 {strides = array<i32>} : memref<1x784xf32, #tpu.memory_space<vmem>>, vector<1x16xf32>,
    %236 = vector.extract_strided_slice %226 {offsets = [0, 3, 0], sizes = [1, 1, 16], strides = [1, 1, 1]} : vector<1x49x16xf32> to vector<1x1x16xf32>
    %237 = vector.shape_cast %236 : vector<1x1x16xf32> to vector<1x16xf32>
    %c0_384 = arith.constant 0 : index
    %c48_385 = arith.constant 48 : index
    %238 = vector.load %arg13[%c0_384, %c48_385] : memref<1x784xf32, #tpu.memory_space<vmem>>, vector<1x16xf32>
    tpu.vector_store %arg13[%c0_384, %c48_385], %237 {strides = array<i32>} : memref<1x784xf32, #tpu.memory_space<vmem>>, vector<1x16xf32>,
    %239 = vector.extract_strided_slice %226 {offsets = [0, 4, 0], sizes = [1, 1, 16], strides = [1, 1, 1]} : vector<1x49x16xf32> to vector<1x1x16xf32>
    %240 = vector.shape_cast %239 : vector<1x1x16xf32> to vector<1x16xf32>
    %c0_386 = arith.constant 0 : index
    %c64_387 = arith.constant 64 : index
    %241 = vector.load %arg13[%c0_386, %c64_387] : memref<1x784xf32, #tpu.memory_space<vmem>>, vector<1x16xf32>
    tpu.vector_store %arg13[%c0_386, %c64_387], %240 {strides = array<i32>} : memref<1x784xf32, #tpu.memory_space<vmem>>, vector<1x16xf32>,
    %242 = vector.extract_strided_slice %226 {offsets = [0, 5, 0], sizes = [1, 1, 16], strides = [1, 1, 1]} : vector<1x49x16xf32> to vector<1x1x16xf32>
    %243 = vector.shape_cast %242 : vector<1x1x16xf32> to vector<1x16xf32>
    %c0_388 = arith.constant 0 : index
    %c80 = arith.constant 80 : index
    %244 = vector.load %arg13[%c0_388, %c80] : memref<1x784xf32, #tpu.memory_space<vmem>>, vector<1x16xf32>
    tpu.vector_store %arg13[%c0_388, %c80], %243 {strides = array<i32>} : memref<1x784xf32, #tpu.memory_space<vmem>>, vector<1x16xf32>,
    %245 = vector.extract_strided_slice %226 {offsets = [0, 6, 0], sizes = [1, 1, 16], strides = [1, 1, 1]} : vector<1x49x16xf32> to vector<1x1x16xf32>
    %246 = vector.shape_cast %245 : vector<1x1x16xf32> to vector<1x16xf32>
    %c0_389 = arith.constant 0 : index
    %c96 = arith.constant 96 : index
    %247 = vector.load %arg13[%c0_389, %c96] : memref<1x784xf32, #tpu.memory_space<vmem>>, vector<1x16xf32>
    tpu.vector_store %arg13[%c0_389, %c96], %246 {strides = array<i32>} : memref<1x784xf32, #tpu.memory_space<vmem>>, vector<1x16xf32>,
    %248 = vector.extract_strided_slice %226 {offsets = [0, 7, 0], sizes = [1, 1, 16], strides = [1, 1, 1]} : vector<1x49x16xf32> to vector<1x1x16xf32>
    %249 = vector.shape_cast %248 : vector<1x1x16xf32> to vector<1x16xf32>
    %c0_390 = arith.constant 0 : index
    %c112 = arith.constant 112 : index
    %250 = vector.load %arg13[%c0_390, %c112] : memref<1x784xf32, #tpu.memory_space<vmem>>, vector<1x16xf32>
    tpu.vector_store %arg13[%c0_390, %c112], %249 {strides = array<i32>} : memref<1x784xf32, #tpu.memory_space<vmem>>, vector<1x16xf32>,
    %251 = vector.extract_strided_slice %226 {offsets = [0, 8, 0], sizes = [1, 1, 16], strides = [1, 1, 1]} : vector<1x49x16xf32> to vector<1x1x16xf32>
    %252 = vector.shape_cast %251 : vector<1x1x16xf32> to vector<1x16xf32>
    %c0_391 = arith.constant 0 : index
    %c128 = arith.constant 128 : index
    %253 = vector.load %arg13[%c0_391, %c128] : memref<1x784xf32, #tpu.memory_space<vmem>>, vector<1x16xf32>
    tpu.vector_store %arg13[%c0_391, %c128], %252 {strides = array<i32>} : memref<1x784xf32, #tpu.memory_space<vmem>>, vector<1x16xf32>,
    %254 = vector.extract_strided_slice %226 {offsets = [0, 9, 0], sizes = [1, 1, 16], strides = [1, 1, 1]} : vector<1x49x16xf32> to vector<1x1x16xf32>
    %255 = vector.shape_cast %254 : vector<1x1x16xf32> to vector<1x16xf32>
    %c0_392 = arith.constant 0 : index
    %c144 = arith.constant 144 : index
    %256 = vector.load %arg13[%c0_392, %c144] : memref<1x784xf32, #tpu.memory_space<vmem>>, vector<1x16xf32>
    tpu.vector_store %arg13[%c0_392, %c144], %255 {strides = array<i32>} : memref<1x784xf32, #tpu.memory_space<vmem>>, vector<1x16xf32>,
    %257 = vector.extract_strided_slice %226 {offsets = [0, 10, 0], sizes = [1, 1, 16], strides = [1, 1, 1]} : vector<1x49x16xf32> to vector<1x1x16xf32>
    %258 = vector.shape_cast %257 : vector<1x1x16xf32> to vector<1x16xf32>
    %c0_393 = arith.constant 0 : index
    %c160 = arith.constant 160 : index
    %259 = vector.load %arg13[%c0_393, %c160] : memref<1x784xf32, #tpu.memory_space<vmem>>, vector<1x16xf32>
    tpu.vector_store %arg13[%c0_393, %c160], %258 {strides = array<i32>} : memref<1x784xf32, #tpu.memory_space<vmem>>, vector<1x16xf32>,
    %260 = vector.extract_strided_slice %226 {offsets = [0, 11, 0], sizes = [1, 1, 16], strides = [1, 1, 1]} : vector<1x49x16xf32> to vector<1x1x16xf32>
    %261 = vector.shape_cast %260 : vector<1x1x16xf32> to vector<1x16xf32>
    %c0_394 = arith.constant 0 : index
    %c176 = arith.constant 176 : index
    %262 = vector.load %arg13[%c0_394, %c176] : memref<1x784xf32, #tpu.memory_space<vmem>>, vector<1x16xf32>
    tpu.vector_store %arg13[%c0_394, %c176], %261 {strides = array<i32>} : memref<1x784xf32, #tpu.memory_space<vmem>>, vector<1x16xf32>,
    %263 = vector.extract_strided_slice %226 {offsets = [0, 12, 0], sizes = [1, 1, 16], strides = [1, 1, 1]} : vector<1x49x16xf32> to vector<1x1x16xf32>
    %264 = vector.shape_cast %263 : vector<1x1x16xf32> to vector<1x16xf32>
    %c0_395 = arith.constant 0 : index
    %c192 = arith.constant 192 : index
    %265 = vector.load %arg13[%c0_395, %c192] : memref<1x784xf32, #tpu.memory_space<vmem>>, vector<1x16xf32>
    tpu.vector_store %arg13[%c0_395, %c192], %264 {strides = array<i32>} : memref<1x784xf32, #tpu.memory_space<vmem>>, vector<1x16xf32>,
    %266 = vector.extract_strided_slice %226 {offsets = [0, 13, 0], sizes = [1, 1, 16], strides = [1, 1, 1]} : vector<1x49x16xf32> to vector<1x1x16xf32>
    %267 = vector.shape_cast %266 : vector<1x1x16xf32> to vector<1x16xf32>
    %c0_396 = arith.constant 0 : index
    %c208 = arith.constant 208 : index
    %268 = vector.load %arg13[%c0_396, %c208] : memref<1x784xf32, #tpu.memory_space<vmem>>, vector<1x16xf32>
    tpu.vector_store %arg13[%c0_396, %c208], %267 {strides = array<i32>} : memref<1x784xf32, #tpu.memory_space<vmem>>, vector<1x16xf32>,
    %269 = vector.extract_strided_slice %226 {offsets = [0, 14, 0], sizes = [1, 1, 16], strides = [1, 1, 1]} : vector<1x49x16xf32> to vector<1x1x16xf32>
    %270 = vector.shape_cast %269 : vector<1x1x16xf32> to vector<1x16xf32>
    %c0_397 = arith.constant 0 : index
    %c224 = arith.constant 224 : index
    %271 = vector.load %arg13[%c0_397, %c224] : memref<1x784xf32, #tpu.memory_space<vmem>>, vector<1x16xf32>
    tpu.vector_store %arg13[%c0_397, %c224], %270 {strides = array<i32>} : memref<1x784xf32, #tpu.memory_space<vmem>>, vector<1x16xf32>,
    %272 = vector.extract_strided_slice %226 {offsets = [0, 15, 0], sizes = [1, 1, 16], strides = [1, 1, 1]} : vector<1x49x16xf32> to vector<1x1x16xf32>
    %273 = vector.shape_cast %272 : vector<1x1x16xf32> to vector<1x16xf32>
    %c0_398 = arith.constant 0 : index
    %c240 = arith.constant 240 : index
    %274 = vector.load %arg13[%c0_398, %c240] : memref<1x784xf32, #tpu.memory_space<vmem>>, vector<1x16xf32>
    tpu.vector_store %arg13[%c0_398, %c240], %273 {strides = array<i32>} : memref<1x784xf32, #tpu.memory_space<vmem>>, vector<1x16xf32>,
    %275 = vector.extract_strided_slice %226 {offsets = [0, 16, 0], sizes = [1, 1, 16], strides = [1, 1, 1]} : vector<1x49x16xf32> to vector<1x1x16xf32>
    %276 = vector.shape_cast %275 : vector<1x1x16xf32> to vector<1x16xf32>
    %c0_399 = arith.constant 0 : index
    %c256 = arith.constant 256 : index
    %277 = vector.load %arg13[%c0_399, %c256] : memref<1x784xf32, #tpu.memory_space<vmem>>, vector<1x16xf32>
    tpu.vector_store %arg13[%c0_399, %c256], %276 {strides = array<i32>} : memref<1x784xf32, #tpu.memory_space<vmem>>, vector<1x16xf32>,
    %278 = vector.extract_strided_slice %226 {offsets = [0, 17, 0], sizes = [1, 1, 16], strides = [1, 1, 1]} : vector<1x49x16xf32> to vector<1x1x16xf32>
    %279 = vector.shape_cast %278 : vector<1x1x16xf32> to vector<1x16xf32>
    %c0_400 = arith.constant 0 : index
    %c272 = arith.constant 272 : index
    %280 = vector.load %arg13[%c0_400, %c272] : memref<1x784xf32, #tpu.memory_space<vmem>>, vector<1x16xf32>
    tpu.vector_store %arg13[%c0_400, %c272], %279 {strides = array<i32>} : memref<1x784xf32, #tpu.memory_space<vmem>>, vector<1x16xf32>,
    %281 = vector.extract_strided_slice %226 {offsets = [0, 18, 0], sizes = [1, 1, 16], strides = [1, 1, 1]} : vector<1x49x16xf32> to vector<1x1x16xf32>
    %282 = vector.shape_cast %281 : vector<1x1x16xf32> to vector<1x16xf32>
    %c0_401 = arith.constant 0 : index
    %c288 = arith.constant 288 : index
    %283 = vector.load %arg13[%c0_401, %c288] : memref<1x784xf32, #tpu.memory_space<vmem>>, vector<1x16xf32>
    tpu.vector_store %arg13[%c0_401, %c288], %282 {strides = array<i32>} : memref<1x784xf32, #tpu.memory_space<vmem>>, vector<1x16xf32>,
    %284 = vector.extract_strided_slice %226 {offsets = [0, 19, 0], sizes = [1, 1, 16], strides = [1, 1, 1]} : vector<1x49x16xf32> to vector<1x1x16xf32>
    %285 = vector.shape_cast %284 : vector<1x1x16xf32> to vector<1x16xf32>
    %c0_402 = arith.constant 0 : index
    %c304 = arith.constant 304 : index
    %286 = vector.load %arg13[%c0_402, %c304] : memref<1x784xf32, #tpu.memory_space<vmem>>, vector<1x16xf32>
    tpu.vector_store %arg13[%c0_402, %c304], %285 {strides = array<i32>} : memref<1x784xf32, #tpu.memory_space<vmem>>, vector<1x16xf32>,
    %287 = vector.extract_strided_slice %226 {offsets = [0, 20, 0], sizes = [1, 1, 16], strides = [1, 1, 1]} : vector<1x49x16xf32> to vector<1x1x16xf32>
    %288 = vector.shape_cast %287 : vector<1x1x16xf32> to vector<1x16xf32>
    %c0_403 = arith.constant 0 : index
    %c320 = arith.constant 320 : index
    %289 = vector.load %arg13[%c0_403, %c320] : memref<1x784xf32, #tpu.memory_space<vmem>>, vector<1x16xf32>
    tpu.vector_store %arg13[%c0_403, %c320], %288 {strides = array<i32>} : memref<1x784xf32, #tpu.memory_space<vmem>>, vector<1x16xf32>,
    %290 = vector.extract_strided_slice %226 {offsets = [0, 21, 0], sizes = [1, 1, 16], strides = [1, 1, 1]} : vector<1x49x16xf32> to vector<1x1x16xf32>
    %291 = vector.shape_cast %290 : vector<1x1x16xf32> to vector<1x16xf32>
    %c0_404 = arith.constant 0 : index
    %c336 = arith.constant 336 : index
    %292 = vector.load %arg13[%c0_404, %c336] : memref<1x784xf32, #tpu.memory_space<vmem>>, vector<1x16xf32>
    tpu.vector_store %arg13[%c0_404, %c336], %291 {strides = array<i32>} : memref<1x784xf32, #tpu.memory_space<vmem>>, vector<1x16xf32>,
    %293 = vector.extract_strided_slice %226 {offsets = [0, 22, 0], sizes = [1, 1, 16], strides = [1, 1, 1]} : vector<1x49x16xf32> to vector<1x1x16xf32>
    %294 = vector.shape_cast %293 : vector<1x1x16xf32> to vector<1x16xf32>
    %c0_405 = arith.constant 0 : index
    %c352 = arith.constant 352 : index
    %295 = vector.load %arg13[%c0_405, %c352] : memref<1x784xf32, #tpu.memory_space<vmem>>, vector<1x16xf32>
    tpu.vector_store %arg13[%c0_405, %c352], %294 {strides = array<i32>} : memref<1x784xf32, #tpu.memory_space<vmem>>, vector<1x16xf32>,
    %296 = vector.extract_strided_slice %226 {offsets = [0, 23, 0], sizes = [1, 1, 16], strides = [1, 1, 1]} : vector<1x49x16xf32> to vector<1x1x16xf32>
    %297 = vector.shape_cast %296 : vector<1x1x16xf32> to vector<1x16xf32>
    %c0_406 = arith.constant 0 : index
    %c368 = arith.constant 368 : index
    %298 = vector.load %arg13[%c0_406, %c368] : memref<1x784xf32, #tpu.memory_space<vmem>>, vector<1x16xf32>
    tpu.vector_store %arg13[%c0_406, %c368], %297 {strides = array<i32>} : memref<1x784xf32, #tpu.memory_space<vmem>>, vector<1x16xf32>,
    %299 = vector.extract_strided_slice %226 {offsets = [0, 24, 0], sizes = [1, 1, 16], strides = [1, 1, 1]} : vector<1x49x16xf32> to vector<1x1x16xf32>
    %300 = vector.shape_cast %299 : vector<1x1x16xf32> to vector<1x16xf32>
    %c0_407 = arith.constant 0 : index
    %c384 = arith.constant 384 : index
    %301 = vector.load %arg13[%c0_407, %c384] : memref<1x784xf32, #tpu.memory_space<vmem>>, vector<1x16xf32>
    tpu.vector_store %arg13[%c0_407, %c384], %300 {strides = array<i32>} : memref<1x784xf32, #tpu.memory_space<vmem>>, vector<1x16xf32>,
    %302 = vector.extract_strided_slice %226 {offsets = [0, 25, 0], sizes = [1, 1, 16], strides = [1, 1, 1]} : vector<1x49x16xf32> to vector<1x1x16xf32>
    %303 = vector.shape_cast %302 : vector<1x1x16xf32> to vector<1x16xf32>
    %c0_408 = arith.constant 0 : index
    %c400 = arith.constant 400 : index
    %304 = vector.load %arg13[%c0_408, %c400] : memref<1x784xf32, #tpu.memory_space<vmem>>, vector<1x16xf32>
    tpu.vector_store %arg13[%c0_408, %c400], %303 {strides = array<i32>} : memref<1x784xf32, #tpu.memory_space<vmem>>, vector<1x16xf32>,
    %305 = vector.extract_strided_slice %226 {offsets = [0, 26, 0], sizes = [1, 1, 16], strides = [1, 1, 1]} : vector<1x49x16xf32> to vector<1x1x16xf32>
    %306 = vector.shape_cast %305 : vector<1x1x16xf32> to vector<1x16xf32>
    %c0_409 = arith.constant 0 : index
    %c416 = arith.constant 416 : index
    %307 = vector.load %arg13[%c0_409, %c416] : memref<1x784xf32, #tpu.memory_space<vmem>>, vector<1x16xf32>
    tpu.vector_store %arg13[%c0_409, %c416], %306 {strides = array<i32>} : memref<1x784xf32, #tpu.memory_space<vmem>>, vector<1x16xf32>,
    %308 = vector.extract_strided_slice %226 {offsets = [0, 27, 0], sizes = [1, 1, 16], strides = [1, 1, 1]} : vector<1x49x16xf32> to vector<1x1x16xf32>
    %309 = vector.shape_cast %308 : vector<1x1x16xf32> to vector<1x16xf32>
    %c0_410 = arith.constant 0 : index
    %c432 = arith.constant 432 : index
    %310 = vector.load %arg13[%c0_410, %c432] : memref<1x784xf32, #tpu.memory_space<vmem>>, vector<1x16xf32>
    tpu.vector_store %arg13[%c0_410, %c432], %309 {strides = array<i32>} : memref<1x784xf32, #tpu.memory_space<vmem>>, vector<1x16xf32>,
    %311 = vector.extract_strided_slice %226 {offsets = [0, 28, 0], sizes = [1, 1, 16], strides = [1, 1, 1]} : vector<1x49x16xf32> to vector<1x1x16xf32>
    %312 = vector.shape_cast %311 : vector<1x1x16xf32> to vector<1x16xf32>
    %c0_411 = arith.constant 0 : index
    %c448 = arith.constant 448 : index
    %313 = vector.load %arg13[%c0_411, %c448] : memref<1x784xf32, #tpu.memory_space<vmem>>, vector<1x16xf32>
    tpu.vector_store %arg13[%c0_411, %c448], %312 {strides = array<i32>} : memref<1x784xf32, #tpu.memory_space<vmem>>, vector<1x16xf32>,
    %314 = vector.extract_strided_slice %226 {offsets = [0, 29, 0], sizes = [1, 1, 16], strides = [1, 1, 1]} : vector<1x49x16xf32> to vector<1x1x16xf32>
    %315 = vector.shape_cast %314 : vector<1x1x16xf32> to vector<1x16xf32>
    %c0_412 = arith.constant 0 : index
    %c464 = arith.constant 464 : index
    %316 = vector.load %arg13[%c0_412, %c464] : memref<1x784xf32, #tpu.memory_space<vmem>>, vector<1x16xf32>
    tpu.vector_store %arg13[%c0_412, %c464], %315 {strides = array<i32>} : memref<1x784xf32, #tpu.memory_space<vmem>>, vector<1x16xf32>,
    %317 = vector.extract_strided_slice %226 {offsets = [0, 30, 0], sizes = [1, 1, 16], strides = [1, 1, 1]} : vector<1x49x16xf32> to vector<1x1x16xf32>
    %318 = vector.shape_cast %317 : vector<1x1x16xf32> to vector<1x16xf32>
    %c0_413 = arith.constant 0 : index
    %c480 = arith.constant 480 : index
    %319 = vector.load %arg13[%c0_413, %c480] : memref<1x784xf32, #tpu.memory_space<vmem>>, vector<1x16xf32>
    tpu.vector_store %arg13[%c0_413, %c480], %318 {strides = array<i32>} : memref<1x784xf32, #tpu.memory_space<vmem>>, vector<1x16xf32>,
    %320 = vector.extract_strided_slice %226 {offsets = [0, 31, 0], sizes = [1, 1, 16], strides = [1, 1, 1]} : vector<1x49x16xf32> to vector<1x1x16xf32>
    %321 = vector.shape_cast %320 : vector<1x1x16xf32> to vector<1x16xf32>
    %c0_414 = arith.constant 0 : index
    %c496 = arith.constant 496 : index
    %322 = vector.load %arg13[%c0_414, %c496] : memref<1x784xf32, #tpu.memory_space<vmem>>, vector<1x16xf32>
    tpu.vector_store %arg13[%c0_414, %c496], %321 {strides = array<i32>} : memref<1x784xf32, #tpu.memory_space<vmem>>, vector<1x16xf32>,
    %323 = vector.extract_strided_slice %226 {offsets = [0, 32, 0], sizes = [1, 1, 16], strides = [1, 1, 1]} : vector<1x49x16xf32> to vector<1x1x16xf32>
    %324 = vector.shape_cast %323 : vector<1x1x16xf32> to vector<1x16xf32>
    %c0_415 = arith.constant 0 : index
    %c512 = arith.constant 512 : index
    %325 = vector.load %arg13[%c0_415, %c512] : memref<1x784xf32, #tpu.memory_space<vmem>>, vector<1x16xf32>
    tpu.vector_store %arg13[%c0_415, %c512], %324 {strides = array<i32>} : memref<1x784xf32, #tpu.memory_space<vmem>>, vector<1x16xf32>,
    %326 = vector.extract_strided_slice %226 {offsets = [0, 33, 0], sizes = [1, 1, 16], strides = [1, 1, 1]} : vector<1x49x16xf32> to vector<1x1x16xf32>
    %327 = vector.shape_cast %326 : vector<1x1x16xf32> to vector<1x16xf32>
    %c0_416 = arith.constant 0 : index
    %c528 = arith.constant 528 : index
    %328 = vector.load %arg13[%c0_416, %c528] : memref<1x784xf32, #tpu.memory_space<vmem>>, vector<1x16xf32>
    tpu.vector_store %arg13[%c0_416, %c528], %327 {strides = array<i32>} : memref<1x784xf32, #tpu.memory_space<vmem>>, vector<1x16xf32>,
    %329 = vector.extract_strided_slice %226 {offsets = [0, 34, 0], sizes = [1, 1, 16], strides = [1, 1, 1]} : vector<1x49x16xf32> to vector<1x1x16xf32>
    %330 = vector.shape_cast %329 : vector<1x1x16xf32> to vector<1x16xf32>
    %c0_417 = arith.constant 0 : index
    %c544 = arith.constant 544 : index
    %331 = vector.load %arg13[%c0_417, %c544] : memref<1x784xf32, #tpu.memory_space<vmem>>, vector<1x16xf32>
    tpu.vector_store %arg13[%c0_417, %c544], %330 {strides = array<i32>} : memref<1x784xf32, #tpu.memory_space<vmem>>, vector<1x16xf32>,
    %332 = vector.extract_strided_slice %226 {offsets = [0, 35, 0], sizes = [1, 1, 16], strides = [1, 1, 1]} : vector<1x49x16xf32> to vector<1x1x16xf32>
    %333 = vector.shape_cast %332 : vector<1x1x16xf32> to vector<1x16xf32>
    %c0_418 = arith.constant 0 : index
    %c560 = arith.constant 560 : index
    %334 = vector.load %arg13[%c0_418, %c560] : memref<1x784xf32, #tpu.memory_space<vmem>>, vector<1x16xf32>
    tpu.vector_store %arg13[%c0_418, %c560], %333 {strides = array<i32>} : memref<1x784xf32, #tpu.memory_space<vmem>>, vector<1x16xf32>,
    %335 = vector.extract_strided_slice %226 {offsets = [0, 36, 0], sizes = [1, 1, 16], strides = [1, 1, 1]} : vector<1x49x16xf32> to vector<1x1x16xf32>
    %336 = vector.shape_cast %335 : vector<1x1x16xf32> to vector<1x16xf32>
    %c0_419 = arith.constant 0 : index
    %c576 = arith.constant 576 : index
    %337 = vector.load %arg13[%c0_419, %c576] : memref<1x784xf32, #tpu.memory_space<vmem>>, vector<1x16xf32>
    tpu.vector_store %arg13[%c0_419, %c576], %336 {strides = array<i32>} : memref<1x784xf32, #tpu.memory_space<vmem>>, vector<1x16xf32>,
    %338 = vector.extract_strided_slice %226 {offsets = [0, 37, 0], sizes = [1, 1, 16], strides = [1, 1, 1]} : vector<1x49x16xf32> to vector<1x1x16xf32>
    %339 = vector.shape_cast %338 : vector<1x1x16xf32> to vector<1x16xf32>
    %c0_420 = arith.constant 0 : index
    %c592 = arith.constant 592 : index
    %340 = vector.load %arg13[%c0_420, %c592] : memref<1x784xf32, #tpu.memory_space<vmem>>, vector<1x16xf32>
    tpu.vector_store %arg13[%c0_420, %c592], %339 {strides = array<i32>} : memref<1x784xf32, #tpu.memory_space<vmem>>, vector<1x16xf32>,
    %341 = vector.extract_strided_slice %226 {offsets = [0, 38, 0], sizes = [1, 1, 16], strides = [1, 1, 1]} : vector<1x49x16xf32> to vector<1x1x16xf32>
    %342 = vector.shape_cast %341 : vector<1x1x16xf32> to vector<1x16xf32>
    %c0_421 = arith.constant 0 : index
    %c608 = arith.constant 608 : index
    %343 = vector.load %arg13[%c0_421, %c608] : memref<1x784xf32, #tpu.memory_space<vmem>>, vector<1x16xf32>
    tpu.vector_store %arg13[%c0_421, %c608], %342 {strides = array<i32>} : memref<1x784xf32, #tpu.memory_space<vmem>>, vector<1x16xf32>,
    %344 = vector.extract_strided_slice %226 {offsets = [0, 39, 0], sizes = [1, 1, 16], strides = [1, 1, 1]} : vector<1x49x16xf32> to vector<1x1x16xf32>
    %345 = vector.shape_cast %344 : vector<1x1x16xf32> to vector<1x16xf32>
    %c0_422 = arith.constant 0 : index
    %c624 = arith.constant 624 : index
    %346 = vector.load %arg13[%c0_422, %c624] : memref<1x784xf32, #tpu.memory_space<vmem>>, vector<1x16xf32>
    tpu.vector_store %arg13[%c0_422, %c624], %345 {strides = array<i32>} : memref<1x784xf32, #tpu.memory_space<vmem>>, vector<1x16xf32>,
    %347 = vector.extract_strided_slice %226 {offsets = [0, 40, 0], sizes = [1, 1, 16], strides = [1, 1, 1]} : vector<1x49x16xf32> to vector<1x1x16xf32>
    %348 = vector.shape_cast %347 : vector<1x1x16xf32> to vector<1x16xf32>
    %c0_423 = arith.constant 0 : index
    %c640 = arith.constant 640 : index
    %349 = vector.load %arg13[%c0_423, %c640] : memref<1x784xf32, #tpu.memory_space<vmem>>, vector<1x16xf32>
    tpu.vector_store %arg13[%c0_423, %c640], %348 {strides = array<i32>} : memref<1x784xf32, #tpu.memory_space<vmem>>, vector<1x16xf32>,
    %350 = vector.extract_strided_slice %226 {offsets = [0, 41, 0], sizes = [1, 1, 16], strides = [1, 1, 1]} : vector<1x49x16xf32> to vector<1x1x16xf32>
    %351 = vector.shape_cast %350 : vector<1x1x16xf32> to vector<1x16xf32>
    %c0_424 = arith.constant 0 : index
    %c656 = arith.constant 656 : index
    %352 = vector.load %arg13[%c0_424, %c656] : memref<1x784xf32, #tpu.memory_space<vmem>>, vector<1x16xf32>
    tpu.vector_store %arg13[%c0_424, %c656], %351 {strides = array<i32>} : memref<1x784xf32, #tpu.memory_space<vmem>>, vector<1x16xf32>,
    %353 = vector.extract_strided_slice %226 {offsets = [0, 42, 0], sizes = [1, 1, 16], strides = [1, 1, 1]} : vector<1x49x16xf32> to vector<1x1x16xf32>
    %354 = vector.shape_cast %353 : vector<1x1x16xf32> to vector<1x16xf32>
    %c0_425 = arith.constant 0 : index
    %c672 = arith.constant 672 : index
    %355 = vector.load %arg13[%c0_425, %c672] : memref<1x784xf32, #tpu.memory_space<vmem>>, vector<1x16xf32>
    tpu.vector_store %arg13[%c0_425, %c672], %354 {strides = array<i32>} : memref<1x784xf32, #tpu.memory_space<vmem>>, vector<1x16xf32>,
    %356 = vector.extract_strided_slice %226 {offsets = [0, 43, 0], sizes = [1, 1, 16], strides = [1, 1, 1]} : vector<1x49x16xf32> to vector<1x1x16xf32>
    %357 = vector.shape_cast %356 : vector<1x1x16xf32> to vector<1x16xf32>
    %c0_426 = arith.constant 0 : index
    %c688 = arith.constant 688 : index
    %358 = vector.load %arg13[%c0_426, %c688] : memref<1x784xf32, #tpu.memory_space<vmem>>, vector<1x16xf32>
    tpu.vector_store %arg13[%c0_426, %c688], %357 {strides = array<i32>} : memref<1x784xf32, #tpu.memory_space<vmem>>, vector<1x16xf32>,
    %359 = vector.extract_strided_slice %226 {offsets = [0, 44, 0], sizes = [1, 1, 16], strides = [1, 1, 1]} : vector<1x49x16xf32> to vector<1x1x16xf32>
    %360 = vector.shape_cast %359 : vector<1x1x16xf32> to vector<1x16xf32>
    %c0_427 = arith.constant 0 : index
    %c704 = arith.constant 704 : index
    %361 = vector.load %arg13[%c0_427, %c704] : memref<1x784xf32, #tpu.memory_space<vmem>>, vector<1x16xf32>
    tpu.vector_store %arg13[%c0_427, %c704], %360 {strides = array<i32>} : memref<1x784xf32, #tpu.memory_space<vmem>>, vector<1x16xf32>,
    %362 = vector.extract_strided_slice %226 {offsets = [0, 45, 0], sizes = [1, 1, 16], strides = [1, 1, 1]} : vector<1x49x16xf32> to vector<1x1x16xf32>
    %363 = vector.shape_cast %362 : vector<1x1x16xf32> to vector<1x16xf32>
    %c0_428 = arith.constant 0 : index
    %c720 = arith.constant 720 : index
    %364 = vector.load %arg13[%c0_428, %c720] : memref<1x784xf32, #tpu.memory_space<vmem>>, vector<1x16xf32>
    tpu.vector_store %arg13[%c0_428, %c720], %363 {strides = array<i32>} : memref<1x784xf32, #tpu.memory_space<vmem>>, vector<1x16xf32>,
    %365 = vector.extract_strided_slice %226 {offsets = [0, 46, 0], sizes = [1, 1, 16], strides = [1, 1, 1]} : vector<1x49x16xf32> to vector<1x1x16xf32>
    %366 = vector.shape_cast %365 : vector<1x1x16xf32> to vector<1x16xf32>
    %c0_429 = arith.constant 0 : index
    %c736 = arith.constant 736 : index
    %367 = vector.load %arg13[%c0_429, %c736] : memref<1x784xf32, #tpu.memory_space<vmem>>, vector<1x16xf32>
    tpu.vector_store %arg13[%c0_429, %c736], %366 {strides = array<i32>} : memref<1x784xf32, #tpu.memory_space<vmem>>, vector<1x16xf32>,
    %368 = vector.extract_strided_slice %226 {offsets = [0, 47, 0], sizes = [1, 1, 16], strides = [1, 1, 1]} : vector<1x49x16xf32> to vector<1x1x16xf32>
    %369 = vector.shape_cast %368 : vector<1x1x16xf32> to vector<1x16xf32>
    %c0_430 = arith.constant 0 : index
    %c752 = arith.constant 752 : index
    %370 = vector.load %arg13[%c0_430, %c752] : memref<1x784xf32, #tpu.memory_space<vmem>>, vector<1x16xf32>
    tpu.vector_store %arg13[%c0_430, %c752], %369 {strides = array<i32>} : memref<1x784xf32, #tpu.memory_space<vmem>>, vector<1x16xf32>,
    %371 = vector.extract_strided_slice %226 {offsets = [0, 48, 0], sizes = [1, 1, 16], strides = [1, 1, 1]} : vector<1x49x16xf32> to vector<1x1x16xf32>
    %372 = vector.shape_cast %371 : vector<1x1x16xf32> to vector<1x16xf32>
    %c0_431 = arith.constant 0 : index
    %c768 = arith.constant 768 : index
    %373 = vector.load %arg13[%c0_431, %c768] : memref<1x784xf32, #tpu.memory_space<vmem>>, vector<1x16xf32>
    tpu.vector_store %arg13[%c0_431, %c768], %372 {strides = array<i32>} : memref<1x784xf32, #tpu.memory_space<vmem>>, vector<1x16xf32>,
    %c0_432 = arith.constant 0 : index
    %c0_433 = arith.constant 0 : index
    %374 = vector.load %arg13[%c0_432, %c0_433] : memref<1x784xf32, #tpu.memory_space<vmem>>, vector<1x784xf32>
    %c0_434 = arith.constant 0 : index
    %c0_435 = arith.constant 0 : index
    %375 = vector.load %arg6[%c0_434, %c0_435] : memref<784x32xf32, #tpu.memory_space<vmem>>, vector<784x32xf32>
    %cst_436 = arith.constant dense<0.000000e+00> : vector<1x32xf32>
    %376 = tpu.matmul %374, %375, %cst_436 {dimension_numbers = #tpu.dot_dimension_numbers<[1], [0], [0], [1], [0, 0, 1, 1], [], []>} : vector<1x784xf32>, vector<784x32xf32>, vector<1x32xf32> -> vector<1x32xf32>
    %c0_437 = arith.constant 0 : index
    %c0_438 = arith.constant 0 : index
    %377 = vector.load %arg7[%c0_437, %c0_438] : memref<1x32xf32, #tpu.memory_space<vmem>>, vector<1x32xf32>
    %378 = arith.addf %376, %377 : vector<1x32xf32>
    %cst_439 = arith.constant 0.000000e+00 : f32
    %379 = vector.broadcast %cst_439 : f32 to vector<1x32xf32>
    %380 = arith.maximumf %378, %379 : vector<1x32xf32>
    %c0_440 = arith.constant 0 : index
    %c0_441 = arith.constant 0 : index
    %381 = vector.load %arg8[%c0_440, %c0_441] : memref<32x10xf32, #tpu.memory_space<vmem>>, vector<32x10xf32>
    %cst_442 = arith.constant dense<0.000000e+00> : vector<1x10xf32>
    %382 = tpu.matmul %380, %381, %cst_442 {dimension_numbers = #tpu.dot_dimension_numbers<[1], [0], [0], [1], [0, 0, 1, 1], [], []>} : vector<1x32xf32>, vector<32x10xf32>, vector<1x10xf32> -> vector<1x10xf32>
    %c0_443 = arith.constant 0 : index
    %c0_444 = arith.constant 0 : index
    %383 = vector.load %arg9[%c0_443, %c0_444] : memref<1x10xf32, #tpu.memory_space<vmem>>, vector<1x10xf32>
    %384 = arith.addf %382, %383 : vector<1x10xf32>
    %c0_445 = arith.constant 0 : index
    %c0_446 = arith.constant 0 : index
    %c0_447 = arith.constant 0 : index
    %385 = vector.load %arg10[%c0_445, %c0_446, %c0_447] : memref<1x1x10xf32, #tpu.memory_space<vmem>>, vector<1x1x10xf32>
    %386 = vector.shape_cast %385 : vector<1x1x10xf32> to vector<1x10xf32>
    %387 = vector.shape_cast %384 : vector<1x10xf32> to vector<1x1x10xf32>
    tpu.vector_store %arg10[%c0_445, %c0_446, %c0_447], %387 {strides = array<i32>} : memref<1x1x10xf32, #tpu.memory_space<vmem>>, vector<1x1x10xf32>,
    return
  }
  func.func @transform_0(%arg0: i32) -> (i32, i32, i32) {
    %c0_i32 = arith.constant 0 : i32
    %c0_i32_0 = arith.constant 0 : i32
    %c0_i32_1 = arith.constant 0 : i32
    return %arg0, %c0_i32, %c0_i32_0 : i32, i32, i32
  }
  func.func @transform_1(%arg0: i32) -> (i32, i32) {
    %c0_i32 = arith.constant 0 : i32
    %c0_i32_0 = arith.constant 0 : i32
    %c0_i32_1 = arith.constant 0 : i32
    return %c0_i32, %c0_i32_0 : i32, i32
  }
  func.func @transform_2(%arg0: i32) -> (i32, i32) {
    %c0_i32 = arith.constant 0 : i32
    %c0_i32_0 = arith.constant 0 : i32
    %c0_i32_1 = arith.constant 0 : i32
    return %c0_i32, %c0_i32_0 : i32, i32
  }
  func.func @transform_3(%arg0: i32) -> (i32, i32) {
    %c0_i32 = arith.constant 0 : i32
    %c0_i32_0 = arith.constant 0 : i32
    %c0_i32_1 = arith.constant 0 : i32
    return %c0_i32, %c0_i32_0 : i32, i32
  }
  func.func @transform_4(%arg0: i32) -> (i32, i32) {
    %c0_i32 = arith.constant 0 : i32
    %c0_i32_0 = arith.constant 0 : i32
    %c0_i32_1 = arith.constant 0 : i32
    return %c0_i32, %c0_i32_0 : i32, i32
  }
  func.func @transform_5(%arg0: i32) -> (i32, i32) {
    %c0_i32 = arith.constant 0 : i32
    %c0_i32_0 = arith.constant 0 : i32
    %c0_i32_1 = arith.constant 0 : i32
    return %c0_i32, %c0_i32_0 : i32, i32
  }
  func.func @transform_6(%arg0: i32) -> (i32, i32) {
    %c0_i32 = arith.constant 0 : i32
    %c0_i32_0 = arith.constant 0 : i32
    %c0_i32_1 = arith.constant 0 : i32
    return %c0_i32, %c0_i32_0 : i32, i32
  }
  func.func @transform_7(%arg0: i32) -> (i32, i32) {
    %c0_i32 = arith.constant 0 : i32
    %c0_i32_0 = arith.constant 0 : i32
    %c0_i32_1 = arith.constant 0 : i32
    return %c0_i32, %c0_i32_0 : i32, i32
  }
  func.func @transform_8(%arg0: i32) -> (i32, i32) {
    %c0_i32 = arith.constant 0 : i32
    %c0_i32_0 = arith.constant 0 : i32
    %c0_i32_1 = arith.constant 0 : i32
    return %c0_i32, %c0_i32_0 : i32, i32
  }
  func.func @transform_9(%arg0: i32) -> (i32, i32, i32) {
    %c0_i32 = arith.constant 0 : i32
    %c0_i32_0 = arith.constant 0 : i32
    %c0_i32_1 = arith.constant 0 : i32
    return %arg0, %c0_i32, %c0_i32_0 : i32, i32, i32
  }
}

</mosaic_0001>

<bundles_post_ra>
// kernel: cnn_forward.1
= control target key start
LH: loop header
LB: loop body
LE: loop exit
PB: predicated region body
PF: predicated region fallthrough
CT: control target
= control target key end

     0   :  { %s16887_s0 = inlined_call_operand.vmem [shape: f32[2,784,9], index: 0, kind: input, shape index: {}]   ;;  %s16888_s1 = inlined_call_operand.vmem [shape: f32[9,8], index: 1, kind: input, shape index: {}]   ;;  %s16889_s2 = inlined_call_operand.vmem [shape: f32[1,8], index: 2, kind: input, shape index: {}]   ;;  %s16890_s3 = inlined_call_operand.vmem [shape: f32[72,16], index: 3, kind: input, shape index: {}]   ;;  %s16891_s4 = inlined_call_operand.vmem [shape: f32[1,16], index: 4, kind: input, shape index: {}]   ;;  %s16892_s5 = inlined_call_operand.vmem [shape: f32[784,32], index: 5, kind: input, shape index: {}]   ;;  %s16893_s6 = inlined_call_operand.vmem [shape: f32[1,32], index: 6, kind: input, shape index: {}]   ;;  %s16894_s7 = inlined_call_operand.vmem [shape: f32[32,10], index: 7, kind: input, shape index: {}]   ;;  %s16895_s8 = inlined_call_operand.vmem [shape: f32[1,10], index: 8, kind: input, shape index: {}]   ;;  %s16896_s9 = inlined_call_operand.hbm [shape: f32[2,1,10], index: 9, kind: output, shape index: {}]  }
   0x1   :  { %17026 = sst [smem:[#allocation65_spill]] %s16887_s0 }
   0x2   :  { %14 = vsyncpa [#allocation6], 0 }
   0x3   :  { %16 = vsyncpa [#allocation6 + $0x1], 0  ;;  %s12218_s30 = smov 0   ;;  %s12220_s10 = smov 0  }
   0x4   :  { %s12222_s11 = smov 0   ;;  %s12224_s12 = smov 0  }
   0x5 LB: > { %s12239_s13 = sadd.s32 4294967295, %s12149_s12   ;;  %s11209_s14 = sadd.s32 4294967294, %s12149_s12   ;;  %s12149_s12 = sphi %s12224_s12, %s17458_s12   ;;  %s12145_s11 = sphi %s12222_s11, %s17457_s11   ;;  %s12141_s10 = sphi %s12220_s10, %s17456_s10   ;;  %s12137_s30 = sphi %s12218_s30, %s17455_s30  }
   0x6   : > { %s12243_s15 = sadd.s32 1, %s12149_s12   ;;  %s223_s16 = sadd.s32 1, %s12145_s11 }
   0x7   : > { %s220_s17 = ssub.s32 %s12149_s12, %s12243_s15  ;;  %p233_p0 = scmp.ne.s32.totalorder %s12145_s11, %s12141_s10 }
   0x8   : > { %p221_p1 = scmp.eq.s32.totalorder %s220_s17, 0  ;;  %p234_p2 = scmp.eq.s32.totalorder %s12239_s13, 1 }
   0x9   : > { %p239_p3 = scmp.ne.s32.totalorder %s12141_s10, %s12137_s30  ;;  %p240_p4 = scmp.eq.s32.totalorder %s11209_s14, 1 }
   0xa   : > { %s12254_s18 = scalar_select %p221_p1, %s12145_s11, %s223_s16  }
   0xb   : > { %p12256_p5 = por %p234_p2, %p233_p0  ;;  %p12260_p6 = por %p240_p4, %p239_p3 }
   0xc   : > { %p11212_p7 = scmp.ge.s32.totalorder %s12149_s12, 1  ;;  %p290_p8 = scmp.lt.s32.totalorder %s12149_s12, 3 }
   0xe   : > { %p291_p9 = pnand %p11212_p7, %p290_p8 }
  0x10   : > { %294 = sbr.rel (%p291_p9) target bundleno = 1974 (0x7b6), region = 56 }
  0x17   : > { %v428_v0 = vld [vmem:[%s16888_s1] sm:$0xff]  ;;  %v429_v1 = vld [vmem:[%s16888_s1 + $0x8] sm:$0x1]  ;;  %vm732_vm0 = vcmask 1040384   ;;  %p325_p10 = scmp.lt.s32.totalorder %s12239_s13, 1  ;;  %vm12151_vm1 = vmmov 1  }
  0x18   : > { %v11889_v2 = vpack.c.bf16 %v429_v1, %v428_v0  ;;  %vm11890_vm2 = vmpackc.low %vm732_vm0, %vm12151_vm1  ;;  %vm437_vm3 = vcmask 72704   ;;  %s17029_s0 = sld [smem:[#allocation65_spill]]  ;;  %vm1830_vm4 = vcmask 64512   ;;  %s16929_s17 = smov 8   ;;  %vm1832_vm5 = vcmask 57344  }
  0x19   : > { %s326_s25 = scalar_select %p325_p10, %s12239_s13, 1  ;;  %vm4502_vm6 = vcmask 63488   ;;  %vm4582_vm7 = vcmask 129088   ;;  %vm4625_vm8 = vcmask 194688   ;;  %vm4669_vm9 = vcmask 260288  }
  0x1a   : > { %11891 = vmatprep.subr.msk.bf16.mxu0 %vm11890_vm2, %v11889_v2  ;;  %s16927_s21 = smov 16   ;;  %s16931_s22 = smov 48   ;;  %vm4712_vm10 = vcmask 325888   ;;  %vm4755_vm11 = vcmask 391488   ;;  %vm4799_vm12 = vcmask 457088   ;;  %vm12163_vm13 = vmmov 0  }
  0x1b   : > { %11894 = vmatpush3.bf16.msk.msra.mxu0 %vm11890_vm2, %v11889_v2  ;;  %s12012_s26 = smul.u32 784, %s326_s25  ;;  %s16925_s23 = smov 64   ;;  %vm4843_vm14 = vcmask 522688   ;;  %vm4886_vm15 = vcmask 588288   ;;  %vm8565_vm0 = vcmask 588800  }
  0x1c   : > { %s12158_s24 = smov 56   ;;  %s17020_s27 = smov 32  }
  0x1d   : > { %s12160_s28 = smov 24   ;;  %s17164_s14 = smov 48  }
  0x1e   : > { %s12277_s29 = scalar_lea.vmem %s17029_s0, %s12012_s26  ;;  %s17165_s16 = smov 8  }
  0x1f   : > { %v330_v3 = vld [vmem:[%s12277_s29] sm:$0xff]  ;;  %v331_v4 = vld [vmem:[%s12277_s29 + $0x8] sm:$0xff]  ;;  %v332_v5 = vld [vmem:[%s12277_s29 + $0x10] sm:$0xff]  ;;  %s17411_s25 = smov 112   ;;  %s17426_s26 = smov 80  }
  0x20   : > { %11631 = vmatprep.mubr.msk.f32.mxu0 %vm437_vm3, %v330_v3  ;;  %v333_v6 = vld [vmem:[%s12277_s29 + $0x18] sm:$0xff]  ;;  %v334_v7 = vld [vmem:[%s12277_s29 + $0x20] sm:$0xff]  ;;  %v335_v8 = vld [vmem:[%s12277_s29 + $0x28] sm:$0xff] }
  0x21   : > { %11632 = vmatmul.mubr.msk.f32.vlgmr.msra.gmra.mrb[0].mxu0 %vm437_vm3, %v331_v4  ;;  %v336_v9 = vld [vmem:[%s12277_s29 + $0x30] sm:$0xff]  ;;  %v337_v10 = vld [vmem:[%s12277_s29 + $0x38] sm:$0xff]  ;;  %v338_v11 = vld [vmem:[%s12277_s29 + $0x40] sm:$0xff] }
  0x22   : > { %11634 = vmatprep.mubr.msk.f32.mxu0 %vm437_vm3, %v332_v5  ;;  %v339_v12 = vld [vmem:[%s12277_s29 + $0x48] sm:$0xff]  ;;  %v340_v13 = vld [vmem:[%s12277_s29 + $0x50] sm:$0xff]  ;;  %v341_v14 = vld [vmem:[%s12277_s29 + $0x58] sm:$0xff] }
  0x23   : > { %v342_v15 = vld [vmem:[%s12277_s29 + $0x60] sm:$0xff]  ;;  %v343_v16 = vld [vmem:[%s12277_s29 + $0x68] sm:$0xff]  ;;  %v344_v17 = vld [vmem:[%s12277_s29 + $0x70] sm:$0xff] }
  0x24   : > { %v345_v18 = vld [vmem:[%s12277_s29 + $0x78] sm:$0xff]  ;;  %v346_v19 = vld [vmem:[%s12277_s29 + $0x80] sm:$0xff]  ;;  %v347_v20 = vld [vmem:[%s12277_s29 + $0x88] sm:$0xff] }
  0x25   : > { %11635 = vmatmul.mubr.msk.f32.gmra.mrb[2].mxu0 %vm437_vm3, %v333_v6  ;;  %v348_v21 = vld [vmem:[%s12277_s29 + $0x90] sm:$0xff]  ;;  %v349_v22 = vld [vmem:[%s12277_s29 + $0x98] sm:$0xff]  ;;  %v350_v23 = vld [vmem:[%s12277_s29 + $0xa0] sm:$0xff] }
  0x26   : > { %11637 = vmatprep.mubr.msk.f32.mxu0 %vm437_vm3, %v334_v7  ;;  %v351_v24 = vld [vmem:[%s12277_s29 + $0xa8] sm:$0xff]  ;;  %v352_v25 = vld [vmem:[%s12277_s29 + $0xb0] sm:$0xff]  ;;  %v353_v26 = vld [vmem:[%s12277_s29 + $0xb8] sm:$0xff] }
  0x27   : > { %v354_v27 = vld [vmem:[%s12277_s29 + $0xc0] sm:$0xff]  ;;  %v355_v28 = vld [vmem:[%s12277_s29 + $0xc8] sm:$0xff]  ;;  %v356_v29 = vld [vmem:[%s12277_s29 + $0xd0] sm:$0xff] }
  0x28   : > { %v357_v30 = vld [vmem:[%s12277_s29 + $0xd8] sm:$0xff]  ;;  %v358_v31 = vld [vmem:[%s12277_s29 + $0xe0] sm:$0xff]  ;;  %v359_v32 = vld [vmem:[%s12277_s29 + $0xe8] sm:$0xff] }
  0x29   : > { %11638 = vmatmul.mubr.msk.f32.gmra.mrb[4].mxu0 %vm437_vm3, %v335_v8  ;;  %v360_v33 = vld [vmem:[%s12277_s29 + $0xf0] sm:$0xff]  ;;  %v361_v34 = vld [vmem:[%s12277_s29 + $0xf8] sm:$0xff]  ;;  %v362_v35 = vld [vmem:[%s12277_s29 + $0x100] sm:$0xff] }
  0x2a   : > { %11640 = vmatprep.mubr.msk.f32.mxu0 %vm437_vm3, %v336_v9  ;;  %v363_v36 = vld [vmem:[%s12277_s29 + $0x108] sm:$0xff]  ;;  %v364_v37 = vld [vmem:[%s12277_s29 + $0x110] sm:$0xff]  ;;  %v365_v38 = vld [vmem:[%s12277_s29 + $0x118] sm:$0xff] }
  0x2b   : > { %v366_v39 = vld [vmem:[%s12277_s29 + $0x120] sm:$0xff]  ;;  %v367_v40 = vld [vmem:[%s12277_s29 + $0x128] sm:$0xff]  ;;  %v368_v41 = vld [vmem:[%s12277_s29 + $0x130] sm:$0xff] }
  0x2c   : > { %v369_v42 = vld [vmem:[%s12277_s29 + $0x138] sm:$0xff]  ;;  %v370_v43 = vld [vmem:[%s12277_s29 + $0x140] sm:$0xff]  ;;  %v371_v44 = vld [vmem:[%s12277_s29 + $0x148] sm:$0xff] }
  0x2d   : > { %11641 = vmatmul.mubr.msk.f32.gmra.mrb[6].mxu0 %vm437_vm3, %v337_v10  ;;  %v372_v45 = vld [vmem:[%s12277_s29 + $0x150] sm:$0xff]  ;;  %v373_v46 = vld [vmem:[%s12277_s29 + $0x158] sm:$0xff]  ;;  %v374_v47 = vld [vmem:[%s12277_s29 + $0x160] sm:$0xff] }
  0x2e   : > { %11643 = vmatprep.mubr.msk.f32.mxu0 %vm437_vm3, %v338_v11  ;;  %v375_v48 = vld [vmem:[%s12277_s29 + $0x168] sm:$0xff]  ;;  %v376_v49 = vld [vmem:[%s12277_s29 + $0x170] sm:$0xff]  ;;  %v377_v50 = vld [vmem:[%s12277_s29 + $0x178] sm:$0xff] }
  0x2f   : > { %v378_v51 = vld [vmem:[%s12277_s29 + $0x180] sm:$0xff]  ;;  %v379_v52 = vld [vmem:[%s12277_s29 + $0x188] sm:$0xff]  ;;  %v380_v53 = vld [vmem:[%s12277_s29 + $0x190] sm:$0xff] }
  0x30   : > { %v381_v54 = vld [vmem:[%s12277_s29 + $0x198] sm:$0xff]  ;;  %v382_v55 = vld [vmem:[%s12277_s29 + $0x1a0] sm:$0xff]  ;;  %v383_v56 = vld [vmem:[%s12277_s29 + $0x1a8] sm:$0xff] }
  0x31   : > { %11644 = vmatmul.mubr.msk.f32.gmra.mrb[8].mxu0 %vm437_vm3, %v339_v12  ;;  %v384_v57 = vld [vmem:[%s12277_s29 + $0x1b0] sm:$0xff]  ;;  %v385_v58 = vld [vmem:[%s12277_s29 + $0x1b8] sm:$0xff]  ;;  %v386_v59 = vld [vmem:[%s12277_s29 + $0x1c0] sm:$0xff] }
  0x32   : > { %11646 = vmatprep.mubr.msk.f32.mxu0 %vm437_vm3, %v340_v13  ;;  %v387_v60 = vld [vmem:[%s12277_s29 + $0x1c8] sm:$0xff]  ;;  %v388_v61 = vld [vmem:[%s12277_s29 + $0x1d0] sm:$0xff]  ;;  %v389_v62 = vld [vmem:[%s12277_s29 + $0x1d8] sm:$0xff] }
  0x33   : > { %v390_v63 = vld [vmem:[%s12277_s29 + $0x1e0] sm:$0xff]  ;;  %v391_v0 = vld [vmem:[%s12277_s29 + $0x1e8] sm:$0xff]  ;;  %v392_v1 = vld [vmem:[%s12277_s29 + $0x1f0] sm:$0xff] }
  0x34   : > { %v393_v2 = vld [vmem:[%s12277_s29 + $0x1f8] sm:$0xff]  ;;  %v394_v3 = vld [vmem:[%s12277_s29 + $0x200] sm:$0xff]  ;;  %v395_v4 = vld [vmem:[%s12277_s29 + $0x208] sm:$0xff] }
  0x35   : > { %11647 = vmatmul.mubr.msk.f32.gmra.mrb[10].mxu0 %vm437_vm3, %v341_v14  ;;  %v396_v5 = vld [vmem:[%s12277_s29 + $0x210] sm:$0xff]  ;;  %v397_v6 = vld [vmem:[%s12277_s29 + $0x218] sm:$0xff]  ;;  %v398_v7 = vld [vmem:[%s12277_s29 + $0x220] sm:$0xff] }
  0x36   : > { %11649 = vmatprep.mubr.msk.f32.mxu0 %vm437_vm3, %v342_v15  ;;  %v399_v8 = vld [vmem:[%s12277_s29 + $0x228] sm:$0xff]  ;;  %v400_v9 = vld [vmem:[%s12277_s29 + $0x230] sm:$0xff]  ;;  %v401_v10 = vld [vmem:[%s12277_s29 + $0x238] sm:$0xff] }
  0x37   : > { %v402_v11 = vld [vmem:[%s12277_s29 + $0x240] sm:$0xff]  ;;  %v403_v12 = vld [vmem:[%s12277_s29 + $0x248] sm:$0xff]  ;;  %v404_v13 = vld [vmem:[%s12277_s29 + $0x250] sm:$0xff] }
  0x38   : > { %v405_v14 = vld [vmem:[%s12277_s29 + $0x258] sm:$0xff]  ;;  %v406_v15 = vld [vmem:[%s12277_s29 + $0x260] sm:$0xff] }
  0x39   : > { %11650 = vmatmul.mubr.msk.f32.gmra.mrb[12].mxu0 %vm437_vm3, %v343_v16  ;;  %v407_v16 = vld [vmem:[%s12277_s29 + $0x268] sm:$0xff] }
  0x3a   : > { %11652 = vmatprep.mubr.msk.f32.mxu0 %vm437_vm3, %v344_v17  ;;  %v408_v17 = vld [vmem:[%s12277_s29 + $0x270] sm:$0xff] }
  0x3d   : > { %11653 = vmatmul.mubr.msk.f32.gmra.mrb[14].mxu0 %vm437_vm3, %v345_v18  ;;  %v409_v18 = vld [vmem:[%s12277_s29 + $0x278] sm:$0xff] }
  0x3e   : > { %11655 = vmatprep.mubr.msk.f32.mxu0 %vm437_vm3, %v346_v19  ;;  %v410_v19 = vld [vmem:[%s12277_s29 + $0x280] sm:$0xff] }
  0x41   : > { %11656 = vmatmul.mubr.msk.f32.gmra.mrb[16].mxu0 %vm437_vm3, %v347_v20  ;;  %v411_v20 = vld [vmem:[%s12277_s29 + $0x288] sm:$0xff] }
  0x42   : > { %11658 = vmatprep.mubr.msk.f32.mxu0 %vm437_vm3, %v348_v21  ;;  %v412_v21 = vld [vmem:[%s12277_s29 + $0x290] sm:$0xff] }
  0x45   : > { %11659 = vmatmul.mubr.msk.f32.gmra.mrb[18].mxu0 %vm437_vm3, %v349_v22  ;;  %v413_v22 = vld [vmem:[%s12277_s29 + $0x298] sm:$0xff] }
  0x46   : > { %11661 = vmatprep.mubr.msk.f32.mxu0 %vm437_vm3, %v350_v23  ;;  %v414_v23 = vld [vmem:[%s12277_s29 + $0x2a0] sm:$0xff] }
  0x49   : > { %11662 = vmatmul.mubr.msk.f32.gmra.mrb[20].mxu0 %vm437_vm3, %v351_v24  ;;  %v415_v24 = vld [vmem:[%s12277_s29 + $0x2a8] sm:$0xff] }
  0x4a   : > { %11664 = vmatprep.mubr.msk.f32.mxu0 %vm437_vm3, %v352_v25  ;;  %v416_v25 = vld [vmem:[%s12277_s29 + $0x2b0] sm:$0xff] }
  0x4d   : > { %11665 = vmatmul.mubr.msk.f32.gmra.mrb[22].mxu0 %vm437_vm3, %v353_v26  ;;  %v417_v26 = vld [vmem:[%s12277_s29 + $0x2b8] sm:$0xff] }
  0x4e   : > { %11667 = vmatprep.mubr.msk.f32.mxu0 %vm437_vm3, %v354_v27  ;;  %v418_v27 = vld [vmem:[%s12277_s29 + $0x2c0] sm:$0xff] }
  0x51   : > { %11668 = vmatmul.mubr.msk.f32.gmra.mrb[24].mxu0 %vm437_vm3, %v355_v28  ;;  %v419_v28 = vld [vmem:[%s12277_s29 + $0x2c8] sm:$0xff] }
  0x52   : > { %11670 = vmatprep.mubr.msk.f32.mxu0 %vm437_vm3, %v356_v29  ;;  %v420_v29 = vld [vmem:[%s12277_s29 + $0x2d0] sm:$0xff] }
  0x55   : > { %11671 = vmatmul.mubr.msk.f32.gmra.mrb[26].mxu0 %vm437_vm3, %v357_v30  ;;  %v421_v30 = vld [vmem:[%s12277_s29 + $0x2d8] sm:$0xff] }
  0x56   : > { %11673 = vmatprep.mubr.msk.f32.mxu0 %vm437_vm3, %v358_v31  ;;  %v422_v31 = vld [vmem:[%s12277_s29 + $0x2e0] sm:$0xff] }
  0x59   : > { %11674 = vmatmul.mubr.msk.f32.gmra.mrb[28].mxu0 %vm437_vm3, %v359_v32  ;;  %v423_v32 = vld [vmem:[%s12277_s29 + $0x2e8] sm:$0xff] }
  0x5a   : > { %11676 = vmatprep.mubr.msk.f32.mxu0 %vm437_vm3, %v360_v33  ;;  %v424_v33 = vld [vmem:[%s12277_s29 + $0x2f0] sm:$0xff] }
  0x5d   : > { %11677 = vmatmul.mubr.msk.f32.gmra.mrb[30].mxu0 %vm437_vm3, %v361_v34  ;;  %v425_v34 = vld [vmem:[%s12277_s29 + $0x2f8] sm:$0xff] }
  0x5e   : > { %11679 = vmatprep.mubr.msk.f32.mxu0 %vm437_vm3, %v362_v35  ;;  %v426_v35 = vld [vmem:[%s12277_s29 + $0x300] sm:$0xff] }
  0x61   : > { %11680 = vmatmul.mubr.msk.f32.gmra.mrb[32].mxu0 %vm437_vm3, %v363_v36  ;;  %v427_v36 = vld [vmem:[%s12277_s29 + $0x308] sm:$0xff]  ;;  %s12161_s29 = smov 40  }
  0x62   : > { %11682 = vmatprep.mubr.msk.f32.mxu0 %vm437_vm3, %v364_v37 }
  0x65   : > { %11683 = vmatmul.mubr.msk.f32.gmra.mrb[34].mxu0 %vm437_vm3, %v365_v38 }
  0x66   : > { %11685 = vmatprep.mubr.msk.f32.mxu0 %vm437_vm3, %v366_v39 }
  0x69   : > { %11686 = vmatmul.mubr.msk.f32.gmra.mrb[36].mxu0 %vm437_vm3, %v367_v40 }
  0x6a   : > { %11688 = vmatprep.mubr.msk.f32.mxu0 %vm437_vm3, %v368_v41 }
  0x6d   : > { %11689 = vmatmul.mubr.msk.f32.gmra.mrb[38].mxu0 %vm437_vm3, %v369_v42 }
  0x6e   : > { %11691 = vmatprep.mubr.msk.f32.mxu0 %vm437_vm3, %v370_v43 }
  0x71   : > { %11692 = vmatmul.mubr.msk.f32.gmra.mrb[40].mxu0 %vm437_vm3, %v371_v44 }
  0x72   : > { %11694 = vmatprep.mubr.msk.f32.mxu0 %vm437_vm3, %v372_v45 }
  0x75   : > { %11695 = vmatmul.mubr.msk.f32.gmra.mrb[42].mxu0 %vm437_vm3, %v373_v46 }
  0x76   : > { %11697 = vmatprep.mubr.msk.f32.mxu0 %vm437_vm3, %v374_v47 }
  0x79   : > { %11698 = vmatmul.mubr.msk.f32.gmra.mrb[44].mxu0 %vm437_vm3, %v375_v48 }
  0x7a   : > { %11700 = vmatprep.mubr.msk.f32.mxu0 %vm437_vm3, %v376_v49 }
  0x7d   : > { %11701 = vmatmul.mubr.msk.f32.gmra.mrb[46].mxu0 %vm437_vm3, %v377_v50 }
  0x7e   : > { %11703 = vmatprep.mubr.msk.f32.mxu0 %vm437_vm3, %v378_v51 }
  0x81   : > { %11704 = vmatmul.mubr.msk.f32.gmra.mrb[48].mxu0 %vm437_vm3, %v379_v52 }
  0x82   : > { %11706 = vmatprep.mubr.msk.f32.mxu0 %vm437_vm3, %v380_v53  ;;  %v16897_v53 = vmov 0.0  }
  0x83   : > { %1834 = vst.msk [vmem:[#allocation2 + $0x10] sm:$0xff] %vm1830_vm4, %v16897_v53  ;;  %1836 = vst.msk [vmem:[#allocation2 + $0x20] sm:$0xff] %vm1830_vm4, %v16897_v53 }
  0x84   : > { %1838 = vst.msk [vmem:[#allocation2 + $0x30] sm:$0xff] %vm1830_vm4, %v16897_v53  ;;  %1840 = vst.msk [vmem:[#allocation2 + $0x40] sm:$0xff] %vm1830_vm4, %v16897_v53 }
  0x85   : > { %11707 = vmatmul.mubr.msk.f32.gmra.mrb[50].mxu0 %vm437_vm3, %v381_v54  ;;  %1842 = vst.msk [vmem:[#allocation2 + $0x50] sm:$0xff] %vm1830_vm4, %v16897_v53  ;;  %1844 = vst.msk [vmem:[#allocation2 + $0x60] sm:$0xff] %vm1830_vm4, %v16897_v53 }
  0x86   : > { %11709 = vmatprep.mubr.msk.f32.mxu0 %vm437_vm3, %v382_v55  ;;  %1846 = vst.msk [vmem:[#allocation2 + $0x70] sm:$0xff] %vm1830_vm4, %v16897_v53  ;;  %1848 = vst.msk [vmem:[#allocation2 + $0x80] sm:$0xff] %vm1830_vm4, %v16897_v53 }
  0x87   : > { %1852 = vst.msk [vmem:[#allocation2 + $0xa0] sm:$0xff] %vm1830_vm4, %v16897_v53  ;;  %1854 = vst.msk [vmem:[#allocation2 + $0xb0] sm:$0xff] %vm1830_vm4, %v16897_v53 }
  0x88   : > { %1856 = vst.msk [vmem:[#allocation2 + $0xc0] sm:$0xff] %vm1830_vm4, %v16897_v53  ;;  %1858 = vst.msk [vmem:[#allocation2 + $0xd0] sm:$0xff] %vm1830_vm4, %v16897_v53 }
  0x89   : > { %11710 = vmatmul.mubr.msk.f32.gmra.mrb[52].mxu0 %vm437_vm3, %v383_v56  ;;  %1860 = vst.msk [vmem:[#allocation2 + $0xe0] sm:$0xff] %vm1830_vm4, %v16897_v53  ;;  %1862 = vst.msk [vmem:[#allocation2 + $0xf0] sm:$0xff] %vm1830_vm4, %v16897_v53 }
  0x8a   : > { %11712 = vmatprep.mubr.msk.f32.mxu0 %vm437_vm3, %v384_v57  ;;  %1864 = vst.msk [vmem:[#allocation2 + $0x100] sm:$0xff] %vm1830_vm4, %v16897_v53  ;;  %1866 = vst.msk [vmem:[#allocation2 + $0x110] sm:$0xff] %vm1830_vm4, %v16897_v53 }
  0x8b   : > { %1868 = vst.msk [vmem:[#allocation2 + $0x120] sm:$0xff] %vm1830_vm4, %v16897_v53  ;;  %1870 = vst.msk [vmem:[#allocation2 + $0x130] sm:$0xff] %vm1830_vm4, %v16897_v53 }
  0x8c   : > { %1872 = vst.msk [vmem:[#allocation2 + $0x140] sm:$0xff] %vm1830_vm4, %v16897_v53  ;;  %1874 = vst.msk [vmem:[#allocation2 + $0x150] sm:$0xff] %vm1830_vm4, %v16897_v53 }
  0x8d   : > { %11713 = vmatmul.mubr.msk.f32.gmra.mrb[54].mxu0 %vm437_vm3, %v385_v58  ;;  %1876 = vst.msk [vmem:[#allocation2 + $0x160] sm:$0xff] %vm1830_vm4, %v16897_v53  ;;  %1878 = vst.msk [vmem:[#allocation2 + $0x170] sm:$0xff] %vm1830_vm4, %v16897_v53  ;;  %v12576_v58 = vld [vmem:[%s16889_s2] ss:$0 sm:$0xff] }
  0x8e   : > { %11715 = vmatprep.mubr.msk.f32.mxu0 %vm437_vm3, %v386_v59  ;;  %1880 = vst.msk [vmem:[#allocation2 + $0x180] sm:$0xff] %vm1830_vm4, %v16897_v53  ;;  %1882 = vst.msk [vmem:[#allocation2 + $0x190] sm:$0xff] %vm1830_vm4, %v16897_v53 }
  0x8f   : > { %1886 = vst.msk [vmem:[#allocation2 + $0x1b0] sm:$0xff] %vm1830_vm4, %v16897_v53  ;;  %1888 = vst.msk [vmem:[#allocation2 + $0x1c0] sm:$0xff] %vm1830_vm4, %v16897_v53 }
  0x90   : > { %1890 = vst.msk [vmem:[#allocation2 + $0x1d0] sm:$0xff] %vm1830_vm4, %v16897_v53  ;;  %1892 = vst.msk [vmem:[#allocation2 + $0x1e0] sm:$0xff] %vm1830_vm4, %v16897_v53 }
  0x91   : > { %11716 = vmatmul.mubr.msk.f32.gmra.mrb[56].mxu0 %vm437_vm3, %v387_v60  ;;  %1894 = vst.msk [vmem:[#allocation2 + $0x1f0] sm:$0xff] %vm1830_vm4, %v16897_v53  ;;  %1896 = vst.msk [vmem:[#allocation2 + $0x200] sm:$0xff] %vm1830_vm4, %v16897_v53 }
  0x92   : > { %11718 = vmatprep.mubr.msk.f32.mxu0 %vm437_vm3, %v388_v61  ;;  %1898 = vst.msk [vmem:[#allocation2 + $0x210] sm:$0xff] %vm1830_vm4, %v16897_v53  ;;  %1900 = vst.msk [vmem:[#allocation2 + $0x220] sm:$0xff] %vm1830_vm4, %v16897_v53 }
  0x95   : > { %11719 = vmatmul.mubr.msk.f32.gmra.mrb[58].mxu0 %vm437_vm3, %v389_v62 }
  0x96   : > { %11721 = vmatprep.mubr.msk.f32.mxu0 %vm437_vm3, %v390_v63 }
  0x99   : > { %11722 = vmatmul.mubr.msk.f32.gmra.mrb[60].mxu0 %vm437_vm3, %v391_v0 }
  0x9a   : > { %11724 = vmatprep.mubr.msk.f32.mxu0 %vm437_vm3, %v392_v1 }
  0x9d   : > { %11725 = vmatmul.mubr.msk.f32.gmra.mrb[62].mxu0 %vm437_vm3, %v393_v2 }
  0x9e   : > { %11727 = vmatprep.mubr.msk.f32.mxu0 %vm437_vm3, %v394_v3 }
  0xa1   : > { %11728 = vmatmul.mubr.msk.f32.gmra.mrb[64].mxu0 %vm437_vm3, %v395_v4 }
  0xa2   : > { %11730 = vmatprep.mubr.msk.f32.mxu0 %vm437_vm3, %v396_v5 }
  0xa5   : > { %11731 = vmatmul.mubr.msk.f32.gmra.mrb[66].mxu0 %vm437_vm3, %v397_v6 }
  0xa6   : > { %11733 = vmatprep.mubr.msk.f32.mxu0 %vm437_vm3, %v398_v7 }
  0xa9   : > { %11734 = vmatmul.mubr.msk.f32.gmra.mrb[68].mxu0 %vm437_vm3, %v399_v8 }
  0xaa   : > { %11736 = vmatprep.mubr.msk.f32.mxu0 %vm437_vm3, %v400_v9 }
  0xad   : > { %11737 = vmatmul.mubr.msk.f32.gmra.mrb[70].mxu0 %vm437_vm3, %v401_v10 }
  0xae   : > { %11739 = vmatprep.mubr.msk.f32.mxu0 %vm437_vm3, %v402_v11 }
  0xb1   : > { %11740 = vmatmul.mubr.msk.f32.gmra.mrb[72].mxu0 %vm437_vm3, %v403_v12 }
  0xb2   : > { %11742 = vmatprep.mubr.msk.f32.mxu0 %vm437_vm3, %v404_v13 }
  0xb5   : > { %11743 = vmatmul.mubr.msk.f32.gmra.mrb[74].mxu0 %vm437_vm3, %v405_v14 }
  0xb6   : > { %11745 = vmatprep.mubr.msk.f32.mxu0 %vm437_vm3, %v406_v15 }
  0xb9   : > { %11746 = vmatmul.mubr.msk.f32.gmra.mrb[76].mxu0 %vm437_vm3, %v407_v16 }
  0xba   : > { %11748 = vmatprep.mubr.msk.f32.mxu0 %vm437_vm3, %v408_v17 }
  0xbd   : > { %11749 = vmatmul.mubr.msk.f32.gmra.mrb[78].mxu0 %vm437_vm3, %v409_v18 }
  0xbe   : > { %11751 = vmatprep.mubr.msk.f32.mxu0 %vm437_vm3, %v410_v19 }
  0xc1   : > { %11752 = vmatmul.mubr.msk.f32.gmra.mrb[80].mxu0 %vm437_vm3, %v411_v20 }
  0xc2   : > { %11754 = vmatprep.mubr.msk.f32.mxu0 %vm437_vm3, %v412_v21 }
  0xc5   : > { %11755 = vmatmul.mubr.msk.f32.gmra.mrb[82].mxu0 %vm437_vm3, %v413_v22 }
  0xc6   : > { %11757 = vmatprep.mubr.msk.f32.mxu0 %vm437_vm3, %v414_v23 }
  0xc9   : > { %11758 = vmatmul.mubr.msk.f32.gmra.mrb[84].mxu0 %vm437_vm3, %v415_v24 }
  0xca   : > { %11760 = vmatprep.mubr.msk.f32.mxu0 %vm437_vm3, %v416_v25 }
  0xcd   : > { %11761 = vmatmul.mubr.msk.f32.gmra.mrb[86].mxu0 %vm437_vm3, %v417_v26 }
  0xce   : > { %11763 = vmatprep.mubr.msk.f32.mxu0 %vm437_vm3, %v418_v27 }
  0xd1   : > { %11764 = vmatmul.mubr.msk.f32.gmra.mrb[88].mxu0 %vm437_vm3, %v419_v28 }
  0xd2   : > { %11766 = vmatprep.mubr.msk.f32.mxu0 %vm437_vm3, %v420_v29 }
  0xd5   : > { %11767 = vmatmul.mubr.msk.f32.gmra.mrb[90].mxu0 %vm437_vm3, %v421_v30 }
  0xd6   : > { %11769 = vmatprep.mubr.msk.f32.mxu0 %vm437_vm3, %v422_v31 }
  0xd9   : > { %11770 = vmatmul.mubr.msk.f32.gmra.mrb[92].mxu0 %vm437_vm3, %v423_v32 }
  0xda   : > { %11772 = vmatprep.mubr.msk.f32.mxu0 %vm437_vm3, %v424_v33 }
  0xdd   : > { %11773 = vmatmul.mubr.msk.f32.gmra.mrb[94].mxu0 %vm437_vm3, %v425_v34 }
  0xde   : > { %11775 = vmatprep.mubr.msk.f32.mxu0 %vm437_vm3, %v426_v35 }
  0xe1   : > { %11776 = vmatmul.mubr.msk.f32.gmra.mrb[96].mxu0 %vm437_vm3, %v427_v36 }
  0xf4   : > { %v11633_v37 = vpop.f32.mrb[0].mxu0 }
  0xf5   : > { %v802_v38 = vpop.f32.mrb[1].mxu0  ;;  %v808_v0 = vadd.f32 %v11633_v37, %v12576_v58 }
  0xf6   : > { %v803_v61 = vadd.f32 %v12576_v58, %v802_v38 }
  0xf7   : > { %v1292_v6 = vmax.f32 %v808_v0, 0.0 }
  0xf8   : > { %v12475_v39 = vpop.f32.mrb[2].mxu0  ;;  %v1291_v1 = vmax.f32 %v803_v61, 0.0 }
  0xf9   : > { %v812_v40 = vpop.f32.mrb[3].mxu0  ;;  %v818_v12 = vadd.f32 %v12475_v39, %v12576_v58  ;;  %v1488_v19 = vcombine.high %v1292_v6, %v1292_v6 }
  0xfa   : > { %v813_v2 = vadd.f32 %v12576_v58, %v812_v40  ;;  %v1487_v8 = vcombine.high %v1291_v1, %v1291_v1 }
  0xfb   : > { %v1294_v27 = vmax.f32 %v818_v12, 0.0 }
  0xfc   : > { %v12477_v41 = vpop.f32.mrb[4].mxu0  ;;  %v1293_v9 = vmax.f32 %v813_v2, 0.0 }
  0xfd   : > { %v12479_v42 = vpop.f32.mrb[5].mxu0  ;;  %v828_v28 = vadd.f32 %v12477_v41, %v12576_v58 }
  0xfe   : > { %v823_v10 = vadd.f32 %v12576_v58, %v12479_v42  ;;  %v1489_v23 = vcombine.high %v1293_v9, %v1293_v9 }
  0xff   : > { %v1296_v0 = vmax.f32 %v828_v28, 0.0 }
 0x100   : > { %v12481_v43 = vpop.f32.mrb[6].mxu0  ;;  %v1295_v24 = vmax.f32 %v823_v10, 0.0 }
 0x101   : > { %v12483_v44 = vpop.f32.mrb[7].mxu0  ;;  %v838_v32 = vadd.f32 %v12481_v43, %v12576_v58  ;;  %v1490_v43 = vcombine.high %v1294_v27, %v1294_v27 }
 0x102   : > { %v833_v20 = vadd.f32 %v12576_v58, %v12483_v44  ;;  %v1491_v41 = vcombine.high %v1295_v24, %v1295_v24 }
 0x104   : > { %v12485_v45 = vpop.f32.mrb[8].mxu0  ;;  %v1297_v37 = vmax.f32 %v833_v20, 0.0 }
 0x105   : > { %v12487_v46 = vpop.f32.mrb[9].mxu0 }
 0x106   : > { %v843_v42 = vadd.f32 %v12576_v58, %v12487_v46  ;;  %v1493_v10 = vcombine.high %v1297_v37, %v1297_v37 }
 0x108   : > { %v12489_v47 = vpop.f32.mrb[10].mxu0 }
 0x109   : > { %v12491_v48 = vpop.f32.mrb[11].mxu0 }
 0x10c   : > { %v12493_v49 = vpop.f32.mrb[12].mxu0 }
 0x10d   : > { %v12495_v50 = vpop.f32.mrb[13].mxu0 }
 0x110   : > { %v12497_v51 = vpop.f32.mrb[14].mxu0 }
 0x111   : > { %v12499_v52 = vpop.f32.mrb[15].mxu0 }
 0x114   : > { %v12565_v54 = vpop.f32.mrb[16].mxu0 }
 0x115   : > { %v12567_v55 = vpop.f32.mrb[17].mxu0 }
 0x118   : > { %v12569_v56 = vpop.f32.mrb[18].mxu0 }
 0x119   : > { %v12571_v57 = vpop.f32.mrb[19].mxu0 }
 0x11c   : > { %v12578_v59 = vpop.f32.mrb[20].mxu0 }
 0x11d   : > { %v12580_v60 = vpop.f32.mrb[21].mxu0 }
 0x120   : > { %v12583_v62 = vpop.f32.mrb[22].mxu0 }
 0x121   : > { %v12585_v63 = vpop.f32.mrb[23].mxu0 }
 0x124   : > { %v11669_v3 = vpop.f32.mrb[24].mxu0 }
 0x125   : > { %v928_v4 = vadd.f32 %v11669_v3, %v12576_v58  ;;  %v922_v5 = vpop.f32.mrb[25].mxu0 }
 0x126   : > { %v923_v7 = vadd.f32 %v12576_v58, %v922_v5 }
 0x127   : > { %v1316_v11 = vmax.f32 %v928_v4, 0.0  ;;  %v1298_v4 = vmax.f32 %v838_v32, 0.0 }
 0x128   : > { %v12595_v13 = vmax.f32 %v923_v7, 0.0  ;;  %v11672_v14 = vpop.f32.mrb[26].mxu0 }
 0x129   : > { %v1512_v15 = vcombine.high %v1316_v11, %v1316_v11  ;;  %v12597_v16 = vmax.f32 %v1487_v8, %v1316_v11  ;;  %v938_v17 = vadd.f32 %v11672_v14, %v12576_v58  ;;  %v932_v18 = vpop.f32.mrb[27].mxu0  ;;  %v1299_v14 = vmax.f32 %v843_v42, 0.0 }
 0x12a   : > { %v1511_v21 = vcombine.high %v12595_v13, %v12595_v13  ;;  %v933_v22 = vadd.f32 %v12576_v58, %v932_v18  ;;  %v1492_v18 = vcombine.high %v1296_v0, %v1296_v0 }
 0x12b   : > { %v12605_v25 = vmax.f32 %v1292_v6, %v1512_v15  ;;  %v1318_v26 = vmax.f32 %v938_v17, 0.0 }
 0x12c   : > { %v12609_v29 = vmax.f32 %v1291_v1, %v1511_v21  ;;  %v1317_v30 = vmax.f32 %v933_v22, 0.0  ;;  %v11675_v31 = vpop.f32.mrb[28].mxu0 }
 0x12d   : > { %v1514_v33 = vcombine.high %v1318_v26, %v1318_v26  ;;  %v12613_v34 = vmax.f32 %v1489_v23, %v1318_v26  ;;  %v948_v35 = vadd.f32 %v11675_v31, %v12576_v58  ;;  %v942_v36 = vpop.f32.mrb[29].mxu0  ;;  %v1494_v23 = vcombine.high %v1298_v4, %v1298_v4 }
 0x12e   : > { %v1513_v38 = vcombine.high %v1317_v30, %v1317_v30  ;;  %v12616_v39 = vmax.f32 %v1488_v19, %v1317_v30  ;;  %v943_v40 = vadd.f32 %v12576_v58, %v942_v36  ;;  %v848_v19 = vadd.f32 %v12485_v45, %v12576_v58 }
 0x12f   : > { %v12621_v44 = vmax.f32 %v1294_v27, %v1514_v33  ;;  %v1320_v61 = vmax.f32 %v948_v35, 0.0  ;;  %v1495_v45 = vcombine.high %v1299_v14, %v1299_v14 }
 0x130   : > { %v12623_v1 = vmax.f32 %v1293_v9, %v1513_v38  ;;  %v1319_v2 = vmax.f32 %v943_v40, 0.0  ;;  %v11678_v3 = vpop.f32.mrb[30].mxu0  ;;  %v853_v9 = vadd.f32 %v12576_v58, %v12491_v48  ;;  %v863_v48 = vadd.f32 %v12576_v58, %v12495_v50 }
 0x131   : > { %v1516_v5 = vcombine.high %v1320_v61, %v1320_v61  ;;  %v12625_v6 = vmax.f32 %v1491_v41, %v1320_v61  ;;  %v958_v7 = vadd.f32 %v11678_v3, %v12576_v58  ;;  %v952_v8 = vpop.f32.mrb[31].mxu0  ;;  %v1300_v38 = vmax.f32 %v848_v19, 0.0 }
 0x132   : > { %v1515_v11 = vcombine.high %v1319_v2, %v1319_v2  ;;  %v12628_v12 = vmax.f32 %v1490_v43, %v1319_v2  ;;  %v953_v46 = vadd.f32 %v12576_v58, %v952_v8  ;;  %v858_v40 = vadd.f32 %v12489_v47, %v12576_v58 }
 0x133   : > { %v12633_v15 = vmax.f32 %v1296_v0, %v1516_v5  ;;  %v1322_v17 = vmax.f32 %v958_v7, 0.0  ;;  %v868_v50 = vadd.f32 %v12493_v49, %v12576_v58  ;;  %v1496_v49 = vcombine.high %v1300_v38, %v1300_v38 }
 0x134   : > { %v12637_v20 = vmax.f32 %v1295_v24, %v1515_v11  ;;  %v1321_v21 = vmax.f32 %v953_v46, 0.0  ;;  %v11681_v22 = vpop.f32.mrb[32].mxu0  ;;  %v1301_v24 = vmax.f32 %v853_v9, 0.0  ;;  %v1302_v46 = vmax.f32 %v858_v40, 0.0 }
 0x135   : > { %v1518_v26 = vcombine.high %v1322_v17, %v1322_v17  ;;  %v12639_v27 = vmax.f32 %v1493_v10, %v1322_v17  ;;  %v968_v28 = vadd.f32 %v11681_v22, %v12576_v58  ;;  %v962_v30 = vpop.f32.mrb[33].mxu0  ;;  %v1304_v19 = vmax.f32 %v868_v50, 0.0 }
 0x136   : > { %v1517_v31 = vcombine.high %v1321_v21, %v1321_v21  ;;  %v12644_v32 = vmax.f32 %v1492_v18, %v1321_v21  ;;  %v963_v33 = vadd.f32 %v12576_v58, %v962_v30  ;;  %v1497_v47 = vcombine.high %v1301_v24, %v1301_v24 }
 0x137   : > { %v12647_v35 = vmax.f32 %v1298_v4, %v1518_v26  ;;  %v1324_v36 = vmax.f32 %v968_v28, 0.0  ;;  %v1303_v4 = vmax.f32 %v863_v48, 0.0  ;;  %v1500_v50 = vcombine.high %v1304_v19, %v1304_v19 }
 0x138   : > { %v12651_v41 = vmax.f32 %v1297_v37, %v1517_v31  ;;  %v1323_v42 = vmax.f32 %v963_v33, 0.0  ;;  %v11684_v61 = vpop.f32.mrb[34].mxu0  ;;  %v873_v37 = vadd.f32 %v12576_v58, %v12499_v52 }
 0x139   : > { %v1520_v43 = vcombine.high %v1324_v36, %v1324_v36  ;;  %v12655_v0 = vmax.f32 %v1495_v45, %v1324_v36  ;;  %v978_v2 = vadd.f32 %v11684_v61, %v12576_v58  ;;  %v972_v3 = vpop.f32.mrb[35].mxu0  ;;  %v1499_v28 = vcombine.high %v1303_v4, %v1303_v4 }
 0x13a   : > { %v1519_v5 = vcombine.high %v1323_v42, %v1323_v42  ;;  %v12658_v7 = vmax.f32 %v1494_v23, %v1323_v42  ;;  %v973_v8 = vadd.f32 %v12576_v58, %v972_v3  ;;  %v1305_v31 = vmax.f32 %v873_v37, 0.0 }
 0x13b   : > { %v12663_v10 = vmax.f32 %v1300_v38, %v1520_v43  ;;  %v1326_v11 = vmax.f32 %v978_v2, 0.0  ;;  %v1498_v36 = vcombine.high %v1302_v46, %v1302_v46  ;;  %v878_v38 = vadd.f32 %v12497_v51, %v12576_v58 }
 0x13c   : > { %v12665_v9 = vmax.f32 %v1299_v14, %v1519_v5  ;;  %v1325_v17 = vmax.f32 %v973_v8, 0.0  ;;  %v11687_v18 = vpop.f32.mrb[36].mxu0  ;;  %v883_v14 = vadd.f32 %v12576_v58, %v12567_v55  ;;  %v893_v55 = vadd.f32 %v12576_v58, %v12571_v57 }
 0x13d   : > { %v1522_v21 = vcombine.high %v1326_v11, %v1326_v11  ;;  %v12667_v22 = vmax.f32 %v1497_v47, %v1326_v11  ;;  %v988_v23 = vadd.f32 %v11687_v18, %v12576_v58  ;;  %v982_v26 = vpop.f32.mrb[37].mxu0  ;;  %v1501_v51 = vcombine.high %v1305_v31, %v1305_v31 }
 0x13e   : > { %v1521_v30 = vcombine.high %v1325_v17, %v1325_v17  ;;  %v12670_v48 = vmax.f32 %v1496_v49, %v1325_v17  ;;  %v983_v52 = vadd.f32 %v12576_v58, %v982_v26  ;;  %v888_v17 = vadd.f32 %v12565_v54, %v12576_v58 }
 0x13f   : > { %17030 = vst [vmem:[#allocation8_spill] sm:$0xff] %v12667_v22  ;;  %v12675_v33 = vmax.f32 %v1302_v46, %v1522_v21  ;;  %v1328_v45 = vmax.f32 %v988_v23, 0.0  ;;  %v1306_v46 = vmax.f32 %v878_v38, 0.0  ;;  %v898_v57 = vadd.f32 %v12569_v56, %v12576_v58 }
 0x140   : > { %v12679_v40 = vmax.f32 %v1301_v24, %v1521_v30  ;;  %v1327_v42 = vmax.f32 %v983_v52, 0.0  ;;  %v11690_v61 = vpop.f32.mrb[38].mxu0  ;;  %v1307_v24 = vmax.f32 %v883_v14, 0.0 }
 0x141   : > { %17031 = vst [vmem:[#allocation9_spill] sm:$0xff] %v12675_v33  ;;  %v1524_v43 = vcombine.high %v1328_v45, %v1328_v45  ;;  %v12681_v2 = vmax.f32 %v1499_v28, %v1328_v45  ;;  %v998_v3 = vadd.f32 %v11690_v61, %v12576_v58  ;;  %v992_v5 = vpop.f32.mrb[39].mxu0  ;;  %v1502_v56 = vcombine.high %v1306_v46, %v1306_v46 }
 0x142   : > { %v1523_v8 = vcombine.high %v1327_v42, %v1327_v42  ;;  %v12686_v47 = vmax.f32 %v1498_v36, %v1327_v42  ;;  %v993_v37 = vadd.f32 %v12576_v58, %v992_v5  ;;  %v1503_v54 = vcombine.high %v1307_v24, %v1307_v24 }
 0x143   : > { %17032 = vst [vmem:[#allocation10_spill] sm:$0xff] %v12681_v2  ;;  %v12689_v11 = vmax.f32 %v1304_v19, %v1524_v43  ;;  %v1330_v49 = vmax.f32 %v998_v3, 0.0  ;;  %v1309_v19 = vmax.f32 %v893_v55, 0.0  ;;  %v1308_v61 = vmax.f32 %v888_v17, 0.0 }
 0x144   : > { %v12693_v18 = vmax.f32 %v1303_v4, %v1523_v8  ;;  %v1329_v21 = vmax.f32 %v993_v37, 0.0  ;;  %v11693_v23 = vpop.f32.mrb[40].mxu0  ;;  %v903_v4 = vadd.f32 %v12576_v58, %v12580_v60  ;;  %v1310_v8 = vmax.f32 %v898_v57, 0.0 }
 0x145   : > { %17033 = vst [vmem:[#allocation11_spill] sm:$0xff] %v12689_v11  ;;  %v1526_v26 = vcombine.high %v1330_v49, %v1330_v49  ;;  %v12697_v28 = vmax.f32 %v1501_v51, %v1330_v49  ;;  %v1008_v30 = vadd.f32 %v11693_v23, %v12576_v58  ;;  %v1002_v52 = vpop.f32.mrb[41].mxu0  ;;  %v4547_v49 = vld [vmem:[#allocation2 + $0x121] sm:$0x7f] }
 0x146   : > { %17034 = vst [vmem:[#allocation12_spill] sm:$0xff] %v12693_v18  ;;  %v1525_v14 = vcombine.high %v1329_v21, %v1329_v21  ;;  %v12700_v45 = vmax.f32 %v1500_v50, %v1329_v21  ;;  %v1003_v36 = vadd.f32 %v12576_v58, %v1002_v52  ;;  %v1505_v21 = vcombine.high %v1309_v19, %v1309_v19 }
 0x147   : > { %17035 = vst [vmem:[#allocation13_spill] sm:$0xff] %v12697_v28  ;;  %v12705_v38 = vmax.f32 %v1306_v46, %v1526_v26  ;;  %v1332_v42 = vmax.f32 %v1008_v30, 0.0  ;;  %4561 = vrot.lane.b32.xlu0 %v4547_v49, %s16929_s17  ;;  %v913_v46 = vadd.f32 %v12576_v58, %v12585_v63  ;;  %v1504_v30 = vcombine.high %v1308_v61, %v1308_v61 }
 0x148   : > { %17036 = vst [vmem:[#allocation14_spill] sm:$0xff] %v12700_v45  ;;  %v12707_v43 = vmax.f32 %v1305_v31, %v1525_v14  ;;  %v1331_v3 = vmax.f32 %v1003_v36, 0.0  ;;  %v11696_v5 = vpop.f32.mrb[42].mxu0  ;;  %v1311_v31 = vmax.f32 %v903_v4, 0.0  ;;  %v908_v52 = vadd.f32 %v12578_v59, %v12576_v58 }
 0x149   : > { %17037 = vst [vmem:[#allocation15_spill] sm:$0xff] %v12705_v38  ;;  %v1528_v55 = vcombine.high %v1332_v42, %v1332_v42  ;;  %v12709_v37 = vmax.f32 %v1503_v54, %v1332_v42  ;;  %v1018_v50 = vadd.f32 %v11696_v5, %v12576_v58  ;;  %v1012_v51 = vpop.f32.mrb[43].mxu0  ;;  %v1506_v5 = vcombine.high %v1310_v8, %v1310_v8 }
 0x14a   : > { %17038 = vst [vmem:[#allocation16_spill] sm:$0xff] %v12707_v43  ;;  %v1527_v23 = vcombine.high %v1331_v3, %v1331_v3  ;;  %v12712_v60 = vmax.f32 %v1502_v56, %v1331_v3  ;;  %v1013_v26 = vadd.f32 %v12576_v58, %v1012_v51 }
 0x14b   : > { %17039 = vst [vmem:[#allocation17_spill] sm:$0xff] %v12709_v37  ;;  %v12718_v17 = vmax.f32 %v1308_v61, %v1528_v55  ;;  %v1334_v57 = vmax.f32 %v1018_v50, 0.0  ;;  %v1507_v61 = vcombine.high %v1311_v31, %v1311_v31  ;;  %v1313_v50 = vmax.f32 %v913_v46, 0.0 }
 0x14c   : > { %17040 = vst [vmem:[#allocation18_spill] sm:$0xff] %v12712_v60  ;;  %v12722_v14 = vmax.f32 %v1307_v24, %v1527_v23  ;;  %v1333_v36 = vmax.f32 %v1013_v26, 0.0  ;;  %v11699_v54 = vpop.f32.mrb[44].mxu0  ;;  %v1312_v24 = vmax.f32 %v908_v52, 0.0  ;;  %v918_v23 = vadd.f32 %v12583_v62, %v12576_v58 }
 0x14d   : > { %17041 = vst [vmem:[#allocation19_spill] sm:$0xff] %v12718_v17  ;;  %v1530_v42 = vcombine.high %v1334_v57, %v1334_v57  ;;  %v12724_v56 = vmax.f32 %v1505_v21, %v1334_v57  ;;  %v1028_v3 = vadd.f32 %v11699_v54, %v12576_v58  ;;  %v1022_v4 = vpop.f32.mrb[45].mxu0  ;;  %v1509_v46 = vcombine.high %v1313_v50, %v1313_v50 }
 0x14e   : > { %17042 = vst [vmem:[#allocation20_spill] sm:$0xff] %v12722_v14  ;;  %v1529_v51 = vcombine.high %v1333_v36, %v1333_v36  ;;  %v12727_v63 = vmax.f32 %v1504_v30, %v1333_v36  ;;  %v1023_v55 = vadd.f32 %v12576_v58, %v1022_v4  ;;  %v1508_v62 = vcombine.high %v1312_v24, %v1312_v24 }
 0x14f   : > { %17043 = vst [vmem:[#allocation21_spill] sm:$0xff] %v12724_v56  ;;  %v12730_v49 = vmax.f32 %v1310_v8, %v1530_v42  ;;  %v1336_v59 = vmax.f32 %v1028_v3, 0.0 }
 0x150   : > { %17044 = vst [vmem:[#allocation22_spill] sm:$0xff] %v12727_v63  ;;  %v12734_v21 = vmax.f32 %v1309_v19, %v1529_v51  ;;  %v1335_v26 = vmax.f32 %v1023_v55, 0.0  ;;  %v11702_v57 = vpop.f32.mrb[46].mxu0  ;;  %v1314_v19 = vmax.f32 %v918_v23, 0.0  ;;  %v17058_v63 = vlaneseq }
 0x151   : > { %17045 = vst [vmem:[#allocation23_spill] sm:$0xff] %v12730_v49  ;;  %v1532_v54 = vcombine.high %v1336_v59, %v1336_v59  ;;  %v12736_v53 = vmax.f32 %v1507_v61, %v1336_v59  ;;  %v1038_v30 = vadd.f32 %v11702_v57, %v12576_v58  ;;  %v1032_v36 = vpop.f32.mrb[47].mxu0 }
 0x152   : > { %17046 = vst [vmem:[#allocation24_spill] sm:$0xff] %v12734_v21  ;;  %v1531_v4 = vcombine.high %v1335_v26, %v1335_v26  ;;  %v12739_v56 = vmax.f32 %v1506_v5, %v1335_v26  ;;  %v1033_v8 = vadd.f32 %v12576_v58, %v1032_v36  ;;  %v5520_v21 = vld [vmem:[#allocation2 + $0x81] sm:$0x7f] }
 0x153   : > { %17047 = vst [vmem:[#allocation25_spill] sm:$0xff] %v12736_v53  ;;  %v12742_v52 = vmax.f32 %v1312_v24, %v1532_v54  ;;  %v1338_v42 = vmax.f32 %v1038_v30, 0.0  ;;  %v1510_v54 = vcombine.high %v1314_v19, %v1314_v19 }
 0x154   : > { %17048 = vst [vmem:[#allocation26_spill] sm:$0xff] %v12739_v56  ;;  %v12744_v3 = vmax.f32 %v1311_v31, %v1531_v4  ;;  %v1337_v51 = vmax.f32 %v1033_v8, 0.0  ;;  %v11705_v55 = vpop.f32.mrb[48].mxu0  ;;  %v5562_v56 = vld [vmem:[#allocation2 + $0x111] sm:$0x7f] }
 0x155   : > { %17049 = vst [vmem:[#allocation27_spill] sm:$0xff] %v12742_v52  ;;  %v1534_v61 = vcombine.high %v1338_v42, %v1338_v42  ;;  %v12746_v59 = vmax.f32 %v1509_v46, %v1338_v42  ;;  %v1042_v57 = vpop.f32.mrb[49].mxu0  ;;  %v4909_v42 = vld [vmem:[#allocation2 + $0x1b1] sm:$0x7f] }
 0x156   : > { %17050 = vst [vmem:[#allocation28_spill] sm:$0xff] %v12744_v3  ;;  %v1533_v53 = vcombine.high %v1337_v51, %v1337_v51  ;;  %v12748_v49 = vmax.f32 %v1508_v62, %v1337_v51  ;;  %v1043_v5 = vadd.f32 %v12576_v58, %v1042_v57  ;;  %v4590_v62 = vld [vmem:[#allocation2 + $0x1b1] sm:$0x7f]  ;;  %4923 = vrot.lane.b32.xlu1 %v4909_v42, %s16929_s17 }
 0x157   : > { %17051 = vst [vmem:[#allocation29_spill] sm:$0xff] %v12746_v59  ;;  %v12751_v26 = vmax.f32 %v1314_v19, %v1534_v61  ;;  %4604 = vrot.lane.b32.xlu0 %v4590_v62, %s16927_s21  ;;  %v17057_v19 = vmov 0.0  }
 0x158   : > { %17052 = vst [vmem:[#allocation30_spill] sm:$0xff] %v12748_v49  ;;  %v12753_v36 = vmax.f32 %v1313_v50, %v1533_v53  ;;  %v1339_v24 = vmax.f32 %v1043_v5, 0.0  ;;  %v11708_v23 = vpop.f32.mrb[50].mxu0  ;;  %1869 = vst.msk [vmem:[#allocation2 + $0x128] sm:$0x1] %vm1832_vm5, %v17057_v19 }
 0x159   : > { %17053 = vst [vmem:[#allocation31_spill] sm:$0xff] %v12751_v26  ;;  %v1052_v31 = vpop.f32.mrb[51].mxu0  ;;  %1835 = vst.msk [vmem:[#allocation2 + $0x18] sm:$0x1] %vm1832_vm5, %v17057_v19  ;;  %v1058_v49 = vadd.f32 %v11708_v23, %v12576_v58  ;;  %v12805_v23 = vshrl.u32 %v17058_v63, 7 }
 0x15a   : > { %17054 = vst [vmem:[#allocation32_spill] sm:$0xff] %v12753_v36  ;;  %v1535_v30 = vcombine.high %v1339_v24, %v1339_v24  ;;  %v12755_v4 = vmax.f32 %v1510_v54, %v1339_v24  ;;  %1837 = vst.msk [vmem:[#allocation2 + $0x28] sm:$0x1] %vm1832_vm5, %v17057_v19  ;;  %v5477_v24 = vld [vmem:[#allocation2 + $0x110] sm:$0x7f]  ;;  %v1048_v36 = vadd.f32 %v11705_v55, %v12576_v58 }
 0x15b   : > { %1839 = vst.msk [vmem:[#allocation2 + $0x38] sm:$0x1] %vm1832_vm5, %v17057_v19  ;;  %1841 = vst.msk [vmem:[#allocation2 + $0x48] sm:$0x1] %vm1832_vm5, %v17057_v19  ;;  %5497 = vrot.lane.b32.xlu0 %v5477_v24, %s16931_s22  ;;  %v1053_v3 = vadd.f32 %v12576_v58, %v1052_v31 }
 0x15c   : > { %17055 = vst [vmem:[#allocation33_spill] sm:$0xff] %v12755_v4  ;;  %v12758_v8 = vmax.f32 %v12595_v13, %v1535_v30  ;;  %v11711_v46 = vpop.f32.mrb[52].mxu0  ;;  %1843 = vst.msk [vmem:[#allocation2 + $0x58] sm:$0x1] %vm1832_vm5, %v17057_v19  ;;  %v12156_v4 = vmov 1966171168  }
 0x15d   : > { %v1062_v51 = vpop.f32.mrb[53].mxu0  ;;  %1845 = vst.msk [vmem:[#allocation2 + $0x68] sm:$0x1] %vm1832_vm5, %v17057_v19  ;;  %1847 = vst.msk [vmem:[#allocation2 + $0x78] sm:$0x1] %vm1832_vm5, %v17057_v19  ;;  %v1954_v52 = vunpack.c.l.s4 %v12156_v4  ;;  %v12808_v31 = vmax.f32 %v1048_v36, 0.0 }
 0x15e   : > { %17056 = vst [vmem:[#allocation34_spill] sm:$0xff] %v12758_v8  ;;  %1849 = vst.msk [vmem:[#allocation2 + $0x88] sm:$0x1] %vm1832_vm5, %v17057_v19  ;;  %v1063_v24 = vadd.f32 %v12576_v58, %v1062_v51 }
 0x15f   : > { %1871 = vst.msk [vmem:[#allocation2 + $0x138] sm:$0x1] %vm1832_vm5, %v17057_v19  ;;  %1873 = vst.msk [vmem:[#allocation2 + $0x148] sm:$0x1] %vm1832_vm5, %v17057_v19  ;;  %v4951_v54 = vld [vmem:[#allocation2 + $0x122] sm:$0x7f]  ;;  %v1955_v55 = vunpack.c.0.s8 %v1954_v52  ;;  %5540 = vrot.lane.b32.xlu0 %v5520_v21, %s12158_s24 }
 0x160   : > { %v11714_v53 = vpop.f32.mrb[54].mxu0  ;;  %1875 = vst.msk [vmem:[#allocation2 + $0x158] sm:$0x1] %vm1832_vm5, %v17057_v19  ;;  %1877 = vst.msk [vmem:[#allocation2 + $0x168] sm:$0x1] %vm1832_vm5, %v17057_v19  ;;  %4965 = vrot.lane.b32.xlu1 %v4951_v54, %s16927_s21  ;;  %v1068_v54 = vadd.f32 %v11711_v46, %v12576_v58  ;;  %v12810_v46 = vmax.f32 %v1058_v49, 0.0 }
 0x161   : > { %v1072_v50 = vpop.f32.mrb[55].mxu0  ;;  %1879 = vst.msk [vmem:[#allocation2 + $0x178] sm:$0x1] %vm1832_vm5, %v17057_v19  ;;  %1881 = vst.msk [vmem:[#allocation2 + $0x188] sm:$0x1] %vm1832_vm5, %v17057_v19  ;;  %v1078_v17 = vadd.f32 %v11714_v53, %v12576_v58  ;;  %v12813_v53 = vmax.f32 %v1053_v3, 0.0  ;;  %v12826_v49 = vsub.s32 %v1955_v55, %v12805_v23 }
 0x162   : > { %1883 = vst.msk [vmem:[#allocation2 + $0x198] sm:$0x1] %vm1832_vm5, %v17057_v19  ;;  %v1073_v4 = vadd.f32 %v12576_v58, %v1072_v50  ;;  %17059 = vst [vmem:[#allocation35_spill] sm:$0xff] %v12805_v23  ;;  %v12818_v38 = vmax.f32 %v1063_v24, 0.0 }
 0x163   : > { %v12820_v52 = vmax.f32 %v1078_v17, 0.0 }
 0x164   : > { %v11717_v13 = vpop.f32.mrb[56].mxu0  ;;  %5582 = vrot.lane.b32.xlu1 %v5562_v56, %s16925_s23  ;;  %v12815_v56 = vmax.f32 %v1068_v54, 0.0  ;;  %v12822_v28 = vmax.f32 %v1073_v4, 0.0 }
 0x165   : > { %v1082_v61 = vpop.f32.mrb[57].mxu0  ;;  %v1088_v51 = vadd.f32 %v11717_v13, %v12576_v58 }
 0x166   : > { %v1083_v50 = vadd.f32 %v12576_v58, %v1082_v61 }
 0x167   : > { %v12832_v61 = vmax.f32 %v1088_v51, 0.0 }
 0x168   : > { %v11720_v57 = vpop.f32.mrb[58].mxu0  ;;  %v12839_v24 = vmax.f32 %v1083_v50, 0.0 }
 0x169   : > { %v1092_v5 = vpop.f32.mrb[59].mxu0  ;;  %v1098_v21 = vadd.f32 %v11720_v57, %v12576_v58 }
 0x16a   : > { %v1093_v17 = vadd.f32 %v12576_v58, %v1092_v5 }
 0x16b   : > { %v12850_v23 = vmax.f32 %v1098_v21, 0.0 }
 0x16c   : > { %v11723_v30 = vpop.f32.mrb[60].mxu0  ;;  %v12856_v14 = vmax.f32 %v1093_v17, 0.0 }
 0x16d   : > { %v1102_v42 = vpop.f32.mrb[61].mxu0  ;;  %v1108_v4 = vadd.f32 %v11723_v30, %v12576_v58 }
 0x16e   : > { %v1103_v51 = vadd.f32 %v12576_v58, %v1102_v42 }
 0x16f   : > { %v12862_v54 = vmax.f32 %v1108_v4, 0.0 }
 0x170   : > { %v11726_v62 = vpop.f32.mrb[62].mxu0 }
 0x171   : > { %v1112_v26 = vpop.f32.mrb[63].mxu0  ;;  %v1118_v5 = vadd.f32 %v11726_v62, %v12576_v58 }
 0x172   : > { %v1113_v50 = vadd.f32 %v12576_v58, %v1112_v26 }
 0x173   : > { %v12868_v60 = vmax.f32 %v1118_v5, 0.0 }
 0x174   : > { %v11729_v59 = vpop.f32.mrb[64].mxu0  ;;  %v12874_v11 = vmax.f32 %v1113_v50, 0.0 }
 0x175   : > { %v1122_v8 = vpop.f32.mrb[65].mxu0  ;;  %v1128_v30 = vadd.f32 %v11729_v59, %v12576_v58  ;;  %v12866_v59 = vmax.f32 %v1103_v51, 0.0  ;;  %17060 = vst [vmem:[#allocation36_spill] sm:$0xff] %v12868_v60 }
 0x176   : > { %v1123_v42 = vadd.f32 %v12576_v58, %v1122_v8  ;;  %17061 = vst [vmem:[#allocation37_spill] sm:$0xff] %v12874_v11 }
 0x177   : > { %v12876_v4 = vmax.f32 %v1128_v30, 0.0 }
 0x178   : > { %v11732_v37 = vpop.f32.mrb[66].mxu0  ;;  %v12881_v51 = vmax.f32 %v1123_v42, 0.0  ;;  %v17072_v42 = vcombine.high %v12808_v31, %v12808_v31 }
 0x179   : > { %v1132_v19 = vpop.f32.mrb[67].mxu0  ;;  %v1138_v62 = vadd.f32 %v11732_v37, %v12576_v58  ;;  %17062 = vst [vmem:[#allocation38_spill] sm:$0xff] %v12876_v4 }
 0x17a   : > { %v1133_v21 = vadd.f32 %v12576_v58, %v1132_v19  ;;  %17063 = vst [vmem:[#allocation39_spill] sm:$0xff] %v12881_v51 }
 0x17b   : > { %v12883_v5 = vmax.f32 %v1138_v62, 0.0 }
 0x17c   : > { %v11735_v63 = vpop.f32.mrb[68].mxu0  ;;  %v12888_v37 = vmax.f32 %v1133_v21, 0.0 }
 0x17d   : > { %v1142_v36 = vpop.f32.mrb[69].mxu0  ;;  %v1148_v26 = vadd.f32 %v11735_v63, %v12576_v58  ;;  %17064 = vst [vmem:[#allocation40_spill] sm:$0xff] %v12883_v5 }
 0x17e   : > { %v1143_v17 = vadd.f32 %v12576_v58, %v1142_v36  ;;  %17065 = vst [vmem:[#allocation41_spill] sm:$0xff] %v12888_v37 }
 0x17f   : > { %v12890_v50 = vmax.f32 %v1148_v26, 0.0 }
 0x180   : > { %v11738_v3 = vpop.f32.mrb[70].mxu0  ;;  %v12898_v63 = vmax.f32 %v1143_v17, 0.0 }
 0x181   : > { %v1152_v57 = vpop.f32.mrb[71].mxu0  ;;  %v1158_v55 = vadd.f32 %v11738_v3, %v12576_v58  ;;  %17066 = vst [vmem:[#allocation42_spill] sm:$0xff] %v12890_v50  ;;  %v17071_v3 = vcombine.high %v12813_v53, %v12813_v53 }
 0x182   : > { %v1153_v36 = vadd.f32 %v12576_v58, %v1152_v57  ;;  %17068 = vst [vmem:[#allocation44_spill] sm:$0xff] %v12898_v63 }
 0x183   : > { %v12900_v62 = vmax.f32 %v1158_v55, 0.0 }
 0x184   : > { %v11741_v8 = vpop.f32.mrb[72].mxu0  ;;  %v12913_v17 = vmax.f32 %v1153_v36, 0.0 }
 0x185   : > { %v1168_v19 = vadd.f32 %v11741_v8, %v12576_v58  ;;  %v1162_v13 = vpop.f32.mrb[73].mxu0  ;;  %17069 = vst [vmem:[#allocation45_spill] sm:$0xff] %v12900_v62 }
 0x186   : > { %17070 = vst [vmem:[#allocation46_spill] sm:$0xff] %v12913_v17  ;;  %v1163_v36 = vadd.f32 %v12576_v58, %v1162_v13 }
 0x187   : > { %v12892_v30 = vmax.f32 %v1168_v19, 0.0 }
 0x188   : > { %v11744_v57 = vpop.f32.mrb[74].mxu0 }
 0x189   : > { %17067 = vst [vmem:[#allocation43_spill] sm:$0xff] %v12892_v30  ;;  %v1560_v26 = vcombine.high %v12892_v30, %v12892_v30  ;;  %v1178_v19 = vadd.f32 %v11744_v57, %v12576_v58  ;;  %v1172_v8 = vpop.f32.mrb[75].mxu0 }
 0x18a   : > { %v1173_v2 = vadd.f32 %v12576_v58, %v1172_v8 }
 0x18b   : > { %v1732_v30 = vmax.f32 %v12808_v31, %v1560_v26  ;;  %v1366_v57 = vmax.f32 %v1178_v19, 0.0 }
 0x18c   : > { %v1365_v55 = vmax.f32 %v1173_v2, 0.0  ;;  %v11747_v5 = vpop.f32.mrb[76].mxu0 }
 0x18d   : > { %v1781_v8 = vmax.f32 %v12609_v29, %v1732_v30  ;;  %v1562_v51 = vcombine.high %v1366_v57, %v1366_v57  ;;  %v1735_v21 = vmax.f32 %v17071_v3, %v1366_v57  ;;  %v1188_v26 = vadd.f32 %v11747_v5, %v12576_v58  ;;  %v1182_v19 = vpop.f32.mrb[77].mxu0 }
 0x18e   : > { %v1561_v50 = vcombine.high %v1365_v55, %v1365_v55  ;;  %v1733_v13 = vmax.f32 %v17072_v42, %v1365_v55  ;;  %v1183_v2 = vadd.f32 %v12576_v58, %v1182_v19  ;;  %v12940_v57 = vmax.f32 %v1163_v36, 0.0 }
 0x18f   : > { %v1959_v29 = vrot.slane %v1781_v8, %v12826_v49  ;;  %v1736_v30 = vmax.f32 %v12810_v46, %v1562_v51  ;;  %v1784_v62 = vmax.f32 %v12616_v39, %v1735_v21  ;;  %v1368_v3 = vmax.f32 %v1188_v26, 0.0 }
 0x190   : > { %17073 = vst [vmem:[#allocation47_spill] sm:$0xff] %v12940_v57  ;;  %v1734_v5 = vmax.f32 %v12813_v53, %v1561_v50  ;;  %v1782_v4 = vmax.f32 %v12597_v16, %v1733_v13  ;;  %v12944_v17 = vmax.f32 %v1183_v2, 0.0  ;;  %v12946_v63 = vpop.f32.mrb[78].mxu0  ;;  %v17074_v16 = vcombine.high %v12818_v38, %v12818_v38 }
 0x191   : > { %v1960_v31 = vcombine.high %v1959_v29, %v1959_v29  ;;  %v1967_v58 = vrot.slane %v1959_v29, %v12826_v49  ;;  %v1785_v42 = vmax.f32 %v12623_v1, %v1736_v30  ;;  %v2031_v51 = vrot.slane %v1784_v62, %v12826_v49  ;;  %v12951_v55 = vpop.f32.mrb[79].mxu0 }
 0x192   : > { %v1783_v39 = vmax.f32 %v12605_v25, %v1734_v5  ;;  %v1983_v21 = vrot.slane %v1782_v4, %v12826_v49  ;;  %v1564_v53 = vcombine.high %v1368_v3, %v1368_v3  ;;  %v1739_v50 = vmax.f32 %v17074_v16, %v1368_v3 }
 0x193   : > { %v1974_v36 = vrot.slane %v1960_v31, %v12826_v49  ;;  %v2032_v8 = vcombine.high %v2031_v51, %v2031_v51  ;;  %v2039_v26 = vrot.slane %v2031_v51, %v12826_v49  ;;  %v2055_v1 = vrot.slane %v1785_v42, %v12826_v49 }
 0x194   : > { %v1984_v19 = vcombine.high %v1983_v21, %v1983_v21  ;;  %v1991_v62 = vrot.slane %v1983_v21, %v12826_v49  ;;  %v2007_v13 = vrot.slane %v1783_v39, %v12826_v49  ;;  %v1740_v25 = vmax.f32 %v12815_v56, %v1564_v53  ;;  %v12964_v4 = vpop.f32.mrb[80].mxu0 }
 0x195   : > { %v3129_v2 = vcombine.low %v1967_v58, %v1974_v36  ;;  %v11314_v29 = vcombine.high %v1967_v58, %v1974_v36  ;;  %v2046_v30 = vrot.slane %v2032_v8, %v12826_v49  ;;  %v2056_v3 = vcombine.high %v2055_v1, %v2055_v1  ;;  %v12967_v5 = vpop.f32.mrb[81].mxu0 }
 0x196   : > { %v12970_v31 = vrot.slane %v2055_v1, %v12826_v49  ;;  %v1998_v42 = vrot.slane %v1984_v19, %v12826_v49  ;;  %v1999_v51 = vcombine.high %v1991_v62, %v1991_v62  ;;  %v2008_v21 = vcombine.high %v2007_v13, %v2007_v13 }
 0x197   : > { %v3138_v39 = vrot.slane %v3129_v2, %v12826_v49  ;;  %v3145_v53 = vrot.slane %v11314_v29, %v12826_v49  ;;  %v2070_v16 = vrot.slane %v2056_v3, %v12826_v49  ;;  %v3207_v58 = vrot.slane %v2046_v30, %v12826_v49 }
 0x198   : > { %v11315_v36 = vcombine.high %v2039_v26, %v2046_v30  ;;  %v2000_v8 = vcombine.high %v1998_v42, %v1998_v42  ;;  %v2015_v57 = vrot.slane %v2007_v13, %v12826_v49  ;;  %v2022_v37 = vrot.slane %v2008_v21, %v12826_v49  ;;  %v12979_v1 = vpop.f32.mrb[82].mxu0 }
 0x199   : > { %v3160_v19 = vcombine.low %v3138_v39, %v3145_v53  ;;  %v3226_v43 = vcombine.low %v12970_v31, %v2070_v16  ;;  %v11316_v2 = vcombine.high %v12970_v31, %v2070_v16  ;;  %v3131_v45 = vcombine.low %v1991_v62, %v1998_v42  ;;  %v12983_v29 = vpop.f32.mrb[83].mxu0 }
 0x19a   : > { %v3234_v3 = vrot.slane %v11315_v36, %v12826_v49  ;;  %v2023_v60 = vcombine.high %v2015_v57, %v2015_v57  ;;  %v2024_v30 = vcombine.high %v2022_v37, %v2022_v37  ;;  %v3159_v11 = vrot.slane %v1999_v51, %v12826_v49 }
 0x19b   : > { %v3168_v13 = vrot.slane %v3160_v19, %v12826_v49  ;;  %v3241_v21 = vrot.slane %v3226_v43, %v12826_v49  ;;  %v3152_v33 = vrot.slane %v3131_v45, %v12826_v49  ;;  %v3177_v39 = vcombine.low %v2000_v8, %v2015_v57 }
 0x19c   : > { %v3178_v53 = vcombine.low %v2022_v37, %v2023_v60  ;;  %v3179_v22 = vcombine.low %v2024_v30, %v2039_v26  ;;  %v1788_v31 = vmax.f32 %v12628_v12, %v1739_v50  ;;  %v1789_v62 = vmax.f32 %v12637_v20, %v1740_v25  ;;  %v12992_v42 = vpop.f32.mrb[84].mxu0 }
 0x19d   : > { %v3256_v16 = vcombine.low %v3234_v3, %v3241_v21  ;;  %v3161_v36 = vcombine.low %v3152_v33, %v3159_v11  ;;  %v3186_v18 = vrot.slane %v3177_v39, %v12826_v49  ;;  %v1563_v51 = vcombine.high %v12944_v17, %v12944_v17  ;;  %v12997_v19 = vpop.f32.mrb[85].mxu0 }
 0x19e   : > { %v3193_v45 = vrot.slane %v3178_v53, %v12826_v49  ;;  %v3200_v43 = vrot.slane %v3179_v22, %v12826_v49  ;;  %v2127_v60 = vrot.slane %v1788_v31, %v12826_v49  ;;  %v2151_v12 = vrot.slane %v1789_v62, %v12826_v49 }
 0x19f   : > { %v13004_v20 = vrot.slane %v3256_v16, %v12826_v49  ;;  %v3175_v33 = vrot.slane %v3161_v36, %v12826_v49  ;;  %v17075_v11 = vcombine.high %v12810_v46, %v12810_v46  ;;  %v1738_v57 = vmax.f32 %v12818_v38, %v1563_v51 }
 0x1a0   : > { %v3208_v50 = vcombine.low %v3186_v18, %v3193_v45  ;;  %v3209_v26 = vcombine.low %v3200_v43, %v3207_v58  ;;  %v2128_v25 = vcombine.high %v2127_v60, %v2127_v60  ;;  %v2135_v22 = vrot.slane %v2127_v60, %v12826_v49  ;;  %v13013_v8 = vpop.f32.mrb[86].mxu0 }
 0x1a1   : > { %v1737_v37 = vmax.f32 %v17075_v11, %v12944_v17  ;;  %v3176_v3 = vcombine.low %v3168_v13, %v3175_v33  ;;  %v2152_v30 = vcombine.high %v2151_v12, %v2151_v12  ;;  %v2159_v21 = vrot.slane %v2151_v12, %v12826_v49  ;;  %v13017_v53 = vpop.f32.mrb[87].mxu0 }
 0x1a2   : > { %v3216_v46 = vrot.slane %v3208_v50, %v12826_v49  ;;  %v3223_v17 = vrot.slane %v3209_v26, %v12826_v49  ;;  %v2142_v18 = vrot.slane %v2128_v25, %v12826_v49  ;;  %v1787_v38 = vmax.f32 %v12621_v44, %v1738_v57 }
 0x1a3   : > { %v1786_v39 = vmax.f32 %v12613_v34, %v1737_v37  ;;  %4503 = vst.msk [vmem:[#allocation2 + $0x11] sm:$0x7f] %vm4502_vm6, %v3176_v3  ;;  %v13025_v58 = vrot.slane %v2152_v30, %v12826_v49  ;;  %v2167_v13 = vcombine.high %v2159_v21, %v2159_v21  ;;  %v3248_v34 = vrot.slane %v11316_v2, %v12826_v49 }
 0x1a4   : > { %v3224_v62 = vcombine.low %v3216_v46, %v3223_v17  ;;  %v3321_v16 = vcombine.low %v2135_v22, %v2142_v18  ;;  %v11317_v36 = vcombine.high %v2135_v22, %v2142_v18  ;;  %v2103_v51 = vrot.slane %v1787_v38, %v12826_v49  ;;  %v13030_v45 = vpop.f32.mrb[88].mxu0 }
 0x1a5   : > { %v2079_v31 = vrot.slane %v1786_v39, %v12826_v49  ;;  %v3323_v43 = vcombine.low %v2159_v21, %v13025_v58  ;;  %v3351_v44 = vrot.slane %v2167_v13, %v12826_v49  ;;  %v13035_v33 = vpop.f32.mrb[89].mxu0  ;;  %v13048_v39 = vld [vmem:[%s16889_s2] ss:$0 sm:$0xff] }
 0x1a6   : > { %4504 = vst.msk [vmem:[#allocation2 + $0x21] sm:$0x7f] %vm4502_vm6, %v3224_v62  ;;  %v3330_v2 = vrot.slane %v3321_v16, %v12826_v49  ;;  %v3337_v11 = vrot.slane %v11317_v36, %v12826_v49  ;;  %v2104_v37 = vcombine.high %v2103_v51, %v2103_v51  ;;  %v2111_v57 = vrot.slane %v2103_v51, %v12826_v49 }
 0x1a7   : > { %v2080_v60 = vcombine.high %v2079_v31, %v2079_v31  ;;  %v2087_v12 = vrot.slane %v2079_v31, %v12826_v49  ;;  %v3344_v50 = vrot.slane %v3323_v43, %v12826_v49  ;;  %v1198_v46 = vadd.f32 %v13048_v39, %v12946_v63 }
 0x1a8   : > { %v3352_v3 = vcombine.low %v3330_v2, %v3337_v11  ;;  %v2118_v30 = vrot.slane %v2104_v37, %v12826_v49  ;;  %v2119_v21 = vcombine.high %v2111_v57, %v2111_v57  ;;  %v13052_v17 = vpop.f32.mrb[90].mxu0 }
 0x1a9   : > { %v2094_v26 = vrot.slane %v2080_v60, %v12826_v49  ;;  %v2095_v25 = vcombine.high %v2087_v12, %v2087_v12  ;;  %v3255_v22 = vrot.slane %v2087_v12, %v12826_v49  ;;  %v3353_v18 = vcombine.low %v3344_v50, %v3351_v44  ;;  %v13054_v62 = vpop.f32.mrb[91].mxu0 }
 0x1aa   : > { %v3360_v16 = vrot.slane %v3352_v3, %v12826_v49  ;;  %v2120_v36 = vcombine.high %v2118_v30, %v2118_v30  ;;  %v3275_v51 = vcombine.low %v2118_v30, %v2119_v21  ;;  %v1370_v43 = vmax.f32 %v1198_v46, 0.0  ;;  %v5260_v60 = vld [vmem:[#allocation2 + $0x11] sm:$0x7f] }
 0x1ab   : > { %v2096_v38 = vcombine.high %v2094_v26, %v2094_v26  ;;  %v3257_v13 = vcombine.low %v3248_v34, %v3255_v22  ;;  %v3273_v31 = vcombine.low %v2094_v26, %v2095_v25  ;;  %v4677_v12 = vld [vmem:[#allocation2 + $0x11] sm:$0x7f]  ;;  %v3367_v2 = vrot.slane %v3353_v18, %v12826_v49  ;;  %5274 = vrot.lane.b32.xlu0 %v5260_v60, %s16929_s17 }
 0x1ac   : > { %v3296_v34 = vrot.slane %v3275_v51, %v12826_v49  ;;  %v3303_v44 = vrot.slane %v2120_v36, %v12826_v49  ;;  %v1566_v50 = vcombine.high %v1370_v43, %v1370_v43  ;;  %v17076_v26 = vcombine.high %v12822_v28, %v12822_v28  ;;  %4691 = vrot.lane.b32.xlu1 %v4677_v12, %s17020_s27  ;;  %v13067_v22 = vpop.f32.mrb[92].mxu0  ;;  %v5598_v3 = vld [vmem:[#allocation2 + $0x11] sm:$0x7f] }
 0x1ad   : > { %v3271_v11 = vrot.slane %v3257_v13, %v12826_v49  ;;  %v3274_v63 = vcombine.low %v2096_v38, %v2111_v57  ;;  %v3282_v37 = vrot.slane %v3273_v31, %v12826_v49  ;;  %v3368_v57 = vcombine.low %v3360_v16, %v3367_v2  ;;  %v13073_v18 = vpop.f32.mrb[93].mxu0  ;;  %5606 = vst.msk [vmem:[#allocation3 + $0xa8] sm:$0x7f] %vm4502_vm6, %v5598_v3 }
 0x1ae   : > { %v1743_v25 = vmax.f32 %v17076_v26, %v1370_v43  ;;  %v1193_v46 = vadd.f32 %v13048_v39, %v12951_v55  ;;  %v3305_v38 = vcombine.low %v3296_v34, %v3303_v44  ;;  %v1744_v13 = vmax.f32 %v12820_v52, %v1566_v50  ;;  %v4993_v43 = vld [vmem:[#allocation2 + $0x11] sm:$0x7f] }
 0x1af   : > { %v3272_v30 = vcombine.low %v13004_v20, %v3271_v11  ;;  %v3289_v21 = vrot.slane %v3274_v63, %v12826_v49  ;;  %v2168_v36 = vcombine.high %v13025_v58, %v13025_v58  ;;  %4507 = vst.msk [vmem:[#allocation2 + $0x51] sm:$0x7f] %vm4502_vm6, %v3368_v57  ;;  %v1208_v55 = vadd.f32 %v13048_v39, %v12964_v4 }
 0x1b0   : > { %v1792_v31 = vmax.f32 %v12644_v32, %v1743_v25  ;;  %v1369_v16 = vmax.f32 %v1193_v46, 0.0  ;;  %v1203_v51 = vadd.f32 %v13048_v39, %v12967_v5  ;;  %v3319_v60 = vrot.slane %v3305_v38, %v12826_v49  ;;  %5007 = vrot.lane.b32.xlu1 %v4993_v43, %s12160_s28  ;;  %v13094_v11 = vpop.f32.mrb[94].mxu0  ;;  %v5599_v46 = vld [vmem:[#allocation2 + $0x21] sm:$0x7f] }
 0x1b1   : > { %v3304_v20 = vcombine.low %v3282_v37, %v3289_v21  ;;  %4505 = vst.msk [vmem:[#allocation2 + $0x31] sm:$0x7f] %vm4502_vm6, %v3272_v30  ;;  %v1793_v32 = vmax.f32 %v12651_v41, %v1744_v13  ;;  %v13091_v2 = vadd.f32 %v13048_v39, %v12979_v1  ;;  %v17077_v5 = vcombine.high %v12815_v56, %v12815_v56  ;;  %v13100_v41 = vpop.f32.mrb[95].mxu0  ;;  %v5077_v21 = vld [vmem:[#allocation2 + $0x12] sm:$0x7f] }
 0x1b2   : > { %v2223_v12 = vrot.slane %v1792_v31, %v12826_v49  ;;  %v1565_v63 = vcombine.high %v1369_v16, %v1369_v16  ;;  %v1372_v34 = vmax.f32 %v1208_v55, 0.0  ;;  %v13104_v26 = vmax.f32 %v1203_v51, 0.0  ;;  %5607 = vst.msk [vmem:[#allocation3 + $0xb0] sm:$0x7f] %vm4502_vm6, %v5599_v46 }
 0x1b3   : > { %v3312_v4 = vrot.slane %v3304_v20, %v12826_v49  ;;  %v1741_v37 = vmax.f32 %v17077_v5, %v1369_v16  ;;  %v2247_v1 = vrot.slane %v1793_v32, %v12826_v49  ;;  %v17078_v31 = vcombine.high %v12839_v24, %v12839_v24 }
 0x1b4   : > { %v2224_v44 = vcombine.high %v2223_v12, %v2223_v12  ;;  %v2231_v50 = vrot.slane %v2223_v12, %v12826_v49  ;;  %v1742_v3 = vmax.f32 %v12822_v28, %v1565_v63  ;;  %v1568_v30 = vcombine.high %v1372_v34, %v1372_v34  ;;  %5091 = vrot.lane.b32.xlu1 %v5077_v21, %s12161_s29  ;;  %v13114_v16 = vpop.f32.mrb[96].mxu0 }
 0x1b5   : > { %v3320_v25 = vcombine.low %v3312_v4, %v3319_v60  ;;  %v1790_v57 = vmax.f32 %v12625_v6, %v1741_v37  ;;  %v2248_v38 = vcombine.high %v2247_v1, %v2247_v1  ;;  %v2255_v13 = vrot.slane %v2247_v1, %v12826_v49  ;;  %v13123_v43 = vpop.f32.mrb[97].mxu0 }
 0x1b6   : > { %v2238_v56 = vrot.slane %v2224_v44, %v12826_v49  ;;  %v1747_v20 = vmax.f32 %v17078_v31, %v1372_v34  ;;  %v1791_v6 = vmax.f32 %v12633_v15, %v1742_v3  ;;  %v1748_v55 = vmax.f32 %v12832_v61, %v1568_v30  ;;  %v5655_v44 = vld [vmem:[#allocation2 + $0x12] sm:$0x7f] }
 0x1b7   : > { %4506 = vst.msk [vmem:[#allocation2 + $0x41] sm:$0x7f] %vm4502_vm6, %v3320_v25  ;;  %v2175_v28 = vrot.slane %v1790_v57, %v12826_v49  ;;  %v1567_v51 = vcombine.high %v13104_v26, %v13104_v26  ;;  %v13126_v60 = vrot.slane %v2248_v38, %v12826_v49  ;;  %v2263_v32 = vcombine.high %v2255_v13, %v2255_v13  ;;  %v5602_v58 = vld [vmem:[#allocation2 + $0x51] sm:$0x7f] }
 0x1b8   : > { %v3418_v12 = vcombine.low %v2231_v50, %v2238_v56  ;;  %v11319_v4 = vcombine.high %v2231_v50, %v2238_v56  ;;  %v4679_v63 = vld [vmem:[#allocation2 + $0x31] sm:$0x7f]  ;;  %v3447_v5 = vrot.slane %v2255_v13, %v12826_v49  ;;  %v2199_v34 = vrot.slane %v1791_v6, %v12826_v49  ;;  %5669 = vrot.lane.b32.xlu1 %v5655_v44, %s16927_s21 }
 0x1b9   : > { %v2176_v37 = vcombine.high %v2175_v28, %v2175_v28  ;;  %v2183_v15 = vrot.slane %v2175_v28, %v12826_v49  ;;  %4695 = vrot.lane.b32.xlu0 %v4679_v63, %s17020_s27  ;;  %v13135_v3 = vcombine.low %v13126_v60, %v2263_v32  ;;  %v1796_v50 = vmax.f32 %v12658_v7, %v1747_v20  ;;  %v5262_v6 = vld [vmem:[#allocation2 + $0x31] sm:$0x7f] }
 0x1ba   : > { %v3433_v1 = vrot.slane %v3418_v12, %v12826_v49  ;;  %v3440_v25 = vrot.slane %v11319_v4, %v12826_v49  ;;  %v2200_v21 = vcombine.high %v2199_v34, %v2199_v34  ;;  %v2207_v46 = vrot.slane %v2199_v34, %v12826_v49  ;;  %v5600_v7 = vld [vmem:[#allocation2 + $0x31] sm:$0x7f]  ;;  %5610 = vst.msk [vmem:[#allocation3 + $0xc8] sm:$0x7f] %vm4502_vm6, %v5602_v58  ;;  %v4678_v58 = vld [vmem:[#allocation2 + $0x21] sm:$0x7f] }
 0x1bb   : > { %v2190_v57 = vrot.slane %v2176_v37, %v12826_v49  ;;  %v2191_v30 = vcombine.high %v2183_v15, %v2183_v15  ;;  %v3369_v38 = vcombine.low %v2168_v36, %v2183_v15  ;;  %v1797_v13 = vmax.f32 %v12665_v9, %v1748_v55  ;;  %v4995_v63 = vld [vmem:[#allocation2 + $0x31] sm:$0x7f]  ;;  %5608 = vst.msk [vmem:[#allocation3 + $0xb8] sm:$0x7f] %vm4502_vm6, %v5600_v7 }
 0x1bc   : > { %v13141_v56 = vcombine.low %v3440_v25, %v3447_v5  ;;  %v2319_v31 = vrot.slane %v1796_v50, %v12826_v49  ;;  %v2214_v28 = vrot.slane %v2200_v21, %v12826_v49  ;;  %v17079_v12 = vcombine.high %v12820_v52, %v12820_v52  ;;  %5011 = vrot.lane.b32.xlu1 %v4995_v63, %s12160_s28 }
 0x1bd   : > { %v2192_v20 = vcombine.high %v2190_v57, %v2190_v57  ;;  %v3370_v32 = vcombine.low %v2190_v57, %v2191_v30  ;;  %5278 = vrot.lane.b32.xlu0 %v5262_v6, %s16929_s17  ;;  %v3378_v36 = vrot.slane %v3369_v38, %v12826_v49  ;;  %v2343_v25 = vrot.slane %v1797_v13, %v12826_v49  ;;  %v5657_v57 = vld [vmem:[#allocation2 + $0x32] sm:$0x7f] }
 0x1be   : > { %v1745_v4 = vmax.f32 %v17079_v12, %v13104_v26  ;;  %v3463_v9 = vrot.slane %v13141_v56, %v12826_v49  ;;  %v2320_v55 = vcombine.high %v2319_v31, %v2319_v31  ;;  %v2327_v5 = vrot.slane %v2319_v31, %v12826_v49  ;;  %v5601_v30 = vld [vmem:[#allocation2 + $0x41] sm:$0x7f]  ;;  %v5079_v6 = vld [vmem:[#allocation2 + $0x32] sm:$0x7f] }
 0x1bf   : > { %v3371_v52 = vcombine.low %v2192_v20, %v2207_v46  ;;  %v3385_v26 = vrot.slane %v3370_v32, %v12826_v49  ;;  %v3399_v37 = vrot.slane %v2214_v28, %v12826_v49  ;;  %v11318_v15 = vcombine.high %v2207_v46, %v2214_v28  ;;  %5609 = vst.msk [vmem:[#allocation3 + $0xc0] sm:$0x7f] %vm4502_vm6, %v5601_v30 }
 0x1c0   : > { %v2334_v34 = vrot.slane %v2320_v55, %v12826_v49  ;;  %v2335_v44 = vcombine.high %v2327_v5, %v2327_v5  ;;  %v1746_v50 = vmax.f32 %v12839_v24, %v1567_v51  ;;  %v1794_v31 = vmax.f32 %v12639_v27, %v1745_v4  ;;  %5095 = vrot.lane.b32.xlu1 %v5079_v6, %s12161_s29  ;;  %v5824_v6 = vld [vmem:[#allocation2 + $0x31] sm:$0x7f] }
 0x1c1   : > { %v3392_v21 = vrot.slane %v3371_v52, %v12826_v49  ;;  %v3400_v56 = vcombine.low %v3378_v36, %v3385_v26  ;;  %v3426_v38 = vrot.slane %v11318_v15, %v12826_v49  ;;  %5673 = vrot.lane.b32.xlu0 %v5657_v57, %s16927_s21  ;;  %v2344_v7 = vcombine.high %v2343_v25, %v2343_v25 }
 0x1c2   : > { %v2336_v46 = vcombine.high %v2334_v34, %v2334_v34  ;;  %v2351_v13 = vrot.slane %v2343_v25, %v12826_v49  ;;  %v3515_v20 = vcombine.low %v2327_v5, %v2334_v34  ;;  %v3543_v32 = vrot.slane %v2335_v44, %v12826_v49 }
 0x1c3   : > { %v3401_v24 = vcombine.low %v3392_v21, %v3399_v37  ;;  %v3408_v51 = vrot.slane %v3400_v56, %v12826_v49  ;;  %v3448_v28 = vcombine.low %v3426_v38, %v3433_v1  ;;  %v13176_v27 = vrot.slane %v2344_v7, %v12826_v49  ;;  %v5515_v1 = vld [vmem:[#allocation2 + $0x31] sm:$0x7f]  ;;  %v4994_v56 = vld [vmem:[#allocation2 + $0x21] sm:$0x7f] }
 0x1c4   : > { %v2359_v12 = vcombine.high %v2351_v13, %v2351_v13  ;;  %v3536_v4 = vrot.slane %v3515_v20, %v12826_v49  ;;  %v3561_v63 = vcombine.low %v2336_v46, %v2351_v13  ;;  %v1795_v5 = vmax.f32 %v12647_v35, %v1746_v50  ;;  %5530 = vrot.lane.b32.xlu1 %v5515_v1, %s12158_s24  ;;  %v5908_v1 = vld [vmem:[#allocation2 + $0x32] sm:$0x7f] }
 0x1c5   : > { %v3415_v36 = vrot.slane %v3401_v24, %v12826_v49  ;;  %v3456_v55 = vrot.slane %v3448_v28, %v12826_v49  ;;  %v2264_v52 = vcombine.high %v13126_v60, %v13126_v60  ;;  %4693 = vrot.lane.b32.xlu0 %v4678_v58, %s17020_s27  ;;  %v2271_v34 = vrot.slane %v1794_v31, %v12826_v49  ;;  %v5261_v58 = vld [vmem:[#allocation2 + $0x21] sm:$0x7f] }
 0x1c6   : > { %v3545_v26 = vcombine.low %v3536_v4, %v3543_v32  ;;  %v3562_v37 = vcombine.low %v13176_v27, %v2359_v12  ;;  %v3570_v15 = vrot.slane %v3561_v63, %v12826_v49  ;;  %v2295_v57 = vrot.slane %v1795_v5, %v12826_v49 }
 0x1c7   : > { %v3416_v44 = vcombine.low %v3408_v51, %v3415_v36  ;;  %v3464_v25 = vcombine.low %v3456_v55, %v3463_v9  ;;  %v3474_v35 = vrot.slane %v13135_v3, %v12826_v49  ;;  %v2272_v30 = vcombine.high %v2271_v34, %v2271_v34 }
 0x1c8   : > { %v13193_v60 = vrot.slane %v3545_v26, %v12826_v49  ;;  %v3577_v50 = vrot.slane %v3562_v37, %v12826_v49  ;;  %v2279_v21 = vrot.slane %v2271_v34, %v12826_v49  ;;  %v2296_v38 = vcombine.high %v2295_v57, %v2295_v57  ;;  %5839 = vrot.lane.b32.xlu1 %v5824_v6, %s16931_s22 }
 0x1c9   : > { %4508 = vst.msk [vmem:[#allocation2 + $0x61] sm:$0x7f] %vm4502_vm6, %v3416_v44  ;;  %4509 = vst.msk [vmem:[#allocation2 + $0x71] sm:$0x7f] %vm4502_vm6, %v3464_v25  ;;  %v2303_v9 = vrot.slane %v2295_v57, %v12826_v49  ;;  %v1374_v31 = vmax.f32 %v13091_v2, 0.0  ;;  %v1213_v3 = vadd.f32 %v13048_v39, %v12983_v29  ;;  %5009 = vrot.lane.b32.xlu0 %v4994_v56, %s12160_s28 }
 0x1ca   : > { %v13204_v46 = vcombine.low %v3570_v15, %v3577_v50  ;;  %v2286_v7 = vrot.slane %v2272_v30, %v12826_v49  ;;  %v2287_v13 = vcombine.high %v2279_v21, %v2279_v21  ;;  %v3466_v20 = vcombine.low %v2264_v52, %v2279_v21 }
 0x1cb   : > { %v2310_v24 = vrot.slane %v2296_v38, %v12826_v49  ;;  %v1570_v51 = vcombine.high %v1374_v31, %v1374_v31  ;;  %v17080_v2 = vcombine.high %v12856_v14, %v12856_v14  ;;  %v1373_v32 = vmax.f32 %v1213_v3, 0.0  ;;  %v5656_v38 = vld [vmem:[#allocation2 + $0x22] sm:$0x7f] }
 0x1cc   : > { %v3600_v29 = vrot.slane %v13204_v46, %v12826_v49  ;;  %v2288_v12 = vcombine.high %v2286_v7, %v2286_v7  ;;  %v3467_v4 = vcombine.low %v2286_v7, %v2287_v13  ;;  %v3481_v63 = vrot.slane %v3466_v20, %v12826_v49  ;;  %5923 = vrot.lane.b32.xlu1 %v5908_v1, %s16925_s23 }
 0x1cd   : > { %v1751_v28 = vmax.f32 %v17080_v2, %v1374_v31  ;;  %v3513_v36 = vcombine.low %v2303_v9, %v2310_v24  ;;  %v11320_v55 = vcombine.high %v2303_v9, %v2310_v24  ;;  %v1752_v5 = vmax.f32 %v12850_v23, %v1570_v51  ;;  %5276 = vrot.lane.b32.xlu0 %v5261_v58, %s16929_s17 }
 0x1ce   : > { %v3488_v26 = vrot.slane %v3467_v4, %v12826_v49  ;;  %v3495_v37 = vrot.slane %v2288_v12, %v12826_v49  ;;  %v3496_v15 = vcombine.low %v3474_v35, %v3481_v63  ;;  %v1569_v34 = vcombine.high %v1373_v32, %v1373_v32  ;;  %v4681_v4 = vld [vmem:[#allocation2 + $0x51] sm:$0x7f] }
 0x1cf   : > { %v1800_v52 = vmax.f32 %v12670_v48, %v1751_v28  ;;  %v3522_v44 = vrot.slane %v3513_v36, %v12826_v49  ;;  %v3529_v25 = vrot.slane %v11320_v55, %v12826_v49  ;;  %v1801_v57 = vmax.f32 %v12679_v40, %v1752_v5  ;;  %v5078_v40 = vld [vmem:[#allocation2 + $0x22] sm:$0x7f]  ;;  %v4532_v28 = vld [vmem:[#allocation2 + $0x1b0] sm:$0x7f] }
 0x1d0   : > { %v3497_v48 = vcombine.low %v3488_v26, %v3495_v37  ;;  %v3504_v30 = vrot.slane %v3496_v15, %v12826_v49  ;;  %v17081_v21 = vcombine.high %v12832_v61, %v12832_v61  ;;  %v1750_v35 = vmax.f32 %v12856_v14, %v1569_v34  ;;  %5093 = vrot.lane.b32.xlu1 %v5078_v40, %s12161_s29  ;;  %v5514_v5 = vld [vmem:[#allocation2 + $0x21] sm:$0x7f]  ;;  %v5604_v34 = vld [vmem:[#allocation2 + $0x71] sm:$0x7f] }
 0x1d1   : > { %v2415_v50 = vrot.slane %v1800_v52, %v12826_v49  ;;  %v3544_v9 = vcombine.low %v3522_v44, %v3529_v25  ;;  %v2439_v6 = vrot.slane %v1801_v57, %v12826_v49  ;;  %5671 = vrot.lane.b32.xlu0 %v5656_v38, %s16927_s21  ;;  %v2360_v14 = vcombine.high %v13176_v27, %v13176_v27  ;;  %v5603_v15 = vld [vmem:[#allocation2 + $0x61] sm:$0x7f] }
 0x1d2   : > { %v1749_v56 = vmax.f32 %v17081_v21, %v1373_v32  ;;  %v3511_v7 = vrot.slane %v3497_v48, %v12826_v49  ;;  %v1799_v61 = vmax.f32 %v12663_v10, %v1750_v35  ;;  %v4894_v32 = vld [vmem:[#allocation2 + $0x121] sm:$0x7f]  ;;  %4539 = vst.msk [vmem:[#allocation3] sm:$0x7f] %vm4502_vm6, %v4532_v28  ;;  %v1228_v57 = vadd.f32 %v13048_v39, %v12992_v42 }
 0x1d3   : > { %v2416_v31 = vcombine.high %v2415_v50, %v2415_v50  ;;  %v13231_v3 = vrot.slane %v2415_v50, %v12826_v49  ;;  %v3552_v20 = vrot.slane %v3544_v9, %v12826_v49  ;;  %v2440_v2 = vcombine.high %v2439_v6, %v2439_v6  ;;  %4902 = vst.msk [vmem:[#allocation3 + $0x38] sm:$0x7f] %vm4502_vm6, %v4894_v32  ;;  %v5823_v42 = vld [vmem:[#allocation2 + $0x21] sm:$0x7f] }
 0x1d4   : > { %v1798_v13 = vmax.f32 %v12655_v0, %v1749_v56  ;;  %v3512_v12 = vcombine.low %v3504_v30, %v3511_v7  ;;  %v2447_v0 = vrot.slane %v2439_v6, %v12826_v49  ;;  %v2391_v37 = vrot.slane %v1799_v61, %v12826_v49  ;;  %5528 = vrot.lane.b32.xlu1 %v5514_v5, %s12158_s24  ;;  %v4997_v56 = vld [vmem:[#allocation2 + $0x51] sm:$0x7f] }
 0x1d5   : > { %v2430_v24 = vrot.slane %v2416_v31, %v12826_v49  ;;  %v2431_v51 = vcombine.high %v13231_v3, %v13231_v3  ;;  %v3639_v10 = vrot.slane %v13231_v3, %v12826_v49  ;;  %v3560_v63 = vcombine.low %v3552_v20, %v13193_v60  ;;  %4699 = vrot.lane.b32.xlu0 %v4681_v4, %s17020_s27 }
 0x1d6   : > { %v2367_v27 = vrot.slane %v1798_v13, %v12826_v49  ;;  %v2454_v36 = vrot.slane %v2440_v2, %v12826_v49  ;;  %4510 = vst.msk [vmem:[#allocation2 + $0xa1] sm:$0x7f] %vm4502_vm6, %v3512_v12  ;;  %v2455_v52 = vcombine.high %v2447_v0, %v2447_v0  ;;  %5611 = vst.msk [vmem:[#allocation3 + $0xd0] sm:$0x7f] %vm4502_vm6, %v5603_v15  ;;  %v1376_v31 = vmax.f32 %v1228_v57, 0.0 }
 0x1d7   : > { %v2432_v58 = vcombine.high %v2430_v24, %v2430_v24  ;;  %v3657_v55 = vcombine.low %v2430_v24, %v2431_v51  ;;  %4511 = vst.msk [vmem:[#allocation2 + $0xb1] sm:$0x7f] %vm4502_vm6, %v3560_v63  ;;  %5612 = vst.msk [vmem:[#allocation3 + $0xd8] sm:$0x7f] %vm4502_vm6, %v5604_v34  ;;  %v2392_v30 = vcombine.high %v2391_v37, %v2391_v37 }
 0x1d8   : > { %v2368_v1 = vcombine.high %v2367_v27, %v2367_v27  ;;  %v2375_v26 = vrot.slane %v2367_v27, %v12826_v49  ;;  %v2456_v60 = vcombine.high %v2454_v36, %v2454_v36  ;;  %v3659_v50 = vcombine.low %v2454_v36, %v2455_v52  ;;  %5837 = vrot.lane.b32.xlu1 %v5823_v42, %s16931_s22  ;;  %v5907_v36 = vld [vmem:[#allocation2 + $0x22] sm:$0x7f] }
 0x1d9   : > { %v3658_v44 = vcombine.low %v2432_v58, %v2447_v0  ;;  %v3666_v25 = vrot.slane %v3657_v55, %v12826_v49  ;;  %v2399_v21 = vrot.slane %v2391_v37, %v12826_v49  ;;  %5015 = vrot.lane.b32.xlu0 %v4997_v56, %s12160_s28  ;;  %v2406_v40 = vrot.slane %v2392_v30, %v12826_v49  ;;  %v5264_v0 = vld [vmem:[#allocation2 + $0x51] sm:$0x7f]  ;;  %v17083_v37 = vld [vmem:[#allocation12_spill] sm:$0xff] }
 0x1da   : > { %v2382_v48 = vrot.slane %v2368_v1, %v12826_v49  ;;  %v3687_v38 = vrot.slane %v2456_v60, %v12826_v49  ;;  %v3563_v9 = vcombine.low %v2360_v14, %v2375_v26  ;;  %v3680_v6 = vrot.slane %v3659_v50, %v12826_v49  ;;  %v5517_v50 = vld [vmem:[#allocation2 + $0x51] sm:$0x7f] }
 0x1db   : > { %v3673_v35 = vrot.slane %v3658_v44, %v12826_v49  ;;  %v1572_v24 = vcombine.high %v1376_v31, %v1376_v31  ;;  %v17082_v14 = vcombine.high %v12866_v59, %v12866_v59  ;;  %v3610_v28 = vcombine.low %v2399_v21, %v2406_v40 }
 0x1dc   : > { %v3591_v7 = vrot.slane %v2382_v48, %v12826_v49  ;;  %v11321_v13 = vcombine.high %v2375_v26, %v2382_v48  ;;  %v3584_v20 = vrot.slane %v3563_v9, %v12826_v49  ;;  %v3689_v2 = vcombine.low %v3680_v6, %v3687_v38  ;;  %5921 = vrot.lane.b32.xlu1 %v5907_v36, %s16925_s23 }
 0x1dd   : > { %v3688_v61 = vcombine.low %v3666_v25, %v3673_v35  ;;  %v1755_v51 = vmax.f32 %v17082_v14, %v1376_v31  ;;  %v11322_v32 = vcombine.high %v2399_v21, %v2406_v40  ;;  %v1756_v63 = vmax.f32 %v12862_v54, %v1572_v24  ;;  %5282 = vrot.lane.b32.xlu0 %v5264_v0, %s16929_s17  ;;  %v5245_v56 = vld [vmem:[#allocation2 + $0xa0] sm:$0x7f] }
 0x1de   : > { %v3618_v12 = vrot.slane %v11321_v13, %v12826_v49  ;;  %v3593_v4 = vcombine.low %v3584_v20, %v3591_v7  ;;  %v3703_v55 = vrot.slane %v3689_v2, %v12826_v49  ;;  %v3625_v5 = vrot.slane %v3610_v28, %v12826_v49  ;;  %5253 = vst.msk [vmem:[#allocation3 + $0x70] sm:$0x7f] %vm4502_vm6, %v5245_v56  ;;  %v5246_v38 = vld [vmem:[#allocation2 + $0xb0] sm:$0x7f]  ;;  %v4680_v20 = vld [vmem:[#allocation2 + $0x41] sm:$0x7f] }
 0x1df   : > { %v3696_v27 = vrot.slane %v3688_v61, %v12826_v49  ;;  %v1804_v58 = vmax.f32 %v12686_v47, %v1755_v51  ;;  %v3632_v52 = vrot.slane %v11322_v32, %v12826_v49  ;;  %v1223_v1 = vadd.f32 %v13048_v39, %v12997_v19  ;;  %5254 = vst.msk [vmem:[#allocation3 + $0x78] sm:$0x7f] %vm4502_vm6, %v5246_v38  ;;  %v17085_v7 = vld [vmem:[#allocation8_spill] sm:$0xff]  ;;  %v5080_v28 = vld [vmem:[#allocation2 + $0x42] sm:$0x7f]  ;;  %v17086_v32 = vld [vmem:[#allocation9_spill] sm:$0xff] }
 0x1e0   : > { %v3607_v26 = vrot.slane %v3593_v4, %v12826_v49  ;;  %v1805_v15 = vmax.f32 %v17083_v37, %v1756_v63  ;;  %v1238_v34 = vadd.f32 %v13048_v39, %v13013_v8  ;;  %v3640_v44 = vcombine.low %v3618_v12, %v3625_v5  ;;  %v5081_v8 = vld [vmem:[#allocation2 + $0x52] sm:$0x7f] }
 0x1e1   : > { %v2511_v47 = vrot.slane %v1804_v58, %v12826_v49  ;;  %v3704_v60 = vcombine.low %v3696_v27, %v3703_v55  ;;  %v3641_v25 = vcombine.low %v3632_v52, %v3639_v10  ;;  %v1375_v57 = vmax.f32 %v1223_v1, 0.0  ;;  %5534 = vrot.lane.b32.xlu0 %v5517_v50, %s12158_s24  ;;  %5099 = vrot.lane.b32.xlu1 %v5081_v8, %s12161_s29  ;;  %v17087_v27 = vld [vmem:[#allocation37_spill] sm:$0xff] }
 0x1e2   : > { %v3608_v19 = vcombine.low %v3600_v29, %v3607_v26  ;;  %v2535_v21 = vrot.slane %v1805_v15, %v12826_v49  ;;  %v3648_v3 = vrot.slane %v3640_v44, %v12826_v49  ;;  %v17084_v46 = vcombine.high %v12850_v23, %v12850_v23  ;;  %v17089_v26 = vld [vmem:[#allocation36_spill] sm:$0xff]  ;;  %v4996_v15 = vld [vmem:[#allocation2 + $0x41] sm:$0x7f] }
 0x1e3   : > { %v2512_v48 = vcombine.high %v2511_v47, %v2511_v47  ;;  %v13300_v30 = vrot.slane %v2511_v47, %v12826_v49  ;;  %4514 = vst.msk [vmem:[#allocation2 + $0xe1] sm:$0x7f] %vm4502_vm6, %v3704_v60  ;;  %v3655_v10 = vrot.slane %v3641_v25, %v12826_v49  ;;  %v1571_v35 = vcombine.high %v1375_v57, %v1375_v57  ;;  %v17090_v60 = vld [vmem:[#allocation14_spill] sm:$0xff] }
 0x1e4   : > { %v1753_v29 = vmax.f32 %v17084_v46, %v1375_v57  ;;  %4512 = vst.msk [vmem:[#allocation2 + $0xc1] sm:$0x7f] %vm4502_vm6, %v3608_v19  ;;  %v2536_v42 = vcombine.high %v2535_v21, %v2535_v21  ;;  %v2543_v6 = vrot.slane %v2535_v21, %v12826_v49  ;;  %v1378_v61 = vmax.f32 %v1238_v34, 0.0  ;;  %v4998_v57 = vld [vmem:[#allocation2 + $0x61] sm:$0x7f]  ;;  %v17091_v21 = vld [vmem:[#allocation16_spill] sm:$0xff] }
 0x1e5   : > { %v2526_v9 = vrot.slane %v2512_v48, %v12826_v49  ;;  %v2527_v31 = vcombine.high %v13300_v30, %v13300_v30  ;;  %v3656_v40 = vcombine.low %v3648_v3, %v3655_v10  ;;  %v1754_v23 = vmax.f32 %v12866_v59, %v1571_v35  ;;  %4697 = vrot.lane.b32.xlu0 %v4680_v20, %s17020_s27 }
 0x1e6   : > { %v1802_v13 = vmax.f32 %v17085_v7, %v1753_v29  ;;  %v2550_v14 = vrot.slane %v2536_v42, %v12826_v49  ;;  %v1233_v2 = vadd.f32 %v13048_v39, %v13017_v53  ;;  %v1574_v0 = vcombine.high %v1378_v61, %v1378_v61  ;;  %5097 = vrot.lane.b32.xlu1 %v5080_v28, %s12161_s29  ;;  %v5263_v42 = vld [vmem:[#allocation2 + $0x41] sm:$0x7f] }
 0x1e7   : > { %v2528_v24 = vcombine.high %v2526_v9, %v2526_v9  ;;  %v13321_v51 = vcombine.low %v2526_v9, %v2527_v31  ;;  %4513 = vst.msk [vmem:[#allocation2 + $0xd1] sm:$0x7f] %vm4502_vm6, %v3656_v40  ;;  %v1803_v12 = vmax.f32 %v17086_v32, %v1754_v23  ;;  %v17088_v4 = vcombine.high %v17087_v27, %v17087_v27 }
 0x1e8   : > { %v2463_v59 = vrot.slane %v1802_v13, %v12826_v49  ;;  %v3783_v36 = vrot.slane %v2550_v14, %v12826_v49  ;;  %v11324_v55 = vcombine.high %v2543_v6, %v2550_v14  ;;  %v1760_v37 = vmax.f32 %v17089_v26, %v1574_v0 }
 0x1e9   : > { %v1759_v63 = vmax.f32 %v17088_v4, %v1378_v61  ;;  %v3755_v58 = vcombine.low %v2528_v24, %v2543_v6  ;;  %v3769_v53 = vrot.slane %v13321_v51, %v12826_v49  ;;  %v2487_v1 = vrot.slane %v1803_v12, %v12826_v49  ;;  %5013 = vrot.lane.b32.xlu0 %v4996_v15, %s12160_s28  ;;  %v5518_v15 = vld [vmem:[#allocation2 + $0x61] sm:$0x7f] }
 0x1ea   : > { %v2464_v5 = vcombine.high %v2463_v59, %v2463_v59  ;;  %v2471_v52 = vrot.slane %v2463_v59, %v12826_v49  ;;  %v13341_v34 = vrot.slane %v11324_v55, %v12826_v49  ;;  %v1377_v25 = vmax.f32 %v1233_v2, 0.0  ;;  %5017 = vrot.lane.b32.xlu1 %v4998_v57, %s12160_s28  ;;  %v5249_v59 = vld [vmem:[#allocation2 + $0xe0] sm:$0x7f] }
 0x1eb   : > { %v3776_v47 = vrot.slane %v3755_v58, %v12826_v49  ;;  %v1808_v44 = vmax.f32 %v17090_v60, %v1759_v63  ;;  %v2488_v19 = vcombine.high %v2487_v1, %v2487_v1  ;;  %v2495_v48 = vrot.slane %v2487_v1, %v12826_v49  ;;  %v5247_v6 = vld [vmem:[#allocation2 + $0xc0] sm:$0x7f]  ;;  %5257 = vst.msk [vmem:[#allocation3 + $0x90] sm:$0x7f] %vm4502_vm6, %v5249_v59 }
 0x1ec   : > { %v2478_v50 = vrot.slane %v2464_v5, %v12826_v49  ;;  %v1809_v8 = vmax.f32 %v17091_v21, %v1760_v37  ;;  %v1573_v10 = vcombine.high %v1377_v25, %v1377_v25  ;;  %v17092_v35 = vcombine.high %v12862_v54, %v12862_v54  ;;  %v5082_v54 = vld [vmem:[#allocation2 + $0x62] sm:$0x7f]  ;;  %5255 = vst.msk [vmem:[#allocation3 + $0x80] sm:$0x7f] %vm4502_vm6, %v5247_v6 }
 0x1ed   : > { %v13349_v56 = vcombine.low %v3776_v47, %v3783_v36  ;;  %v2607_v3 = vrot.slane %v1808_v44, %v12826_v49  ;;  %v2502_v29 = vrot.slane %v2488_v19, %v12826_v49  ;;  %v2503_v38 = vcombine.high %v2495_v48, %v2495_v48  ;;  %5280 = vrot.lane.b32.xlu0 %v5263_v42, %s16929_s17  ;;  %v5516_v36 = vld [vmem:[#allocation2 + $0x41] sm:$0x7f]  ;;  %v17093_v44 = vld [vmem:[#allocation10_spill] sm:$0xff] }
 0x1ee   : > { %v1757_v46 = vmax.f32 %v17092_v35, %v1377_v25  ;;  %v3705_v9 = vcombine.low %v2471_v52, %v2478_v50  ;;  %v11323_v31 = vcombine.high %v2471_v52, %v2478_v50  ;;  %v2631_v13 = vrot.slane %v1809_v8, %v12826_v49  ;;  %5101 = vrot.lane.b32.xlu1 %v5082_v54, %s12161_s29  ;;  %v5248_v55 = vld [vmem:[#allocation2 + $0xd0] sm:$0x7f]  ;;  %v17094_v8 = vld [vmem:[#allocation11_spill] sm:$0xff] }
 0x1ef   : > { %v3799_v40 = vrot.slane %v13349_v56, %v12826_v49  ;;  %v2608_v23 = vcombine.high %v2607_v3, %v2607_v3  ;;  %v13359_v7 = vrot.slane %v2607_v3, %v12826_v49  ;;  %v2504_v61 = vcombine.high %v2502_v29, %v2502_v29  ;;  %5256 = vst.msk [vmem:[#allocation3 + $0x88] sm:$0x7f] %vm4502_vm6, %v5248_v55 }
 0x1f0   : > { %v3707_v20 = vcombine.low %v2495_v48, %v2502_v29  ;;  %v3714_v24 = vrot.slane %v3705_v9, %v12826_v49  ;;  %v3721_v14 = vrot.slane %v11323_v31, %v12826_v49  ;;  %v3735_v2 = vrot.slane %v2503_v38, %v12826_v49  ;;  %v5519_v9 = vld [vmem:[#allocation2 + $0x71] sm:$0x7f] }
 0x1f1   : > { %v2622_v28 = vrot.slane %v2608_v23, %v12826_v49  ;;  %v2623_v32 = vcombine.high %v13359_v7, %v13359_v7  ;;  %v2632_v12 = vcombine.high %v2631_v13, %v2631_v13  ;;  %v3753_v63 = vcombine.low %v2504_v61, %v13300_v30  ;;  %5532 = vrot.lane.b32.xlu0 %v5516_v36, %s12158_s24 }
 0x1f2   : > { %v3728_v0 = vrot.slane %v3707_v20, %v12826_v49  ;;  %v3736_v4 = vcombine.low %v3714_v24, %v3721_v14  ;;  %v2639_v58 = vrot.slane %v2631_v13, %v12826_v49  ;;  %v1758_v37 = vmax.f32 %v17087_v27, %v1573_v10  ;;  %5536 = vrot.lane.b32.xlu1 %v5518_v15, %s12158_s24  ;;  %v4682_v10 = vld [vmem:[#allocation2 + $0x61] sm:$0x7f]  ;;  %v4683_v14 = vld [vmem:[#allocation2 + $0x71] sm:$0x7f]  ;;  %v17098_v15 = vld [vmem:[#allocation18_spill] sm:$0xff] }
 0x1f3   : > { %v2624_v5 = vcombine.high %v2622_v28, %v2622_v28  ;;  %v2646_v52 = vrot.slane %v2632_v12, %v12826_v49  ;;  %v3851_v1 = vcombine.low %v2622_v28, %v2623_v32  ;;  %v3762_v60 = vrot.slane %v3753_v63, %v12826_v49 }
 0x1f4   : > { %v3737_v47 = vcombine.low %v3728_v0, %v3735_v2  ;;  %v3744_v30 = vrot.slane %v3736_v4, %v12826_v49  ;;  %v1806_v25 = vmax.f32 %v17093_v44, %v1757_v46  ;;  %v1807_v56 = vmax.f32 %v17094_v8, %v1758_v37  ;;  %v17095_v4 = vld [vmem:[#allocation39_spill] sm:$0xff] }
 0x1f5   : > { %v3872_v57 = vrot.slane %v3851_v1, %v12826_v49  ;;  %v3879_v50 = vrot.slane %v2624_v5, %v12826_v49  ;;  %v3897_v19 = vcombine.low %v2639_v58, %v2646_v52  ;;  %v11326_v27 = vcombine.high %v2639_v58, %v2646_v52  ;;  %4701 = vrot.lane.b32.xlu0 %v4682_v10, %s17020_s27  ;;  %v17097_v5 = vld [vmem:[#allocation38_spill] sm:$0xff] }
 0x1f6   : > { %v3751_v48 = vrot.slane %v3737_v47, %v12826_v49  ;;  %v3784_v21 = vcombine.low %v3762_v60, %v3769_v53  ;;  %v2559_v3 = vrot.slane %v1806_v25, %v12826_v49  ;;  %v1248_v38 = vadd.f32 %v13048_v39, %v13030_v45  ;;  %5538 = vrot.lane.b32.xlu1 %v5519_v9, %s12158_s24  ;;  %v4999_v60 = vld [vmem:[#allocation2 + $0x71] sm:$0x7f] }
 0x1f7   : > { %v13391_v35 = vcombine.low %v3872_v57, %v3879_v50  ;;  %v3906_v46 = vrot.slane %v3897_v19, %v12826_v49  ;;  %v3913_v29 = vrot.slane %v11326_v27, %v12826_v49  ;;  %v2583_v13 = vrot.slane %v1807_v56, %v12826_v49  ;;  %v17099_v57 = vld [vmem:[#allocation20_spill] sm:$0xff] }
 0x1f8   : > { %v3752_v31 = vcombine.low %v3744_v30, %v3751_v48  ;;  %v3792_v51 = vrot.slane %v3784_v21, %v12826_v49  ;;  %v2560_v53 = vcombine.high %v2559_v3, %v2559_v3  ;;  %v2567_v42 = vrot.slane %v2559_v3, %v12826_v49  ;;  %v4720_v48 = vld [vmem:[#allocation2 + $0xa1] sm:$0x7f] }
 0x1f9   : > { %v3895_v6 = vrot.slane %v13391_v35, %v12826_v49  ;;  %v3928_v23 = vcombine.low %v3906_v46, %v3913_v29  ;;  %v1380_v54 = vmax.f32 %v1248_v38, 0.0  ;;  %v1243_v20 = vadd.f32 %v13048_v39, %v13035_v33  ;;  %4703 = vrot.lane.b32.xlu0 %v4683_v14, %s17020_s27 }
 0x1fa   : > { %v3800_v61 = vcombine.low %v3792_v51, %v3799_v40  ;;  %4515 = vst.msk [vmem:[#allocation2 + $0xf1] sm:$0x7f] %vm4502_vm6, %v3752_v31  ;;  %v2574_v45 = vrot.slane %v2560_v53, %v12826_v49  ;;  %v1258_v24 = vadd.f32 %v13048_v39, %v13052_v17  ;;  %v2584_v28 = vcombine.high %v2583_v13, %v2583_v13  ;;  %v4634_v40 = vld [vmem:[#allocation2 + $0xa0] sm:$0x7f]  ;;  %v5083_v53 = vld [vmem:[#allocation2 + $0x72] sm:$0x7f] }
 0x1fb   : > { %v13411_v2 = vrot.slane %v3928_v23, %v12826_v49  ;;  %v2591_v32 = vrot.slane %v2583_v13, %v12826_v49  ;;  %v1576_v12 = vcombine.high %v1380_v54, %v1380_v54  ;;  %v17096_v33 = vcombine.high %v17095_v4, %v17095_v4  ;;  %4648 = vrot.lane.b32.xlu1 %v4634_v40, %s12160_s28 }
 0x1fc   : > { %4516 = vst.msk [vmem:[#allocation2 + $0x101] sm:$0x7f] %vm4502_vm6, %v3800_v61  ;;  %v3802_v59 = vcombine.low %v2567_v42, %v2574_v45  ;;  %v11325_v0 = vcombine.high %v2567_v42, %v2574_v45  ;;  %v1379_v17 = vmax.f32 %v1243_v20, 0.0  ;;  %v2598_v58 = vrot.slane %v2584_v28, %v12826_v49  ;;  %v5035_v61 = vld [vmem:[#allocation2 + $0xa1] sm:$0x7f] }
 0x1fd   : > { %v1763_v63 = vmax.f32 %v17096_v33, %v1380_v54  ;;  %v2599_v36 = vcombine.high %v2591_v32, %v2591_v32  ;;  %v3831_v55 = vrot.slane %v2591_v32, %v12826_v49  ;;  %v1764_v52 = vmax.f32 %v17097_v5, %v1576_v12  ;;  %5019 = vrot.lane.b32.xlu0 %v4999_v60, %s12160_s28 }
 0x1fe   : > { %v3817_v1 = vrot.slane %v3802_v59, %v12826_v49  ;;  %v3824_v37 = vrot.slane %v11325_v0, %v12826_v49  ;;  %v1575_v30 = vcombine.high %v1379_v17, %v1379_v17  ;;  %v2600_v44 = vcombine.high %v2598_v58, %v2598_v58 }
 0x1ff   : > { %v1812_v47 = vmax.f32 %v17098_v15, %v1763_v63  ;;  %v3849_v25 = vcombine.low %v2598_v58, %v2599_v36  ;;  %v1813_v50 = vmax.f32 %v17099_v57, %v1764_v52  ;;  %v17100_v19 = vcombine.high %v17089_v26, %v17089_v26  ;;  %4734 = vrot.lane.b32.xlu1 %v4720_v48, %s12161_s29  ;;  %v17101_v26 = vld [vmem:[#allocation13_spill] sm:$0xff]  ;;  %v5265_v58 = vld [vmem:[#allocation2 + $0x61] sm:$0x7f] }
 0x200   : > { %v3832_v21 = vcombine.low %v13341_v34, %v3817_v1  ;;  %v3833_v8 = vcombine.low %v3824_v37, %v3831_v55  ;;  %v1762_v3 = vmax.f32 %v17095_v4, %v1575_v30  ;;  %v3850_v10 = vcombine.low %v2600_v44, %v13359_v7  ;;  %v17102_v7 = vld [vmem:[#allocation15_spill] sm:$0xff]  ;;  %v5266_v48 = vld [vmem:[#allocation2 + $0x71] sm:$0x7f] }
 0x201   : > { %v1761_v27 = vmax.f32 %v17100_v19, %v1379_v17  ;;  %v2703_v56 = vrot.slane %v1812_v47, %v12826_v49  ;;  %v3858_v46 = vrot.slane %v3849_v25, %v12826_v49  ;;  %v2727_v29 = vrot.slane %v1813_v50, %v12826_v49  ;;  %5103 = vrot.lane.b32.xlu0 %v5083_v53, %s12161_s29  ;;  %v5250_v0 = vld [vmem:[#allocation2 + $0xf0] sm:$0x7f]  ;;  %v5302_v52 = vld [vmem:[#allocation2 + $0xa1] sm:$0x7f]  ;;  %v17106_v53 = vld [vmem:[#allocation22_spill] sm:$0xff] }
 0x202   : > { %v3840_v9 = vrot.slane %v3832_v21, %v12826_v49  ;;  %v3847_v31 = vrot.slane %v3833_v8, %v12826_v49  ;;  %v3865_v42 = vrot.slane %v3850_v10, %v12826_v49  ;;  %v1811_v54 = vmax.f32 %v17102_v7, %v1762_v3  ;;  %5258 = vst.msk [vmem:[#allocation3 + $0x98] sm:$0x7f] %vm4502_vm6, %v5250_v0  ;;  %v13504_v0 = vpop.permute.xlu0 %4561 }
 0x203   : > { %v1810_v38 = vmax.f32 %v17101_v26, %v1761_v27  ;;  %v2704_v34 = vcombine.high %v2703_v56, %v2703_v56  ;;  %v2711_v51 = vrot.slane %v2703_v56, %v12826_v49  ;;  %v2728_v23 = vcombine.high %v2727_v29, %v2727_v29  ;;  %5049 = vrot.lane.b32.xlu1 %v5035_v61, %s17020_s27  ;;  %v5251_v4 = vld [vmem:[#allocation2 + $0x100] sm:$0x7f]  ;;  %v17103_v56 = vld [vmem:[#allocation41_spill] sm:$0xff] }
 0x204   : > { %v13444_v13 = vrot.slane %v2727_v29, %v12826_v49  ;;  %v3848_v45 = vcombine.low %v3840_v9, %v3847_v31  ;;  %v1382_v28 = vmax.f32 %v1258_v24, 0.0  ;;  %v3880_v32 = vcombine.low %v3858_v46, %v3865_v42  ;;  %5259 = vst.msk [vmem:[#allocation3 + $0xa0] sm:$0x7f] %vm4502_vm6, %v5251_v4  ;;  %v4635_v46 = vld [vmem:[#allocation2 + $0xb0] sm:$0x7f] }
 0x205   : > { %v13449_v20 = vrot.slane %v2704_v34, %v12826_v49  ;;  %v2655_v14 = vrot.slane %v1810_v38, %v12826_v49  ;;  %v13454_v12 = vrot.slane %v2728_v23, %v12826_v49  ;;  %v2679_v40 = vrot.slane %v1811_v54, %v12826_v49  ;;  %5284 = vrot.lane.b32.xlu0 %v5265_v58, %s16929_s17  ;;  %v17107_v23 = vld [vmem:[#allocation24_spill] sm:$0xff] }
 0x206   : > { %v1253_v59 = vadd.f32 %v13048_v39, %v13054_v62  ;;  %4517 = vst.msk [vmem:[#allocation2 + $0x131] sm:$0x7f] %vm4502_vm6, %v3848_v45  ;;  %v3888_v36 = vrot.slane %v3880_v32, %v12826_v49  ;;  %v1578_v25 = vcombine.high %v1382_v28, %v1382_v28  ;;  %v17104_v3 = vcombine.high %v17103_v56, %v17103_v56 }
 0x207   : > { %v3975_v33 = vrot.slane %v13449_v20, %v12826_v49  ;;  %v11327_v24 = vcombine.high %v2711_v51, %v13449_v20  ;;  %v2656_v63 = vcombine.high %v2655_v14, %v2655_v14  ;;  %v2663_v17 = vrot.slane %v2655_v14, %v12826_v49  ;;  %5316 = vrot.lane.b32.xlu1 %v5302_v52, %s16927_s21  ;;  %v5613_v14 = vld [vmem:[#allocation2 + $0xa1] sm:$0x7f] }
 0x208   : > { %v3994_v39 = vcombine.low %v13444_v13, %v13454_v12  ;;  %v11328_v62 = vcombine.high %v13444_v13, %v13454_v12  ;;  %v2680_v55 = vcombine.high %v2679_v40, %v2679_v40  ;;  %v2687_v47 = vrot.slane %v2679_v40, %v12826_v49  ;;  %4583 = vst.msk [vmem:[#allocation3] sm:$0x7f] %vm4582_vm7, %v13504_v0  ;;  %v5475_v0 = vld [vmem:[#allocation2 + $0xf0] sm:$0x7f] }
 0x209   : > { %v4002_v1 = vrot.slane %v11327_v24, %v12826_v49  ;;  %v2670_v37 = vrot.slane %v2656_v63, %v12826_v49  ;;  %v2671_v15 = vcombine.high %v2663_v17, %v2663_v17  ;;  %v3896_v30 = vcombine.low %v3888_v36, %v3895_v6  ;;  %v17105_v6 = vld [vmem:[#allocation40_spill] sm:$0xff]  ;;  %5286 = vrot.lane.b32.xlu0 %v5266_v48, %s16929_s17  ;;  %v13510_v36 = vpop.permute.xlu1 %4923 }
 0x20a   : > { %v4009_v60 = vrot.slane %v3994_v39, %v12826_v49  ;;  %v2694_v44 = vrot.slane %v2680_v55, %v12826_v49  ;;  %v2695_v50 = vcombine.high %v2687_v47, %v2687_v47  ;;  %v1767_v35 = vmax.f32 %v17104_v3, %v1382_v28  ;;  %4944 = vst.msk [vmem:[#allocation3 + $0x38] sm:$0x7f] %vm4582_vm7, %v13510_v36 }
 0x20b   : > { %v2672_v57 = vcombine.high %v2670_v37, %v2670_v37  ;;  %v3899_v19 = vcombine.low %v2663_v17, %v2670_v37  ;;  %v3927_v27 = vrot.slane %v2671_v15, %v12826_v49  ;;  %4518 = vst.msk [vmem:[#allocation2 + $0x141] sm:$0x7f] %vm4502_vm6, %v3896_v30  ;;  %v1768_v10 = vmax.f32 %v17105_v6, %v1578_v25  ;;  %v17109_v15 = vld [vmem:[#allocation17_spill] sm:$0xff] }
 0x20c   : > { %v4024_v21 = vcombine.low %v4002_v1, %v4009_v60  ;;  %v2696_v8 = vcombine.high %v2694_v44, %v2694_v44  ;;  %v3946_v38 = vcombine.low %v2694_v44, %v2695_v50  ;;  %v1381_v9 = vmax.f32 %v1253_v59, 0.0  ;;  %4650 = vrot.lane.b32.xlu1 %v4635_v46, %s12160_s28  ;;  %v4721_v59 = vld [vmem:[#allocation2 + $0xb1] sm:$0x7f] }
 0x20d   : > { %v3920_v29 = vrot.slane %v3899_v19, %v12826_v49  ;;  %v3945_v26 = vcombine.low %v2672_v57, %v2687_v47  ;;  %v1816_v42 = vmax.f32 %v17106_v53, %v1767_v35  ;;  %v1817_v13 = vmax.f32 %v17107_v23, %v1768_v10  ;;  %5627 = vrot.lane.b32.xlu0 %v5613_v14, %s16929_s17  ;;  %v4895_v4 = vld [vmem:[#allocation2 + $0x131] sm:$0x7f]  ;;  %v13533_v19 = vld [vmem:[%s16889_s2] ss:$0 sm:$0xff]  ;;  %v13541_v10 = vpop.permute.xlu0 %4604 }
 0x20e   : > { %v13491_v31 = vrot.slane %v4024_v21, %v12826_v49  ;;  %v3947_v34 = vcombine.low %v2696_v8, %v2711_v51  ;;  %v3961_v61 = vrot.slane %v3946_v38, %v12826_v49  ;;  %v1577_v45 = vcombine.high %v1381_v9, %v1381_v9  ;;  %4903 = vst.msk [vmem:[#allocation3 + $0x40] sm:$0x7f] %vm4502_vm6, %v4895_v4  ;;  %v5036_v30 = vld [vmem:[#allocation2 + $0xb1] sm:$0x7f]  ;;  %v13547_v38 = vpop.permute.xlu1 %4965  ;;  %v4636_v4 = vld [vmem:[#allocation2 + $0xc0] sm:$0x7f] }
 0x20f   : > { %v3929_v7 = vcombine.low %v3920_v29, %v3927_v27  ;;  %v3954_v54 = vrot.slane %v3945_v26, %v12826_v49  ;;  %v2799_v32 = vrot.slane %v1816_v42, %v12826_v49  ;;  %v2823_v12 = vrot.slane %v1817_v13, %v12826_v49  ;;  %v5471_v57 = vld [vmem:[#allocation2 + $0xb0] sm:$0x7f]  ;;  %4626 = vst.msk [vmem:[#allocation3] sm:$0x7f] %vm4625_vm8, %v13541_v10  ;;  %v5559_v10 = vld [vmem:[#allocation2 + $0xe1] sm:$0x7f] }
 0x210   : > { %v3968_v28 = vrot.slane %v3947_v34, %v12826_v49  ;;  %v17108_v51 = vcombine.high %v17097_v5, %v17097_v5  ;;  %v1766_v17 = vmax.f32 %v17103_v56, %v1577_v45  ;;  %v4016_v58 = vrot.slane %v11328_v62, %v12826_v49  ;;  %4736 = vrot.lane.b32.xlu1 %v4721_v59, %s12161_s29  ;;  %v5556_v23 = vld [vmem:[#allocation2 + $0xb1] sm:$0x7f] }
 0x211   : > { %v3943_v24 = vrot.slane %v3929_v7, %v12826_v49  ;;  %v3976_v63 = vcombine.low %v3954_v54, %v3961_v61  ;;  %v2800_v39 = vcombine.high %v2799_v32, %v2799_v32  ;;  %v2807_v55 = vrot.slane %v2799_v32, %v12826_v49  ;;  %5051 = vrot.lane.b32.xlu0 %v5036_v30, %s17020_s27 }
 0x212   : > { %v1765_v40 = vmax.f32 %v17108_v51, %v1381_v9  ;;  %v3977_v5 = vcombine.low %v3968_v28, %v3975_v33  ;;  %v2824_v52 = vcombine.high %v2823_v12, %v2823_v12  ;;  %v2831_v62 = vrot.slane %v2823_v12, %v12826_v49  ;;  %v17110_v33 = vld [vmem:[#allocation19_spill] sm:$0xff]  ;;  %v13569_v30 = vpop.permute.xlu1 %5582  ;;  %4986 = vst.msk [vmem:[#allocation3 + $0x38] sm:$0x7f] %vm4625_vm8, %v13547_v38 }
 0x213   : > { %v3944_v1 = vcombine.low %v13411_v2, %v3943_v24  ;;  %v3984_v37 = vrot.slane %v3976_v63, %v12826_v49  ;;  %v2814_v44 = vrot.slane %v2800_v39, %v12826_v49  ;;  %v1815_v25 = vmax.f32 %v17110_v33, %v1766_v17  ;;  %v4896_v21 = vld [vmem:[#allocation2 + $0x141] sm:$0x7f]  ;;  %17114 = vst [vmem:[#allocation8_spill] sm:$0xff] %v13569_v30 }
 0x214   : > { %v1814_v47 = vmax.f32 %v17109_v15, %v1765_v40  ;;  %v3991_v60 = vrot.slane %v3977_v5, %v12826_v49  ;;  %v13524_v20 = vrot.slane %v2824_v52, %v12826_v49  ;;  %v2839_v2 = vcombine.high %v2831_v62, %v2831_v62  ;;  %5485 = vrot.lane.b32.xlu1 %v5471_v57, %s16931_s22  ;;  %v17111_v5 = vld [vmem:[#allocation44_spill] sm:$0xff]  ;;  %v13565_v52 = vpop.permute.xlu0 %5497 }
 0x215   : > { %4519 = vst.msk [vmem:[#allocation2 + $0x151] sm:$0x7f] %vm4502_vm6, %v3944_v1  ;;  %v1268_v27 = vadd.f32 %v13533_v19, %v13067_v22  ;;  %v1263_v48 = vadd.f32 %v13533_v19, %v13073_v18  ;;  %v4089_v56 = vcombine.low %v2807_v55, %v2814_v44  ;;  %v11329_v3 = vcombine.high %v2807_v55, %v2814_v44  ;;  %v5303_v18 = vld [vmem:[#allocation2 + $0xb1] sm:$0x7f]  ;;  %v17115_v44 = vld [vmem:[#allocation42_spill] sm:$0xff] }
 0x216   : > { %v2751_v50 = vrot.slane %v1814_v47, %v12826_v49  ;;  %v3992_v8 = vcombine.low %v3984_v37, %v3991_v60  ;;  %v4091_v35 = vcombine.low %v2831_v62, %v13524_v20  ;;  %4904 = vst.msk [vmem:[#allocation3 + $0x48] sm:$0x7f] %vm4502_vm6, %v4896_v21  ;;  %v4119_v46 = vrot.slane %v2839_v2, %v12826_v49  ;;  %v5614_v1 = vld [vmem:[#allocation2 + $0xb1] sm:$0x7f] }
 0x217   : > { %v2775_v26 = vrot.slane %v1815_v25, %v12826_v49  ;;  %v4098_v9 = vrot.slane %v4089_v56, %v12826_v49  ;;  %v4105_v34 = vrot.slane %v11329_v3, %v12826_v49  ;;  %v1384_v42 = vmax.f32 %v1268_v27, 0.0  ;;  %5318 = vrot.lane.b32.xlu0 %v5303_v18, %s16927_s21  ;;  %17113 = vst [vmem:[#allocation12_spill] sm:$0xff] %v13565_v52  ;;  %v17116_v25 = vld [vmem:[#allocation26_spill] sm:$0xff]  ;;  %v5037_v56 = vld [vmem:[#allocation2 + $0xc1] sm:$0x7f] }
 0x218   : > { %v2752_v29 = vcombine.high %v2751_v50, %v2751_v50  ;;  %v2759_v22 = vrot.slane %v2751_v50, %v12826_v49  ;;  %4520 = vst.msk [vmem:[#allocation2 + $0x161] sm:$0x7f] %vm4502_vm6, %v3992_v8  ;;  %v4112_v53 = vrot.slane %v4091_v35, %v12826_v49  ;;  %5570 = vrot.lane.b32.xlu1 %v5556_v23, %s16925_s23  ;;  %v1383_v8 = vmax.f32 %v1263_v48, 0.0  ;;  %v17117_v3 = vld [vmem:[#allocation47_spill] sm:$0xff]  ;;  %v5865_v18 = vld [vmem:[#allocation2 + $0xb1] sm:$0x7f] }
 0x219   : > { %v2776_v54 = vcombine.high %v2775_v26, %v2775_v26  ;;  %v2783_v61 = vrot.slane %v2775_v26, %v12826_v49  ;;  %v4120_v45 = vcombine.low %v4098_v9, %v4105_v34  ;;  %v1580_v32 = vcombine.high %v1384_v42, %v1384_v42 }
 0x21a   : > { %v2766_v13 = vrot.slane %v2752_v29, %v12826_v49  ;;  %v2767_v7 = vcombine.high %v2759_v22, %v2759_v22  ;;  %v4121_v14 = vcombine.low %v4112_v53, %v4119_v46  ;;  %v4023_v28 = vrot.slane %v2759_v22, %v12826_v49  ;;  %v17118_v29 = vld [vmem:[#allocation28_spill] sm:$0xff] }
 0x21b   : > { %v2790_v51 = vrot.slane %v2776_v54, %v12826_v49  ;;  %v2791_v40 = vcombine.high %v2783_v61, %v2783_v61  ;;  %v4128_v24 = vrot.slane %v4120_v45, %v12826_v49  ;;  %v17112_v39 = vcombine.high %v17111_v5, %v17111_v5  ;;  %4652 = vrot.lane.b32.xlu0 %v4636_v4, %s12160_s28  ;;  %v13594_v54 = vpop.permute.xlu0 %5540 }
 0x21c   : > { %v2768_v12 = vcombine.high %v2766_v13, %v2766_v13  ;;  %v4041_v59 = vcombine.low %v2766_v13, %v2767_v7  ;;  %v4135_v63 = vrot.slane %v4121_v14, %v12826_v49  ;;  %v4025_v17 = vcombine.low %v4016_v58, %v4023_v28  ;;  %5629 = vrot.lane.b32.xlu1 %v5614_v1, %s16929_s17  ;;  %v4897_v2 = vld [vmem:[#allocation2 + $0x151] sm:$0x7f] }
 0x21d   : > { %v1771_v55 = vmax.f32 %v17112_v39, %v1384_v42  ;;  %v2792_v37 = vcombine.high %v2790_v51, %v2790_v51  ;;  %v4043_v15 = vcombine.low %v2790_v51, %v2791_v40  ;;  %v1772_v33 = vmax.f32 %v17115_v44, %v1580_v32  ;;  %4905 = vst.msk [vmem:[#allocation3 + $0x50] sm:$0x7f] %vm4502_vm6, %v4897_v2  ;;  %v17121_v28 = vld [vmem:[#allocation21_spill] sm:$0xff] }
 0x21e   : > { %v4042_v62 = vcombine.low %v2768_v12, %v2783_v61  ;;  %v4050_v47 = vrot.slane %v4041_v59, %v12826_v49  ;;  %v4136_v60 = vcombine.low %v4128_v24, %v4135_v63  ;;  %v4039_v58 = vrot.slane %v4025_v17, %v12826_v49  ;;  %17120 = vst [vmem:[#allocation9_spill] sm:$0xff] %v13594_v54  ;;  %v5304_v12 = vld [vmem:[#allocation2 + $0xc1] sm:$0x7f]  ;;  %v13600_v51 = vpop.permute.xlu1 %4691 }
 0x21f   : > { %v1820_v57 = vmax.f32 %v17116_v25, %v1771_v55  ;;  %v4064_v27 = vrot.slane %v4043_v15, %v12826_v49  ;;  %v4071_v21 = vrot.slane %v2792_v37, %v12826_v49  ;;  %v1559_v35 = vcombine.high %v17117_v3, %v17117_v3  ;;  %5053 = vrot.lane.b32.xlu0 %v5037_v56, %s17020_s27  ;;  %v4898_v61 = vld [vmem:[#allocation2 + $0x161] sm:$0x7f] }
 0x220   : > { %v4057_v50 = vrot.slane %v4042_v62, %v12826_v49  ;;  %4523 = vst.msk [vmem:[#allocation2 + $0x191] sm:$0x7f] %vm4502_vm6, %v4136_v60  ;;  %v4040_v46 = vcombine.low %v13491_v31, %v4039_v58  ;;  %v1821_v22 = vmax.f32 %v17118_v29, %v1772_v33  ;;  %v1579_v48 = vcombine.high %v1383_v8, %v1383_v8  ;;  %v4722_v24 = vld [vmem:[#allocation2 + $0xc1] sm:$0x7f] }
 0x221   : > { %v2895_v26 = vrot.slane %v1820_v57, %v12826_v49  ;;  %v4073_v34 = vcombine.low %v4064_v27, %v4071_v21  ;;  %v17119_v53 = vcombine.high %v17105_v6, %v17105_v6  ;;  %5879 = vrot.lane.b32.xlu1 %v5865_v18, %s12158_s24  ;;  %v1278_v7 = vadd.f32 %v13533_v19, %v13094_v11  ;;  %v17122_v17 = vld [vmem:[#allocation23_spill] sm:$0xff]  ;;  %v17123_v18 = vld [vmem:[#allocation46_spill] sm:$0xff] }
 0x222   : > { %v4072_v9 = vcombine.low %v4050_v47, %v4057_v50  ;;  %4521 = vst.msk [vmem:[#allocation2 + $0x171] sm:$0x7f] %vm4502_vm6, %v4040_v46  ;;  %v2919_v13 = vrot.slane %v1821_v22, %v12826_v49  ;;  %v1770_v14 = vmax.f32 %v17111_v5, %v1579_v48  ;;  %4906 = vst.msk [vmem:[#allocation3 + $0x58] sm:$0x7f] %vm4502_vm6, %v4898_v61  ;;  %v5615_v33 = vld [vmem:[#allocation2 + $0xc1] sm:$0x7f]  ;;  %v13619_v25 = vpop.permute.xlu1 %5007 }
 0x223   : > { %v1769_v42 = vmax.f32 %v17119_v53, %v1383_v8  ;;  %v2896_v23 = vcombine.high %v2895_v26, %v2895_v26  ;;  %v2903_v31 = vrot.slane %v2895_v26, %v12826_v49  ;;  %v4087_v6 = vrot.slane %v4073_v34, %v12826_v49  ;;  %5320 = vrot.lane.b32.xlu0 %v5304_v12, %s16927_s21  ;;  %v5472_v21 = vld [vmem:[#allocation2 + $0xc0] sm:$0x7f]  ;;  %v17125_v48 = vld [vmem:[#allocation45_spill] sm:$0xff] }
 0x224   : > { %v4080_v45 = vrot.slane %v4072_v9, %v12826_v49  ;;  %v2920_v59 = vcombine.high %v2919_v13, %v2919_v13  ;;  %v2927_v11 = vrot.slane %v2919_v13, %v12826_v49  ;;  %v1386_v4 = vmax.f32 %v1278_v7, 0.0  ;;  %v5039_v7 = vld [vmem:[#allocation2 + $0xe1] sm:$0x7f]  ;;  %5028 = vst.msk [vmem:[#allocation3 + $0x38] sm:$0x7f] %vm4669_vm9, %v13619_v25 }
 0x225   : > { %v1818_v32 = vmax.f32 %v17121_v28, %v1769_v42  ;;  %v2910_v40 = vrot.slane %v2896_v23, %v12826_v49  ;;  %v1819_v39 = vmax.f32 %v17122_v17, %v1770_v14  ;;  %v2840_v5 = vcombine.high %v13524_v20, %v13524_v20  ;;  %4738 = vrot.lane.b32.xlu1 %v4722_v24, %s12161_s29  ;;  %v17126_v14 = vld [vmem:[#allocation30_spill] sm:$0xff] }
 0x226   : > { %v4088_v63 = vcombine.low %v4080_v45, %v4087_v6  ;;  %v13612_v1 = vrot.slane %v2920_v59, %v12826_v49  ;;  %v1273_v15 = vadd.f32 %v13533_v19, %v13100_v41  ;;  %v2935_v47 = vcombine.high %v2927_v11, %v2927_v11  ;;  %v13627_v41 = vpop.permute.xlu0 %5274  ;;  %v13639_v61 = vpop.permute.xlu1 %5091 }
 0x227   : > { %v2847_v55 = vrot.slane %v1818_v32, %v12826_v49  ;;  %v4186_v37 = vcombine.low %v2903_v31, %v2910_v40  ;;  %v11331_v62 = vcombine.high %v2903_v31, %v2910_v40  ;;  %v2871_v20 = vrot.slane %v1819_v39, %v12826_v49  ;;  %5631 = vrot.lane.b32.xlu0 %v5615_v33, %s16929_s17  ;;  %v17127_v32 = vld [vmem:[#allocation32_spill] sm:$0xff]  ;;  %v5557_v40 = vld [vmem:[#allocation2 + $0xc1] sm:$0x7f] }
 0x228   : > { %4522 = vst.msk [vmem:[#allocation2 + $0x181] sm:$0x7f] %vm4502_vm6, %v4088_v63  ;;  %v4215_v50 = vrot.slane %v2927_v11, %v12826_v49  ;;  %v1582_v27 = vcombine.high %v1386_v4, %v1386_v4  ;;  %v17124_v9 = vcombine.high %v17123_v18, %v17123_v18  ;;  %v1385_v13 = vmax.f32 %v1273_v15, 0.0 }
 0x229   : > { %v2848_v60 = vcombine.high %v2847_v55, %v2847_v55  ;;  %v2855_v58 = vrot.slane %v2847_v55, %v12826_v49  ;;  %v13622_v57 = vrot.slane %v4186_v37, %v12826_v49  ;;  %v4208_v2 = vrot.slane %v11331_v62, %v12826_v49  ;;  %5487 = vrot.lane.b32.xlu1 %v5472_v21, %s16931_s22  ;;  %v4899_v59 = vld [vmem:[#allocation2 + $0x171] sm:$0x7f] }
 0x22a   : > { %v2872_v46 = vcombine.high %v2871_v20, %v2871_v20  ;;  %v2879_v29 = vrot.slane %v2871_v20, %v12826_v49  ;;  %v1775_v34 = vmax.f32 %v17124_v9, %v1386_v4  ;;  %v1776_v53 = vmax.f32 %v17125_v48, %v1582_v27  ;;  %4907 = vst.msk [vmem:[#allocation3 + $0x60] sm:$0x7f] %vm4502_vm6, %v4899_v59  ;;  %v4637_v20 = vld [vmem:[#allocation2 + $0xd0] sm:$0x7f]  ;;  %v13663_v33 = vpop.permute.xlu1 %5669  ;;  %v4638_v59 = vld [vmem:[#allocation2 + $0xe0] sm:$0x7f] }
 0x22b   : > { %v2862_v8 = vrot.slane %v2848_v60, %v12826_v49  ;;  %v2863_v56 = vcombine.high %v2855_v58, %v2855_v58  ;;  %v13632_v22 = vcombine.low %v4208_v2, %v4215_v50  ;;  %v4137_v26 = vcombine.low %v2840_v5, %v2855_v58  ;;  %5057 = vrot.lane.b32.xlu0 %v5039_v7, %s17020_s27  ;;  %v13658_v62 = vpop.permute.xlu0 %4695 }
 0x22c   : > { %v2886_v23 = vrot.slane %v2872_v46, %v12826_v49  ;;  %v13642_v45 = vcombine.low %v13612_v1, %v2935_v47  ;;  %v1824_v28 = vmax.f32 %v17126_v14, %v1775_v34  ;;  %v1825_v12 = vmax.f32 %v17127_v32, %v1776_v53  ;;  %5295 = vst.msk [vmem:[#allocation3 + $0x70] sm:$0x7f] %vm4582_vm7, %v13627_v41 }
 0x22d   : > { %v2864_v42 = vcombine.high %v2862_v8, %v2862_v8  ;;  %v4138_v31 = vcombine.low %v2862_v8, %v2863_v56  ;;  %v4146_v6 = vrot.slane %v4137_v26, %v12826_v49  ;;  %v4231_v11 = vrot.slane %v13632_v22, %v12826_v49  ;;  %5572 = vrot.lane.b32.xlu1 %v5557_v40, %s16925_s23 }
 0x22e   : > { %v11330_v63 = vcombine.high %v2879_v29, %v2886_v23  ;;  %v2991_v17 = vrot.slane %v1824_v28, %v12826_v49  ;;  %v3015_v39 = vrot.slane %v1825_v12, %v12826_v49  ;;  %v1581_v5 = vcombine.high %v1385_v13, %v1385_v13  ;;  %v13683_v14 = vpop.permute.xlu1 %5011 }
 0x22f   : > { %v4139_v4 = vcombine.low %v2864_v42, %v2879_v29  ;;  %v4153_v24 = vrot.slane %v4138_v31, %v12826_v49  ;;  %v17128_v55 = vcombine.high %v17115_v44, %v17115_v44  ;;  %v4167_v47 = vrot.slane %v2886_v23, %v12826_v49  ;;  %4654 = vrot.lane.b32.xlu0 %v4637_v20, %s12160_s28  ;;  %v5866_v44 = vld [vmem:[#allocation2 + $0xc1] sm:$0x7f]  ;;  %v13677_v42 = vpop.permute.xlu0 %5278 }
 0x230   : > { %v4194_v58 = vrot.slane %v11330_v63, %v12826_v49  ;;  %v2992_v2 = vcombine.high %v2991_v17, %v2991_v17  ;;  %v2999_v50 = vrot.slane %v2991_v17, %v12826_v49  ;;  %v3016_v27 = vcombine.high %v3015_v39, %v3015_v39  ;;  %v4900_v8 = vld [vmem:[#allocation2 + $0x181] sm:$0x7f]  ;;  %5297 = vst.msk [vmem:[#allocation3 + $0x80] sm:$0x7f] %vm4582_vm7, %v13677_v42 }
 0x231   : > { %v1773_v37 = vmax.f32 %v17128_v55, %v1385_v13  ;;  %v4160_v15 = vrot.slane %v4139_v4, %v12826_v49  ;;  %v4168_v60 = vcombine.low %v4146_v6, %v4153_v24  ;;  %v3023_v21 = vrot.slane %v3015_v39, %v12826_v49  ;;  %5881 = vrot.lane.b32.xlu1 %v5866_v44, %s12158_s24  ;;  %v5038_v6 = vld [vmem:[#allocation2 + $0xd1] sm:$0x7f]  ;;  %v4724_v44 = vld [vmem:[#allocation2 + $0xe1] sm:$0x7f] }
 0x232   : > { %v4216_v29 = vcombine.low %v4194_v58, %v13622_v57  ;;  %v1774_v22 = vmax.f32 %v17123_v18, %v1581_v5  ;;  %4908 = vst.msk [vmem:[#allocation3 + $0x68] sm:$0x7f] %vm4502_vm6, %v4900_v8  ;;  %v3006_v26 = vrot.slane %v2992_v2, %v12826_v49  ;;  %v3007_v9 = vcombine.high %v2999_v50, %v2999_v50  ;;  %v17129_v57 = vld [vmem:[#allocation25_spill] sm:$0xff]  ;;  %v17130_v18 = vld [vmem:[#allocation27_spill] sm:$0xff]  ;;  %v13701_v20 = vpop.permute.xlu1 %5095 }
 0x233   : > { %v4169_v56 = vcombine.low %v4160_v15, %v4167_v47  ;;  %v4176_v46 = vrot.slane %v4168_v60, %v12826_v49  ;;  %v13675_v34 = vrot.slane %v3016_v27, %v12826_v49  ;;  %v3031_v53 = vcombine.high %v3023_v21, %v3023_v21  ;;  %5055 = vrot.lane.b32.xlu0 %v5038_v6, %s17020_s27  ;;  %v13695_v15 = vpop.permute.xlu0 %5673  ;;  %v5305_v58 = vld [vmem:[#allocation2 + $0xd1] sm:$0x7f] }
 0x234   : > { %v4224_v31 = vrot.slane %v4216_v29, %v12826_v49  ;;  %v1822_v13 = vmax.f32 %v17129_v57, %v1773_v37  ;;  %v1823_v7 = vmax.f32 %v17130_v18, %v1774_v22  ;;  %v3008_v28 = vcombine.high %v3006_v26, %v3006_v26  ;;  %v4639_v57 = vld [vmem:[#allocation2 + $0xf0] sm:$0x7f] }
 0x235   : > { %v4183_v23 = vrot.slane %v4169_v56, %v12826_v49  ;;  %v4283_v32 = vcombine.low %v2999_v50, %v3006_v26  ;;  %v4330_v12 = vcombine.low %v13675_v34, %v3031_v53  ;;  %v2936_v40 = vcombine.high %v13612_v1, %v13612_v1  ;;  %4656 = vrot.lane.b32.xlu1 %v4638_v59, %s12160_s28 }
 0x236   : > { %v4232_v24 = vcombine.low %v4224_v31, %v4231_v11  ;;  %v2943_v63 = vrot.slane %v1822_v13, %v12826_v49  ;;  %v2967_v17 = vrot.slane %v1823_v7, %v12826_v49  ;;  %v4311_v5 = vrot.slane %v3007_v9, %v12826_v49  ;;  %v13719_v13 = vpop.permute.xlu1 %5530 }
 0x237   : > { %v4184_v4 = vcombine.low %v4176_v46, %v4183_v23  ;;  %v4304_v39 = vrot.slane %v4283_v32, %v12826_v49  ;;  %v4329_v55 = vcombine.low %v3008_v28, %v3023_v21  ;;  %v4345_v37 = vrot.slane %v4330_v12, %v12826_v49  ;;  %5322 = vrot.lane.b32.xlu0 %v5305_v58, %s16927_s21  ;;  %v13716_v53 = vpop.permute.xlu0 %4693  ;;  %v5306_v28 = vld [vmem:[#allocation2 + $0xe1] sm:$0x7f]  ;;  %v5040_v58 = vld [vmem:[#allocation2 + $0xf1] sm:$0x7f] }
 0x238   : > { %4525 = vst.msk [vmem:[#allocation2 + $0x1d1] sm:$0x7f] %vm4502_vm6, %v4232_v24  ;;  %v2944_v1 = vcombine.high %v2943_v63, %v2943_v63  ;;  %v2951_v11 = vrot.slane %v2943_v63, %v12826_v49  ;;  %v2968_v47 = vcombine.high %v2967_v17, %v2967_v17  ;;  %v2975_v60 = vrot.slane %v2967_v17, %v12826_v49  ;;  %v17131_v24 = vld [vmem:[#allocation43_spill] sm:$0xff]  ;;  %v17132_v17 = vld [vmem:[#allocation33_spill] sm:$0xff] }
 0x239   : > { %4524 = vst.msk [vmem:[#allocation2 + $0x1c1] sm:$0x7f] %vm4502_vm6, %v4184_v4  ;;  %v4313_v2 = vcombine.low %v4304_v39, %v4311_v5  ;;  %v4338_v50 = vrot.slane %v4329_v55, %v12826_v49  ;;  %v1288_v27 = vadd.f32 %v13533_v19, %v13114_v16  ;;  %v1283_v21 = vadd.f32 %v13533_v19, %v13123_v43 }
 0x23a   : > { %v2958_v8 = vrot.slane %v2944_v1, %v12826_v49  ;;  %v2959_v56 = vcombine.high %v2951_v11, %v2951_v11  ;;  %v2982_v46 = vrot.slane %v2968_v47, %v12826_v49  ;;  %v4234_v29 = vcombine.low %v2936_v40, %v2951_v11  ;;  %4742 = vrot.lane.b32.xlu1 %v4724_v44, %s12161_s29 }
 0x23b   : > { %v13712_v22 = vcombine.low %v4338_v50, %v4345_v37  ;;  %v4242_v26 = vrot.slane %v13642_v45, %v12826_v49  ;;  %v1388_v16 = vmax.f32 %v1288_v27, 0.0  ;;  %v1387_v9 = vmax.f32 %v1283_v21, 0.0  ;;  %4658 = vrot.lane.b32.xlu0 %v4639_v57, %s12160_s28  ;;  %v17134_v27 = vld [vmem:[#allocation34_spill] sm:$0xff] }
 0x23c   : > { %v2960_v43 = vcombine.high %v2958_v8, %v2958_v8  ;;  %v4235_v19 = vcombine.low %v2958_v8, %v2959_v56  ;;  %v4249_v23 = vrot.slane %v4234_v29, %v12826_v49  ;;  %v4281_v31 = vcombine.low %v2975_v60, %v2982_v46  ;;  %v5474_v56 = vld [vmem:[#allocation2 + $0xe0] sm:$0x7f] }
 0x23d   : > { %v13722_v18 = vrot.slane %v4313_v2, %v12826_v49  ;;  %v11332_v7 = vcombine.high %v2975_v60, %v2982_v46  ;;  %v1584_v6 = vcombine.high %v1388_v16, %v1388_v16  ;;  %v1779_v45 = vmax.f32 %v1559_v35, %v1388_v16  ;;  %v13735_v35 = vpop.permute.xlu0 %5009  ;;  %v13743_v2 = vpop.permute.xlu1 %5839  ;;  %v17135_v46 = vld [vmem:[#allocation29_spill] sm:$0xff] }
 0x23e   : > { %v4256_v32 = vrot.slane %v4235_v19, %v12826_v49  ;;  %v4263_v12 = vrot.slane %v2960_v43, %v12826_v49  ;;  %v4264_v40 = vcombine.low %v4242_v26, %v4249_v23  ;;  %v4290_v59 = vrot.slane %v4281_v31, %v12826_v49  ;;  %5324 = vrot.lane.b32.xlu1 %v5306_v28, %s16927_s21  ;;  %v17136_v19 = vld [vmem:[#allocation31_spill] sm:$0xff] }
 0x23f   : > { %v4297_v4 = vrot.slane %v11332_v7, %v12826_v49  ;;  %v1780_v63 = vmax.f32 %v17131_v24, %v1584_v6  ;;  %v1828_v39 = vmax.f32 %v17132_v17, %v1779_v45  ;;  %v1583_v5 = vcombine.high %v1387_v9, %v1387_v9  ;;  %5059 = vrot.lane.b32.xlu0 %v5040_v58, %s17020_s27  ;;  %v4534_v38 = vld [vmem:[#allocation2 + $0x1d0] sm:$0x7f] }
 0x240   : > { %v4533_v55 = vld [vmem:[#allocation2 + $0x1c0] sm:$0x7f]  ;;  %v4265_v37 = vcombine.low %v4256_v32, %v4263_v12  ;;  %v4272_v1 = vrot.slane %v4264_v40, %v12826_v49  ;;  %v17133_v11 = vcombine.high %v17125_v48, %v17125_v48  ;;  %v3032_v60 = vcombine.high %v13675_v34, %v13675_v34  ;;  %4541 = vst.msk [vmem:[#allocation3 + $0x10] sm:$0x7f] %vm4502_vm6, %v4534_v38 }
 0x241   : > { %4540 = vst.msk [vmem:[#allocation3 + $0x8] sm:$0x7f] %vm4502_vm6, %v4533_v55  ;;  %v4312_v50 = vcombine.low %v4290_v59, %v4297_v4  ;;  %v1829_v21 = vmax.f32 %v17134_v27, %v1780_v63  ;;  %v3087_v44 = vrot.slane %v1828_v39, %v12826_v49  ;;  %v1778_v8 = vmax.f32 %v17117_v3, %v1583_v5  ;;  %v5277_v3 = vpop.permute.xlu0 %5276  ;;  %v13773_v36 = vpop.permute.xlu1 %5923  ;;  %v4548_v63 = vld [vmem:[#allocation2 + $0x131] sm:$0x7f]  ;;  %v4640_v38 = vld [vmem:[#allocation2 + $0x100] sm:$0x7f] }
 0x242   : > { %v1777_v47 = vmax.f32 %v17133_v11, %v1387_v9  ;;  %v4279_v48 = vrot.slane %v4265_v37, %v12826_v49  ;;  %5491 = vrot.lane.b32.xlu1 %v5474_v56, %s16931_s22  ;;  %5296 = vst.msk [vmem:[#allocation3 + $0x78] sm:$0x7f] %vm4582_vm7, %v5277_v3  ;;  %v5473_v3 = vld [vmem:[#allocation2 + $0xd0] sm:$0x7f] }
 0x243   : > { %v4320_v34 = vrot.slane %v4312_v50, %v12826_v49  ;;  %v3088_v26 = vcombine.high %v3087_v44, %v3087_v44  ;;  %v13755_v16 = vrot.slane %v3087_v44, %v12826_v49  ;;  %v3111_v9 = vrot.slane %v1829_v21, %v12826_v49  ;;  %5493 = vrot.lane.b32.xlu0 %v5475_v0, %s16931_s22 }
 0x244   : > { %v1826_v29 = vmax.f32 %v17135_v46, %v1777_v47  ;;  %v4280_v43 = vcombine.low %v4272_v1, %v4279_v48  ;;  %v1827_v23 = vmax.f32 %v17136_v19, %v1778_v8  ;;  %v4723_v1 = vld [vmem:[#allocation2 + $0xd1] sm:$0x7f] }
 0x245   : > { %v4328_v41 = vcombine.low %v4320_v34, %v13722_v18  ;;  %v3102_v42 = vrot.slane %v3088_v26, %v12826_v49  ;;  %v3103_v57 = vcombine.high %v13755_v16, %v13755_v16  ;;  %v3112_v7 = vcombine.high %v3111_v9, %v3111_v9  ;;  %v13790_v40 = vpop.permute.xlu0 %5671  ;;  %v13793_v17 = vpop.permute.xlu1 %5093  ;;  %v4808_v46 = vld [vmem:[#allocation2 + $0x131] sm:$0x7f] }
 0x246   : > { %v3039_v31 = vrot.slane %v1826_v29, %v12826_v49  ;;  %4526 = vst.msk [vmem:[#allocation2 + $0x1e1] sm:$0x7f] %vm4502_vm6, %v4280_v43  ;;  %v3119_v6 = vrot.slane %v3111_v9, %v12826_v49  ;;  %5576 = vrot.lane.b32.xlu1 %v5559_v10, %s16925_s23  ;;  %v3063_v12 = vrot.slane %v1827_v23, %v12826_v49 }
 0x247   : > { %4527 = vst.msk [vmem:[#allocation2 + $0x1f1] sm:$0x7f] %vm4502_vm6, %v4328_v41  ;;  %v3104_v28 = vcombine.high %v3102_v42, %v3102_v42  ;;  %v3126_v25 = vrot.slane %v3112_v7, %v12826_v49  ;;  %v4425_v32 = vcombine.low %v3102_v42, %v3103_v57  ;;  %4563 = vrot.lane.b32.xlu0 %v4548_v63, %s16929_s17 }
 0x248   : > { %v3040_v45 = vcombine.high %v3039_v31, %v3039_v31  ;;  %v3047_v18 = vrot.slane %v3039_v31, %v12826_v49  ;;  %v3127_v59 = vcombine.high %v3119_v6, %v3119_v6  ;;  %v3064_v37 = vcombine.high %v3063_v12, %v3063_v12 }
 0x249   : > { %v3128_v39 = vcombine.high %v3126_v25, %v3126_v25  ;;  %v4426_v5 = vcombine.low %v3104_v28, %v3119_v6  ;;  %v4434_v55 = vrot.slane %v4425_v32, %v12826_v49  ;;  %v3071_v47 = vrot.slane %v3063_v12, %v12826_v49  ;;  %v13804_v8 = vpop.permute.xlu0 %4699  ;;  %v13807_v29 = vpop.permute.xlu1 %5528  ;;  %v5558_v28 = vld [vmem:[#allocation2 + $0xd1] sm:$0x7f] }
 0x24a   : > { %v3054_v4 = vrot.slane %v3040_v45, %v12826_v49  ;;  %v4331_v24 = vcombine.low %v3032_v60, %v3047_v18  ;;  %v4427_v11 = vcombine.low %v3126_v25, %v3127_v59  ;;  %4740 = vrot.lane.b32.xlu1 %v4723_v1, %s12161_s29  ;;  %v3078_v21 = vrot.slane %v3064_v37, %v12826_v49  ;;  %v4952_v37 = vld [vmem:[#allocation2 + $0x132] sm:$0x7f] }
 0x24b   : > { %v4441_v60 = vrot.slane %v4426_v5, %v12826_v49  ;;  %v4455_v27 = vrot.slane %v3128_v39, %v12826_v49  ;;  %17137 = vst [vmem:[#allocation37_spill] sm:$0xff] %v13804_v8  ;;  %4822 = vrot.lane.b32.xlu0 %v4808_v46, %s12158_s24  ;;  %v4368_v43 = vrot.slane %v13712_v22, %v12826_v49  ;;  %v4725_v5 = vld [vmem:[#allocation2 + $0xf1] sm:$0x7f] }
 0x24c   : > { %v4352_v58 = vrot.slane %v4331_v24, %v12826_v49  ;;  %v4359_v50 = vrot.slane %v3054_v4, %v12826_v49  ;;  %v11333_v44 = vcombine.high %v3047_v18, %v3054_v4  ;;  %v4448_v56 = vrot.slane %v4427_v11, %v12826_v49  ;;  %v4726_v24 = vld [vmem:[#allocation2 + $0x101] sm:$0x7f]  ;;  %v5307_v11 = vld [vmem:[#allocation2 + $0xf1] sm:$0x7f] }
 0x24d   : > { %v4456_v34 = vcombine.low %v4434_v55, %v4441_v60  ;;  %v4378_v26 = vcombine.low %v3071_v47, %v3078_v21  ;;  %v11334_v9 = vcombine.high %v3071_v47, %v3078_v21  ;;  %v4407_v19 = vrot.slane %v13755_v16, %v12826_v49  ;;  %v4535_v0 = vld [vmem:[#allocation2 + $0x1e0] sm:$0x7f]  ;;  %v13820_v10 = vpop.permute.xlu0 %5015  ;;  %v13824_v6 = vpop.permute.xlu1 %5837  ;;  %v5119_v46 = vld [vmem:[#allocation2 + $0x131] sm:$0x7f] }
 0x24e   : > { %v4361_v48 = vcombine.low %v4352_v58, %v4359_v50  ;;  %v4457_v23 = vcombine.low %v4448_v56, %v4455_v27  ;;  %5489 = vrot.lane.b32.xlu1 %v5473_v3, %s16931_s22  ;;  %v4386_v42 = vrot.slane %v11333_v44, %v12826_v49  ;;  %17138 = vst [vmem:[#allocation36_spill] sm:$0xff] %v13820_v10  ;;  %4542 = vst.msk [vmem:[#allocation3 + $0x18] sm:$0x7f] %vm4502_vm6, %v4535_v0  ;;  %v4536_v32 = vld [vmem:[#allocation2 + $0x1f0] sm:$0x7f] }
 0x24f   : > { %v4464_v41 = vrot.slane %v4456_v34, %v12826_v49  ;;  %v4393_v57 = vrot.slane %v4378_v26, %v12826_v49  ;;  %v4400_v7 = vrot.slane %v11334_v9, %v12826_v49  ;;  %4660 = vrot.lane.b32.xlu0 %v4640_v38, %s12160_s28  ;;  %4543 = vst.msk [vmem:[#allocation3 + $0x20] sm:$0x7f] %vm4502_vm6, %v4536_v32  ;;  %v5041_v50 = vld [vmem:[#allocation2 + $0x101] sm:$0x7f]  ;;  %v5560_v27 = vld [vmem:[#allocation2 + $0xf1] sm:$0x7f] }
 0x250   : > { %v4375_v31 = vrot.slane %v4361_v48, %v12826_v49  ;;  %v4471_v22 = vrot.slane %v4457_v23, %v12826_v49  ;;  %v5308_v56 = vld [vmem:[#allocation2 + $0x101] sm:$0x7f]  ;;  %v5203_v3 = vld [vmem:[#allocation2 + $0x132] sm:$0x7f] }
 0x251   : > { %v4408_v45 = vcombine.low %v4386_v42, %v4393_v57  ;;  %v4409_v18 = vcombine.low %v4400_v7, %v4407_v19  ;;  %v5283_v4 = vpop.permute.xlu0 %5282  ;;  %v13834_v63 = vpop.permute.xlu1 %5921  ;;  %v5561_v26 = vld [vmem:[#allocation2 + $0x101] sm:$0x7f]  ;;  %v5781_v19 = vld [vmem:[#allocation2 + $0x132] sm:$0x7f] }
 0x252   : > { %v4376_v16 = vcombine.low %v4368_v43, %v4375_v31  ;;  %v4472_v25 = vcombine.low %v4464_v41, %v4471_v22  ;;  %5574 = vrot.lane.b32.xlu1 %v5558_v28, %s16925_s23  ;;  %5299 = vst.msk [vmem:[#allocation3 + $0x90] sm:$0x7f] %vm4582_vm7, %v5283_v4  ;;  %v5386_v31 = vld [vmem:[#allocation2 + $0x131] sm:$0x7f]  ;;  %v4549_v41 = vld [vmem:[#allocation2 + $0x141] sm:$0x7f] }
 0x253   : > { %v4416_v12 = vrot.slane %v4408_v45, %v12826_v49  ;;  %v4423_v59 = vrot.slane %v4409_v18, %v12826_v49  ;;  %4746 = vrot.lane.b32.xlu0 %v4726_v24, %s12161_s29  ;;  %v5476_v57 = vld [vmem:[#allocation2 + $0x100] sm:$0x7f]  ;;  %v4550_v22 = vld [vmem:[#allocation2 + $0x151] sm:$0x7f] }
 0x254   : > { %4528 = vst.msk [vmem:[#allocation2 + $0x201] sm:$0x7f] %vm4502_vm6, %v4376_v16  ;;  %4530 = vst.msk [vmem:[#allocation2 + $0x221] sm:$0x7f] %vm4502_vm6, %v4472_v25  ;;  %v5697_v38 = vld [vmem:[#allocation2 + $0x131] sm:$0x7f] }
 0x255   : > { %v4424_v39 = vcombine.low %v4416_v12, %v4423_v59  ;;  %v13839_v55 = vpop.permute.xlu0 %5534  ;;  %v13841_v1 = vpop.permute.xlu1 %5099  ;;  %v4809_v18 = vld [vmem:[#allocation2 + $0x141] sm:$0x7f]  ;;  %v4810_v25 = vld [vmem:[#allocation2 + $0x151] sm:$0x7f] }
 0x256   : > { %4744 = vrot.lane.b32.xlu1 %v4725_v5, %s12161_s29  ;;  %17139 = vst [vmem:[#allocation14_spill] sm:$0xff] %v13839_v55  ;;  %17140 = vst [vmem:[#allocation16_spill] sm:$0xff] %v13841_v1  ;;  %v4953_v12 = vld [vmem:[#allocation2 + $0x142] sm:$0x7f]  ;;  %v4954_v5 = vld [vmem:[#allocation2 + $0x152] sm:$0x7f] }
 0x257   : > { %4529 = vst.msk [vmem:[#allocation2 + $0x211] sm:$0x7f] %vm4502_vm6, %v4424_v39  ;;  %4967 = vrot.lane.b32.xlu0 %v4952_v37, %s16927_s21  ;;  %v5387_v24 = vld [vmem:[#allocation2 + $0x141] sm:$0x7f] }
 0x259   : > { %v13845_v58 = vpop.permute.xlu0 %4697  ;;  %v13848_v60 = vpop.permute.xlu1 %5097 }
 0x25a   : > { %5326 = vrot.lane.b32.xlu1 %v5307_v11, %s16927_s21  ;;  %v5388_v11 = vld [vmem:[#allocation2 + $0x151] sm:$0x7f] }
 0x25b   : > { %v4537_v47 = vld [vmem:[#allocation2 + $0x200] sm:$0x7f]  ;;  %5061 = vrot.lane.b32.xlu0 %v5041_v50, %s17020_s27 }
 0x25c   : > { %4544 = vst.msk [vmem:[#allocation3 + $0x28] sm:$0x7f] %vm4502_vm6, %v4537_v47  ;;  %v5165_v55 = vld [vmem:[#allocation2 + $0x201] sm:$0x7f] }
 0x25d   : > { %v13852_v21 = vpop.permute.xlu0 %5013  ;;  %v13854_v48 = vpop.permute.xlu1 %5017 }
 0x25e   : > { %5578 = vrot.lane.b32.xlu1 %v5560_v27, %s16925_s23  ;;  %v4538_v44 = vld [vmem:[#allocation2 + $0x210] sm:$0x7f]  ;;  %17141 = vst [vmem:[#allocation10_spill] sm:$0xff] %v13854_v48  ;;  %v5698_v27 = vld [vmem:[#allocation2 + $0x141] sm:$0x7f] }
 0x25f   : > { %4545 = vst.msk [vmem:[#allocation3 + $0x30] sm:$0x7f] %vm4502_vm6, %v4538_v44  ;;  %5328 = vrot.lane.b32.xlu0 %v5308_v56, %s16927_s21  ;;  %v5121_v56 = vld [vmem:[#allocation2 + $0x151] sm:$0x7f] }
 0x261   : > { %v5281_v34 = vpop.permute.xlu0 %5280  ;;  %v13860_v9 = vpop.permute.xlu1 %5101 }
 0x262   : > { %5133 = vrot.lane.b32.xlu1 %v5119_v46, %s16931_s22  ;;  %5298 = vst.msk [vmem:[#allocation3 + $0x88] sm:$0x7f] %vm4582_vm7, %v5281_v34  ;;  %17142 = vst [vmem:[#allocation11_spill] sm:$0xff] %v13860_v9  ;;  %v5699_v34 = vld [vmem:[#allocation2 + $0x151] sm:$0x7f] }
 0x263   : > { %5580 = vrot.lane.b32.xlu0 %v5561_v26, %s16925_s23  ;;  %v5348_v9 = vld [vmem:[#allocation2 + $0x200] sm:$0x7f] }
 0x265   : > { %v13864_v43 = vpop.permute.xlu0 %5532  ;;  %v13866_v23 = vpop.permute.xlu1 %5536 }
 0x266   : > { %5217 = vrot.lane.b32.xlu1 %v5203_v3, %s16925_s23  ;;  %17143 = vst [vmem:[#allocation39_spill] sm:$0xff] %v13866_v23  ;;  %v5205_v3 = vld [vmem:[#allocation2 + $0x152] sm:$0x7f] }
 0x267   : > { %5795 = vrot.lane.b32.xlu0 %v5781_v19, %s12161_s29 }
 0x269   : > { %v13870_v0 = vpop.permute.xlu0 %4701  ;;  %v13872_v42 = vpop.permute.xlu1 %5538 }
 0x26a   : > { %5400 = vrot.lane.b32.xlu1 %v5386_v31, %s17020_s27  ;;  %17144 = vst [vmem:[#allocation38_spill] sm:$0xff] %v13870_v0  ;;  %17145 = vst [vmem:[#allocation18_spill] sm:$0xff] %v13872_v42  ;;  %v4552_v31 = vld [vmem:[#allocation2 + $0x171] sm:$0x7f]  ;;  %v7350_v42 = vld [vmem:[%s16890_s3 + $0x8] sm:$0xff] }
 0x26b   : > { %4565 = vrot.lane.b32.xlu0 %v4549_v41, %s16929_s17  ;;  %v5782_v41 = vld [vmem:[#allocation2 + $0x142] sm:$0x7f] }
 0x26d   : > { %v13876_v7 = vpop.permute.xlu0 %4703  ;;  %v4649_v16 = vpop.permute.xlu1 %4648 }
 0x26e   : > { %5495 = vrot.lane.b32.xlu1 %v5476_v57, %s16931_s22  ;;  %17146 = vst [vmem:[#allocation20_spill] sm:$0xff] %v13876_v7  ;;  %4670 = vst.msk [vmem:[#allocation3] sm:$0x7f] %vm4669_vm9, %v4649_v16 }
 0x26f   : > { %4567 = vrot.lane.b32.xlu0 %v4550_v22, %s16929_s17  ;;  %4713 = vst.msk [vmem:[#allocation3] sm:$0x7f] %vm4712_vm10, %v13600_v51  ;;  %v5120_v51 = vld [vmem:[#allocation2 + $0x141] sm:$0x7f]  ;;  %v4812_v22 = vld [vmem:[#allocation2 + $0x171] sm:$0x7f] }
 0x271   : > { %v13883_v45 = vpop.permute.xlu0 %5019  ;;  %v4735_v28 = vpop.permute.xlu1 %4734 }
 0x272   : > { %5711 = vrot.lane.b32.xlu1 %v5697_v38, %s12160_s28  ;;  %17147 = vst [vmem:[#allocation13_spill] sm:$0xff] %v13883_v45  ;;  %4756 = vst.msk [vmem:[#allocation3] sm:$0x7f] %vm4755_vm11, %v4735_v28  ;;  %v5123_v38 = vld [vmem:[#allocation2 + $0x171] sm:$0x7f] }
 0x273   : > { %4824 = vrot.lane.b32.xlu0 %v4809_v18, %s12158_s24  ;;  %v4956_v28 = vld [vmem:[#allocation2 + $0x172] sm:$0x7f] }
 0x274   : > { %v4911_v45 = vld [vmem:[#allocation2 + $0x1d1] sm:$0x7f] }
 0x275   : > { %v13888_v32 = vpop.permute.xlu0 %5103  ;;  %v5050_v59 = vpop.permute.xlu1 %5049 }
 0x276   : > { %4826 = vrot.lane.b32.xlu1 %v4810_v25, %s12158_s24  ;;  %17148 = vst [vmem:[#allocation15_spill] sm:$0xff] %v13888_v32  ;;  %5070 = vst.msk [vmem:[#allocation3 + $0x38] sm:$0x7f] %vm4712_vm10, %v5050_v59 }
 0x277   : > { %4969 = vrot.lane.b32.xlu0 %v4953_v12, %s16927_s21  ;;  %5112 = vst.msk [vmem:[#allocation3 + $0x38] sm:$0x7f] %vm4755_vm11, %v13639_v61  ;;  %v5204_v61 = vld [vmem:[#allocation2 + $0x142] sm:$0x7f]  ;;  %v5207_v12 = vld [vmem:[#allocation2 + $0x172] sm:$0x7f] }
 0x279   : > { %v5285_v4 = vpop.permute.xlu0 %5284  ;;  %v5317_v39 = vpop.permute.xlu1 %5316 }
 0x27a   : > { %5135 = vrot.lane.b32.xlu1 %v5120_v51, %s16931_s22  ;;  %5300 = vst.msk [vmem:[#allocation3 + $0x98] sm:$0x7f] %vm4582_vm7, %v5285_v4  ;;  %v5390_v51 = vld [vmem:[#allocation2 + $0x171] sm:$0x7f] }
 0x27b   : > { %5402 = vrot.lane.b32.xlu0 %v5387_v24, %s17020_s27  ;;  %5337 = vst.msk [vmem:[#allocation3 + $0x70] sm:$0x7f] %vm4625_vm8, %v5317_v39  ;;  %v4551_v39 = vld [vmem:[#allocation2 + $0x161] sm:$0x7f] }
 0x27d   : > { %v5287_v37 = vpop.permute.xlu0 %5286 }
 0x27e   : > { %4971 = vrot.lane.b32.xlu1 %v4954_v5, %s16927_s21  ;;  %5301 = vst.msk [vmem:[#allocation3 + $0xa0] sm:$0x7f] %vm4582_vm7, %v5287_v37  ;;  %v13900_v47 = vpop.permute.xlu1 %4650  ;;  %v5206_v37 = vld [vmem:[#allocation2 + $0x162] sm:$0x7f] }
 0x27f   : > { %5404 = vrot.lane.b32.xlu0 %v5388_v11, %s17020_s27 }
 0x281   : > { %v5628_v50 = vpop.permute.xlu0 %5627 }
 0x282   : > { %5219 = vrot.lane.b32.xlu1 %v5204_v61, %s16925_s23  ;;  %5648 = vst.msk [vmem:[#allocation3 + $0xa8] sm:$0x7f] %vm4582_vm7, %v5628_v50  ;;  %v13905_v44 = vpop.permute.xlu1 %4736  ;;  %v4811_v61 = vld [vmem:[#allocation2 + $0x161] sm:$0x7f] }
 0x283   : > { %5690 = vst.msk [vmem:[#allocation3 + $0xa8] sm:$0x7f] %vm4625_vm8, %v13663_v33  ;;  %5713 = vrot.lane.b32.xlu0 %v5698_v27, %s12160_s28  ;;  %v5125_v27 = vld [vmem:[#allocation2 + $0x191] sm:$0x7f] }
 0x285   : > { %v13911_v46 = vpop.permute.xlu0 %5051 }
 0x286   : > { %5137 = vrot.lane.b32.xlu1 %v5121_v56, %s16931_s22  ;;  %v13913_v26 = vpop.permute.xlu1 %5485 }
 0x287   : > { %5715 = vrot.lane.b32.xlu0 %v5699_v34, %s12160_s28  ;;  %v5122_v34 = vld [vmem:[#allocation2 + $0x161] sm:$0x7f] }
 0x289   : > { %v5319_v19 = vpop.permute.xlu0 %5318 }
 0x28a   : > { %5221 = vrot.lane.b32.xlu1 %v5205_v3, %s16925_s23  ;;  %5338 = vst.msk [vmem:[#allocation3 + $0x78] sm:$0x7f] %vm4625_vm8, %v5319_v19  ;;  %v13918_v33 = vpop.permute.xlu1 %5570 }
 0x28b   : > { %4571 = vrot.lane.b32.xlu0 %v4552_v31, %s16929_s17  ;;  %v5389_v31 = vld [vmem:[#allocation2 + $0x161] sm:$0x7f] }
 0x28d   : > { %v13922_v57 = vpop.permute.xlu0 %4652 }
 0x28e   : > { %5797 = vrot.lane.b32.xlu1 %v5782_v41, %s12161_s29  ;;  %v5630_v16 = vpop.permute.xlu1 %5629 }
 0x28f   : > { %4830 = vrot.lane.b32.xlu0 %v4812_v22, %s12158_s24  ;;  %5649 = vst.msk [vmem:[#allocation3 + $0xb0] sm:$0x7f] %vm4582_vm7, %v5630_v16  ;;  %v4813_v22 = vld [vmem:[#allocation2 + $0x181] sm:$0x7f] }
 0x290   : > { %5691 = vst.msk [vmem:[#allocation3 + $0xb0] sm:$0x7f] %vm4625_vm8, %v13790_v40  ;;  %v4955_v40 = vld [vmem:[#allocation2 + $0x162] sm:$0x7f] }
 0x291   : > { %v13929_v18 = vpop.permute.xlu0 %5053 }
 0x292   : > { %5141 = vrot.lane.b32.xlu1 %v5123_v38, %s16931_s22  ;;  %v4814_v38 = vld [vmem:[#allocation2 + $0x191] sm:$0x7f] }
 0x293   : > { %v13931_v25 = vpop.permute.xlu1 %5879  ;;  %4975 = vrot.lane.b32.xlu0 %v4956_v28, %s16927_s21 }
 0x295   : > { %v5321_v59 = vpop.permute.xlu0 %5320 }
 0x296   : > { %5225 = vrot.lane.b32.xlu1 %v5207_v12, %s16925_s23  ;;  %5339 = vst.msk [vmem:[#allocation3 + $0x80] sm:$0x7f] %vm4625_vm8, %v5321_v59  ;;  %v4957_v12 = vld [vmem:[#allocation2 + $0x182] sm:$0x7f] }
 0x297   : > { %v13936_v4 = vpop.permute.xlu1 %4738  ;;  %5408 = vrot.lane.b32.xlu0 %v5390_v51, %s17020_s27  ;;  %v5209_v51 = vld [vmem:[#allocation2 + $0x192] sm:$0x7f] }
 0x299   : > { %v5632_v24 = vpop.permute.xlu0 %5631 }
 0x29a   : > { %4973 = vrot.lane.b32.xlu1 %v4955_v40, %s16927_s21  ;;  %5650 = vst.msk [vmem:[#allocation3 + $0xb8] sm:$0x7f] %vm4582_vm7, %v5632_v24  ;;  %v5124_v24 = vld [vmem:[#allocation2 + $0x181] sm:$0x7f] }
 0x29b   : > { %v13941_v5 = vpop.permute.xlu1 %5487  ;;  %5692 = vst.msk [vmem:[#allocation3 + $0xb8] sm:$0x7f] %vm4625_vm8, %v13695_v15  ;;  %4569 = vrot.lane.b32.xlu0 %v4551_v39, %s16929_s17  ;;  %v5392_v15 = vld [vmem:[#allocation2 + $0x191] sm:$0x7f] }
 0x29d   : > { %v13947_v11 = vpop.permute.xlu0 %5057 }
 0x29e   : > { %5223 = vrot.lane.b32.xlu1 %v5206_v37, %s16925_s23  ;;  %17149 = vst [vmem:[#allocation41_spill] sm:$0xff] %v13947_v11  ;;  %v4553_v37 = vld [vmem:[#allocation2 + $0x181] sm:$0x7f] }
 0x29f   : > { %v13949_v50 = vpop.permute.xlu1 %5572  ;;  %4828 = vrot.lane.b32.xlu0 %v4811_v61, %s12158_s24 }
 0x2a1   : > { %v13953_v56 = vpop.permute.xlu0 %4654 }
 0x2a2   : > { %5145 = vrot.lane.b32.xlu1 %v5125_v27, %s16931_s22  ;;  %v4764_v27 = vld [vmem:[#allocation2 + $0x1c0] sm:$0x7f] }
 0x2a3   : > { %v13955_v3 = vpop.permute.xlu1 %5881  ;;  %5139 = vrot.lane.b32.xlu0 %v5122_v34, %s16931_s22 }
 0x2a5   : > { %v13959_v19 = vpop.permute.xlu0 %5055 }
 0x2a6   : > { %5412 = vrot.lane.b32.xlu1 %v5392_v15, %s17020_s27  ;;  %v5208_v15 = vld [vmem:[#allocation2 + $0x182] sm:$0x7f] }
 0x2a7   : > { %v13961_v41 = vpop.permute.xlu1 %4656  ;;  %5406 = vrot.lane.b32.xlu0 %v5389_v31, %s17020_s27 }
 0x2a9   : > { %v5323_v16 = vpop.permute.xlu0 %5322 }
 0x2aa   : > { %4832 = vrot.lane.b32.xlu1 %v4813_v22, %s12158_s24  ;;  %5340 = vst.msk [vmem:[#allocation3 + $0x88] sm:$0x7f] %vm4625_vm8, %v5323_v16  ;;  %v4592_v22 = vld [vmem:[#allocation2 + $0x1d1] sm:$0x7f] }
 0x2ab   : > { %4834 = vrot.lane.b32.xlu0 %v4814_v38, %s12158_s24  ;;  %v5391_v38 = vld [vmem:[#allocation2 + $0x181] sm:$0x7f] }
 0x2ac   : > { %v13966_v28 = vpop.permute.xlu1 %4742 }
 0x2ad   : > { %17150 = vst [vmem:[#allocation40_spill] sm:$0xff] %v13966_v28  ;;  %v13970_v59 = vpop.permute.xlu0 %4658 }
 0x2ae   : > { %4977 = vrot.lane.b32.xlu1 %v4957_v12, %s16927_s21  ;;  %17151 = vst [vmem:[#allocation22_spill] sm:$0xff] %v13970_v59  ;;  %v4914_v59 = vld [vmem:[#allocation2 + $0x201] sm:$0x7f] }
 0x2af   : > { %5229 = vrot.lane.b32.xlu0 %v5209_v51, %s16925_s23  ;;  %v4851_v51 = vld [vmem:[#allocation2 + $0x1c1] sm:$0x7f] }
 0x2b0   : > { %v5325_v40 = vpop.permute.xlu1 %5324 }
 0x2b1   : > { %5341 = vst.msk [vmem:[#allocation3 + $0x90] sm:$0x7f] %vm4625_vm8, %v5325_v40  ;;  %v13975_v39 = vpop.permute.xlu0 %5059 }
 0x2b2   : > { %5143 = vrot.lane.b32.xlu1 %v5124_v24, %s16931_s22  ;;  %17152 = vst [vmem:[#allocation24_spill] sm:$0xff] %v13975_v39  ;;  %v4591_v24 = vld [vmem:[#allocation2 + $0x1c1] sm:$0x7f] }
 0x2b3   : > { %4573 = vrot.lane.b32.xlu0 %v4553_v37, %s16929_s17 }
 0x2b4   : > { %v13977_v61 = vpop.permute.xlu1 %5491 }
 0x2b5   : > { %17153 = vst [vmem:[#allocation17_spill] sm:$0xff] %v13977_v61  ;;  %v13981_v34 = vpop.permute.xlu0 %5493 }
 0x2b6   : > { %4778 = vrot.lane.b32.xlu1 %v4764_v27, %s16931_s22  ;;  %17154 = vst [vmem:[#allocation19_spill] sm:$0xff] %v13981_v34  ;;  %v4765_v27 = vld [vmem:[#allocation2 + $0x1d0] sm:$0x7f] }
 0x2b7   : > { %5227 = vrot.lane.b32.xlu0 %v5208_v15, %s16925_s23 }
 0x2b8   : > { %v13983_v31 = vpop.permute.xlu1 %5576 }
 0x2b9   : > { %17155 = vst [vmem:[#allocation44_spill] sm:$0xff] %v13983_v31  ;;  %v4564_v16 = vpop.permute.xlu0 %4563 }
 0x2ba   : > { %4608 = vrot.lane.b32.xlu1 %v4592_v22, %s16927_s21  ;;  %4584 = vst.msk [vmem:[#allocation3 + $0x8] sm:$0x7f] %vm4582_vm7, %v4564_v16  ;;  %v4910_v22 = vld [vmem:[#allocation2 + $0x1c1] sm:$0x7f] }
 0x2bb   : > { %5410 = vrot.lane.b32.xlu0 %v5391_v38, %s17020_s27  ;;  %v4852_v38 = vld [vmem:[#allocation2 + $0x1d1] sm:$0x7f] }
 0x2bc   : > { %v13988_v12 = vpop.permute.xlu1 %4740 }
 0x2bd   : > { %v13992_v40 = vpop.permute.xlu0 %4822 }
 0x2be   : > { %4865 = vrot.lane.b32.xlu1 %v4851_v51, %s16925_s23  ;;  %v7349_v51 = vld [vmem:[%s16890_s3] sm:$0xff] }
 0x2bf   : > { %4606 = vrot.lane.b32.xlu0 %v4591_v24, %s16927_s21  ;;  %v16933_v24 = vmov 0.0|0.0   ;;  %s17168_s21 = smov 64  }
 0x2c0   : > { %v13994_v37 = vpop.permute.xlu1 %5489  ;;  %11895 = vmatprep.subr.bf16.mxu1 %v16933_v24 }
 0x2c1   : > { %v13998_v15 = vpop.permute.xlu0 %4660 }
 0x2c2   : > { %4780 = vrot.lane.b32.xlu1 %v4765_v27, %s16931_s22  ;;  %17156 = vst [vmem:[#allocation42_spill] sm:$0xff] %v13998_v15  ;;  %v11896_v27 = vpack.c.bf16 %v7350_v42, %v7349_v51  ;;  %v7351_v42 = vld [vmem:[%s16890_s3 + $0x10] sm:$0xff]  ;;  %v7352_v51 = vld [vmem:[%s16890_s3 + $0x18] sm:$0xff]  ;;  %s17017_s22 = smov 96  }
 0x2c3   : > { %4925 = vrot.lane.b32.xlu0 %v4910_v22, %s16929_s17  ;;  %v5161_v22 = vld [vmem:[#allocation2 + $0x1c1] sm:$0x7f]  ;;  %v5345_v15 = vld [vmem:[#allocation2 + $0x1d0] sm:$0x7f] }
 0x2c4   : > { %v14000_v16 = vpop.permute.xlu1 %5574  ;;  %11897 = vmatpush3.bf16.msra.mxu1 %v11896_v27  ;;  %v11899_v27 = vpack.c.bf16 %v7352_v51, %v7351_v42  ;;  %v5428_v42 = vld [vmem:[#allocation2 + $0x1c1] sm:$0x7f] }
 0x2c5   : > { %v14011_v32 = vpop.permute.xlu0 %4746  ;;  %11898 = vmatprep.subr.bf16.mxu1 %v16933_v24  ;;  %v7354_v24 = vld [vmem:[%s16890_s3 + $0x28] sm:$0xff] }
 0x2c6   : > { %4867 = vrot.lane.b32.xlu1 %v4852_v38, %s16925_s23  ;;  %17157 = vst [vmem:[#allocation26_spill] sm:$0xff] %v14011_v32  ;;  %v5162_v38 = vld [vmem:[#allocation2 + $0x1d1] sm:$0x7f]  ;;  %s17022_s23 = smov 112  }
 0x2c7   : > { %4927 = vrot.lane.b32.xlu0 %v4911_v45, %s16929_s17  ;;  %v5344_v45 = vld [vmem:[#allocation2 + $0x1c0] sm:$0x7f]  ;;  %s17166_s17 = smov 16  }
 0x2c8   : > { %v14013_v30 = vpop.permute.xlu1 %4744  ;;  %11900 = vmatpush3.bf16.msra.mxu1 %v11899_v27  ;;  %v5429_v27 = vld [vmem:[#allocation2 + $0x1d1] sm:$0x7f] }
 0x2c9   : > { %17158 = vst [vmem:[#allocation47_spill] sm:$0xff] %v14013_v30  ;;  %v14018_v54 = vpop.permute.xlu0 %4967 }
 0x2ca   : > { %5175 = vrot.lane.b32.xlu1 %v5161_v22, %s12158_s24  ;;  %v7353_v22 = vld [vmem:[%s16890_s3 + $0x20] sm:$0xff] }
 0x2cb   : > { %5177 = vrot.lane.b32.xlu0 %v5162_v38, %s12158_s24  ;;  %v11902_v7 = vpack.c.bf16 %v7354_v24, %v7353_v22  ;;  %v7355_v24 = vld [vmem:[%s16890_s3 + $0x30] sm:$0xff]  ;;  %v17162_v22 = vmov 0.0  }
 0x2cc   : > { %v5327_v52 = vpop.permute.xlu1 %5326  ;;  %11796 = vmatprep.mubr.msk.f32.mxu1 %vm12163_vm13, %v17162_v22 }
 0x2cd   : > { %5342 = vst.msk [vmem:[#allocation3 + $0x98] sm:$0x7f] %vm4625_vm8, %v5327_v52  ;;  %v14035_v32 = vpop.permute.xlu0 %5061  ;;  %v17161_v52 = vmov 0.0|0.0  }
 0x2ce   : > { %5358 = vrot.lane.b32.xlu1 %v5344_v45, %s12160_s28  ;;  %17159 = vst [vmem:[#allocation28_spill] sm:$0xff] %v14035_v32  ;;  %11901 = vmatprep.subr.bf16.mxu1 %v17161_v52  ;;  %v5740_v45 = vld [vmem:[#allocation2 + $0x1d1] sm:$0x7f]  ;;  %v5163_v32 = vld [vmem:[#allocation2 + $0x1e1] sm:$0x7f] }
 0x2cf   : > { %5360 = vrot.lane.b32.xlu0 %v5345_v15, %s12160_s28  ;;  %11903 = vmatpush3.bf16.msra.mxu1 %v11902_v7  ;;  %v7356_v15 = vld [vmem:[%s16890_s3 + $0x38] sm:$0xff] }
 0x2d0   : > { %v14037_v38 = vpop.permute.xlu1 %5578  ;;  %11904 = vmatprep.subr.bf16.mxu1 %v17161_v52  ;;  %v11905_v7 = vpack.c.bf16 %v7356_v15, %v7355_v24  ;;  %v4912_v15 = vld [vmem:[#allocation2 + $0x1e1] sm:$0x7f] }
 0x2d1   : > { %17160 = vst [vmem:[#allocation21_spill] sm:$0xff] %v14037_v38  ;;  %v5329_v51 = vpop.permute.xlu0 %5328 }
 0x2d2   : > { %5442 = vrot.lane.b32.xlu1 %v5428_v42, %s12161_s29  ;;  %5343 = vst.msk [vmem:[#allocation3 + $0xa0] sm:$0x7f] %vm4625_vm8, %v5329_v51  ;;  %v4766_v51 = vld [vmem:[#allocation2 + $0x1e0] sm:$0x7f] }
 0x2d3   : > { %5755 = vrot.lane.b32.xlu0 %v5740_v45, %s17020_s27  ;;  %11906 = vmatpush3.bf16.msra.mxu1 %v11905_v7  ;;  %v5739_v45 = vld [vmem:[#allocation2 + $0x1c1] sm:$0x7f] }
 0x2d4   : > { %v5134_v23 = vpop.permute.xlu1 %5133  ;;  %11794 = vmatprep.subr.mxu1 %v17162_v22  ;;  %v4593_v7 = vld [vmem:[#allocation2 + $0x1e1] sm:$0x7f] }
 0x2d5   : > { %5154 = vst.msk [vmem:[#allocation3 + $0x38] sm:$0x7f] %vm4799_vm12, %v5134_v23  ;;  %v14055_v42 = vpop.permute.xlu0 %5580  ;;  %v7357_v23 = vld [vmem:[%s16890_s3 + $0x40] sm:$0xff] }
 0x2d6   : > { %5444 = vrot.lane.b32.xlu1 %v5429_v27, %s12161_s29  ;;  %17163 = vst [vmem:[#allocation23_spill] sm:$0xff] %v14055_v42 }
 0x2d7   : > { %4782 = vrot.lane.b32.xlu0 %v4766_v51, %s17164_s14  ;;  %11795 = vmatpush3.msra.mxu1 %v7357_v23  ;;  %v4853_v51 = vld [vmem:[#allocation2 + $0x1e1] sm:$0x7f] }
 0x2d8   : > { %v14057_v52 = vpop.permute.xlu1 %5217 }
 0x2d9   : > { %v14065_v24 = vpop.permute.xlu0 %5795 }
 0x2da   : > { %5753 = vrot.lane.b32.xlu1 %v5739_v45, %s17020_s27  ;;  %v5346_v45 = vld [vmem:[#allocation2 + $0x1e0] sm:$0x7f] }
 0x2db   : > { %4929 = vrot.lane.b32.xlu0 %v4912_v15, %s17165_s16  ;;  %v5430_v15 = vld [vmem:[#allocation2 + $0x1e1] sm:$0x7f] }
 0x2dc   : > { %v14067_v27 = vpop.permute.xlu1 %5400 }
 0x2dd   : > { %v4566_v42 = vpop.permute.xlu0 %4565 }
 0x2de   : > { %4610 = vrot.lane.b32.xlu1 %v4593_v7, %s17166_s17  ;;  %4585 = vst.msk [vmem:[#allocation3 + $0x10] sm:$0x7f] %vm4582_vm7, %v4566_v42  ;;  %v5741_v7 = vld [vmem:[#allocation2 + $0x1e1] sm:$0x7f] }
 0x2df   : > { %5179 = vrot.lane.b32.xlu0 %v5163_v32, %s12158_s24  ;;  %v4767_v32 = vld [vmem:[#allocation2 + $0x1f0] sm:$0x7f] }
 0x2e0   : > { %v14072_v38 = vpop.permute.xlu1 %5495 }
 0x2e1   : > { %17167 = vst [vmem:[#allocation46_spill] sm:$0xff] %v14072_v38  ;;  %v4568_v23 = vpop.permute.xlu0 %4567 }
 0x2e2   : > { %4869 = vrot.lane.b32.xlu1 %v4853_v51, %s17168_s21  ;;  %4586 = vst.msk [vmem:[#allocation3 + $0x18] sm:$0x7f] %vm4582_vm7, %v4568_v23  ;;  %v4594_v23 = vld [vmem:[#allocation2 + $0x1f1] sm:$0x7f] }
 0x2e3   : > { %5362 = vrot.lane.b32.xlu0 %v5346_v45, %s12160_s28 }
 0x2e4   : > { %v5712_v34 = vpop.permute.xlu1 %5711 }
 0x2e5   : > { %5732 = vst.msk [vmem:[#allocation3 + $0xa8] sm:$0x7f] %vm4669_vm9, %v5712_v34  ;;  %v14080_v42 = vpop.permute.xlu0 %4824  ;;  %v4854_v34 = vld [vmem:[#allocation2 + $0x1f1] sm:$0x7f] }
 0x2e6   : > { %5446 = vrot.lane.b32.xlu1 %v5430_v15, %s12161_s29  ;;  %v4913_v15 = vld [vmem:[#allocation2 + $0x1f1] sm:$0x7f] }
 0x2e7   : > { %5757 = vrot.lane.b32.xlu0 %v5741_v7, %s17020_s27  ;;  %v5164_v7 = vld [vmem:[#allocation2 + $0x1f1] sm:$0x7f] }
 0x2e8   : > { %v14082_v38 = vpop.permute.xlu1 %4826 }
 0x2e9   : > { %v14086_v51 = vpop.permute.xlu0 %4969 }
 0x2ea   : > { %4784 = vrot.lane.b32.xlu1 %v4767_v32, %s17164_s14 }
 0x2eb   : > { %4612 = vrot.lane.b32.xlu0 %v4594_v23, %s17166_s17  ;;  %v5347_v23 = vld [vmem:[#allocation2 + $0x1f0] sm:$0x7f] }
 0x2ec   : > { %v14088_v30 = vpop.permute.xlu1 %5135 }
 0x2ed   : > { %v14092_v45 = vpop.permute.xlu0 %5402 }
 0x2ee   : > { %4871 = vrot.lane.b32.xlu1 %v4854_v34, %s17168_s21 }
 0x2ef   : > { %4931 = vrot.lane.b32.xlu0 %v4913_v15, %s17165_s16  ;;  %v5431_v15 = vld [vmem:[#allocation2 + $0x1f1] sm:$0x7f] }
 0x2f0   : > { %v14094_v0 = vpop.permute.xlu1 %4971 }
 0x2f1   : > { %v14098_v32 = vpop.permute.xlu0 %5404 }
 0x2f2   : > { %5181 = vrot.lane.b32.xlu1 %v5164_v7, %s12158_s24 }
 0x2f3   : > { %4933 = vrot.lane.b32.xlu0 %v4914_v59, %s17165_s16  ;;  %v4595_v59 = vld [vmem:[#allocation2 + $0x201] sm:$0x7f] }
 0x2f4   : > { %v14100_v31 = vpop.permute.xlu1 %5219 }
 0x2f5   : > { %v5714_v34 = vpop.permute.xlu0 %5713 }
 0x2f6   : > { %5364 = vrot.lane.b32.xlu1 %v5347_v23, %s12160_s28  ;;  %5733 = vst.msk [vmem:[#allocation3 + $0xb0] sm:$0x7f] %vm4669_vm9, %v5714_v34  ;;  %v4770_v34 = vld [vmem:[#allocation2 + $0x220] sm:$0x7f] }
 0x2f7   : > { %5183 = vrot.lane.b32.xlu0 %v5165_v55, %s12158_s24  ;;  %v4768_v55 = vld [vmem:[#allocation2 + $0x200] sm:$0x7f] }
 0x2f8   : > { %v14105_v61 = vpop.permute.xlu1 %5137 }
 0x2f9   : > { %v5716_v7 = vpop.permute.xlu0 %5715 }
 0x2fa   : > { %5448 = vrot.lane.b32.xlu1 %v5431_v15, %s12161_s29  ;;  %5734 = vst.msk [vmem:[#allocation3 + $0xb8] sm:$0x7f] %vm4669_vm9, %v5716_v7  ;;  %v4857_v7 = vld [vmem:[#allocation2 + $0x221] sm:$0x7f] }
 0x2fb   : > { %5366 = vrot.lane.b32.xlu0 %v5348_v9, %s12160_s28  ;;  %v4855_v9 = vld [vmem:[#allocation2 + $0x201] sm:$0x7f] }
 0x2fc   : > { %v14110_v39 = vpop.permute.xlu1 %5221 }
 0x2fd   : > { %v4572_v23 = vpop.permute.xlu0 %4571 }
 0x2fe   : > { %4614 = vrot.lane.b32.xlu1 %v4595_v59, %s17166_s17  ;;  %4588 = vst.msk [vmem:[#allocation3 + $0x28] sm:$0x7f] %vm4582_vm7, %v4572_v23  ;;  %v5167_v23 = vld [vmem:[#allocation2 + $0x221] sm:$0x7f] }
 0x2ff   : > { %4790 = vrot.lane.b32.xlu0 %v4770_v34, %s17164_s14  ;;  %v5432_v34 = vld [vmem:[#allocation2 + $0x201] sm:$0x7f] }
 0x300   : > { %v14115_v48 = vpop.permute.xlu1 %5797 }
 0x301   : > { %v14119_v15 = vpop.permute.xlu0 %4830 }
 0x302   : > { %4786 = vrot.lane.b32.xlu1 %v4768_v55, %s17164_s14  ;;  %17169 = vst [vmem:[#allocation45_spill] sm:$0xff] %v14119_v15  ;;  %v5350_v15 = vld [vmem:[#allocation2 + $0x220] sm:$0x7f] }
 0x303   : > { %4877 = vrot.lane.b32.xlu0 %v4857_v7, %s17168_s21  ;;  %v4596_v7 = vld [vmem:[#allocation2 + $0x211] sm:$0x7f] }
 0x304   : > { %v14121_v1 = vpop.permute.xlu1 %5141 }
 0x305   : > { %17170 = vst [vmem:[#allocation30_spill] sm:$0xff] %v14121_v1  ;;  %v14125_v59 = vpop.permute.xlu0 %4975 }
 0x306   : > { %4873 = vrot.lane.b32.xlu1 %v4855_v9, %s17168_s21  ;;  %17171 = vst [vmem:[#allocation32_spill] sm:$0xff] %v14125_v59  ;;  %v5434_v59 = vld [vmem:[#allocation2 + $0x221] sm:$0x7f] }
 0x307   : > { %5187 = vrot.lane.b32.xlu0 %v5167_v23, %s12158_s24  ;;  %v4856_v23 = vld [vmem:[#allocation2 + $0x211] sm:$0x7f] }
 0x308   : > { %v14127_v11 = vpop.permute.xlu1 %5225 }
 0x309   : > { %17172 = vst [vmem:[#allocation25_spill] sm:$0xff] %v14127_v11  ;;  %v14131_v55 = vpop.permute.xlu0 %5408 }
 0x30a   : > { %5450 = vrot.lane.b32.xlu1 %v5432_v34, %s12161_s29  ;;  %17173 = vst [vmem:[#allocation27_spill] sm:$0xff] %v14131_v55  ;;  %v4769_v55 = vld [vmem:[#allocation2 + $0x210] sm:$0x7f] }
 0x30b   : > { %5370 = vrot.lane.b32.xlu0 %v5350_v15, %s12160_s28  ;;  %v5783_v15 = vld [vmem:[#allocation2 + $0x152] sm:$0x7f] }
 0x30c   : > { %v14133_v10 = vpop.permute.xlu1 %4973 }
 0x30d   : > { %17174 = vst [vmem:[#allocation43_spill] sm:$0xff] %v14133_v10  ;;  %v4570_v9 = vpop.permute.xlu0 %4569 }
 0x30e   : > { %4616 = vrot.lane.b32.xlu1 %v4596_v7, %s17166_s17  ;;  %4587 = vst.msk [vmem:[#allocation3 + $0x20] sm:$0x7f] %vm4582_vm7, %v4570_v9  ;;  %v5616_v9 = vld [vmem:[#allocation2 + $0xd1] sm:$0x7f] }
 0x30f   : > { %5454 = vrot.lane.b32.xlu0 %v5434_v59, %s12161_s29  ;;  %v5825_v59 = vld [vmem:[#allocation2 + $0x41] sm:$0x7f] }
 0x310   : > { %v14138_v11 = vpop.permute.xlu1 %5223 }
 0x311   : > { %17175 = vst [vmem:[#allocation33_spill] sm:$0xff] %v14138_v11  ;;  %v14142_v34 = vpop.permute.xlu0 %4828  ;;  %v5658_v11 = vld [vmem:[#allocation2 + $0x42] sm:$0x7f] }
 0x312   : > { %4875 = vrot.lane.b32.xlu1 %v4856_v23, %s17168_s21 }
 0x313   : > { %4788 = vrot.lane.b32.xlu0 %v4769_v55, %s17164_s14  ;;  %v5867_v55 = vld [vmem:[#allocation2 + $0xd1] sm:$0x7f] }
 0x314   : > { %v14144_v1 = vpop.permute.xlu1 %5145 }
 0x315   : > { %17176 = vst [vmem:[#allocation34_spill] sm:$0xff] %v14144_v1  ;;  %v14148_v7 = vpop.permute.xlu0 %5139  ;;  %v5700_v1 = vld [vmem:[#allocation2 + $0x161] sm:$0x7f] }
 0x316   : > { %5799 = vrot.lane.b32.xlu1 %v5783_v15, %s12161_s29 }
 0x317   : > { %5633 = vrot.lane.b32.xlu0 %v5616_v9, %s17165_s16  ;;  %v5909_v9 = vld [vmem:[#allocation2 + $0x42] sm:$0x7f] }
 0x318   : > { %v14150_v10 = vpop.permute.xlu1 %5412 }
 0x319   : > { %17177 = vst [vmem:[#allocation29_spill] sm:$0xff] %v14150_v10  ;;  %v14154_v23 = vpop.permute.xlu0 %5406  ;;  %v5742_v10 = vld [vmem:[#allocation2 + $0x1f1] sm:$0x7f] }
 0x31a   : > { %5841 = vrot.lane.b32.xlu1 %v5825_v59, %s17164_s14  ;;  %17178 = vst [vmem:[#allocation31_spill] sm:$0xff] %v14154_v23 }
 0x31b   : > { %5675 = vrot.lane.b32.xlu0 %v5658_v11, %s17166_s17  ;;  %v5784_v11 = vld [vmem:[#allocation2 + $0x162] sm:$0x7f] }
 0x31c   : > { %v14156_v28 = vpop.permute.xlu1 %4832 }
 0x31d   : > { %17179 = vst [vmem:[#allocation48_spill] sm:$0xff] %v14156_v28  ;;  %v14160_v15 = vpop.permute.xlu0 %4834 }
 0x31e   : > { %5883 = vrot.lane.b32.xlu1 %v5867_v55, %s12158_s24 }
 0x31f   : > { %5717 = vrot.lane.b32.xlu0 %v5700_v1, %s12160_s28  ;;  %v5166_v1 = vld [vmem:[#allocation2 + $0x211] sm:$0x7f] }
 0x320   : > { %v14162_v8 = vpop.permute.xlu1 %4977 }
 0x321   : > { %17180 = vst [vmem:[#allocation49_spill] sm:$0xff] %v14162_v8  ;;  %v14166_v59 = vpop.permute.xlu0 %5229  ;;  %v5617_v8 = vld [vmem:[#allocation2 + $0xe1] sm:$0x7f] }
 0x322   : > { %5925 = vrot.lane.b32.xlu1 %v5909_v9, %s17168_s21  ;;  %v4915_v9 = vld [vmem:[#allocation2 + $0x211] sm:$0x7f] }
 0x323   : > { %5759 = vrot.lane.b32.xlu0 %v5742_v10, %s17020_s27 }
 0x324   : > { %v14168_v23 = vpop.permute.xlu1 %5143 }
 0x325   : > { %v4574_v55 = vpop.permute.xlu0 %4573 }
 0x326   : > { %5801 = vrot.lane.b32.xlu1 %v5784_v11, %s12161_s29  ;;  %4589 = vst.msk [vmem:[#allocation3 + $0x30] sm:$0x7f] %vm4582_vm7, %v4574_v55  ;;  %v5826_v55 = vld [vmem:[#allocation2 + $0x51] sm:$0x7f] }
 0x327   : > { %5635 = vrot.lane.b32.xlu0 %v5617_v8, %s17165_s16 }
 0x328   : > { %v4779_v28 = vpop.permute.xlu1 %4778 }
 0x329   : > { %4800 = vst.msk [vmem:[#allocation3] sm:$0x7f] %vm4799_vm12, %v4779_v28  ;;  %v14178_v10 = vpop.permute.xlu0 %5227  ;;  %v5659_v28 = vld [vmem:[#allocation2 + $0x52] sm:$0x7f] }
 0x32a   : > { %5185 = vrot.lane.b32.xlu1 %v5166_v1, %s12158_s24  ;;  %4844 = vst.msk [vmem:[#allocation3] sm:$0x7f] %vm4843_vm14, %v13992_v40  ;;  %v5701_v1 = vld [vmem:[#allocation2 + $0x171] sm:$0x7f] }
 0x32b   : > { %4935 = vrot.lane.b32.xlu0 %v4915_v9, %s17165_s16  ;;  %v5618_v9 = vld [vmem:[#allocation2 + $0xf1] sm:$0x7f] }
 0x32c   : > { %v4609_v11 = vpop.permute.xlu1 %4608 }
 0x32d   : > { %4628 = vst.msk [vmem:[#allocation3 + $0x10] sm:$0x7f] %vm4625_vm8, %v4609_v11  ;;  %v14185_v8 = vpop.permute.xlu0 %5410 }
 0x32e   : > { %4672 = vst.msk [vmem:[#allocation3 + $0x10] sm:$0x7f] %vm4669_vm9, %v13922_v57  ;;  %5843 = vrot.lane.b32.xlu1 %v5826_v55, %s17164_s14  ;;  %v5868_v55 = vld [vmem:[#allocation2 + $0xe1] sm:$0x7f] }
 0x32f   : > { %4715 = vst.msk [vmem:[#allocation3 + $0x10] sm:$0x7f] %vm4712_vm10, %v13658_v62  ;;  %5677 = vrot.lane.b32.xlu0 %v5659_v28, %s17166_s17  ;;  %v5660_v62 = vld [vmem:[#allocation2 + $0x62] sm:$0x7f] }
 0x330   : > { %4758 = vst.msk [vmem:[#allocation3 + $0x10] sm:$0x7f] %vm4755_vm11, %v13936_v4  ;;  %v4866_v40 = vpop.permute.xlu1 %4865 }
 0x331   : > { %4887 = vst.msk [vmem:[#allocation3] sm:$0x7f] %vm4886_vm15, %v4866_v40  ;;  %v4607_v57 = vpop.permute.xlu0 %4606 }
 0x332   : > { %5719 = vrot.lane.b32.xlu1 %v5701_v1, %s12160_s28  ;;  %4627 = vst.msk [vmem:[#allocation3 + $0x8] sm:$0x7f] %vm4625_vm8, %v4607_v57 }
 0x333   : > { %4671 = vst.msk [vmem:[#allocation3 + $0x8] sm:$0x7f] %vm4669_vm9, %v13900_v47  ;;  %5637 = vrot.lane.b32.xlu0 %v5618_v9, %s17165_s16 }
 0x334   : > { %v4781_v11 = vpop.permute.xlu1 %4780  ;;  %4714 = vst.msk [vmem:[#allocation3 + $0x8] sm:$0x7f] %vm4712_vm10, %v13716_v53  ;;  %v5910_v53 = vld [vmem:[#allocation2 + $0x52] sm:$0x7f] }
 0x335   : > { %4757 = vst.msk [vmem:[#allocation3 + $0x8] sm:$0x7f] %vm4755_vm11, %v13905_v44  ;;  %v4926_v4 = vpop.permute.xlu0 %4925 }
 0x336   : > { %5679 = vrot.lane.b32.xlu1 %v5660_v62, %s17166_s17  ;;  %4945 = vst.msk [vmem:[#allocation3 + $0x40] sm:$0x7f] %vm4582_vm7, %v4926_v4  ;;  %v5702_v62 = vld [vmem:[#allocation2 + $0x181] sm:$0x7f] }
 0x337   : > { %4801 = vst.msk [vmem:[#allocation3 + $0x8] sm:$0x7f] %vm4799_vm12, %v4781_v11  ;;  %5885 = vrot.lane.b32.xlu0 %v5868_v55, %s12158_s24 }
 0x338   : > { %v4868_v28 = vpop.permute.xlu1 %4867  ;;  %v5949_v40 = vld [vmem:[#allocation3] sm:$0x7f]  ;;  %4987 = vst.msk [vmem:[#allocation3 + $0x40] sm:$0x7f] %vm4625_vm8, %v14018_v54 }
 0x339   : > { %4845 = vst.msk [vmem:[#allocation3 + $0x8] sm:$0x7f] %vm4843_vm14, %v14080_v42  ;;  %v6005_v47 = vcombine.high %v5949_v40, %v5949_v40  ;;  %v6012_v44 = vrot.slane %v5949_v40, %v12826_v49  ;;  %v4928_v54 = vpop.permute.xlu0 %4927  ;;  %v5743_v42 = vld [vmem:[#allocation2 + $0x201] sm:$0x7f] }
 0x33a   : > { %5029 = vst.msk [vmem:[#allocation3 + $0x40] sm:$0x7f] %vm4669_vm9, %v13735_v35  ;;  %5927 = vrot.lane.b32.xlu1 %v5910_v53, %s17168_s21  ;;  %v5785_v35 = vld [vmem:[#allocation2 + $0x172] sm:$0x7f] }
 0x33b   : > { %4888 = vst.msk [vmem:[#allocation3 + $0x8] sm:$0x7f] %vm4886_vm15, %v4868_v28  ;;  %v6019_v1 = vrot.slane %v6005_v47, %v12826_v49  ;;  %v6020_v57 = vcombine.high %v6012_v44, %v6012_v44  ;;  %5761 = vrot.lane.b32.xlu0 %v5743_v42, %s17020_s27 }
 0x33c   : > { %5071 = vst.msk [vmem:[#allocation3 + $0x40] sm:$0x7f] %vm4712_vm10, %v13911_v46  ;;  %v5176_v9 = vpop.permute.xlu1 %5175 }
 0x33d   : > { %5113 = vst.msk [vmem:[#allocation3 + $0x40] sm:$0x7f] %vm4755_vm11, %v13793_v17  ;;  %v6021_v46 = vcombine.high %v6019_v1, %v6019_v1  ;;  %v6042_v11 = vrot.slane %v6020_v57, %v12826_v49  ;;  %v5178_v17 = vpop.permute.xlu0 %5177 }
 0x33e   : > { %4946 = vst.msk [vmem:[#allocation3 + $0x48] sm:$0x7f] %vm4582_vm7, %v4928_v54  ;;  %5803 = vrot.lane.b32.xlu1 %v5785_v35, %s12161_s29 }
 0x33f   : > { %5155 = vst.msk [vmem:[#allocation3 + $0x40] sm:$0x7f] %vm4799_vm12, %v14088_v30  ;;  %v6028_v30 = vrot.slane %v6012_v44, %v12826_v49  ;;  %v6049_v4 = vrot.slane %v6021_v46, %v12826_v49  ;;  %5721 = vrot.lane.b32.xlu0 %v5702_v62, %s12160_s28 }
 0x340   : > { %4988 = vst.msk [vmem:[#allocation3 + $0x48] sm:$0x7f] %vm4625_vm8, %v14086_v51  ;;  %v6035_v51 = vrot.slane %v6019_v1, %v12826_v49 }
 0x341   : > { %5196 = vst.msk [vmem:[#allocation3 + $0x38] sm:$0x7f] %vm4843_vm14, %v5176_v9  ;;  %5197 = vst.msk [vmem:[#allocation3 + $0x40] sm:$0x7f] %vm4843_vm14, %v5178_v17  ;;  %v11336_v55 = vcombine.high %v6028_v30, %v6042_v11  ;;  %v5361_v40 = vpop.permute.xlu0 %5360 }
 0x342   : > { %5030 = vst.msk [vmem:[#allocation3 + $0x48] sm:$0x7f] %vm4669_vm9, %v13683_v14  ;;  %v5359_v14 = vpop.permute.xlu1 %5358  ;;  %v6051_v53 = vcombine.high %v6035_v51, %v6035_v51  ;;  %5380 = vst.msk [vmem:[#allocation3 + $0x78] sm:$0x7f] %vm4669_vm9, %v5361_v40  ;;  %v7367_v44 = vcombine.low %v6035_v51, %v6049_v4 }
 0x343   : > { %5238 = vst.msk [vmem:[#allocation3 + $0x38] sm:$0x7f] %vm4886_vm15, %v14057_v52  ;;  %v7365_v52 = vcombine.low %v6028_v30, %v6042_v11  ;;  %5239 = vst.msk [vmem:[#allocation3 + $0x40] sm:$0x7f] %vm4886_vm15, %v14100_v31  ;;  %v7382_v1 = vrot.slane %v11336_v55, %v12826_v49 }
 0x344   : > { %5072 = vst.msk [vmem:[#allocation3 + $0x48] sm:$0x7f] %vm4712_vm10, %v13929_v18  ;;  %v5433_v18 = vld [vmem:[#allocation2 + $0x211] sm:$0x7f]  ;;  %5422 = vst.msk [vmem:[#allocation3 + $0x78] sm:$0x7f] %vm4712_vm10, %v14092_v45  ;;  %v7389_v46 = vrot.slane %v7367_v44, %v12826_v49 }
 0x345   : > { %5114 = vst.msk [vmem:[#allocation3 + $0x48] sm:$0x7f] %vm4755_vm11, %v13701_v20  ;;  %v5950_v20 = vld [vmem:[#allocation3 + $0x8] sm:$0x7f]  ;;  %5452 = vrot.lane.b32.xlu1 %v5433_v18, %s12161_s29  ;;  %v7375_v54 = vrot.slane %v7365_v52, %v12826_v49  ;;  %v5756_v42 = vpop.permute.xlu0 %5755  ;;  %v5619_v45 = vld [vmem:[#allocation2 + $0x101] sm:$0x7f] }
 0x346   : > { %5156 = vst.msk [vmem:[#allocation3 + $0x48] sm:$0x7f] %vm4799_vm12, %v14105_v61  ;;  %v6060_v28 = vrot.slane %v5950_v20, %v12826_v49  ;;  %v5349_v61 = vld [vmem:[#allocation2 + $0x210] sm:$0x7f]  ;;  %v5443_v47 = vpop.permute.xlu1 %5442  ;;  %v6053_v17 = vcombine.high %v5950_v20, %v5950_v20 }
 0x347   : > { %5379 = vst.msk [vmem:[#allocation3 + $0x70] sm:$0x7f] %vm4669_vm9, %v5359_v14  ;;  %5368 = vrot.lane.b32.xlu0 %v5349_v61, %s12160_s28  ;;  %v7397_v11 = vcombine.low %v7375_v54, %v7382_v1  ;;  %v5828_v18 = vld [vmem:[#allocation2 + $0x71] sm:$0x7f] }
 0x348   : > { %5421 = vst.msk [vmem:[#allocation3 + $0x70] sm:$0x7f] %vm4712_vm10, %v14067_v27  ;;  %v14253_v31 = vrot.slane %v6060_v28, %v12826_v49  ;;  %v5827_v27 = vld [vmem:[#allocation2 + $0x61] sm:$0x7f]  ;;  %5775 = vst.msk [vmem:[#allocation3 + $0xb0] sm:$0x7f] %vm4712_vm10, %v5756_v42  ;;  %v6068_v30 = vcombine.high %v6060_v28, %v6060_v28 }
 0x349   : > { %5463 = vst.msk [vmem:[#allocation3 + $0x70] sm:$0x7f] %vm4755_vm11, %v5443_v47  ;;  %5845 = vrot.lane.b32.xlu1 %v5827_v27, %s17164_s14  ;;  %5817 = vst.msk [vmem:[#allocation3 + $0xb0] sm:$0x7f] %vm4755_vm11, %v14115_v48  ;;  %v4783_v48 = vpop.permute.xlu0 %4782  ;;  %v7405_v14 = vrot.slane %v7397_v11, %v12826_v49  ;;  %v5703_v61 = vld [vmem:[#allocation2 + $0x191] sm:$0x7f] }
 0x34a   : > { %5506 = vst.msk [vmem:[#allocation3 + $0x70] sm:$0x7f] %vm4799_vm12, %v13913_v26  ;;  %v7368_v57 = vcombine.low %v6051_v53, %v14253_v31  ;;  %v5956_v9 = vld [vmem:[#allocation3 + $0x38] sm:$0x7f]  ;;  %v5445_v35 = vpop.permute.xlu1 %5444  ;;  %5859 = vst.msk [vmem:[#allocation3 + $0xb0] sm:$0x7f] %vm4799_vm12, %v13743_v2 }
 0x34b   : > { %5549 = vst.msk [vmem:[#allocation3 + $0x70] sm:$0x7f] %vm4843_vm14, %v13807_v29  ;;  %5639 = vrot.lane.b32.xlu0 %v5619_v45, %s17165_s16  ;;  %v5786_v29 = vld [vmem:[#allocation2 + $0x182] sm:$0x7f]  ;;  %v14282_v51 = vrot.slane %v5956_v9, %v12826_v49  ;;  %5901 = vst.msk [vmem:[#allocation3 + $0xb0] sm:$0x7f] %vm4843_vm14, %v13955_v3  ;;  %v6341_v62 = vcombine.high %v5956_v9, %v5956_v9  ;;  %v6067_v3 = vrot.slane %v6053_v17, %v12826_v49 }
 0x34c   : > { %5591 = vst.msk [vmem:[#allocation3 + $0x70] sm:$0x7f] %vm4886_vm15, %v13918_v33  ;;  %v7396_v26 = vrot.slane %v7368_v57, %v12826_v49  ;;  %5943 = vst.msk [vmem:[#allocation3 + $0xb0] sm:$0x7f] %vm4886_vm15, %v13773_v36  ;;  %v5869_v2 = vld [vmem:[#allocation2 + $0xf1] sm:$0x7f]  ;;  %v6090_v36 = vrot.slane %v6068_v30, %v12826_v49 }
 0x34d   : > { %5464 = vst.msk [vmem:[#allocation3 + $0x78] sm:$0x7f] %vm4755_vm11, %v5445_v35  ;;  %5805 = vrot.lane.b32.xlu1 %v5786_v29, %s12161_s29  ;;  %v6356_v52 = vcombine.high %v14282_v51, %v14282_v51  ;;  %v6355_v55 = vrot.slane %v6341_v62, %v12826_v49  ;;  %v5957_v20 = vld [vmem:[#allocation3 + $0x40] sm:$0x7f]  ;;  %v14357_v42 = vrot.slane %v14282_v51, %v12826_v49  ;;  %v5912_v45 = vld [vmem:[#allocation2 + $0x72] sm:$0x7f] }
 0x34e   : > { %5507 = vst.msk [vmem:[#allocation3 + $0x78] sm:$0x7f] %vm4799_vm12, %v13941_v5  ;;  %v7398_v33 = vcombine.low %v7389_v46, %v7396_v26  ;;  %4802 = vst.msk [vmem:[#allocation3 + $0x10] sm:$0x7f] %vm4799_vm12, %v4783_v48  ;;  %v5754_v5 = vpop.permute.xlu1 %5753  ;;  %v6100_v28 = vcombine.high %v6090_v36, %v6090_v36  ;;  %v6389_v53 = vcombine.high %v5957_v20, %v5957_v20  ;;  %v5829_v30 = vld [vmem:[#allocation2 + $0x81] sm:$0x7f] }
 0x34f   : > { %5550 = vst.msk [vmem:[#allocation3 + $0x78] sm:$0x7f] %vm4843_vm14, %v13719_v13  ;;  %4846 = vst.msk [vmem:[#allocation3 + $0x10] sm:$0x7f] %vm4843_vm14, %v14082_v38  ;;  %5887 = vrot.lane.b32.xlu0 %v5869_v2, %s12158_s24  ;;  %v5661_v13 = vld [vmem:[#allocation2 + $0x72] sm:$0x7f]  ;;  %v4930_v38 = vpop.permute.xlu0 %4929  ;;  %v6357_v40 = vcombine.high %v6355_v55, %v6355_v55  ;;  %v6396_v47 = vrot.slane %v5957_v20, %v12826_v49 }
 0x350   : > { %5592 = vst.msk [vmem:[#allocation3 + $0x78] sm:$0x7f] %vm4886_vm15, %v13949_v50  ;;  %v7412_v4 = vrot.slane %v7398_v33, %v12826_v49  ;;  %v6403_v27 = vrot.slane %v6389_v53, %v12826_v49  ;;  %v5744_v48 = vld [vmem:[#allocation2 + $0x211] sm:$0x7f]  ;;  %s11377_s16 = sshll.u32 %s12239_s13, 4  ;;  %s12167_s13 = smov [#allocation5]  }
 0x351   : > { %5774 = vst.msk [vmem:[#allocation3 + $0xa8] sm:$0x7f] %vm4712_vm10, %v5754_v5  ;;  %5681 = vrot.lane.b32.xlu1 %v5661_v13, %s17166_s17  ;;  %v6385_v1 = vrot.slane %v6357_v40, %v12826_v49  ;;  %v6404_v9 = vcombine.high %v6396_v47, %v6396_v47  ;;  %v6386_v5 = vcombine.high %v14357_v42, %v14357_v42 }
 0x352   : > { %5816 = vst.msk [vmem:[#allocation3 + $0xa8] sm:$0x7f] %vm4755_vm11, %v14065_v24  ;;  %v7413_v50 = vcombine.low %v7405_v14, %v7412_v4  ;;  %v4611_v24 = vpop.permute.xlu1 %4610  ;;  %v6405_v17 = vcombine.high %v6403_v27, %v6403_v27 }
 0x353   : > { %5858 = vst.msk [vmem:[#allocation3 + $0xa8] sm:$0x7f] %vm4799_vm12, %v13824_v6  ;;  %5847 = vrot.lane.b32.xlu0 %v5828_v18, %s17164_s14  ;;  %v5911_v6 = vld [vmem:[#allocation2 + $0x62] sm:$0x7f]  ;;  %v5963_v51 = vld [vmem:[#allocation3 + $0x70] sm:$0x7f]  ;;  %v6426_v14 = vrot.slane %v6404_v9, %v12826_v49 }
 0x354   : > { %4947 = vst.msk [vmem:[#allocation3 + $0x50] sm:$0x7f] %vm4582_vm7, %v4930_v38  ;;  %11797 = vmatmul.mubr.msk.f32.vlgmr.msra.gmra.mrb[0].mxu1 %vm8565_vm0, %v7413_v50  ;;  %v6412_v50 = vrot.slane %v6396_v47, %v12826_v49  ;;  %v5913_v38 = vld [vmem:[#allocation2 + $0x82] sm:$0x7f]  ;;  %v6433_v20 = vrot.slane %v6405_v17, %v12826_v49 }
 0x355   : > { %5900 = vst.msk [vmem:[#allocation3 + $0xa8] sm:$0x7f] %vm4843_vm14, %v13931_v25  ;;  %11799 = vmatprep.mubr.msk.f32.mxu1 %vm12163_vm13, %v17162_v22  ;;  %5929 = vrot.lane.b32.xlu1 %v5911_v6, %s17168_s21  ;;  %v14328_v25 = vrot.slane %v6356_v52, %v12826_v49 }
 0x356   : > { %4989 = vst.msk [vmem:[#allocation3 + $0x50] sm:$0x7f] %vm4625_vm8, %v14094_v0  ;;  %4629 = vst.msk [vmem:[#allocation3 + $0x18] sm:$0x7f] %vm4625_vm8, %v4611_v24  ;;  %v6083_v0 = vrot.slane %v6067_v3, %v12826_v49 }
 0x357   : > { %5942 = vst.msk [vmem:[#allocation3 + $0xa8] sm:$0x7f] %vm4886_vm15, %v13834_v63  ;;  %v5180_v63 = vpop.permute.xlu0 %5179  ;;  %5723 = vrot.lane.b32.xlu0 %v5703_v61, %s12160_s28  ;;  %v5964_v61 = vld [vmem:[#allocation3 + $0x78] sm:$0x7f] }
 0x358   : > { %5031 = vst.msk [vmem:[#allocation3 + $0x50] sm:$0x7f] %vm4669_vm9, %v13852_v21  ;;  %4673 = vst.msk [vmem:[#allocation3 + $0x18] sm:$0x7f] %vm4669_vm9, %v13953_v56  ;;  %v6098_v21 = vcombine.high %v14253_v31, %v14253_v31  ;;  %v6371_v56 = vrot.slane %v6355_v55, %v12826_v49  ;;  %v7415_v31 = vcombine.low %v6100_v28, %v6083_v0 }
 0x359   : > { %5073 = vst.msk [vmem:[#allocation3 + $0x50] sm:$0x7f] %vm4712_vm10, %v13959_v19  ;;  %4716 = vst.msk [vmem:[#allocation3 + $0x18] sm:$0x7f] %vm4712_vm10, %v13845_v58  ;;  %v4870_v19 = vpop.permute.xlu1 %4869  ;;  %v5870_v58 = vld [vmem:[#allocation2 + $0x101] sm:$0x7f]  ;;  %v6099_v46 = vcombine.high %v6083_v0, %v6083_v0  ;;  %v14395_v28 = vcombine.low %v14328_v25, %v6386_v5  ;;  %v7708_v0 = vcombine.low %v6412_v50, %v6426_v14 }
 0x35a   : > { %5115 = vst.msk [vmem:[#allocation3 + $0x50] sm:$0x7f] %vm4755_vm11, %v13848_v60  ;;  %4759 = vst.msk [vmem:[#allocation3 + $0x18] sm:$0x7f] %vm4755_vm11, %v13988_v12  ;;  %v6069_v60 = vcombine.high %v6067_v3, %v6067_v3  ;;  %5889 = vrot.lane.b32.xlu1 %v5870_v58, %s12158_s24  ;;  %v6388_v12 = vcombine.high %v14328_v25, %v14328_v25  ;;  %v7414_v54 = vcombine.low %v6090_v36, %v6098_v21 }
 0x35b   : > { %5198 = vst.msk [vmem:[#allocation3 + $0x48] sm:$0x7f] %vm4843_vm14, %v5180_v63  ;;  %v5363_v44 = vpop.permute.xlu0 %5362  ;;  %v7431_v26 = vrot.slane %v7415_v31, %v12826_v49  ;;  %v6677_v3 = vcombine.high %v5963_v51, %v5963_v51  ;;  %v11340_v63 = vcombine.high %v6412_v50, %v6426_v14  ;;  %v14410_v25 = vrot.slane %v6403_v27, %v12826_v49  ;;  %v17182_v31 = vld [vmem:[#allocation40_spill] sm:$0xff] }
 0x35c   : > { %5157 = vst.msk [vmem:[#allocation3 + $0x50] sm:$0x7f] %vm4799_vm12, %v14148_v7  ;;  %v6387_v7 = vcombine.high %v6371_v56, %v6371_v56  ;;  %v6097_v35 = vrot.slane %v6069_v60, %v12826_v49  ;;  %v7661_v11 = vcombine.low %v6388_v12, %v6371_v56 }
 0x35d   : > { %5240 = vst.msk [vmem:[#allocation3 + $0x48] sm:$0x7f] %vm4886_vm15, %v14110_v39  ;;  %4889 = vst.msk [vmem:[#allocation3 + $0x10] sm:$0x7f] %vm4886_vm15, %v4870_v19  ;;  %v5745_v39 = vld [vmem:[#allocation2 + $0x221] sm:$0x7f]  ;;  %v5447_v57 = vpop.permute.xlu1 %5446  ;;  %v6691_v58 = vrot.slane %v6677_v3, %v12826_v49  ;;  %v14434_v9 = vrot.slane %v11340_v63, %v12826_v49 }
 0x35e   : > { %5381 = vst.msk [vmem:[#allocation3 + $0x80] sm:$0x7f] %vm4669_vm9, %v5363_v44  ;;  %5765 = vrot.lane.b32.xlu0 %v5745_v39, %s17020_s27  ;;  %5931 = vrot.lane.b32.xlu1 %v5912_v45, %s17168_s21  ;;  %v7662_v33 = vcombine.low %v6385_v1, %v6387_v7  ;;  %v14380_v4 = vcombine.low %v6097_v35, %v6099_v46  ;;  %v17181_v19 = vld [vmem:[#allocation37_spill] sm:$0xff]  ;;  %v17183_v35 = vld [vmem:[#allocation43_spill] sm:$0xff] }
 0x35f   : > { %5423 = vst.msk [vmem:[#allocation3 + $0x80] sm:$0x7f] %vm4712_vm10, %v14098_v32  ;;  %v5758_v29 = vpop.permute.xlu0 %5757  ;;  %v7424_v32 = vrot.slane %v7414_v54, %v12826_v49  ;;  %v7683_v36 = vrot.slane %v7661_v11, %v12826_v49  ;;  %v7710_v7 = vcombine.low %v14410_v25, %v6433_v20  ;;  %v6725_v45 = vcombine.high %v5964_v61, %v5964_v61  ;;  %v17191_v63 = vld [vmem:[#allocation31_spill] sm:$0xff] }
 0x360   : > { %5465 = vst.msk [vmem:[#allocation3 + $0x80] sm:$0x7f] %vm4755_vm11, %v5447_v57  ;;  %v7690_v24 = vrot.slane %v7662_v33, %v12826_v49  ;;  %v7438_v47 = vrot.slane %v14380_v4, %v12826_v49  ;;  %v14431_v57 = vrot.slane %v7708_v0, %v12826_v49  ;;  %v7676_v11 = vrot.slane %v14395_v28, %v12826_v49  ;;  %v17190_v0 = vld [vmem:[#allocation10_spill] sm:$0xff] }
 0x361   : > { %5508 = vst.msk [vmem:[#allocation3 + $0x80] sm:$0x7f] %vm4799_vm12, %v13994_v37  ;;  %v4785_v62 = vpop.permute.xlu1 %4784  ;;  %v14382_v13 = vcombine.low %v7424_v32, %v7431_v26  ;;  %v17185_v32 = vld [vmem:[#allocation33_spill] sm:$0xff]  ;;  %v6693_v17 = vcombine.high %v6691_v58, %v6691_v58  ;;  %v14464_v4 = vrot.slane %v7710_v7, %v12826_v49  ;;  %v17193_v7 = vld [vmem:[#allocation11_spill] sm:$0xff] }
 0x362   : > { %5776 = vst.msk [vmem:[#allocation3 + $0xb8] sm:$0x7f] %vm4712_vm10, %v5758_v29  ;;  %5763 = vrot.lane.b32.xlu0 %v5744_v48, %s17020_s27  ;;  %5849 = vrot.lane.b32.xlu1 %v5829_v30, %s17164_s14  ;;  %v14424_v1 = vcombine.low %v7683_v36, %v7690_v24  ;;  %v6435_v29 = vcombine.high %v14410_v25, %v14410_v25  ;;  %v17184_v30 = vld [vmem:[#allocation36_spill] sm:$0xff] }
 0x363   : > { %5551 = vst.msk [vmem:[#allocation3 + $0x80] sm:$0x7f] %vm4843_vm14, %v13864_v43  ;;  %v4613_v52 = vpop.permute.xlu0 %4612  ;;  %v7454_v54 = vrot.slane %v14382_v13, %v12826_v49  ;;  %v14467_v13 = vrot.slane %v6691_v58, %v12826_v49  ;;  %v7740_v3 = vcombine.low %v14431_v57, %v14434_v9 }
 0x364   : > { %v5951_v2 = vld [vmem:[#allocation3 + $0x10] sm:$0x7f]  ;;  %5593 = vst.msk [vmem:[#allocation3 + $0x80] sm:$0x7f] %vm4886_vm15, %v14000_v16  ;;  %v6684_v16 = vrot.slane %v5963_v51, %v12826_v49  ;;  %v14407_v53 = vld [vmem:[#allocation3 + $0x48] sm:$0x7f] }
 0x365   : > { %4803 = vst.msk [vmem:[#allocation3 + $0x18] sm:$0x7f] %vm4799_vm12, %v4785_v62  ;;  %v6108_v37 = vrot.slane %v5951_v2, %v12826_v49  ;;  %v6101_v43 = vcombine.high %v5951_v2, %v5951_v2  ;;  %v4872_v6 = vpop.permute.xlu1 %4871  ;;  %v6444_v39 = vrot.slane %v14407_v53, %v12826_v49  ;;  %v14457_v62 = vld [vmem:[#allocation3 + $0xb0] sm:$0x7f] }
 0x366   : > { %4847 = vst.msk [vmem:[#allocation3 + $0x18] sm:$0x7f] %vm4843_vm14, %v14142_v34  ;;  %v5787_v34 = vld [vmem:[#allocation2 + $0x192] sm:$0x7f]  ;;  %5933 = vrot.lane.b32.xlu1 %v5913_v38, %s17168_s21  ;;  %v6692_v60 = vcombine.high %v6684_v16, %v6684_v16  ;;  %v14452_v51 = vrot.slane %v6684_v16, %v12826_v49  ;;  %v14478_v38 = vrot.slane %v6725_v45, %v12826_v49 }
 0x367   : > { %v6116_v55 = vcombine.high %v6108_v37, %v6108_v37  ;;  %v6115_v18 = vrot.slane %v6101_v43, %v12826_v49  ;;  %4630 = vst.msk [vmem:[#allocation3 + $0x20] sm:$0x7f] %vm4625_vm8, %v4613_v52  ;;  %5807 = vrot.lane.b32.xlu0 %v5787_v34, %s12161_s29  ;;  %v14402_v21 = vrot.slane %v6108_v37, %v12826_v49  ;;  %v4932_v12 = vpop.permute.xlu0 %4931  ;;  %v17186_v2 = vld [vmem:[#allocation41_spill] sm:$0xff]  ;;  %v17187_v43 = vld [vmem:[#allocation16_spill] sm:$0xff]  ;;  %s17024_s29 = smov 80  }
 0x368   : > { %4674 = vst.msk [vmem:[#allocation3 + $0x20] sm:$0x7f] %vm4669_vm9, %v13961_v41  ;;  %v5871_v41 = vld [vmem:[#allocation2 + $0x111] sm:$0x7f]  ;;  %v14455_v48 = vrot.slane %v6692_v60, %v12826_v49  ;;  %v7706_v37 = vrot.slane %v14424_v1, %v12826_v49  ;;  %v6452_v16 = vcombine.high %v6444_v39, %v6444_v39  ;;  %v6732_v52 = vrot.slane %v5964_v61, %v12826_v49 }
 0x369   : > { %4890 = vst.msk [vmem:[#allocation3 + $0x18] sm:$0x7f] %vm4886_vm15, %v4872_v6  ;;  %v14405_v40 = vrot.slane %v6116_v55, %v12826_v49  ;;  %v6117_v56 = vcombine.high %v6115_v18, %v6115_v18  ;;  %v5182_v27 = vpop.permute.xlu1 %5181  ;;  %v6131_v33 = vrot.slane %v6115_v18, %v12826_v49  ;;  %v17188_v55 = vld [vmem:[#allocation30_spill] sm:$0xff]  ;;  %v17189_v18 = vld [vmem:[#allocation32_spill] sm:$0xff]  ;;  %v7061_v6 = vcombine.high %v14457_v62, %v14457_v62 }
 0x36a   : > { %4717 = vst.msk [vmem:[#allocation3 + $0x20] sm:$0x7f] %vm4712_vm10, %v17181_v19  ;;  %v6437_v61 = vcombine.high %v14407_v53, %v14407_v53  ;;  %v14497_v19 = vrot.slane %v6693_v17, %v12826_v49  ;;  %v14513_v57 = vrot.slane %v6452_v16, %v12826_v49  ;;  %v6740_v9 = vcombine.high %v6732_v52, %v6732_v52  ;;  %v17196_v17 = vld [vmem:[#allocation14_spill] sm:$0xff] }
 0x36b   : > { %4760 = vst.msk [vmem:[#allocation3 + $0x20] sm:$0x7f] %vm4755_vm11, %v17182_v31  ;;  %v7417_v44 = vcombine.low %v14402_v21, %v14405_v40  ;;  %5891 = vrot.lane.b32.xlu0 %v5871_v41, %s12158_s24  ;;  %v6145_v26 = vrot.slane %v6117_v56, %v12826_v49  ;;  %v4934_v5 = vpop.permute.xlu0 %4933  ;;  %v6147_v56 = vcombine.high %v6131_v33, %v6131_v33  ;;  %s16845_s24 = scalar_lea.hbm %s16896_s9, %s11377_s16 }
 0x36c   : > { %4948 = vst.msk [vmem:[#allocation3 + $0x58] sm:$0x7f] %vm4582_vm7, %v4932_v12  ;;  %4949 = vst.msk [vmem:[#allocation3 + $0x60] sm:$0x7f] %vm4582_vm7, %v4934_v5  ;;  %v7954_v41 = vcombine.low %v14452_v51, %v14455_v48  ;;  %v6484_v25 = vcombine.high %v14513_v57, %v14513_v57 }
 0x36d   : > { %4990 = vst.msk [vmem:[#allocation3 + $0x58] sm:$0x7f] %vm4625_vm8, %v17183_v35  ;;  %v7445_v46 = vrot.slane %v7417_v44, %v12826_v49  ;;  %v5365_v36 = vpop.permute.xlu1 %5364  ;;  %4991 = vst.msk [vmem:[#allocation3 + $0x60] sm:$0x7f] %vm4625_vm8, %v17189_v18  ;;  %v7464_v34 = vcombine.low %v6131_v33, %v6145_v26  ;;  %v11337_v44 = vcombine.high %v14402_v21, %v14405_v40  ;;  %v17194_v21 = vld [vmem:[#allocation25_spill] sm:$0xff] }
 0x36e   : > { %5199 = vst.msk [vmem:[#allocation3 + $0x50] sm:$0x7f] %vm4843_vm14, %v5182_v27  ;;  %v14510_v27 = vrot.slane %v6444_v39, %v12826_v49  ;;  %v6723_v26 = vcombine.high %v14467_v13, %v14467_v13  ;;  %v7956_v18 = vcombine.low %v14467_v13, %v14497_v19 }
 0x36f   : > { %5032 = vst.msk [vmem:[#allocation3 + $0x58] sm:$0x7f] %vm4669_vm9, %v17184_v30  ;;  %v7447_v14 = vcombine.low %v7438_v47, %v7445_v46  ;;  %5382 = vst.msk [vmem:[#allocation3 + $0x88] sm:$0x7f] %vm4669_vm9, %v5365_v36  ;;  %v17192_v47 = vld [vmem:[#allocation24_spill] sm:$0xff]  ;;  %v5184_v58 = vpop.permute.xlu0 %5183  ;;  %v7480_v35 = vrot.slane %v7464_v34, %v12826_v49  ;;  %v17195_v46 = vld [vmem:[#allocation17_spill] sm:$0xff]  ;;  %v6741_v30 = vcombine.high %v14478_v38, %v14478_v38 }
 0x370   : > { %5241 = vst.msk [vmem:[#allocation3 + $0x50] sm:$0x7f] %vm4886_vm15, %v17185_v32  ;;  %v14472_v50 = vld [vmem:[#allocation3 + $0x18] sm:$0x7f]  ;;  %v14538_v32 = vrot.slane %v6732_v52, %v12826_v49  ;;  %v7473_v5 = vrot.slane %v11337_v44, %v12826_v49  ;;  %v6755_v36 = vrot.slane %v14478_v38, %v12826_v49  ;;  %v7711_v52 = vcombine.low %v6435_v29, %v14510_v27  ;;  %v17198_v38 = vld [vmem:[#allocation27_spill] sm:$0xff] }
 0x371   : > { %5074 = vst.msk [vmem:[#allocation3 + $0x58] sm:$0x7f] %vm4712_vm10, %v17186_v2  ;;  %v7461_v24 = vrot.slane %v7447_v14, %v12826_v49  ;;  %v6156_v20 = vrot.slane %v14472_v50, %v12826_v49  ;;  %5424 = vst.msk [vmem:[#allocation3 + $0x88] sm:$0x7f] %vm4712_vm10, %v17191_v63  ;;  %v5449_v53 = vpop.permute.xlu1 %5448  ;;  %v17199_v29 = vld [vmem:[#allocation22_spill] sm:$0xff]  ;;  %v17201_v44 = vld [vmem:[#allocation47_spill] sm:$0xff] }
 0x372   : > { %5116 = vst.msk [vmem:[#allocation3 + $0x58] sm:$0x7f] %vm4755_vm11, %v17187_v43  ;;  %5466 = vst.msk [vmem:[#allocation3 + $0x88] sm:$0x7f] %vm4755_vm11, %v5449_v53  ;;  %v6451_v43 = vrot.slane %v6437_v61, %v12826_v49  ;;  %v6770_v61 = vcombine.high %v14538_v32, %v14538_v32 }
 0x373   : > { %5158 = vst.msk [vmem:[#allocation3 + $0x58] sm:$0x7f] %vm4799_vm12, %v17188_v55  ;;  %v7462_v60 = vcombine.low %v7454_v54, %v7461_v24  ;;  %v6164_v31 = vcombine.high %v6156_v20, %v6156_v20  ;;  %v6172_v12 = vrot.slane %v6156_v20, %v12826_v49  ;;  %v11343_v54 = vcombine.high %v14452_v51, %v14455_v48  ;;  %v5367_v33 = vpop.permute.xlu0 %5366 }
 0x374   : > { %5033 = vst.msk [vmem:[#allocation3 + $0x60] sm:$0x7f] %vm4669_vm9, %v17190_v0  ;;  %5383 = vst.msk [vmem:[#allocation3 + $0x90] sm:$0x7f] %vm4669_vm9, %v5367_v33  ;;  %v14555_v55 = vrot.slane %v7740_v3, %v12826_v49  ;;  %v6762_v24 = vrot.slane %v6740_v9, %v12826_v49  ;;  %v7495_v0 = vcombine.low %v7473_v5, %v7480_v35 }
 0x375   : > { %5075 = vst.msk [vmem:[#allocation3 + $0x60] sm:$0x7f] %vm4712_vm10, %v17192_v47  ;;  %11800 = vmatmul.mubr.msk.f32.gmra.mrb[2].mxu1 %vm8565_vm0, %v7462_v60  ;;  %v14524_v40 = vrot.slane %v6164_v31, %v12826_v49  ;;  %v6194_v39 = vcombine.high %v6172_v12, %v6172_v12  ;;  %v7465_v45 = vcombine.low %v6147_v56, %v6172_v12  ;;  %v4615_v16 = vpop.permute.xlu1 %4614  ;;  %5425 = vst.msk [vmem:[#allocation3 + $0x90] sm:$0x7f] %vm4712_vm10, %v17198_v38  ;;  %v17200_v47 = vld [vmem:[#allocation38_spill] sm:$0xff] }
 0x376   : > { %5117 = vst.msk [vmem:[#allocation3 + $0x60] sm:$0x7f] %vm4755_vm11, %v17193_v7  ;;  %11802 = vmatprep.mubr.msk.f32.mxu1 %vm12163_vm13, %v17162_v22  ;;  %v6769_v56 = vrot.slane %v6741_v30, %v12826_v49  ;;  %v6467_v60 = vrot.slane %v6451_v43, %v12826_v49  ;;  %v6482_v31 = vcombine.high %v14510_v27, %v14510_v27 }
 0x377   : > { %5200 = vst.msk [vmem:[#allocation3 + $0x58] sm:$0x7f] %vm4843_vm14, %v5184_v58  ;;  %v7466_v2 = vcombine.low %v14524_v40, %v6194_v39  ;;  %v5959_v14 = vld [vmem:[#allocation3 + $0x50] sm:$0x7f]  ;;  %v7487_v20 = vrot.slane %v7465_v45, %v12826_v49  ;;  %v14573_v19 = vpop.permute.xlu0 %4790  ;;  %v6771_v12 = vcombine.high %v6755_v36, %v6755_v36  ;;  %v6453_v53 = vcombine.high %v6451_v43, %v6451_v43 }
 0x378   : > { %5159 = vst.msk [vmem:[#allocation3 + $0x60] sm:$0x7f] %vm4799_vm12, %v14168_v23  ;;  %5509 = vst.msk [vmem:[#allocation3 + $0x88] sm:$0x7f] %vm4799_vm12, %v17195_v46  ;;  %v6149_v23 = vcombine.high %v14472_v50, %v14472_v50  ;;  %v17197_v50 = vld [vmem:[#allocation44_spill] sm:$0xff]  ;;  %v6485_v63 = vcombine.high %v5959_v14, %v5959_v14  ;;  %v6492_v9 = vrot.slane %v5959_v14, %v12826_v49 }
 0x379   : > { %5242 = vst.msk [vmem:[#allocation3 + $0x58] sm:$0x7f] %vm4886_vm15, %v17194_v21  ;;  %v7494_v34 = vrot.slane %v7466_v2, %v12826_v49  ;;  %v4787_v7 = vpop.permute.xlu1 %4786  ;;  %v14587_v21 = vrot.slane %v7954_v41, %v12826_v49  ;;  %v6772_v39 = vcombine.high %v6762_v24, %v6762_v24  ;;  %v7503_v45 = vrot.slane %v7495_v0, %v12826_v49  ;;  %v14602_v0 = vld [vmem:[#allocation3 + $0xa8] sm:$0x7f] }
 0x37a   : > { %5552 = vst.msk [vmem:[#allocation3 + $0x88] sm:$0x7f] %vm4843_vm14, %v17196_v17  ;;  %v6163_v3 = vrot.slane %v6149_v23, %v12826_v49  ;;  %v7739_v35 = vrot.slane %v7711_v52, %v12826_v49  ;;  %v7758_v46 = vcombine.low %v6484_v25, %v6467_v60  ;;  %v17202_v23 = vld [vmem:[#allocation45_spill] sm:$0xff]  ;;  %v6499_v17 = vrot.slane %v6485_v63, %v12826_v49 }
 0x37b   : > { %5594 = vst.msk [vmem:[#allocation3 + $0x88] sm:$0x7f] %vm4886_vm15, %v17197_v50  ;;  %v7496_v58 = vcombine.low %v7487_v20, %v7494_v34  ;;  %v7984_v41 = vrot.slane %v7956_v18, %v12826_v49  ;;  %v14598_v2 = vpop.permute.xlu0 %4877  ;;  %v7757_v14 = vcombine.low %v14513_v57, %v6482_v31  ;;  %v8003_v43 = vcombine.low %v6762_v24, %v6770_v61 }
 0x37c   : > { %4631 = vst.msk [vmem:[#allocation3 + $0x28] sm:$0x7f] %vm4625_vm8, %v4615_v16  ;;  %v6165_v30 = vcombine.high %v6163_v3, %v6163_v3  ;;  %v6179_v33 = vrot.slane %v6163_v3, %v12826_v49  ;;  %v8005_v50 = vcombine.low %v6769_v56, %v6771_v12  ;;  %v6481_v52 = vrot.slane %v6453_v53, %v12826_v49 }
 0x37d   : > { %4675 = vst.msk [vmem:[#allocation3 + $0x28] sm:$0x7f] %vm4669_vm9, %v17199_v29  ;;  %v7510_v27 = vrot.slane %v7496_v58, %v12826_v49  ;;  %v4874_v16 = vpop.permute.xlu1 %4873  ;;  %v6483_v38 = vcombine.high %v6467_v60, %v6467_v60  ;;  %v6500_v20 = vcombine.high %v6492_v9, %v6492_v9  ;;  %v8004_v34 = vcombine.low %v6772_v39, %v6755_v36 }
 0x37e   : > { %4718 = vst.msk [vmem:[#allocation3 + $0x28] sm:$0x7f] %vm4712_vm10, %v17200_v47  ;;  %v7741_v18 = vcombine.low %v14464_v4, %v7739_v35  ;;  %v7774_v25 = vrot.slane %v7758_v46, %v12826_v49  ;;  %v7977_v57 = vrot.slane %v11343_v54, %v12826_v49  ;;  %v8002_v36 = vcombine.low %v6723_v26, %v14538_v32  ;;  %v17204_v35 = vld [vmem:[#allocation39_spill] sm:$0xff] }
 0x37f   : > { %4761 = vst.msk [vmem:[#allocation3 + $0x28] sm:$0x7f] %vm4755_vm11, %v17201_v44  ;;  %v7511_v5 = vcombine.low %v7503_v45, %v7510_v27  ;;  %v6193_v24 = vrot.slane %v6165_v30, %v12826_v49  ;;  %v6195_v29 = vcombine.high %v6179_v33, %v6179_v33  ;;  %v6196_v4 = vcombine.high %v14524_v40, %v14524_v40  ;;  %v14621_v56 = vpop.permute.xlu0 %5187  ;;  %v17203_v44 = vld [vmem:[#allocation19_spill] sm:$0xff] }
 0x380   : > { %4804 = vst.msk [vmem:[#allocation3 + $0x20] sm:$0x7f] %vm4799_vm12, %v4787_v7  ;;  %v5960_v3 = vld [vmem:[#allocation3 + $0x58] sm:$0x7f]  ;;  %v6501_v63 = vcombine.high %v6499_v17, %v6499_v17  ;;  %v7767_v51 = vrot.slane %v7757_v14, %v12826_v49  ;;  %v7986_v48 = vcombine.low %v7977_v57, %v7984_v41  ;;  %v8019_v54 = vrot.slane %v8003_v43, %v12826_v49 }
 0x381   : > { %4848 = vst.msk [vmem:[#allocation3 + $0x20] sm:$0x7f] %vm4843_vm14, %v17202_v23  ;;  %11803 = vmatmul.mubr.msk.f32.gmra.mrb[4].mxu1 %vm8565_vm0, %v7511_v5  ;;  %v7013_v13 = vcombine.high %v14602_v0, %v14602_v0  ;;  %v5451_v26 = vpop.permute.xlu1 %5450  ;;  %v14628_v32 = vrot.slane %v6500_v20, %v12826_v49  ;;  %v14630_v61 = vcombine.low %v6481_v52, %v6483_v38  ;;  %v5965_v52 = vld [vmem:[#allocation3 + $0x80] sm:$0x7f]  ;;  %v17206_v38 = vld [vmem:[#allocation29_spill] sm:$0xff] }
 0x382   : > { %4891 = vst.msk [vmem:[#allocation3 + $0x20] sm:$0x7f] %vm4886_vm15, %v4874_v16  ;;  %11805 = vmatprep.mubr.msk.f32.mxu1 %vm12163_vm13, %v17162_v22  ;;  %v8026_v40 = vrot.slane %v8004_v34, %v12826_v49  ;;  %v8033_v47 = vrot.slane %v8005_v50, %v12826_v49  ;;  %v7755_v58 = vrot.slane %v7741_v18, %v12826_v49  ;;  %v17207_v57 = vld [vmem:[#allocation42_spill] sm:$0xff] }
 0x383   : > { %5467 = vst.msk [vmem:[#allocation3 + $0x90] sm:$0x7f] %vm4755_vm11, %v5451_v26  ;;  %v14636_v60 = vcombine.low %v7767_v51, %v7774_v25  ;;  %v6540_v31 = vrot.slane %v5960_v3, %v12826_v49  ;;  %v8012_v12 = vrot.slane %v8002_v36, %v12826_v49  ;;  %v7512_v7 = vcombine.low %v6196_v4, %v6179_v33  ;;  %v5371_v27 = vpop.permute.xlu0 %5370 }
 0x384   : > { %5510 = vst.msk [vmem:[#allocation3 + $0x90] sm:$0x7f] %vm4799_vm12, %v17203_v44  ;;  %v7513_v53 = vcombine.low %v6193_v24, %v6195_v29  ;;  %v14643_v39 = vrot.slane %v6492_v9, %v12826_v49  ;;  %v6529_v45 = vrot.slane %v6501_v63, %v12826_v49  ;;  %v6533_v46 = vcombine.high %v5960_v3, %v5960_v3  ;;  %v17205_v9 = vld [vmem:[#allocation21_spill] sm:$0xff]  ;;  %v17208_v3 = vld [vmem:[#allocation20_spill] sm:$0xff] }
 0x385   : > { %5553 = vst.msk [vmem:[#allocation3 + $0x90] sm:$0x7f] %vm4843_vm14, %v17204_v35  ;;  %v14649_v23 = vrot.slane %v7986_v48, %v12826_v49  ;;  %v14651_v30 = vcombine.low %v8012_v12, %v8019_v54  ;;  %v14655_v41 = vrot.slane %v14602_v0, %v12826_v49  ;;  %v4617_v33 = vpop.permute.xlu1 %4616  ;;  %v7781_v43 = vrot.slane %v14630_v61, %v12826_v49  ;;  %v17209_v54 = vld [vmem:[#allocation26_spill] sm:$0xff] }
 0x386   : > { %5385 = vst.msk [vmem:[#allocation3 + $0xa0] sm:$0x7f] %vm4669_vm9, %v5371_v27  ;;  %v7760_v14 = vcombine.low %v14643_v39, %v14628_v32  ;;  %v6515_v50 = vrot.slane %v6499_v17, %v12826_v49  ;;  %v8035_v16 = vcombine.low %v8026_v40, %v8033_v47  ;;  %v14670_v34 = vcombine.low %v14555_v55, %v7755_v58 }
 0x387   : > { %5595 = vst.msk [vmem:[#allocation3 + $0x90] sm:$0x7f] %vm4886_vm15, %v17205_v9  ;;  %v7797_v18 = vrot.slane %v14636_v60, %v12826_v49  ;;  %v6548_v25 = vcombine.high %v6540_v31, %v6540_v31  ;;  %v7522_v17 = vrot.slane %v7512_v7, %v12826_v49  ;;  %v7529_v36 = vrot.slane %v7513_v53, %v12826_v49  ;;  %v5455_v4 = vpop.permute.xlu0 %5454 }
 0x388   : > { %5427 = vst.msk [vmem:[#allocation3 + $0xa0] sm:$0x7f] %vm4712_vm10, %v17206_v38  ;;  %v6556_v24 = vrot.slane %v6540_v31, %v12826_v49  ;;  %v7807_v29 = vcombine.low %v6515_v50, %v6529_v45  ;;  %v6547_v63 = vrot.slane %v6533_v46, %v12826_v49  ;;  %v8042_v51 = vrot.slane %v14651_v30, %v12826_v49  ;;  %v17210_v31 = vld [vmem:[#allocation12_spill] sm:$0xff]  ;;  %v17211_v45 = vld [vmem:[#allocation9_spill] sm:$0xff] }
 0x389   : > { %v5953_v5 = vld [vmem:[#allocation3 + $0x20] sm:$0x7f]  ;;  %4632 = vst.msk [vmem:[#allocation3 + $0x30] sm:$0x7f] %vm4625_vm8, %v4617_v33  ;;  %v6773_v48 = vcombine.high %v5965_v52, %v5965_v52  ;;  %v4876_v26 = vpop.permute.xlu1 %4875  ;;  %v7788_v61 = vrot.slane %v7760_v14, %v12826_v49  ;;  %v6531_v40 = vcombine.high %v6515_v50, %v6515_v50  ;;  %v11341_v47 = vcombine.high %v14643_v39, %v14628_v32  ;;  %v17213_v38 = vld [vmem:[#allocation48_spill] sm:$0xff] }
 0x38a   : > { %v6204_v20 = vrot.slane %v5953_v5, %v12826_v49  ;;  %4676 = vst.msk [vmem:[#allocation3 + $0x30] sm:$0x7f] %vm4669_vm9, %v17207_v57  ;;  %v8049_v58 = vrot.slane %v8035_v16, %v12826_v49  ;;  %v6197_v7 = vcombine.high %v5953_v5, %v5953_v5  ;;  %v6570_v53 = vrot.slane %v6548_v25, %v12826_v49 }
 0x38b   : > { %4719 = vst.msk [vmem:[#allocation3 + $0x30] sm:$0x7f] %vm4712_vm10, %v17208_v3  ;;  %v7544_v32 = vcombine.low %v7522_v17, %v7529_v36  ;;  %v6578_v39 = vcombine.high %v6556_v24, %v6556_v24  ;;  %v7823_v27 = vrot.slane %v7807_v29, %v12826_v49  ;;  %v6780_v35 = vrot.slane %v5965_v52, %v12826_v49  ;;  %v4789_v46 = vpop.permute.xlu0 %4788 }
 0x38c   : > { %v6212_v55 = vcombine.high %v6204_v20, %v6204_v20  ;;  %5469 = vst.msk [vmem:[#allocation3 + $0xa0] sm:$0x7f] %vm4755_vm11, %v5455_v4  ;;  %4762 = vst.msk [vmem:[#allocation3 + $0x30] sm:$0x7f] %vm4755_vm11, %v17209_v54  ;;  %v6220_v12 = vrot.slane %v6204_v20, %v12826_v49  ;;  %v6549_v33 = vcombine.high %v6547_v63, %v6547_v63 }
 0x38d   : > { %5512 = vst.msk [vmem:[#allocation3 + $0xa0] sm:$0x7f] %vm4799_vm12, %v17210_v31  ;;  %4806 = vst.msk [vmem:[#allocation3 + $0x30] sm:$0x7f] %vm4799_vm12, %v14573_v19  ;;  %v17212_v19 = vld [vmem:[#allocation8_spill] sm:$0xff]  ;;  %v6563_v5 = vrot.slane %v6547_v63, %v12826_v49  ;;  %v14710_v14 = vcombine.low %v7781_v43, %v7788_v61  ;;  %v7808_v50 = vcombine.low %v6531_v40, %v6556_v24 }
 0x38e   : > { %v6234_v44 = vrot.slane %v6212_v55, %v12826_v49  ;;  %5555 = vst.msk [vmem:[#allocation3 + $0xa0] sm:$0x7f] %vm4843_vm14, %v17211_v45  ;;  %4850 = vst.msk [vmem:[#allocation3 + $0x30] sm:$0x7f] %vm4843_vm14, %v14160_v15  ;;  %v5800_v15 = vpop.permute.xlu1 %5799  ;;  %v7816_v16 = vrot.slane %v11341_v47, %v12826_v49  ;;  %v6787_v52 = vrot.slane %v6773_v48, %v12826_v49  ;;  %v14725_v48 = vld [vmem:[#allocation3 + $0x88] sm:$0x7f] }
 0x38f   : > { %5597 = vst.msk [vmem:[#allocation3 + $0xa0] sm:$0x7f] %vm4886_vm15, %v17212_v19  ;;  %4893 = vst.msk [vmem:[#allocation3 + $0x30] sm:$0x7f] %vm4886_vm15, %v14598_v2  ;;  %v6211_v25 = vrot.slane %v6197_v7, %v12826_v49  ;;  %v6580_v57 = vcombine.high %v6570_v53, %v6570_v53  ;;  %v7809_v43 = vcombine.low %v6570_v53, %v6578_v39  ;;  %v5634_v29 = vpop.permute.xlu0 %5633 }
 0x390   : > { %v7514_v30 = vcombine.low %v6220_v12, %v6234_v44  ;;  %v11338_v9 = vcombine.high %v6220_v12, %v6234_v44  ;;  %4805 = vst.msk [vmem:[#allocation3 + $0x28] sm:$0x7f] %vm4799_vm12, %v4789_v46  ;;  %v7838_v17 = vcombine.low %v7816_v16, %v7823_v27  ;;  %v14721_v36 = vcombine.low %v8042_v51, %v8049_v58 }
 0x391   : > { %4849 = vst.msk [vmem:[#allocation3 + $0x28] sm:$0x7f] %vm4843_vm14, %v17213_v38  ;;  %v6788_v24 = vcombine.high %v6780_v35, %v6780_v35  ;;  %v7552_v3 = vrot.slane %v7544_v32, %v12826_v49  ;;  %v6577_v55 = vrot.slane %v6549_v33, %v12826_v49  ;;  %v6579_v63 = vcombine.high %v6563_v5, %v6563_v5 }
 0x392   : > { %5818 = vst.msk [vmem:[#allocation3 + $0xb8] sm:$0x7f] %vm4755_vm11, %v5800_v15  ;;  %v7536_v2 = vrot.slane %v7514_v30, %v12826_v49  ;;  %v7543_v20 = vrot.slane %v11338_v9, %v12826_v49  ;;  %v5842_v54 = vpop.permute.xlu1 %5841  ;;  %v7830_v61 = vrot.slane %v7808_v50, %v12826_v49  ;;  %v6789_v51 = vcombine.high %v6787_v52, %v6787_v52 }
 0x393   : > { %4892 = vst.msk [vmem:[#allocation3 + $0x28] sm:$0x7f] %vm4886_vm15, %v4876_v26  ;;  %v7804_v26 = vrot.slane %v14710_v14, %v12826_v49  ;;  %v14732_v40 = vrot.slane %v6787_v52, %v12826_v49  ;;  %v6213_v58 = vcombine.high %v6211_v25, %v6211_v25  ;;  %v14736_v31 = vcombine.low %v6580_v57, %v6563_v5  ;;  %v5676_v39 = vpop.permute.xlu0 %5675 }
 0x394   : > { %v7545_v4 = vcombine.low %v7536_v2, %v7543_v20  ;;  %5651 = vst.msk [vmem:[#allocation3 + $0xc0] sm:$0x7f] %vm4582_vm7, %v5634_v29  ;;  %v14739_v12 = vrot.slane %v6780_v35, %v12826_v49  ;;  %v7837_v7 = vrot.slane %v7809_v43, %v12826_v49  ;;  %v14743_v53 = vrot.slane %v7838_v17, %v12826_v49 }
 0x395   : > { %5860 = vst.msk [vmem:[#allocation3 + $0xb8] sm:$0x7f] %vm4799_vm12, %v5842_v54  ;;  %v14746_v45 = vrot.slane %v6788_v24, %v12826_v49  ;;  %v14750_v32 = vrot.slane %v14725_v48, %v12826_v49  ;;  %v14753_v35 = vcombine.low %v6577_v55, %v6579_v63  ;;  %v6227_v9 = vrot.slane %v6211_v25, %v12826_v49 }
 0x396   : > { %v7559_v47 = vrot.slane %v7545_v4, %v12826_v49  ;;  %v5955_v44 = vld [vmem:[#allocation3 + $0x30] sm:$0x7f]  ;;  %5693 = vst.msk [vmem:[#allocation3 + $0xc0] sm:$0x7f] %vm4625_vm8, %v5676_v39  ;;  %v5884_v30 = vpop.permute.xlu1 %5883  ;;  %v14757_v33 = vcombine.low %v7830_v61, %v7837_v7  ;;  %v14760_v5 = vrot.slane %v6789_v51, %v12826_v49  ;;  %v6819_v15 = vcombine.high %v14732_v40, %v14732_v40 }
 0x397   : > { %v6293_v19 = vcombine.high %v5955_v44, %v5955_v44  ;;  %v6300_v46 = vrot.slane %v5955_v44, %v12826_v49  ;;  %5902 = vst.msk [vmem:[#allocation3 + $0xb8] sm:$0x7f] %vm4843_vm14, %v5884_v30  ;;  %v6241_v16 = vrot.slane %v6213_v58, %v12826_v49  ;;  %v7865_v2 = vrot.slane %v14736_v31, %v12826_v49  ;;  %v5718_v17 = vpop.permute.xlu0 %5717 }
 0x398   : > { %v7560_v27 = vcombine.low %v7552_v3, %v7559_v47  ;;  %v14775_v57 = vrot.slane %v14750_v32, %v12826_v49  ;;  %v8051_v43 = vcombine.low %v14739_v12, %v14746_v45  ;;  %v6821_v3 = vcombine.high %v14725_v48, %v14725_v48  ;;  %5735 = vst.msk [vmem:[#allocation3 + $0xc0] sm:$0x7f] %vm4669_vm9, %v5718_v17 }
 0x399   : > { %v6307_v52 = vrot.slane %v6293_v19, %v12826_v49  ;;  %v6308_v38 = vcombine.high %v6300_v46, %v6300_v46  ;;  %v6243_v63 = vcombine.high %v6227_v9, %v6227_v9  ;;  %v7561_v47 = vcombine.low %v6227_v9, %v6241_v16 }
 0x39a   : > { %11806 = vmatmul.mubr.msk.f32.gmra.mrb[6].mxu1 %vm8565_vm0, %v7560_v27  ;;  %v5954_v50 = vld [vmem:[#allocation3 + $0x28] sm:$0x7f]  ;;  %v5926_v55 = vpop.permute.xlu1 %5925  ;;  %v6316_v58 = vrot.slane %v6300_v46, %v12826_v49 }
 0x39b   : > { %11808 = vmatprep.mubr.msk.f32.mxu1 %vm12163_vm13, %v17162_v22  ;;  %v6245_v20 = vcombine.high %v5954_v50, %v5954_v50  ;;  %v6252_v25 = vrot.slane %v5954_v50, %v12826_v49  ;;  %v6309_v24 = vcombine.high %v6307_v52, %v6307_v52  ;;  %v6323_v29 = vrot.slane %v6307_v52, %v12826_v49  ;;  %v5760_v30 = vpop.permute.xlu0 %5759 }
 0x39c   : > { %v6330_v4 = vrot.slane %v6308_v38, %v12826_v49  ;;  %5944 = vst.msk [vmem:[#allocation3 + $0xb8] sm:$0x7f] %vm4886_vm15, %v5926_v55  ;;  %v7872_v55 = vrot.slane %v14753_v35, %v12826_v49  ;;  %v8054_v35 = vcombine.low %v6819_v15, %v14775_v57 }
 0x39d   : > { %v6259_v54 = vrot.slane %v6245_v20, %v12826_v49  ;;  %v6260_v61 = vcombine.high %v6252_v25, %v6252_v25  ;;  %v6268_v51 = vrot.slane %v6252_v25, %v12826_v49  ;;  %v6337_v44 = vrot.slane %v6309_v24, %v12826_v49  ;;  %5777 = vst.msk [vmem:[#allocation3 + $0xc0] sm:$0x7f] %vm4712_vm10, %v5760_v30 }
 0x39e   : > { %v6339_v7 = vcombine.high %v6323_v29, %v6323_v29  ;;  %v7611_v52 = vcombine.low %v6316_v58, %v6330_v4  ;;  %v11339_v38 = vcombine.high %v6316_v58, %v6330_v4  ;;  %v5802_v25 = vpop.permute.xlu1 %5801  ;;  %v14804_v58 = vld [vmem:[#allocation3 + $0x90] sm:$0x7f] }
 0x39f   : > { %v6275_v39 = vrot.slane %v6259_v54, %v12826_v49  ;;  %v6282_v48 = vrot.slane %v6260_v61, %v12826_v49  ;;  %v6290_v27 = vcombine.high %v6268_v51, %v6268_v51  ;;  %v7562_v19 = vcombine.low %v6243_v63, %v6268_v51  ;;  %5819 = vst.msk [vmem:[#allocation3 + $0xc0] sm:$0x7f] %vm4755_vm11, %v5802_v25 }
 0x3a0   : > { %v6261_v50 = vcombine.high %v6259_v54, %v6259_v54  ;;  %v7613_v20 = vcombine.low %v6323_v29, %v6337_v44  ;;  %v11344_v63 = vcombine.high %v14739_v12, %v14746_v45  ;;  %v6836_v29 = vcombine.high %v14750_v32, %v14750_v32  ;;  %v5636_v44 = vpop.permute.xlu0 %5635 }
 0x3a1   : > { %v6292_v9 = vcombine.high %v6282_v48, %v6282_v48  ;;  %v7563_v16 = vcombine.low %v6282_v48, %v6290_v27  ;;  %v7578_v46 = vrot.slane %v7562_v19, %v12826_v49  ;;  %v6291_v17 = vcombine.high %v6275_v39, %v6275_v39  ;;  %5652 = vst.msk [vmem:[#allocation3 + $0xc8] sm:$0x7f] %vm4582_vm7, %v5636_v44 }
 0x3a2   : > { %v6289_v24 = vrot.slane %v6261_v50, %v12826_v49  ;;  %v7571_v54 = vrot.slane %v7561_v47, %v12826_v49  ;;  %v7641_v61 = vrot.slane %v7613_v20, %v12826_v49  ;;  %v7659_v51 = vcombine.low %v6339_v7, %v14357_v42  ;;  %v5186_v32 = vpop.permute.xlu1 %5185 }
 0x3a3   : > { %v7564_v4 = vcombine.low %v6292_v9, %v6275_v39  ;;  %v7627_v27 = vrot.slane %v7611_v52, %v12826_v49  ;;  %v6835_v19 = vrot.slane %v6821_v3, %v12826_v49  ;;  %v7585_v39 = vrot.slane %v7563_v16, %v12826_v49  ;;  %5201 = vst.msk [vmem:[#allocation3 + $0x60] sm:$0x7f] %vm4843_vm14, %v5186_v32 }
 0x3a4   : > { %v7610_v48 = vcombine.low %v6289_v24, %v6291_v17  ;;  %v7593_v30 = vcombine.low %v7571_v54, %v7578_v46  ;;  %v7634_v42 = vrot.slane %v11339_v38, %v12826_v49  ;;  %v8053_v50 = vcombine.low %v14732_v40, %v14760_v5  ;;  %5243 = vst.msk [vmem:[#allocation3 + $0x60] sm:$0x7f] %vm4886_vm15, %v14178_v10  ;;  %v4936_v9 = vpop.permute.xlu0 %4935  ;;  %v17215_v54 = vld [vmem:[#allocation13_spill] sm:$0xff] }
 0x3a5   : > { %v7592_v47 = vrot.slane %v7564_v4, %v12826_v49  ;;  %v6858_v15 = vrot.slane %v6836_v29, %v12826_v49  ;;  %v6876_v3 = vrot.slane %v14804_v58, %v12826_v49  ;;  %v7669_v25 = vrot.slane %v7659_v51, %v12826_v49  ;;  %4950 = vst.msk [vmem:[#allocation3 + $0x68] sm:$0x7f] %vm4582_vm7, %v4936_v9  ;;  %v17214_v4 = vld [vmem:[#allocation49_spill] sm:$0xff] }
 0x3a6   : > { %v7620_v7 = vrot.slane %v7610_v48, %v12826_v49  ;;  %v7643_v20 = vcombine.low %v7634_v42, %v7641_v61  ;;  %v7853_v38 = vrot.slane %v14757_v33, %v12826_v49  ;;  %v8061_v40 = vrot.slane %v8051_v43, %v12826_v49  ;;  %v5844_v24 = vpop.permute.xlu1 %5843  ;;  %4992 = vst.msk [vmem:[#allocation3 + $0x68] sm:$0x7f] %vm4625_vm8, %v17214_v4 }
 0x3a7   : > { %v7594_v52 = vcombine.low %v7585_v39, %v7592_v47  ;;  %v8068_v5 = vrot.slane %v11344_v63, %v12826_v49  ;;  %v6837_v16 = vcombine.high %v6835_v19, %v6835_v19  ;;  %v6851_v46 = vrot.slane %v6835_v19, %v12826_v49  ;;  %5861 = vst.msk [vmem:[#allocation3 + $0xc0] sm:$0x7f] %vm4799_vm12, %v5844_v24 }
 0x3a8   : > { %v7601_v10 = vrot.slane %v7593_v30, %v12826_v49  ;;  %v7642_v29 = vcombine.low %v7620_v7, %v7627_v27  ;;  %v8082_v33 = vrot.slane %v8054_v35, %v12826_v49  ;;  %v14844_v12 = vcombine.low %v7797_v18, %v7804_v26  ;;  %5034 = vst.msk [vmem:[#allocation3 + $0x68] sm:$0x7f] %vm4669_vm9, %v17215_v54  ;;  %v5969_v18 = vld [vmem:[#allocation3 + $0xa0] sm:$0x7f]  ;;  %v17216_v26 = vld [vmem:[#allocation28_spill] sm:$0xff]  ;;  %v5678_v31 = vpop.permute.xlu0 %5677 }
 0x3a9   : > { %v7608_v17 = vrot.slane %v7594_v52, %v12826_v49  ;;  %v14849_v45 = vcombine.low %v7865_v2, %v7872_v55  ;;  %v6868_v43 = vcombine.high %v6858_v15, %v6858_v15  ;;  %v6884_v63 = vcombine.high %v6876_v3, %v6876_v3  ;;  %5076 = vst.msk [vmem:[#allocation3 + $0x68] sm:$0x7f] %vm4712_vm10, %v17216_v26  ;;  %v17217_v27 = vld [vmem:[#allocation15_spill] sm:$0xff] }
 0x3aa   : > { %v7657_v51 = vrot.slane %v7643_v20, %v12826_v49  ;;  %v7691_v14 = vcombine.low %v7669_v25, %v7676_v11  ;;  %v8075_v60 = vrot.slane %v8053_v50, %v12826_v49  ;;  %v8083_v2 = vcombine.low %v8061_v40, %v8068_v5  ;;  %5118 = vst.msk [vmem:[#allocation3 + $0x68] sm:$0x7f] %vm4755_vm11, %v17217_v27  ;;  %v5720_v11 = vpop.permute.xlu1 %5719 }
 0x3ab   : > { %v7609_v61 = vcombine.low %v7601_v10, %v7608_v17  ;;  %v6865_v55 = vrot.slane %v6837_v16, %v12826_v49  ;;  %v6866_v44 = vcombine.high %v14775_v57, %v14775_v57  ;;  %v6867_v48 = vcombine.high %v6851_v46, %v6851_v46  ;;  %5694 = vst.msk [vmem:[#allocation3 + $0xc8] sm:$0x7f] %vm4625_vm8, %v5678_v31  ;;  %v17218_v57 = vld [vmem:[#allocation34_spill] sm:$0xff] }
 0x3ac   : > { %v7650_v28 = vrot.slane %v7642_v29, %v12826_v49  ;;  %v14869_v35 = vcombine.low %v14743_v53, %v7853_v38  ;;  %v14871_v19 = vcombine.low %v8075_v60, %v8082_v33  ;;  %v6869_v32 = vcombine.high %v14804_v58, %v14804_v58  ;;  %5160 = vst.msk [vmem:[#allocation3 + $0x68] sm:$0x7f] %vm4799_vm12, %v17218_v57  ;;  %v5961_v39 = vld [vmem:[#allocation3 + $0x60] sm:$0x7f]  ;;  %v5638_v20 = vpop.permute.xlu0 %5637 }
 0x3ad   : > { %11809 = vmatmul.mubr.msk.f32.gmra.mrb[8].mxu1 %vm8565_vm0, %v7609_v61  ;;  %5736 = vst.msk [vmem:[#allocation3 + $0xc8] sm:$0x7f] %vm4669_vm9, %v5720_v11  ;;  %v7895_v47 = vrot.slane %v14849_v45, %v12826_v49  ;;  %v14883_v53 = vrot.slane %v6884_v63, %v12826_v49  ;;  %v8101_v30 = vcombine.low %v6868_v43, %v6851_v46 }
 0x3ae   : > { %11811 = vmatprep.mubr.msk.f32.mxu1 %vm12163_vm13, %v17162_v22  ;;  %v6965_v42 = vcombine.high %v5969_v18, %v5969_v18  ;;  %5202 = vst.msk [vmem:[#allocation3 + $0x68] sm:$0x7f] %vm4843_vm14, %v14621_v56  ;;  %v7658_v58 = vcombine.low %v7650_v28, %v7657_v51  ;;  %v7699_v7 = vrot.slane %v7691_v14, %v12826_v49  ;;  %v5680_v56 = vpop.permute.xlu1 %5679 }
 0x3af   : > { %v6588_v50 = vrot.slane %v5961_v39, %v12826_v49  ;;  %v6581_v52 = vcombine.high %v5961_v39, %v5961_v39  ;;  %5244 = vst.msk [vmem:[#allocation3 + $0x68] sm:$0x7f] %vm4886_vm15, %v14166_v59  ;;  %v14892_v25 = vrot.slane %v8083_v2, %v12826_v49  ;;  %v14895_v38 = vrot.slane %v6876_v3, %v12826_v49 }
 0x3b0   : > { %v8100_v9 = vcombine.low %v6858_v15, %v6866_v44  ;;  %v8102_v40 = vcombine.low %v6865_v55, %v6867_v48  ;;  %5653 = vst.msk [vmem:[#allocation3 + $0xd0] sm:$0x7f] %vm4582_vm7, %v5638_v20  ;;  %v8098_v59 = vrot.slane %v14871_v19, %v12826_v49  ;;  %v6883_v46 = vrot.slane %v6869_v32, %v12826_v49  ;;  %v5886_v43 = vpop.permute.xlu0 %5885 }
 0x3b1   : > { %11812 = vmatmul.mubr.msk.f32.gmra.mrb[10].mxu1 %vm8565_vm0, %v7658_v58  ;;  %v6596_v5 = vcombine.high %v6588_v50, %v6588_v50  ;;  %v6595_v16 = vrot.slane %v6581_v52, %v12826_v49  ;;  %5695 = vst.msk [vmem:[#allocation3 + $0xd0] sm:$0x7f] %vm4625_vm8, %v5680_v56  ;;  %v8103_v15 = vcombine.low %v14895_v38, %v14883_v53 }
 0x3b2   : > { %11814 = vmatprep.mubr.msk.f32.mxu1 %vm12163_vm13, %v17162_v22  ;;  %v8117_v3 = vrot.slane %v8101_v30, %v12826_v49  ;;  %v6972_v10 = vrot.slane %v5969_v18, %v12826_v49  ;;  %v6979_v17 = vrot.slane %v6965_v42, %v12826_v49  ;;  %v7707_v24 = vcombine.low %v7699_v7, %v7706_v37  ;;  %v5928_v1 = vpop.permute.xlu1 %5927 }
 0x3b3   : > { %v6604_v29 = vrot.slane %v6588_v50, %v12826_v49  ;;  %v6618_v33 = vrot.slane %v6596_v5, %v12826_v49  ;;  %v6597_v4 = vcombine.high %v6595_v16, %v6595_v16  ;;  %v6611_v63 = vrot.slane %v6595_v16, %v12826_v49  ;;  %5903 = vst.msk [vmem:[#allocation3 + $0xc0] sm:$0x7f] %vm4843_vm14, %v5886_v43 }
 0x3b4   : > { %v8110_v54 = vrot.slane %v8100_v9, %v12826_v49  ;;  %v8124_v61 = vrot.slane %v8102_v40, %v12826_v49  ;;  %v14923_v51 = vrot.slane %v7013_v13, %v12826_v49  ;;  %v6885_v18 = vcombine.high %v6883_v46, %v6883_v46  ;;  %5945 = vst.msk [vmem:[#allocation3 + $0xc0] sm:$0x7f] %vm4886_vm15, %v5928_v1  ;;  %v5762_v28 = vpop.permute.xlu0 %5761 }
 0x3b5   : > { %11815 = vmatmul.mubr.msk.f32.gmra.mrb[12].mxu1 %vm8565_vm0, %v7707_v24  ;;  %v7857_v37 = vcombine.low %v6604_v29, %v6618_v33  ;;  %v11342_v14 = vcombine.high %v6604_v29, %v6618_v33  ;;  %v6625_v60 = vrot.slane %v6597_v4, %v12826_v49  ;;  %v8131_v26 = vrot.slane %v8103_v15, %v12826_v49 }
 0x3b6   : > { %11817 = vmatprep.mubr.msk.f32.mxu1 %vm12163_vm13, %v17162_v22  ;;  %v14932_v0 = vcombine.low %v8110_v54, %v8117_v3  ;;  %v7028_v13 = vcombine.high %v14655_v41, %v14655_v41  ;;  %v14938_v31 = vrot.slane %v14655_v41, %v12826_v49  ;;  %v5962_v44 = vld [vmem:[#allocation3 + $0x68] sm:$0x7f]  ;;  %v6980_v48 = vcombine.high %v6972_v10, %v6972_v10  ;;  %v5804_v41 = vpop.permute.xlu1 %5803 }
 0x3b7   : > { %v7879_v2 = vrot.slane %v7857_v37, %v12826_v49  ;;  %v7886_v55 = vrot.slane %v11342_v14, %v12826_v49  ;;  %v6981_v27 = vcombine.high %v6979_v17, %v6979_v17  ;;  %v6627_v11 = vcombine.high %v6611_v63, %v6611_v63  ;;  %5778 = vst.msk [vmem:[#allocation3 + $0xc8] sm:$0x7f] %vm4712_vm10, %v5762_v28 }
 0x3b8   : > { %v6629_v32 = vcombine.high %v5962_v44, %v5962_v44  ;;  %v6636_v57 = vrot.slane %v5962_v44, %v12826_v49  ;;  %v14944_v39 = vrot.slane %v6883_v46, %v12826_v49  ;;  %v7904_v42 = vcombine.low %v6611_v63, %v6625_v60  ;;  %5820 = vst.msk [vmem:[#allocation3 + $0xc8] sm:$0x7f] %vm4755_vm11, %v5804_v41  ;;  %v5722_v16 = vpop.permute.xlu0 %5721 }
 0x3b9   : > { %11818 = vmatmul.mubr.msk.f32.gmra.mrb[14].mxu1 %vm8565_vm0, %v14670_v34  ;;  %v7888_v30 = vcombine.low %v7879_v2, %v7886_v55  ;;  %v6913_v58 = vrot.slane %v6885_v18, %v12826_v49  ;;  %v14951_v7 = vrot.slane %v6979_v17, %v12826_v49  ;;  %v14958_v9 = vcombine.low %v8124_v61, %v8131_v26 }
 0x3ba   : > { %11820 = vmatprep.mubr.msk.f32.mxu1 %vm12163_vm13, %v17162_v22  ;;  %v6643_v50 = vrot.slane %v6629_v32, %v12826_v49  ;;  %v6644_v52 = vcombine.high %v6636_v57, %v6636_v57  ;;  %v6652_v20 = vrot.slane %v6636_v57, %v12826_v49  ;;  %v6988_v34 = vrot.slane %v6972_v10, %v12826_v49  ;;  %v5453_v10 = vpop.permute.xlu1 %5452  ;;  %v17219_v57 = vld [vmem:[#allocation46_spill] sm:$0xff] }
 0x3bb   : > { %v7002_v40 = vrot.slane %v6980_v48, %v12826_v49  ;;  %v7009_v56 = vrot.slane %v6981_v27, %v12826_v49  ;;  %v14964_v5 = vrot.slane %v7028_v13, %v12826_v49  ;;  %5737 = vst.msk [vmem:[#allocation3 + $0xd0] sm:$0x7f] %vm4669_vm9, %v5722_v16  ;;  %v7902_v24 = vrot.slane %v7888_v30, %v12826_v49  ;;  %v17221_v16 = vld [vmem:[#allocation23_spill] sm:$0xff] }
 0x3bc   : > { %v6659_v46 = vrot.slane %v6643_v50, %v12826_v49  ;;  %v6666_v15 = vrot.slane %v6644_v52, %v12826_v49  ;;  %v6674_v3 = vcombine.high %v6652_v20, %v6652_v20  ;;  %v7905_v17 = vcombine.low %v6627_v11, %v6652_v20  ;;  %v5369_v60 = vpop.permute.xlu0 %5368  ;;  %v17220_v52 = vld [vmem:[#allocation18_spill] sm:$0xff] }
 0x3bd   : > { %11821 = vmatmul.mubr.msk.f32.gmra.mrb[16].mxu1 %vm8565_vm0, %v14844_v12  ;;  %v7914_v29 = vrot.slane %v7904_v42, %v12826_v49  ;;  %v6645_v33 = vcombine.high %v6643_v50, %v6643_v50  ;;  %v7011_v4 = vcombine.high %v14951_v7, %v14951_v7  ;;  %v8147_v12 = vrot.slane %v14958_v9, %v12826_v49  ;;  %v5972_v50 = vld [vmem:[#allocation3 + $0xb8] sm:$0x7f] }
 0x3be   : > { %11823 = vmatprep.mubr.msk.f32.mxu1 %vm12163_vm13, %v17162_v22  ;;  %v6676_v43 = vcombine.high %v6666_v15, %v6666_v15  ;;  %v7906_v63 = vcombine.low %v6666_v15, %v6674_v3  ;;  %v7921_v54 = vrot.slane %v7905_v17, %v12826_v49  ;;  %v6675_v61 = vcombine.high %v6659_v46, %v6659_v46  ;;  %v5846_v44 = vpop.permute.xlu1 %5845 }
 0x3bf   : > { %v6673_v1 = vrot.slane %v6645_v33, %v12826_v49  ;;  %v11345_v37 = vcombine.high %v14895_v38, %v14883_v53  ;;  %v8150_v14 = vcombine.low %v14944_v39, %v6913_v58  ;;  %v8200_v26 = vcombine.low %v6988_v34, %v7002_v40  ;;  %5384 = vst.msk [vmem:[#allocation3 + $0x98] sm:$0x7f] %vm4669_vm9, %v5369_v60 }
 0x3c0   : > { %v7907_v18 = vcombine.low %v6676_v43, %v6659_v46  ;;  %v11346_v13 = vcombine.high %v6988_v34, %v7002_v40  ;;  %v7060_v2 = vcombine.high %v14964_v5, %v14964_v5  ;;  %v7903_v55 = vcombine.low %v7895_v47, %v7902_v24  ;;  %5426 = vst.msk [vmem:[#allocation3 + $0x98] sm:$0x7f] %vm4712_vm10, %v14185_v8  ;;  %v5640_v41 = vpop.permute.xlu0 %5639 }
 0x3c1   : > { %11824 = vmatmul.mubr.msk.f32.gmra.mrb[18].mxu1 %vm8565_vm0, %v14869_v35  ;;  %v7953_v53 = vcombine.low %v6673_v1, %v6675_v61  ;;  %v8247_v38 = vcombine.low %v14951_v7, %v7009_v56  ;;  %v8248_v48 = vcombine.low %v7011_v4, %v14938_v31  ;;  %5862 = vst.msk [vmem:[#allocation3 + $0xc8] sm:$0x7f] %vm4799_vm12, %v5846_v44 }
 0x3c2   : > { %11826 = vmatprep.mubr.msk.f32.mxu1 %vm12163_vm13, %v17162_v22  ;;  %v7928_v35 = vrot.slane %v7906_v63, %v12826_v49  ;;  %v7935_v27 = vrot.slane %v7907_v18, %v12826_v49  ;;  %v7936_v45 = vcombine.low %v7914_v29, %v7921_v54  ;;  %v15003_v47 = vrot.slane %v14923_v51, %v12826_v49 }
 0x3c3   : > { %5468 = vst.msk [vmem:[#allocation3 + $0x98] sm:$0x7f] %vm4755_vm11, %v5453_v10  ;;  %v7963_v28 = vrot.slane %v7953_v53, %v12826_v49  ;;  %v8166_v8 = vrot.slane %v8150_v14, %v12826_v49  ;;  %v7058_v11 = vcombine.high %v14938_v31, %v14938_v31  ;;  %v7068_v32 = vrot.slane %v14457_v62, %v12826_v49  ;;  %v15021_v31 = vpop.permute.xlu1 %5805 }
 0x3c4   : > { %5511 = vst.msk [vmem:[#allocation3 + $0x98] sm:$0x7f] %vm4799_vm12, %v17219_v57  ;;  %v7937_v30 = vcombine.low %v7928_v35, %v7935_v27  ;;  %v8222_v42 = vrot.slane %v8200_v26, %v12826_v49  ;;  %v8229_v58 = vrot.slane %v11346_v13, %v12826_v49  ;;  %v8250_v7 = vcombine.low %v7060_v2, %v15003_v47  ;;  %v5888_v24 = vpop.permute.xlu0 %5887 }
 0x3c5   : > { %5554 = vst.msk [vmem:[#allocation3 + $0x98] sm:$0x7f] %vm4843_vm14, %v17220_v52  ;;  %11827 = vmatmul.mubr.msk.f32.gmra.mrb[20].mxu1 %vm8565_vm0, %v7903_v55  ;;  %v7985_v20 = vcombine.low %v7963_v28, %v14587_v21  ;;  %v8257_v34 = vrot.slane %v8247_v38, %v12826_v49  ;;  %v8264_v40 = vrot.slane %v8248_v48, %v12826_v49  ;;  %5904 = vst.msk [vmem:[#allocation3 + $0xc8] sm:$0x7f] %vm4843_vm14, %v5888_v24 }
 0x3c6   : > { %5654 = vst.msk [vmem:[#allocation3 + $0xd8] sm:$0x7f] %vm4582_vm7, %v5640_v41  ;;  %v7075_v56 = vrot.slane %v7061_v6, %v12826_v49  ;;  %11829 = vmatprep.mubr.msk.f32.mxu1 %vm12163_vm13, %v17162_v22  ;;  %v7944_v46 = vrot.slane %v7936_v45, %v12826_v49  ;;  %v7951_v15 = vrot.slane %v7937_v30, %v12826_v49  ;;  %v5973_v45 = vld [vmem:[#allocation3 + $0xc0] sm:$0x7f] }
 0x3c7   : > { %5596 = vst.msk [vmem:[#allocation3 + $0x98] sm:$0x7f] %vm4886_vm15, %v17221_v16  ;;  %v8159_v21 = vrot.slane %v11345_v37, %v12826_v49  ;;  %v7029_v3 = vcombine.high %v14923_v51, %v14923_v51  ;;  %v8249_v17 = vcombine.low %v14964_v5, %v7058_v11  ;;  %v7076_v10 = vcombine.high %v7068_v32, %v7068_v32  ;;  %v5682_v63 = vpop.permute.xlu1 %5681 }
 0x3c8   : > { %v7109_v62 = vcombine.high %v5972_v50, %v5972_v50  ;;  %v7116_v6 = vrot.slane %v5972_v50, %v12826_v49  ;;  %v7952_v29 = vcombine.low %v7944_v46, %v7951_v15  ;;  %v7993_v33 = vrot.slane %v7985_v20, %v12826_v49  ;;  %5696 = vst.msk [vmem:[#allocation3 + $0xd8] sm:$0x7f] %vm4625_vm8, %v5682_v63 }
 0x3c9   : > { %v8181_v4 = vcombine.low %v8159_v21, %v8166_v8  ;;  %v8231_v43 = vcombine.low %v8222_v42, %v8229_v58  ;;  %v15047_v51 = vcombine.low %v14892_v25, %v8098_v59  ;;  %v8278_v5 = vrot.slane %v8250_v7, %v12826_v49 }
 0x3ca   : > { %v15050_v54 = vcombine.low %v8257_v34, %v8264_v40  ;;  %v7077_v61 = vcombine.high %v7075_v56, %v7075_v56  ;;  %11830 = vmatmul.mubr.msk.f32.gmra.mrb[22].mxu1 %vm8565_vm0, %v7952_v29  ;;  %v8140_v1 = vrot.slane %v14932_v0, %v12826_v49  ;;  %v6915_v37 = vcombine.high %v14944_v39, %v14944_v39  ;;  %v15068_v0 = vpop.permute.xlu0 %5847 }
 0x3cb   : > { %v7057_v19 = vrot.slane %v7029_v3, %v12826_v49  ;;  %v7059_v25 = vcombine.high %v15003_v47, %v15003_v47  ;;  %11832 = vmatprep.mubr.msk.f32.mxu1 %vm12163_vm13, %v17162_v22  ;;  %v8271_v59 = vrot.slane %v8249_v17, %v12826_v49  ;;  %v15065_v14 = vrot.slane %v7076_v10, %v12826_v49  ;;  %v5930_v55 = vpop.permute.xlu1 %5929 }
 0x3cc   : > { %v7123_v60 = vrot.slane %v7109_v62, %v12826_v49  ;;  %v7124_v18 = vcombine.high %v7116_v6, %v7116_v6  ;;  %v8001_v39 = vcombine.low %v7993_v33, %v14649_v23  ;;  %v15074_v26 = vcombine.low %v8140_v1, %v8147_v12  ;;  %5946 = vst.msk [vmem:[#allocation3 + $0xc8] sm:$0x7f] %vm4886_vm15, %v5930_v55 }
 0x3cd   : > { %v15077_v13 = vrot.slane %v8181_v4, %v12826_v49  ;;  %v15080_v2 = vrot.slane %v8231_v43, %v12826_v49  ;;  %v15082_v53 = vcombine.low %v8271_v59, %v8278_v5  ;;  %v8287_v38 = vrot.slane %v15050_v54, %v12826_v49 }
 0x3ce   : > { %v5968_v44 = vld [vmem:[#allocation3 + $0x98] sm:$0x7f]  ;;  %v15087_v23 = vrot.slane %v7068_v32, %v12826_v49  ;;  %v15090_v9 = vrot.slane %v7077_v61, %v12826_v49  ;;  %11833 = vmatmul.mubr.msk.f32.gmra.mrb[24].mxu1 %vm8565_vm0, %v8001_v39  ;;  %v15096_v35 = vrot.slane %v7075_v56, %v12826_v49  ;;  %v15098_v27 = vcombine.low %v7057_v19, %v7059_v25  ;;  %v5724_v32 = vpop.permute.xlu0 %5723 }
 0x3cf   : > { %v6924_v12 = vrot.slane %v5968_v44, %v12826_v49  ;;  %v6917_v48 = vcombine.high %v5968_v44, %v5968_v44  ;;  %11835 = vmatprep.mubr.msk.f32.mxu1 %vm12163_vm13, %v17162_v22  ;;  %v7125_v28 = vcombine.high %v7123_v60, %v7123_v60  ;;  %v7139_v8 = vrot.slane %v7123_v60, %v12826_v49  ;;  %v5890_v58 = vpop.permute.xlu1 %5889 }
 0x3d0   : > { %v8297_v47 = vcombine.low %v15087_v23, %v15065_v14  ;;  %v7146_v11 = vrot.slane %v7124_v18, %v12826_v49  ;;  %v11347_v42 = vcombine.high %v15087_v23, %v15065_v14  ;;  %5738 = vst.msk [vmem:[#allocation3 + $0xd8] sm:$0x7f] %vm4669_vm9, %v5724_v32  ;;  %v8299_v7 = vcombine.low %v15096_v35, %v15090_v9 }
 0x3d1   : > { %v6932_v57 = vcombine.high %v6924_v12, %v6924_v12  ;;  %v6940_v41 = vrot.slane %v6924_v12, %v12826_v49  ;;  %v6931_v30 = vrot.slane %v6917_v48, %v12826_v49  ;;  %v7132_v50 = vrot.slane %v7116_v6, %v12826_v49 }
 0x3d2   : > { %v7157_v52 = vcombine.high %v5973_v45, %v5973_v45  ;;  %v7164_v20 = vrot.slane %v5973_v45, %v12826_v49  ;;  %11836 = vmatmul.mubr.msk.f32.gmra.mrb[26].mxu1 %vm8565_vm0, %v14721_v36  ;;  %v7153_v15 = vrot.slane %v7125_v28, %v12826_v49  ;;  %v7155_v21 = vcombine.high %v7139_v8, %v7139_v8  ;;  %v5766_v17 = vpop.permute.xlu0 %5765 }
 0x3d3   : > { %v6954_v34 = vrot.slane %v6932_v57, %v12826_v49  ;;  %v6962_v40 = vcombine.high %v6940_v41, %v6940_v41  ;;  %v8151_v56 = vcombine.low %v6915_v37, %v6940_v41  ;;  %v6933_v16 = vcombine.high %v6931_v30, %v6931_v30  ;;  %11838 = vmatprep.mubr.msk.f32.mxu1 %vm12163_vm13, %v17162_v22  ;;  %v5932_v24 = vpop.permute.xlu1 %5931  ;;  %v5974_v4 = vld [vmem:[#allocation3 + $0xc8] sm:$0x7f] }
 0x3d4   : > { %v6947_v46 = vrot.slane %v6931_v30, %v12826_v49  ;;  %v7156_v3 = vcombine.high %v7146_v11, %v7146_v11  ;;  %v8306_v36 = vrot.slane %v15098_v27, %v12826_v49  ;;  %5780 = vst.msk [vmem:[#allocation3 + $0xd8] sm:$0x7f] %vm4712_vm10, %v5766_v17  ;;  %v7154_v33 = vcombine.high %v7132_v50, %v7132_v50 }
 0x3d5   : > { %v8152_v10 = vcombine.low %v6954_v34, %v6962_v40  ;;  %v6961_v62 = vrot.slane %v6933_v16, %v12826_v49  ;;  %v6964_v6 = vcombine.high %v6954_v34, %v6954_v34  ;;  %v7171_v43 = vrot.slane %v7157_v52, %v12826_v49 }
 0x3d6   : > { %v6963_v29 = vcombine.high %v6947_v46, %v6947_v46  ;;  %v7172_v63 = vcombine.high %v7164_v20, %v7164_v20  ;;  %11839 = vmatmul.mubr.msk.f32.gmra.mrb[28].mxu1 %vm8565_vm0, %v15047_v51  ;;  %v8173_v5 = vrot.slane %v8151_v56, %v12826_v49  ;;  %v7212_v37 = vrot.slane %v5974_v4, %v12826_v49  ;;  %v5764_v18 = vpop.permute.xlu0 %5763 }
 0x3d7   : > { %v8180_v61 = vrot.slane %v8152_v10, %v12826_v49  ;;  %v8198_v1 = vcombine.low %v6964_v6, %v6947_v46  ;;  %11841 = vmatprep.mubr.msk.f32.mxu1 %vm12163_vm13, %v17162_v22  ;;  %v8313_v25 = vrot.slane %v8297_v47, %v12826_v49  ;;  %v8347_v59 = vcombine.low %v7156_v3, %v7139_v8  ;;  %v5850_v12 = vpop.permute.xlu1 %5849 }
 0x3d8   : > { %v8199_v19 = vcombine.low %v6961_v62, %v6963_v29  ;;  %v8348_v60 = vcombine.low %v7153_v15, %v7155_v21  ;;  %v7107_v51 = vcombine.high %v15096_v35, %v15096_v35  ;;  %v7205_v44 = vcombine.high %v5974_v4, %v5974_v4  ;;  %5779 = vst.msk [vmem:[#allocation3 + $0xd0] sm:$0x7f] %vm4712_vm10, %v5764_v18 }
 0x3d9   : > { %v8182_v39 = vcombine.low %v8173_v5, %v8180_v61  ;;  %v8208_v55 = vrot.slane %v8198_v1, %v12826_v49  ;;  %v7173_v27 = vcombine.high %v7171_v43, %v7171_v43  ;;  %v15141_v45 = vrot.slane %v7171_v43, %v12826_v49  ;;  %5821 = vst.msk [vmem:[#allocation3 + $0xd0] sm:$0x7f] %vm4755_vm11, %v15021_v31 }
 0x3da   : > { %v8215_v48 = vrot.slane %v8199_v19, %v12826_v49  ;;  %v7220_v47 = vcombine.high %v7212_v37, %v7212_v37  ;;  %11842 = vmatmul.mubr.msk.f32.gmra.mrb[30].mxu1 %vm8565_vm0, %v15074_v26  ;;  %v8345_v8 = vcombine.low %v7107_v51, %v7132_v50  ;;  %v8346_v32 = vcombine.low %v7146_v11, %v7154_v33  ;;  %v5808_v26 = vpop.permute.xlu0 %5807 }
 0x3db   : > { %v8196_v28 = vrot.slane %v8182_v39, %v12826_v49  ;;  %v7194_v57 = vrot.slane %v7172_v63, %v12826_v49  ;;  %5863 = vst.msk [vmem:[#allocation3 + $0xd0] sm:$0x7f] %vm4799_vm12, %v15068_v0  ;;  %11844 = vmatprep.mubr.msk.f32.mxu1 %vm12163_vm13, %v17162_v22  ;;  %v8369_v30 = vrot.slane %v8347_v59, %v12826_v49  ;;  %v5934_v9 = vpop.permute.xlu1 %5933 }
 0x3dc   : > { %v8230_v41 = vcombine.low %v8208_v55, %v8215_v48  ;;  %v8376_v31 = vrot.slane %v8348_v60, %v12826_v49  ;;  %v7228_v52 = vrot.slane %v7212_v37, %v12826_v49  ;;  %5905 = vst.msk [vmem:[#allocation3 + $0xd0] sm:$0x7f] %vm4843_vm14, %v5890_v58  ;;  %v7180_v50 = vrot.slane %v7164_v20, %v12826_v49 }
 0x3dd   : > { %v8197_v11 = vcombine.low %v15077_v13, %v8196_v28  ;;  %v7219_v34 = vrot.slane %v7205_v44, %v12826_v49  ;;  %v7242_v0 = vrot.slane %v7220_v47, %v12826_v49  ;;  %5947 = vst.msk [vmem:[#allocation3 + $0xd0] sm:$0x7f] %vm4886_vm15, %v5932_v24  ;;  %v8327_v58 = vrot.slane %v8299_v7, %v12826_v49 }
 0x3de   : > { %5822 = vst.msk [vmem:[#allocation3 + $0xd8] sm:$0x7f] %vm4755_vm11, %v5808_v26  ;;  %v8238_v40 = vrot.slane %v8230_v41, %v12826_v49  ;;  %v7201_v56 = vrot.slane %v7173_v27, %v12826_v49  ;;  %v7203_v13 = vcombine.high %v15141_v45, %v15141_v45  ;;  %v8320_v20 = vrot.slane %v11347_v42, %v12826_v49  ;;  %v5892_v17 = vpop.permute.xlu0 %5891 }
 0x3df   : > { %5864 = vst.msk [vmem:[#allocation3 + $0xd8] sm:$0x7f] %vm4799_vm12, %v5850_v12  ;;  %11845 = vmatmul.mubr.msk.f32.gmra.mrb[32].mxu1 %vm8565_vm0, %v8197_v11  ;;  %v8362_v16 = vrot.slane %v8346_v32, %v12826_v49  ;;  %v8394_v46 = vcombine.low %v7180_v50, %v7194_v57  ;;  %v11348_v15 = vcombine.high %v7180_v50, %v7194_v57 }
 0x3e0   : > { %11847 = vmatprep.mubr.msk.f32.mxu1 %vm12163_vm13, %v17162_v22  ;;  %v8328_v35 = vcombine.low %v8306_v36, %v8313_v25  ;;  %v8355_v7 = vrot.slane %v8345_v8, %v12826_v49  ;;  %v8378_v21 = vcombine.low %v8369_v30, %v8376_v31  ;;  %v8397_v3 = vcombine.low %v7203_v13, %v7228_v52 }
 0x3e1   : > { %v8246_v10 = vcombine.low %v8238_v40, %v15080_v2  ;;  %v7221_v62 = vcombine.high %v7219_v34, %v7219_v34  ;;  %v7235_v14 = vrot.slane %v7219_v34, %v12826_v49  ;;  %v7252_v23 = vcombine.high %v7242_v0, %v7242_v0  ;;  %5906 = vst.msk [vmem:[#allocation3 + $0xd8] sm:$0x7f] %vm4843_vm14, %v5892_v17 }
 0x3e2   : > { %v8294_v42 = vrot.slane %v15082_v53, %v12826_v49  ;;  %v8329_v6 = vcombine.low %v8320_v20, %v8327_v58  ;;  %v8396_v24 = vcombine.low %v15141_v45, %v7201_v56  ;;  %5948 = vst.msk [vmem:[#allocation3 + $0xd8] sm:$0x7f] %vm4886_vm15, %v5934_v9  ;;  %v8377_v36 = vcombine.low %v8355_v7, %v8362_v16 }
 0x3e3   : > { %11848 = vmatmul.mubr.msk.f32.gmra.mrb[34].mxu1 %vm8565_vm0, %v8246_v10  ;;  %v8404_v29 = vrot.slane %v8394_v46, %v12826_v49  ;;  %v8411_v2 = vrot.slane %v11348_v15, %v12826_v49  ;;  %v7250_v33 = vcombine.high %v7228_v52, %v7228_v52  ;;  %v8336_v4 = vrot.slane %v8328_v35, %v12826_v49 }
 0x3e4   : > { %11850 = vmatprep.mubr.msk.f32.mxu1 %vm12163_vm13, %v17162_v22  ;;  %v8295_v53 = vcombine.low %v8287_v38, %v8294_v42  ;;  %v8425_v43 = vrot.slane %v8397_v3, %v12826_v49  ;;  %v8392_v63 = vrot.slane %v8378_v21, %v12826_v49  ;;  %v5975_v5 = vld [vmem:[#allocation3 + $0xd0] sm:$0x7f]  ;;  %v7249_v61 = vrot.slane %v7221_v62, %v12826_v49 }
 0x3e5   : > { %v7251_v1 = vcombine.high %v7235_v14, %v7235_v14  ;;  %v8444_v37 = vcombine.low %v7252_v23, %v7235_v14  ;;  %v8418_v19 = vrot.slane %v8396_v24, %v12826_v49  ;;  %v7260_v25 = vrot.slane %v5975_v5, %v12826_v49 }
 0x3e6   : > { %v7253_v59 = vcombine.high %v5975_v5, %v5975_v5  ;;  %v8343_v54 = vrot.slane %v8329_v6, %v12826_v49  ;;  %v8385_v38 = vrot.slane %v8377_v36, %v12826_v49  ;;  %v8426_v60 = vcombine.low %v8404_v29, %v8411_v2 }
 0x3e7   : > { %11851 = vmatmul.mubr.msk.f32.gmra.mrb[36].mxu1 %vm8565_vm0, %v8295_v53  ;;  %v8443_v18 = vcombine.low %v7242_v0, %v7250_v33  ;;  %v8427_v39 = vcombine.low %v8418_v19, %v8425_v43  ;;  %v7268_v55 = vcombine.high %v7260_v25, %v7260_v25  ;;  %v8445_v48 = vcombine.low %v7249_v61, %v7251_v1 }
 0x3e8   : > { %11853 = vmatprep.mubr.msk.f32.mxu1 %vm12163_vm13, %v17162_v22  ;;  %v7267_v51 = vrot.slane %v7253_v59, %v12826_v49  ;;  %v8344_v44 = vcombine.low %v8336_v4, %v8343_v54  ;;  %v8393_v12 = vcombine.low %v8385_v38, %v8392_v63  ;;  %v8460_v27 = vrot.slane %v8444_v37, %v12826_v49 }
 0x3e9   : > { %v7276_v45 = vrot.slane %v7260_v25, %v12826_v49  ;;  %v7290_v47 = vrot.slane %v7268_v55, %v12826_v49  ;;  %v5976_v28 = vld [vmem:[#allocation3 + $0xd8] sm:$0x7f]  ;;  %v8434_v57 = vrot.slane %v8426_v60, %v12826_v49  ;;  %v8453_v41 = vrot.slane %v8443_v18, %v12826_v49  ;;  %v15254_v55 = vld [vmem:[%s16891_s4] ss:$0 sm:$0xff] }
 0x3ea   : > { %v7269_v8 = vcombine.high %v7267_v51, %v7267_v51  ;;  %v7283_v32 = vrot.slane %v7267_v51, %v12826_v49  ;;  %v7308_v30 = vrot.slane %v5976_v28, %v12826_v49  ;;  %v7301_v31 = vcombine.high %v5976_v28, %v5976_v28 }
 0x3eb   : > { %11854 = vmatmul.mubr.msk.f32.gmra.mrb[38].mxu1 %vm8565_vm0, %v8344_v44  ;;  %v8441_v52 = vrot.slane %v8427_v39, %v12826_v49  ;;  %v8446_v26 = vcombine.low %v7276_v45, %v7290_v47  ;;  %v11349_v40 = vcombine.high %v7276_v45, %v7290_v47  ;;  %v8467_v56 = vrot.slane %v8445_v48, %v12826_v49 }
 0x3ec   : > { %11856 = vmatprep.mubr.msk.f32.mxu1 %vm12163_vm13, %v17162_v22  ;;  %v7297_v11 = vrot.slane %v7269_v8, %v12826_v49  ;;  %v7299_v50 = vcombine.high %v7283_v32, %v7283_v32  ;;  %v7316_v34 = vcombine.high %v7308_v30, %v7308_v30  ;;  %v7324_v0 = vrot.slane %v7308_v30, %v12826_v49 }
 0x3ed   : > { %v7315_v58 = vrot.slane %v7301_v31, %v12826_v49  ;;  %v8474_v13 = vrot.slane %v8446_v26, %v12826_v49  ;;  %v8475_v20 = vcombine.low %v8453_v41, %v8460_v27  ;;  %v8442_v7 = vcombine.low %v8434_v57, %v8441_v52 }
 0x3ee   : > { %v8493_v16 = vcombine.low %v7283_v32, %v7297_v11  ;;  %v7338_v46 = vrot.slane %v7316_v34, %v12826_v49  ;;  %v7346_v15 = vcombine.high %v7324_v0, %v7324_v0  ;;  %v8494_v9 = vcombine.low %v7299_v50, %v7324_v0 }
 0x3ef   : > { %11857 = vmatmul.mubr.msk.f32.gmra.mrb[40].mxu1 %vm8565_vm0, %v8393_v12  ;;  %v7317_v35 = vcombine.high %v7315_v58, %v7315_v58  ;;  %v8476_v21 = vcombine.low %v8467_v56, %v8474_v13  ;;  %v7331_v17 = vrot.slane %v7315_v58, %v12826_v49  ;;  %v8502_v62 = vrot.slane %v11349_v40, %v12826_v49 }
 0x3f0   : > { %11859 = vmatprep.mubr.msk.f32.mxu1 %vm12163_vm13, %v17162_v22  ;;  %v8509_v3 = vrot.slane %v8493_v16, %v12826_v49  ;;  %v8495_v10 = vcombine.low %v7338_v46, %v7346_v15  ;;  %v7348_v23 = vcombine.high %v7338_v46, %v7338_v46  ;;  %v8483_v42 = vrot.slane %v8475_v20, %v12826_v49 }
 0x3f1   : > { %v7345_v14 = vrot.slane %v7317_v35, %v12826_v49  ;;  %v8490_v6 = vrot.slane %v8476_v21, %v12826_v49  ;;  %v7347_v24 = vcombine.high %v7331_v17, %v7331_v17  ;;  %v8516_v36 = vrot.slane %v8494_v9, %v12826_v49 }
 0x3f2   : > { %v8523_v29 = vrot.slane %v8495_v10, %v12826_v49  ;;  %v8524_v2 = vcombine.low %v8502_v62, %v8509_v3  ;;  %v8541_v33 = vcombine.low %v7348_v23, %v7331_v17 }
 0x3f3   : > { %11860 = vmatmul.mubr.msk.f32.gmra.mrb[42].mxu1 %vm8565_vm0, %v8442_v7  ;;  %v8542_v53 = vcombine.low %v7345_v14, %v7347_v24  ;;  %v8491_v4 = vcombine.low %v8483_v42, %v8490_v6 }
 0x3f4   : > { %11862 = vmatprep.mubr.msk.f32.mxu1 %vm12163_vm13, %v17162_v22  ;;  %v8525_v43 = vcombine.low %v8516_v36, %v8523_v29  ;;  %v8549_v63 = vrot.slane %v8541_v33, %v12826_v49  ;;  %v8532_v61 = vrot.slane %v8524_v2, %v12826_v49 }
 0x3f5   : > { %v8556_v5 = vrot.slane %v8542_v53, %v12826_v49 }
 0x3f6   : > { %v8539_v1 = vrot.slane %v8525_v43, %v12826_v49 }
 0x3f7   : > { %11863 = vmatmul.mubr.msk.f32.gmra.mrb[44].mxu1 %vm8565_vm0, %v8491_v4  ;;  %v8557_v37 = vcombine.low %v8549_v63, %v8556_v5 }
 0x3f8   : > { %11865 = vmatprep.mubr.msk.f32.mxu1 %vm12163_vm13, %v17162_v22  ;;  %v8540_v19 = vcombine.low %v8532_v61, %v8539_v1 }
 0x3f9   : > { %v8564_v25 = vrot.slane %v8557_v37, %v12826_v49 }
 0x3fb   : > { %11866 = vmatmul.mubr.msk.f32.gmra.mrb[46].mxu1 %vm8565_vm0, %v8540_v19 }
 0x3fc   : > { %11868 = vmatprep.mubr.msk.f32.mxu1 %vm12163_vm13, %v17162_v22 }
 0x3ff   : > { %11869 = vmatmul.mubr.msk.f32.gmra.mrb[48].mxu1 %vm8565_vm0, %v8564_v25 }
 0x427   : > { %v8682_v59 = vpop.f32.mrb[0].mxu1 }
 0x428   : > { %v11798_v54 = vpop.f32.mrb[1].mxu1  ;;  %v8683_v44 = vadd.f32 %v15254_v55, %v8682_v59 }
 0x42a   : > { %v8806_v27 = vmax.f32 %v8683_v44, 0.0 }
 0x42c   : > { %v8856_v28 = vcombine.high %v8806_v27, %v8806_v27  ;;  %v8863_v32 = vrot.slane %v8806_v27, %v12826_v49 }
 0x42e   : > { %v8870_v30 = vrot.slane %v8856_v28, %v12826_v49  ;;  %v8871_v52 = vcombine.high %v8863_v32, %v8863_v32  ;;  %v15265_v40 = vrot.slane %v8863_v32, %v12826_v49 }
 0x430   : > { %v8872_v34 = vcombine.high %v8870_v30, %v8870_v30  ;;  %17222 = vst [vmem:[#allocation37_spill] sm:$0xff] %v15265_v40  ;;  %v15268_v58 = vrot.slane %v8870_v30, %v12826_v49  ;;  %v15271_v56 = vrot.slane %v8871_v52, %v12826_v49  ;;  %v8901_v10 = vcombine.high %v15265_v40, %v15265_v40 }
 0x432   : > { %v15277_v7 = vrot.slane %v8872_v34, %v12826_v49  ;;  %v8902_v62 = vcombine.high %v15268_v58, %v15268_v58  ;;  %v8903_v42 = vcombine.high %v15271_v56, %v15271_v56 }
 0x434   : > { %v8904_v1 = vcombine.high %v15277_v7, %v15277_v7 }
 0x448   : > { %v8687_v38 = vpop.f32.mrb[2].mxu1 }
 0x449   : > { %v11801_v60 = vpop.f32.mrb[3].mxu1  ;;  %v8688_v48 = vadd.f32 %v15254_v55, %v8687_v38 }
 0x44b   : > { %v8807_v45 = vmax.f32 %v8688_v48, 0.0 }
 0x44d   : > { %v8905_v57 = vcombine.high %v8807_v45, %v8807_v45  ;;  %v8912_v26 = vrot.slane %v8807_v45, %v12826_v49 }
 0x44f   : > { %v8919_v11 = vrot.slane %v8905_v57, %v12826_v49  ;;  %v8920_v13 = vcombine.high %v8912_v26, %v8912_v26  ;;  %v15280_v21 = vrot.slane %v8912_v26, %v12826_v49 }
 0x451   : > { %v8921_v20 = vcombine.high %v8919_v11, %v8919_v11  ;;  %17223 = vst [vmem:[#allocation40_spill] sm:$0xff] %v15280_v21  ;;  %v15289_v14 = vrot.slane %v8919_v11, %v12826_v49  ;;  %v15294_v6 = vrot.slane %v8920_v13, %v12826_v49  ;;  %v8950_v63 = vcombine.high %v15280_v21, %v15280_v21 }
 0x453   : > { %v15297_v24 = vrot.slane %v8921_v20, %v12826_v49  ;;  %v8952_v54 = vcombine.high %v15294_v6, %v15294_v6 }
 0x454   : > { %v8692_v18 = vpop.f32.mrb[4].mxu1 }
 0x455   : > { %v11804_v39 = vpop.f32.mrb[5].mxu1  ;;  %v8693_v47 = vadd.f32 %v15254_v55, %v8692_v18 }
 0x456   : > { %v8953_v39 = vcombine.high %v15297_v24, %v15297_v24 }
 0x457   : > { %v8808_v41 = vmax.f32 %v8693_v47, 0.0 }
 0x459   : > { %v8954_v50 = vcombine.high %v8808_v41, %v8808_v41  ;;  %v8961_v16 = vrot.slane %v8808_v41, %v12826_v49 }
 0x45b   : > { %v8968_v15 = vrot.slane %v8954_v50, %v12826_v49  ;;  %v8969_v36 = vcombine.high %v8961_v16, %v8961_v16  ;;  %v15308_v19 = vrot.slane %v8961_v16, %v12826_v49 }
 0x45d   : > { %v8970_v2 = vcombine.high %v8968_v15, %v8968_v15  ;;  %17224 = vst [vmem:[#allocation43_spill] sm:$0xff] %v15308_v19  ;;  %v15311_v25 = vrot.slane %v8968_v15, %v12826_v49 }
 0x45f   : > { %17225 = vst [vmem:[#allocation36_spill] sm:$0xff] %v15311_v25  ;;  %v15322_v44 = vrot.slane %v8970_v2, %v12826_v49 }
 0x461   : > { %v9002_v16 = vcombine.high %v15322_v44, %v15322_v44 }
 0x46d   : > { %v8697_v51 = vpop.f32.mrb[6].mxu1 }
 0x46e   : > { %v11807_v12 = vpop.f32.mrb[7].mxu1  ;;  %v8698_v8 = vadd.f32 %v15254_v55, %v8697_v51  ;;  %v15319_v51 = vrot.slane %v8969_v36, %v12826_v49 }
 0x470   : > { %v8809_v31 = vmax.f32 %v8698_v8, 0.0  ;;  %v9001_v34 = vcombine.high %v15319_v51, %v15319_v51 }
 0x472   : > { %v9003_v0 = vcombine.high %v8809_v31, %v8809_v31  ;;  %v9010_v3 = vrot.slane %v8809_v31, %v12826_v49 }
 0x474   : > { %v9017_v17 = vrot.slane %v9003_v0, %v12826_v49  ;;  %v9018_v5 = vcombine.high %v9010_v3, %v9010_v3  ;;  %v15325_v12 = vrot.slane %v9010_v3, %v12826_v49 }
 0x476   : > { %v9019_v61 = vcombine.high %v9017_v17, %v9017_v17  ;;  %17226 = vst [vmem:[#allocation33_spill] sm:$0xff] %v15325_v12  ;;  %v15328_v48 = vrot.slane %v9017_v17, %v12826_v49  ;;  %v15331_v45 = vrot.slane %v9018_v5, %v12826_v49 }
 0x478   : > { %17227 = vst [vmem:[#allocation41_spill] sm:$0xff] %v15328_v48  ;;  %v15334_v47 = vrot.slane %v9019_v61, %v12826_v49  ;;  %v9050_v15 = vcombine.high %v15331_v45, %v15331_v45 }
 0x47a   : > { %17228 = vst [vmem:[#allocation16_spill] sm:$0xff] %v15334_v47 }
 0x480   : > { %v8702_v46 = vpop.f32.mrb[8].mxu1 }
 0x481   : > { %v8703_v9 = vadd.f32 %v15254_v55, %v8702_v46  ;;  %v11810_v35 = vpop.f32.mrb[9].mxu1 }
 0x483   : > { %v8810_v23 = vmax.f32 %v8703_v9, 0.0 }
 0x484   : > { %v8707_v29 = vpop.f32.mrb[10].mxu1 }
 0x485   : > { %v9052_v33 = vcombine.high %v8810_v23, %v8810_v23  ;;  %v9059_v53 = vrot.slane %v8810_v23, %v12826_v49  ;;  %v8708_v4 = vadd.f32 %v15254_v55, %v8707_v29  ;;  %v11813_v43 = vpop.f32.mrb[11].mxu1 }
 0x487   : > { %v9066_v59 = vrot.slane %v9052_v33, %v12826_v49  ;;  %v9067_v38 = vcombine.high %v9059_v53, %v9059_v53  ;;  %v8811_v60 = vmax.f32 %v8708_v4, 0.0  ;;  %v15342_v41 = vrot.slane %v9059_v53, %v12826_v49 }
 0x488   : > { %v8712_v18 = vpop.f32.mrb[12].mxu1 }
 0x489   : > { %v11816_v27 = vpop.f32.mrb[13].mxu1  ;;  %v9068_v28 = vcombine.high %v9066_v59, %v9066_v59  ;;  %v8713_v8 = vadd.f32 %v15254_v55, %v8712_v18  ;;  %17229 = vst [vmem:[#allocation30_spill] sm:$0xff] %v15342_v41  ;;  %v15345_v30 = vrot.slane %v9066_v59, %v12826_v49  ;;  %v15348_v31 = vrot.slane %v9067_v38, %v12826_v49 }
 0x48a   : > { %v9101_v52 = vcombine.high %v8811_v60, %v8811_v60  ;;  %v9108_v26 = vrot.slane %v8811_v60, %v12826_v49 }
 0x48b   : > { %17230 = vst [vmem:[#allocation32_spill] sm:$0xff] %v15345_v30  ;;  %v8812_v11 = vmax.f32 %v8713_v8, 0.0  ;;  %v15363_v9 = vrot.slane %v9068_v28, %v12826_v49 }
 0x48c   : > { %v8717_v50 = vpop.f32.mrb[14].mxu1  ;;  %v9115_v33 = vrot.slane %v9101_v52, %v12826_v49  ;;  %v9116_v53 = vcombine.high %v9108_v26, %v9108_v26  ;;  %v15380_v60 = vrot.slane %v9108_v26, %v12826_v49 }
 0x48d   : > { %v8718_v13 = vadd.f32 %v15254_v55, %v8717_v50  ;;  %v11819_v20 = vpop.f32.mrb[15].mxu1  ;;  %17231 = vst [vmem:[#allocation10_spill] sm:$0xff] %v15363_v9  ;;  %v9150_v17 = vcombine.high %v8812_v11, %v8812_v11  ;;  %v9157_v23 = vrot.slane %v8812_v11, %v12826_v49 }
 0x48e   : > { %17233 = vst [vmem:[#allocation24_spill] sm:$0xff] %v15380_v60 }
 0x48f   : > { %v8813_v36 = vmax.f32 %v8718_v13, 0.0  ;;  %v9164_v43 = vrot.slane %v9150_v17, %v12826_v49  ;;  %v9165_v5 = vcombine.high %v9157_v23, %v9157_v23  ;;  %v15377_v61 = vrot.slane %v9157_v23, %v12826_v49 }
 0x490   : > { %v8722_v4 = vpop.f32.mrb[16].mxu1 }
 0x491   : > { %17232 = vst [vmem:[#allocation31_spill] sm:$0xff] %v15377_v61  ;;  %v9199_v59 = vcombine.high %v8813_v36, %v8813_v36  ;;  %v11822_v38 = vpop.f32.mrb[17].mxu1  ;;  %v9206_v18 = vrot.slane %v8813_v36, %v12826_v49  ;;  %v8723_v27 = vadd.f32 %v15254_v55, %v8722_v4  ;;  %v9166_v8 = vcombine.high %v9164_v43, %v9164_v43 }
 0x492   : > { %v9180_v52 = vrot.slane %v9164_v43, %v12826_v49  ;;  %v15388_v11 = vrot.slane %v9165_v5, %v12826_v49  ;;  %v9195_v50 = vcombine.high %v15377_v61, %v15377_v61  ;;  %v9117_v36 = vcombine.high %v9115_v33, %v9115_v33 }
 0x493   : > { %v9213_v13 = vrot.slane %v9199_v59, %v12826_v49  ;;  %v9214_v26 = vcombine.high %v9206_v18, %v9206_v18  ;;  %v9222_v20 = vrot.slane %v9206_v18, %v12826_v49  ;;  %v8814_v17 = vmax.f32 %v8723_v27, 0.0 }
 0x494   : > { %17234 = vst [vmem:[#allocation11_spill] sm:$0xff] %v15388_v11  ;;  %v8727_v23 = vpop.f32.mrb[18].mxu1  ;;  %v15395_v4 = vrot.slane %v9115_v33, %v12826_v49  ;;  %v15398_v38 = vrot.slane %v9116_v53, %v12826_v49  ;;  %v15401_v43 = vmax.f32 %v15271_v56, %v9195_v50  ;;  %v9197_v29 = vcombine.high %v15388_v11, %v15388_v11 }
 0x495   : > { %v11825_v5 = vpop.f32.mrb[19].mxu1  ;;  %v15408_v59 = vmax.f32 %v8903_v42, %v9180_v52  ;;  %v9229_v18 = vrot.slane %v9213_v13, %v12826_v49  ;;  %v15412_v33 = vrot.slane %v9214_v26, %v12826_v49  ;;  %v9244_v27 = vcombine.high %v9222_v20, %v9222_v20 }
 0x496   : > { %17235 = vst [vmem:[#allocation25_spill] sm:$0xff] %v15395_v4  ;;  %v15419_v50 = vmax.f32 %v8904_v1, %v9222_v20  ;;  %v9248_v5 = vcombine.high %v8814_v17, %v8814_v17  ;;  %v15422_v3 = vrot.slane %v9166_v8, %v12826_v49  ;;  %v9196_v56 = vcombine.high %v9180_v52, %v9180_v52 }
 0x497   : > { %17236 = vst [vmem:[#allocation17_spill] sm:$0xff] %v15412_v33  ;;  %v9246_v42 = vcombine.high %v15412_v33, %v15412_v33  ;;  %v15429_v26 = vmax.f32 %v8952_v54, %v9229_v18  ;;  %v15432_v46 = vmax.f32 %v15294_v6, %v9244_v27  ;;  %v9255_v1 = vrot.slane %v8814_v17, %v12826_v49 }
 0x498   : > { %v8732_v53 = vpop.f32.mrb[20].mxu1  ;;  %v9262_v20 = vrot.slane %v9248_v5, %v12826_v49  ;;  %v8728_v8 = vadd.f32 %v15254_v55, %v8727_v23  ;;  %v15438_v52 = vrot.slane %v9117_v36, %v12826_v49  ;;  %v15444_v54 = vmax.f32 %v8901_v10, %v9197_v29 }
 0x499   : > { %v11828_v57 = vpop.f32.mrb[21].mxu1  ;;  %v8733_v28 = vadd.f32 %v15254_v55, %v8732_v53  ;;  %v15449_v6 = vmax.f32 %v8950_v63, %v9246_v42  ;;  %v9215_v17 = vcombine.high %v9213_v13, %v9213_v13  ;;  %v9263_v27 = vcombine.high %v9255_v1, %v9255_v1 }
 0x49a   : > { %17237 = vst [vmem:[#allocation14_spill] sm:$0xff] %v15438_v52  ;;  %v9271_v23 = vrot.slane %v9255_v1, %v12826_v49  ;;  %v15453_v57 = vrot.slane %v9262_v20, %v12826_v49  ;;  %v8815_v36 = vmax.f32 %v8728_v8, 0.0  ;;  %v15456_v53 = vmax.f32 %v15277_v7, %v9196_v56 }
 0x49b   : > { %v8816_v5 = vmax.f32 %v8733_v28, 0.0  ;;  %v9198_v29 = vcombine.high %v15422_v3, %v15422_v3  ;;  %v9245_v63 = vcombine.high %v9229_v18, %v9229_v18  ;;  %v9264_v42 = vcombine.high %v9262_v20, %v9262_v20 }
 0x49c   : > { %v9293_v13 = vcombine.high %v9271_v23, %v9271_v23  ;;  %v15465_v1 = vmax.f32 %v8953_v39, %v9271_v23  ;;  %v15471_v7 = vmax.f32 %v9001_v34, %v15453_v57  ;;  %v9297_v28 = vcombine.high %v8815_v36, %v8815_v36 }
 0x49d   : > { %v8737_v0 = vpop.f32.mrb[22].mxu1  ;;  %v9304_v56 = vrot.slane %v8815_v36, %v12826_v49  ;;  %v15475_v18 = vrot.slane %v9215_v17, %v12826_v49  ;;  %v15478_v20 = vrot.slane %v9263_v27, %v12826_v49  ;;  %v9346_v39 = vcombine.high %v8816_v5, %v8816_v5 }
 0x49e   : > { %17238 = vst [vmem:[#allocation44_spill] sm:$0xff] %v15471_v7  ;;  %v11831_v8 = vpop.f32.mrb[23].mxu1  ;;  %v15481_v10 = vmax.f32 %v15319_v51, %v9293_v13  ;;  %v9311_v23 = vrot.slane %v9297_v28, %v12826_v49  ;;  %v9353_v37 = vrot.slane %v8816_v5, %v12826_v49  ;;  %v15487_v36 = vrot.slane %v9264_v42, %v12826_v49 }
 0x49f   : > { %17239 = vst [vmem:[#allocation27_spill] sm:$0xff] %v15478_v20  ;;  %v9312_v32 = vcombine.high %v9304_v56, %v9304_v56  ;;  %v9320_v34 = vrot.slane %v9304_v56, %v12826_v49  ;;  %v9360_v17 = vrot.slane %v9346_v39, %v12826_v49  ;;  %v15491_v27 = vmax.f32 %v15297_v24, %v9245_v63 }
 0x4a0   : > { %17240 = vst [vmem:[#allocation22_spill] sm:$0xff] %v15487_v36  ;;  %v15496_v51 = vmax.f32 %v8902_v62, %v9198_v29  ;;  %v15501_v28 = vrot.slane %v9311_v23, %v12826_v49  ;;  %v8738_v42 = vadd.f32 %v15254_v55, %v8737_v0  ;;  %v9148_v39 = vcombine.high %v15398_v38, %v15398_v38 }
 0x4a1   : > { %v8742_v8 = vpop.f32.mrb[24].mxu1  ;;  %v9342_v5 = vcombine.high %v9320_v34, %v9320_v34  ;;  %v15507_v24 = vrot.slane %v9312_v32, %v12826_v49  ;;  %v15512_v62 = vmax.f32 %v9002_v16, %v9320_v34  ;;  %v9369_v29 = vrot.slane %v9353_v37, %v12826_v49 }
 0x4a2   : > { %17241 = vst [vmem:[#allocation38_spill] sm:$0xff] %v15501_v28  ;;  %v11834_v56 = vpop.f32.mrb[25].mxu1  ;;  %v9247_v63 = vcombine.high %v15475_v18, %v15475_v18  ;;  %v9294_v0 = vcombine.high %v15453_v57, %v15453_v57  ;;  %v9295_v13 = vcombine.high %v15478_v20, %v15478_v20  ;;  %v15532_v34 = vmax.f32 %v9050_v15, %v15501_v28 }
 0x4a3   : > { %17242 = vst [vmem:[#allocation47_spill] sm:$0xff] %v15507_v24  ;;  %17243 = vst [vmem:[#allocation45_spill] sm:$0xff] %v15512_v62  ;;  %v15520_v56 = vmax.f32 %v15331_v45, %v9342_v5  ;;  %v15535_v57 = vrot.slane %v9360_v17, %v12826_v49  ;;  %v9313_v2 = vcombine.high %v9311_v23, %v9311_v23  ;;  %v8817_v20 = vmax.f32 %v8738_v42, 0.0 }
 0x4a4   : > { %17245 = vst [vmem:[#allocation39_spill] sm:$0xff] %v15532_v34  ;;  %v9391_v35 = vcombine.high %v9369_v29, %v9369_v29  ;;  %v17247_v32 = vcombine.high %v15334_v47, %v15334_v47  ;;  %v9344_v16 = vcombine.high %v15507_v24, %v15507_v24  ;;  %v9361_v33 = vcombine.high %v9353_v37, %v9353_v37 }
 0x4a5   : > { %17244 = vst [vmem:[#allocation19_spill] sm:$0xff] %v15520_v56  ;;  %17246 = vst [vmem:[#allocation21_spill] sm:$0xff] %v15535_v57  ;;  %v8747_v5 = vpop.f32.mrb[26].mxu1  ;;  %v9362_v45 = vcombine.high %v9360_v17, %v9360_v17  ;;  %v17249_v15 = vcombine.high %v15348_v31, %v15348_v31  ;;  %v9395_v11 = vcombine.high %v8817_v20, %v8817_v20 }
 0x4a6   : > { %v15540_v22 = vmax.f32 %v17247_v32, %v9369_v29  ;;  %v11837_v21 = vpop.f32.mrb[27].mxu1  ;;  %v15551_v23 = vmax.f32 %v15348_v31, %v9391_v35  ;;  %v9402_v29 = vrot.slane %v8817_v20, %v12826_v49  ;;  %v8743_v42 = vadd.f32 %v15254_v55, %v8742_v8 }
 0x4a7   : > { %v15548_v40 = vmax.f32 %v17249_v15, %v15535_v57  ;;  %v8748_v21 = vadd.f32 %v15254_v55, %v8747_v5  ;;  %v17252_v17 = vcombine.high %v15289_v14, %v15289_v14  ;;  %v17253_v31 = vcombine.high %v15308_v19, %v15308_v19 }
 0x4a8   : > { %17248 = vst [vmem:[#allocation29_spill] sm:$0xff] %v15540_v22  ;;  %17251 = vst [vmem:[#allocation20_spill] sm:$0xff] %v15551_v23  ;;  %v15569_v20 = vrot.slane %v9313_v2, %v12826_v49  ;;  %v9409_v8 = vrot.slane %v9395_v11, %v12826_v49  ;;  %v9418_v5 = vrot.slane %v9402_v29, %v12826_v49  ;;  %v8818_v15 = vmax.f32 %v8743_v42, 0.0 }
 0x4a9   : > { %17250 = vst [vmem:[#allocation42_spill] sm:$0xff] %v15548_v40  ;;  %v8752_v32 = vpop.f32.mrb[28].mxu1  ;;  %v15561_v24 = vmax.f32 %v17252_v17, %v9247_v63  ;;  %v15566_v35 = vmax.f32 %v17253_v31, %v9295_v13  ;;  %v15574_v37 = vrot.slane %v9361_v33, %v12826_v49  ;;  %v8819_v40 = vmax.f32 %v8748_v21, 0.0 }
 0x4aa   : > { %17255 = vst [vmem:[#allocation12_spill] sm:$0xff] %v15569_v20  ;;  %v11840_v4 = vpop.f32.mrb[29].mxu1  ;;  %v17257_v63 = vcombine.high %v15325_v12, %v15325_v12  ;;  %v15582_v13 = vmax.f32 %v15322_v44, %v9294_v0  ;;  %v9410_v2 = vcombine.high %v9402_v29, %v9402_v29  ;;  %v15585_v31 = vrot.slane %v9409_v8, %v12826_v49 }
 0x4ab   : > { %17254 = vst [vmem:[#allocation26_spill] sm:$0xff] %v15566_v35  ;;  %17256 = vst [vmem:[#allocation9_spill] sm:$0xff] %v15574_v37  ;;  %v9440_v11 = vcombine.high %v9418_v5, %v9418_v5  ;;  %v8753_v42 = vadd.f32 %v15254_v55, %v8752_v32  ;;  %v17261_v4 = vcombine.high %v15363_v9, %v15363_v9 }
 0x4ac   : > { %v15579_v17 = vmax.f32 %v17257_v63, %v9344_v16  ;;  %17259 = vst [vmem:[#allocation48_spill] sm:$0xff] %v15582_v13  ;;  %17260 = vst [vmem:[#allocation49_spill] sm:$0xff] %v15585_v31  ;;  %v9444_v21 = vcombine.high %v8818_v15, %v8818_v15  ;;  %v9451_v12 = vrot.slane %v8818_v15, %v12826_v49 }
 0x4ad   : > { %v15591_v33 = vmax.f32 %v17261_v4, %v9418_v5  ;;  %v9493_v16 = vcombine.high %v8819_v40, %v8819_v40  ;;  %v8757_v63 = vpop.f32.mrb[30].mxu1  ;;  %v15597_v0 = vrot.slane %v9362_v45, %v12826_v49  ;;  %v9411_v29 = vcombine.high %v9409_v8, %v9409_v8 }
 0x4ae   : > { %17258 = vst [vmem:[#allocation8_spill] sm:$0xff] %v15579_v17  ;;  %v15600_v19 = vmax.f32 %v15398_v38, %v9440_v11  ;;  %v11843_v32 = vpop.f32.mrb[31].mxu1  ;;  %v15603_v30 = vmax.f32 %v9148_v39, %v15585_v31  ;;  %v9458_v5 = vrot.slane %v9444_v21, %v12826_v49  ;;  %v9459_v4 = vcombine.high %v9451_v12, %v9451_v12 }
 0x4af   : > { %17262 = vst [vmem:[#allocation13_spill] sm:$0xff] %v15591_v33  ;;  %17263 = vst [vmem:[#allocation28_spill] sm:$0xff] %v15597_v0  ;;  %v15607_v15 = vrot.slane %v9451_v12, %v12826_v49  ;;  %v15612_v45 = vrot.slane %v9410_v2, %v12826_v49  ;;  %v9500_v8 = vrot.slane %v8819_v40, %v12826_v49  ;;  %v8820_v12 = vmax.f32 %v8753_v42, 0.0 }
 0x4b0   : > { %17264 = vst [vmem:[#allocation15_spill] sm:$0xff] %v15600_v19  ;;  %17265 = vst [vmem:[#allocation34_spill] sm:$0xff] %v15603_v30  ;;  %v9507_v38 = vrot.slane %v9493_v16, %v12826_v49  ;;  %v15621_v21 = vrot.slane %v9459_v4, %v12826_v49  ;;  %v15626_v2 = vrot.slane %v9411_v29, %v12826_v49 }
 0x4b1   : > { %17266 = vst [vmem:[#allocation46_spill] sm:$0xff] %v15607_v15  ;;  %17267 = vst [vmem:[#allocation18_spill] sm:$0xff] %v15612_v45  ;;  %v9460_v40 = vcombine.high %v9458_v5, %v9458_v5  ;;  %v17270_v16 = vcombine.high %v15438_v52, %v15438_v52  ;;  %v15637_v42 = vrot.slane %v9458_v5, %v12826_v49 }
 0x4b2   : > { %17268 = vst [vmem:[#allocation23_spill] sm:$0xff] %v15621_v21  ;;  %v8762_v32 = vpop.f32.mrb[32].mxu1  ;;  %17269 = vst [vmem:[#allocation50_spill] sm:$0xff] %v15626_v2  ;;  %v9508_v11 = vcombine.high %v9500_v8, %v9500_v8  ;;  %v9509_v30 = vcombine.high %v9507_v38, %v9507_v38  ;;  %v15644_v0 = vrot.slane %v9500_v8, %v12826_v49 }
 0x4b3   : > { %v15632_v39 = vmax.f32 %v17270_v16, %v15607_v15  ;;  %v11846_v33 = vpop.f32.mrb[33].mxu1  ;;  %v15647_v16 = vrot.slane %v9507_v38, %v12826_v49  ;;  %v9549_v4 = vrot.slane %v8820_v12, %v12826_v49  ;;  %v8758_v5 = vadd.f32 %v15254_v55, %v8757_v63 }
 0x4b4   : > { %v9542_v33 = vcombine.high %v8820_v12, %v8820_v12  ;;  %v15655_v29 = vrot.slane %v9460_v40, %v12826_v49  ;;  %v15663_v63 = vrot.slane %v9508_v11, %v12826_v49 }
 0x4b5   : > { %17271 = vst [vmem:[#allocation51_spill] sm:$0xff] %v15632_v39  ;;  %v8763_v39 = vadd.f32 %v15254_v55, %v8762_v32  ;;  %v8821_v9 = vmax.f32 %v8758_v5, 0.0  ;;  %v9557_v57 = vcombine.high %v9549_v4, %v9549_v4 }
 0x4b6   : > { %v8767_v52 = vpop.f32.mrb[34].mxu1  ;;  %v9556_v32 = vrot.slane %v9542_v33, %v12826_v49 }
 0x4b7   : > { %v8768_v38 = vadd.f32 %v15254_v55, %v8767_v52  ;;  %v11849_v31 = vpop.f32.mrb[35].mxu1  ;;  %v8822_v44 = vmax.f32 %v8763_v39, 0.0  ;;  %v15671_v52 = vrot.slane %v9509_v30, %v12826_v49  ;;  %v9591_v5 = vcombine.high %v8821_v9, %v8821_v9 }
 0x4b8   : > { %v9598_v39 = vrot.slane %v8821_v9, %v12826_v49  ;;  %v9558_v15 = vcombine.high %v9556_v32, %v9556_v32  ;;  %v15682_v30 = vrot.slane %v9556_v32, %v12826_v49  ;;  %v15685_v31 = vrot.slane %v9557_v57, %v12826_v49 }
 0x4b9   : > { %v8823_v2 = vmax.f32 %v8768_v38, 0.0  ;;  %v9640_v38 = vcombine.high %v8822_v44, %v8822_v44  ;;  %v9647_v12 = vrot.slane %v8822_v44, %v12826_v49  ;;  %v9605_v11 = vrot.slane %v9591_v5, %v12826_v49 }
 0x4ba   : > { %v8772_v33 = vpop.f32.mrb[36].mxu1  ;;  %v9606_v45 = vcombine.high %v9598_v39, %v9598_v39  ;;  %v15694_v32 = vrot.slane %v9549_v4, %v12826_v49  ;;  %v15702_v37 = vrot.slane %v9558_v15, %v12826_v49  ;;  %v15718_v15 = vrot.slane %v9598_v39, %v12826_v49 }
 0x4bb   : > { %v11852_v40 = vpop.f32.mrb[37].mxu1  ;;  %v9689_v60 = vcombine.high %v8823_v2, %v8823_v2  ;;  %v9654_v9 = vrot.slane %v9640_v38, %v12826_v49  ;;  %v9655_v19 = vcombine.high %v9647_v12, %v9647_v12  ;;  %v9696_v44 = vrot.slane %v8823_v2, %v12826_v49 }
 0x4bc   : > { %v9607_v41 = vcombine.high %v9605_v11, %v9605_v11  ;;  %v15697_v57 = vrot.slane %v9605_v11, %v12826_v49  ;;  %v15707_v2 = vrot.slane %v9606_v45, %v12826_v49  ;;  %v15724_v45 = vrot.slane %v9647_v12, %v12826_v49 }
 0x4bd   : > { %v9703_v40 = vrot.slane %v9689_v60, %v12826_v49  ;;  %v9656_v8 = vcombine.high %v9654_v9, %v9654_v9  ;;  %v15712_v11 = vrot.slane %v9654_v9, %v12826_v49  ;;  %v9704_v38 = vcombine.high %v9696_v44, %v9696_v44 }
 0x4be   : > { %v8777_v61 = vpop.f32.mrb[38].mxu1  ;;  %17272 = vst [vmem:[#allocation52_spill] sm:$0xff] %v15697_v57  ;;  %v15721_v23 = vrot.slane %v9607_v41, %v12826_v49  ;;  %v8773_v39 = vadd.f32 %v15254_v55, %v8772_v33  ;;  %v15747_v4 = vrot.slane %v9696_v44, %v12826_v49 }
 0x4bf   : > { %v11855_v5 = vpop.f32.mrb[39].mxu1  ;;  %17273 = vst [vmem:[#allocation53_spill] sm:$0xff] %v15712_v11  ;;  %v9705_v60 = vcombine.high %v9703_v40, %v9703_v40  ;;  %v15729_v9 = vrot.slane %v9703_v40, %v12826_v49  ;;  %v15738_v12 = vrot.slane %v9656_v8, %v12826_v49  ;;  %v8778_v48 = vadd.f32 %v15254_v55, %v8777_v61 }
 0x4c0   : > { %v15715_v5 = vrot.slane %v9655_v19, %v12826_v49  ;;  %v15732_v19 = vrot.slane %v9704_v38, %v12826_v49 }
 0x4c1   : > { %17274 = vst [vmem:[#allocation54_spill] sm:$0xff] %v15729_v9  ;;  %v15750_v33 = vrot.slane %v9705_v60, %v12826_v49  ;;  %v8825_v41 = vmax.f32 %v8778_v48, 0.0 }
 0x4c2   : > { %v8782_v22 = vpop.f32.mrb[40].mxu1 }
 0x4c3   : > { %v11858_v62 = vpop.f32.mrb[41].mxu1  ;;  %v8783_v20 = vadd.f32 %v15254_v55, %v8782_v22  ;;  %17275 = vst [vmem:[#allocation55_spill] sm:$0xff] %v15750_v33  ;;  %v9794_v60 = vrot.slane %v8825_v41, %v12826_v49 }
 0x4c4   : > { %v8824_v62 = vmax.f32 %v8773_v39, 0.0  ;;  %v9787_v39 = vcombine.high %v8825_v41, %v8825_v41 }
 0x4c5   : > { %v8826_v8 = vmax.f32 %v8783_v20, 0.0  ;;  %v9810_v9 = vrot.slane %v9794_v60, %v12826_v49 }
 0x4c6   : > { %v8787_v36 = vpop.f32.mrb[42].mxu1  ;;  %v9738_v38 = vcombine.high %v8824_v62, %v8824_v62  ;;  %v9745_v44 = vrot.slane %v8824_v62, %v12826_v49  ;;  %v9801_v62 = vrot.slane %v9787_v39, %v12826_v49 }
 0x4c7   : > { %v11861_v11 = vpop.f32.mrb[43].mxu1  ;;  %v9836_v25 = vcombine.high %v8826_v8, %v8826_v8  ;;  %v9843_v47 = vrot.slane %v8826_v8, %v12826_v49  ;;  %v8788_v22 = vadd.f32 %v15254_v55, %v8787_v36  ;;  %v9832_v17 = vcombine.high %v9810_v9, %v9810_v9 }
 0x4c8   : > { %v9752_v20 = vrot.slane %v9738_v38, %v12826_v49  ;;  %v9753_v61 = vcombine.high %v9745_v44, %v9745_v44  ;;  %v15766_v40 = vrot.slane %v9745_v44, %v12826_v49  ;;  %v9802_v11 = vcombine.high %v9794_v60, %v9794_v60 }
 0x4c9   : > { %v9850_v8 = vrot.slane %v9836_v25, %v12826_v49  ;;  %v9803_v36 = vcombine.high %v9801_v62, %v9801_v62  ;;  %v15778_v44 = vrot.slane %v9801_v62, %v12826_v49  ;;  %v17278_v60 = vcombine.high %v15621_v21, %v15621_v21 }
 0x4ca   : > { %17276 = vst [vmem:[#allocation56_spill] sm:$0xff] %v15766_v40  ;;  %v8792_v41 = vpop.f32.mrb[44].mxu1  ;;  %v9754_v28 = vcombine.high %v9752_v20, %v9752_v20  ;;  %v15771_v34 = vrot.slane %v9752_v20, %v12826_v49  ;;  %v15774_v38 = vrot.slane %v9753_v61, %v12826_v49  ;;  %v15781_v39 = vrot.slane %v9802_v11, %v12826_v49 }
 0x4cb   : > { %v11864_v48 = vpop.f32.mrb[45].mxu1  ;;  %v8827_v7 = vmax.f32 %v8788_v22, 0.0  ;;  %v17279_v21 = vcombine.high %v15655_v29, %v15655_v29  ;;  %v17280_v62 = vcombine.high %v15663_v63, %v15663_v63  ;;  %v15815_v33 = vrot.slane %v9803_v36, %v12826_v49 }
 0x4cc   : > { %17277 = vst [vmem:[#allocation57_spill] sm:$0xff] %v15774_v38  ;;  %v10302_v20 = vmax.f32 %v17278_v60, %v15771_v34  ;;  %v15792_v48 = vrot.slane %v9754_v28, %v12826_v49  ;;  %v9784_v11 = vcombine.high %v15771_v34, %v15771_v34  ;;  %v15808_v28 = vmax.f32 %v15663_v63, %v9832_v17 }
 0x4cd   : > { %v15801_v60 = vmax.f32 %v17279_v21, %v9810_v9  ;;  %v10310_v34 = vmax.f32 %v17280_v62, %v15778_v44  ;;  %v9851_v21 = vcombine.high %v9843_v47, %v9843_v47  ;;  %v9852_v9 = vcombine.high %v9850_v8, %v9850_v8 }
 0x4ce   : > { %v8797_v22 = vpop.f32.mrb[46].mxu1  ;;  %v9859_v13 = vrot.slane %v9843_v47, %v12826_v49  ;;  %v15819_v61 = vrot.slane %v9850_v8, %v12826_v49  ;;  %v9885_v25 = vcombine.high %v8827_v7, %v8827_v7  ;;  %v9892_v17 = vrot.slane %v8827_v7, %v12826_v49 }
 0x4cf   : > { %v11867_v40 = vpop.f32.mrb[47].mxu1  ;;  %v10351_v38 = vmax.f32 %v15401_v43, %v10302_v20  ;;  %v17281_v62 = vcombine.high %v15671_v52, %v15671_v52  ;;  %v15834_v8 = vrot.slane %v9852_v9, %v12826_v49  ;;  %v17282_v43 = vcombine.high %v15685_v31, %v15685_v31 }
 0x4d0   : > { %v15826_v40 = vrot.slane %v9851_v21, %v12826_v49  ;;  %v9881_v36 = vcombine.high %v9859_v13, %v9859_v13  ;;  %v9899_v20 = vrot.slane %v9885_v25, %v12826_v49  ;;  %v9900_v21 = vcombine.high %v9892_v17, %v9892_v17 }
 0x4d1   : > { %v15831_v57 = vmax.f32 %v17281_v62, %v9859_v13  ;;  %v15840_v7 = vmax.f32 %v17282_v43, %v15819_v61  ;;  %10405 = vrot.lane.b32.xlu0 %v10351_v38, %s17166_s17  ;;  %v9908_v56 = vrot.slane %v9892_v17, %v12826_v49  ;;  %v10303_v62 = vmax.f32 %v15637_v42, %v15792_v48 }
 0x4d2   : > { %v8802_v47 = vpop.f32.mrb[48].mxu1  ;;  %v15851_v35 = vmax.f32 %v15685_v31, %v9881_v36  ;;  %v9901_v43 = vcombine.high %v9899_v20, %v9899_v20  ;;  %v15855_v25 = vrot.slane %v9899_v20, %v12826_v49  ;;  %v15858_v38 = vrot.slane %v9900_v21, %v12826_v49 }
 0x4d3   : > { %v11870_v63 = vpop.f32.mrb[49].mxu1  ;;  %v10359_v13 = vmax.f32 %v15432_v46, %v10310_v34  ;;  %v8798_v9 = vadd.f32 %v15254_v55, %v8797_v22  ;;  %v9930_v20 = vcombine.high %v9908_v56, %v9908_v56  ;;  %v17286_v22 = vcombine.high %v15707_v2, %v15707_v2 }
 0x4d4   : > { %17283 = vst [vmem:[#allocation58_spill] sm:$0xff] %v15858_v38  ;;  %v8793_v63 = vadd.f32 %v15254_v55, %v8792_v41  ;;  %v17284_v41 = vcombine.high %v15702_v37, %v15702_v37  ;;  %v15886_v36 = vrot.slane %v9901_v43, %v12826_v49  ;;  %v10304_v38 = vmax.f32 %v15655_v29, %v9784_v11 }
 0x4d5   : > { %v15882_v34 = vmax.f32 %v17286_v22, %v15855_v25  ;;  %10462 = vrot.lane.b32.xlu1 %v10359_v13, %s17166_s17  ;;  %v15889_v17 = vmax.f32 %v15707_v2, %v9930_v20  ;;  %v10311_v22 = vmax.f32 %v15647_v16, %v15815_v33 }
 0x4d6   : > { %v15874_v21 = vmax.f32 %v17284_v41, %v9908_v56  ;;  %v8828_v31 = vmax.f32 %v8793_v63, 0.0  ;;  %v10352_v56 = vmax.f32 %v15444_v54, %v10303_v62  ;;  %v8829_v41 = vmax.f32 %v8798_v9, 0.0 }
 0x4d7   : > { %17287 = vst [vmem:[#allocation60_spill] sm:$0xff] %v15889_v17  ;;  %v10355_v54 = vmax.f32 %v15456_v53, %v15801_v60  ;;  %v10353_v29 = vmax.f32 %v15408_v59, %v10304_v38  ;;  %v17345_v17 = vld [vmem:[#allocation30_spill] sm:$0xff] }
 0x4d8   : > { %17285 = vst [vmem:[#allocation59_spill] sm:$0xff] %v15874_v21  ;;  %v9934_v21 = vcombine.high %v8828_v31, %v8828_v31  ;;  %v9941_v46 = vrot.slane %v8828_v31, %v12826_v49  ;;  %10413 = vrot.lane.b32.xlu0 %v10352_v56, %s17020_s27  ;;  %v9983_v43 = vcombine.high %v8829_v41, %v8829_v41 }
 0x4d9   : > { %v9990_v2 = vrot.slane %v8829_v41, %v12826_v49  ;;  %v10360_v56 = vmax.f32 %v15449_v6, %v10311_v22  ;;  %v9933_v6 = vcombine.high %v15886_v36, %v15886_v36 }
 0x4da   : > { %v9948_v62 = vrot.slane %v9934_v21, %v12826_v49  ;;  %v9949_v9 = vcombine.high %v9941_v46, %v9941_v46  ;;  %v9957_v63 = vrot.slane %v9941_v46, %v12826_v49  ;;  %v9997_v11 = vrot.slane %v9983_v43, %v12826_v49 }
 0x4db   : > { %v9998_v31 = vcombine.high %v9990_v2, %v9990_v2  ;;  %v10006_v20 = vrot.slane %v9990_v2, %v12826_v49  ;;  %v17288_v21 = vcombine.high %v15721_v23, %v15721_v23  ;;  %10467 = vrot.lane.b32.xlu1 %v10360_v56, %s17020_s27 }
 0x4dc   : > { %v9950_v13 = vcombine.high %v9948_v62, %v9948_v62  ;;  %v15909_v41 = vrot.slane %v9948_v62, %v12826_v49  ;;  %v15912_v53 = vrot.slane %v9949_v9, %v12826_v49  ;;  %v9979_v60 = vcombine.high %v9957_v63, %v9957_v63  ;;  %10421 = vrot.lane.b32.xlu0 %v10353_v29, %s17164_s14 }
 0x4dd   : > { %v15917_v46 = vmax.f32 %v17288_v21, %v9957_v63  ;;  %v9999_v59 = vcombine.high %v9997_v11, %v9997_v11  ;;  %v15920_v38 = vrot.slane %v9997_v11, %v12826_v49  ;;  %v15923_v43 = vrot.slane %v9998_v31, %v12826_v49  ;;  %v17339_v31 = vld [vmem:[#allocation58_spill] sm:$0xff] }
 0x4de   : > { %v15929_v22 = vrot.slane %v9950_v13, %v12826_v49  ;;  %v8803_v62 = vadd.f32 %v15254_v55, %v8802_v47  ;;  %v15936_v9 = vmax.f32 %v15715_v5, %v9979_v60  ;;  %v17291_v63 = vcombine.high %v15715_v5, %v15715_v5 }
 0x4df   : > { %17289 = vst [vmem:[#allocation61_spill] sm:$0xff] %v15917_v46  ;;  %v15945_v11 = vrot.slane %v9999_v59, %v12826_v49  ;;  %v10028_v13 = vcombine.high %v10006_v20, %v10006_v20  ;;  %v17293_v47 = vcombine.high %v15738_v12, %v15738_v12  ;;  %v17297_v21 = vcombine.high %v15792_v48, %v15792_v48 }
 0x4e0   : > { %17290 = vst [vmem:[#allocation62_spill] sm:$0xff] %v15936_v9  ;;  %v15942_v29 = vmax.f32 %v17291_v63, %v15909_v41  ;;  %v17294_v63 = vcombine.high %v15732_v19, %v15732_v19  ;;  %10437 = vrot.lane.b32.xlu0 %v10355_v54, %s17024_s29  ;;  %v10357_v48 = vmax.f32 %v15419_v50, %v15808_v28  ;;  %v17367_v9 = vld [vmem:[#allocation28_spill] sm:$0xff] }
 0x4e1   : > { %v15956_v60 = vmax.f32 %v17293_v47, %v10006_v20  ;;  %v15963_v59 = vmax.f32 %v15732_v19, %v10028_v13  ;;  %v8830_v20 = vmax.f32 %v8803_v62, 0.0  ;;  %v17296_v47 = vcombine.high %v15778_v44, %v15778_v44 }
 0x4e2   : > { %17292 = vst [vmem:[#allocation63_spill] sm:$0xff] %v15942_v29  ;;  %v15969_v56 = vmax.f32 %v17294_v63, %v15920_v38  ;;  %v17298_v13 = vcombine.high %v15637_v42, %v15637_v42  ;;  %v10363_v19 = vmax.f32 %v15491_v27, %v15831_v57  ;;  %v17299_v63 = vmax.f32 %v15644_v0, %v15781_v39 }
 0x4e3   : > { %v10312_v5 = vmax.f32 %v15671_v52, %v17296_v47  ;;  %v17300_v44 = vcombine.high %v15815_v33, %v15815_v33  ;;  %v17301_v52 = vcombine.high %v15647_v16, %v15647_v16  ;;  %v17302_v42 = vmax.f32 %v15694_v32, %v15826_v40 }
 0x4e4   : > { %17295 = vst [vmem:[#allocation64_spill] sm:$0xff] %v15969_v56  ;;  %v10305_v55 = vmax.f32 %v17298_v13, %v17297_v21  ;;  %v10356_v54 = vmax.f32 %v15496_v51, %v17299_v63  ;;  %v10038_v57 = vrot.slane %v8830_v20, %v12826_v49  ;;  %v17303_v33 = vmax.f32 %v15268_v58, %v15422_v3  ;;  %v17305_v20 = vld [vmem:[#allocation19_spill] sm:$0xff]  ;;  %v17310_v63 = vld [vmem:[#allocation48_spill] sm:$0xff] }
 0x4e5   : > { %v10313_v62 = vmax.f32 %v17301_v52, %v17300_v44  ;;  %v16000_v27 = vmax.f32 %v15561_v24, %v17302_v42  ;;  %v10361_v51 = vmax.f32 %v15429_v26, %v10312_v5  ;;  %v17304_v50 = vmax.f32 %v15289_v14, %v15475_v18  ;;  %v17309_v13 = vld [vmem:[#allocation59_spill] sm:$0xff]  ;;  %v17332_v26 = vld [vmem:[#allocation12_spill] sm:$0xff] }
 0x4e6   : > { %v10354_v21 = vmax.f32 %v17303_v33, %v10305_v55  ;;  %v10367_v47 = vmax.f32 %v15481_v10, %v15840_v7  ;;  %v10319_v24 = vmax.f32 %v15682_v30, %v15834_v8  ;;  %v10039_v5 = vcombine.high %v10038_v57, %v10038_v57  ;;  %v17307_v10 = vld [vmem:[#allocation26_spill] sm:$0xff]  ;;  %v17308_v7 = vld [vmem:[#allocation52_spill] sm:$0xff]  ;;  %v17312_v42 = vld [vmem:[#allocation55_spill] sm:$0xff] }
 0x4e7   : > { %v10362_v28 = vmax.f32 %v17304_v50, %v10313_v62  ;;  %v10046_v58 = vrot.slane %v10038_v57, %v12826_v49  ;;  %10472 = vrot.lane.b32.xlu1 %v10361_v51, %s17164_s14  ;;  %v17306_v14 = vcombine.high %v15819_v61, %v15819_v61  ;;  %v10327_v55 = vmax.f32 %v17308_v7, %v15886_v36  ;;  %v17315_v33 = vld [vmem:[#allocation44_spill] sm:$0xff] }
 0x4e8   : > { %10429 = vrot.lane.b32.xlu0 %v10354_v21, %s17168_s21  ;;  %v16028_v18 = vmax.f32 %v17307_v10, %v10319_v24  ;;  %v17311_v52 = vcombine.high %v15855_v25, %v15855_v25  ;;  %v16041_v61 = vrot.slane %v10039_v5, %v12826_v49  ;;  %v17313_v57 = vcombine.high %v17312_v42, %v17312_v42  ;;  %v17316_v50 = vld [vmem:[#allocation8_spill] sm:$0xff]  ;;  %v17317_v25 = vld [vmem:[#allocation39_spill] sm:$0xff]  ;;  %v17320_v10 = vld [vmem:[#allocation38_spill] sm:$0xff] }
 0x4e9   : > { %v16025_v3 = vmax.f32 %v15702_v37, %v17306_v14  ;;  %v10054_v37 = vcombine.high %v10046_v58, %v10046_v58  ;;  %v16051_v24 = vmax.f32 %v17316_v50, %v10327_v55  ;;  %v17319_v49 = vcombine.high %v15682_v30, %v15682_v30  ;;  %v17324_v50 = vld [vmem:[#allocation56_spill] sm:$0xff]  ;;  %v17325_v14 = vld [vmem:[#allocation57_spill] sm:$0xff] }
 0x4ea   : > { %v16038_v62 = vmax.f32 %v15721_v23, %v17311_v52  ;;  %v16046_v51 = vmax.f32 %v17313_v57, %v10046_v58  ;;  %v17318_v23 = vcombine.high %v15834_v8, %v15834_v8  ;;  %v17321_v58 = vcombine.high %v17320_v10, %v17320_v10  ;;  %v17322_v52 = vld [vmem:[#allocation16_spill] sm:$0xff]  ;;  %v17328_v8 = vld [vmem:[#allocation22_spill] sm:$0xff] }
 0x4eb   : > { %v10055_v55 = vcombine.high %v16041_v61, %v16041_v61  ;;  %v16072_v21 = vmax.f32 %v17325_v14, %v10054_v37  ;;  %10482 = vrot.lane.b32.xlu1 %v10363_v19, %s17024_s29  ;;  %v17327_v30 = vld [vmem:[#allocation36_spill] sm:$0xff]  ;;  %v17333_v19 = vld [vmem:[#allocation41_spill] sm:$0xff]  ;;  %v17353_v2 = vmax.f32 %v15724_v45, %v15912_v53 }
 0x4ec   : > { %17314 = vst [vmem:[#allocation19_spill] sm:$0xff] %v16046_v51  ;;  %v10321_v5 = vmax.f32 %v17319_v49, %v17318_v23  ;;  %v16065_v57 = vmax.f32 %v17322_v52, %v17321_v58  ;;  %10445 = vrot.lane.b32.xlu0 %v10356_v54, %s17017_s22  ;;  %v17329_v23 = vmax.f32 %v17327_v30, %v17328_v8  ;;  %v10644_v51 = vld [vmem:[%s16892_s5 + $0x10] sm:$0xff] }
 0x4ed   : > { %17326 = vst [vmem:[#allocation52_spill] sm:$0xff] %v16072_v21  ;;  %v17330_v58 = vcombine.high %v17328_v8, %v17328_v8  ;;  %v17331_v37 = vcombine.high %v17327_v30, %v17327_v30  ;;  %v10280_v44 = vmax.f32 %v17333_v19, %v17332_v26  ;;  %v17334_v54 = vcombine.high %v17324_v50, %v17324_v50  ;;  %v10645_v21 = vld [vmem:[%s16892_s5 + $0x18] sm:$0xff] }
 0x4ee   : > { %17323 = vst [vmem:[#allocation26_spill] sm:$0xff] %v16065_v57  ;;  %v16079_v49 = vmax.f32 %v17329_v23, %v10321_v5  ;;  %v17335_v5 = vcombine.high %v17308_v7, %v17308_v7  ;;  %v17337_v30 = vcombine.high %v17332_v26, %v17332_v26  ;;  %v17346_v26 = vcombine.high %v17345_v17, %v17345_v17 }
 0x4ef   : > { %v10274_v52 = vmax.f32 %v17331_v37, %v17330_v58  ;;  %v10349_v16 = vmax.f32 %v17334_v54, %v10055_v55  ;;  %v17338_v58 = vcombine.high %v17333_v19, %v17333_v19  ;;  %v17340_v55 = vmax.f32 %v15718_v15, %v17339_v31  ;;  %v17347_v19 = vld [vmem:[#allocation31_spill] sm:$0xff]  ;;  %10477 = vrot.lane.b32.xlu1 %v10362_v28, %s17168_s21 }
 0x4f0   : > { %v10329_v23 = vmax.f32 %v17335_v5, %v9933_v6  ;;  %v17343_v5 = vld [vmem:[#allocation9_spill] sm:$0xff]  ;;  %v17350_v57 = vlaneseq  ;;  %10453 = vrot.lane.b32.xlu0 %v10357_v48, %s17022_s23  ;;  %v17357_v48 = vld [vmem:[#allocation18_spill] sm:$0xff] }
 0x4f1   : > { %v10282_v37 = vmax.f32 %v17338_v58, %v17337_v30  ;;  %v16111_v54 = vmax.f32 %v10274_v52, %v17340_v55  ;;  %v17344_v10 = vcombine.high %v17343_v5, %v17343_v5  ;;  %v17348_v30 = vld [vmem:[#allocation23_spill] sm:$0xff]  ;;  %v17372_v6 = vld [vmem:[#allocation49_spill] sm:$0xff] }
 0x4f2   : > { %v17349_v58 = vmax.f32 %v17347_v19, %v17348_v30  ;;  %vm16127_vm1 = vcmp.lt.s32.totalorder %v17350_v57, 16  ;;  %v16133_v55 = vmax.f32 %v10280_v44, %v10329_v23  ;;  %v17358_v44 = vcombine.high %v17357_v48, %v17357_v48  ;;  %v17359_v23 = vld [vmem:[#allocation24_spill] sm:$0xff]  ;;  %v17362_v30 = vld [vmem:[#allocation21_spill] sm:$0xff] }
 0x4f3   : > { %v10286_v8 = vmax.f32 %v17346_v26, %v17344_v10  ;;  %v16138_v10 = vmax.f32 %v10282_v37, %v17353_v2  ;;  %v17354_v26 = vld [vmem:[#allocation53_spill] sm:$0xff]  ;;  %v17360_v7 = vcombine.high %v17359_v23, %v17359_v23  ;;  %v17361_v37 = vld [vmem:[#allocation54_spill] sm:$0xff]  ;;  %v17363_v56 = vcombine.high %v17362_v30, %v17362_v30  ;;  %10487 = vrot.lane.b32.xlu1 %v16000_v27, %s17017_s22  ;;  %s12091_s22 = sshll.u32 %s12167_s13, 4  ;;  %s12092_s22 = int_to_ptr.vmem [resolvable:$false] %s12091_s22 }
 0x4f4   : > { %v10398_v46 = vmax.f32 %v17349_v58, %v10349_v16  ;;  %v10335_v16 = vmax.f32 %v17354_v26, %v15929_v22  ;;  %v17356_v58 = vcombine.high %v15909_v41, %v15909_v41  ;;  %v10343_v57 = vmax.f32 %v17361_v37, %v15945_v11  ;;  %v17364_v41 = vld [vmem:[#allocation10_spill] sm:$0xff]  ;;  %10498 = vrot.lane.b32.xlu0 %v10367_v47, %s17166_s17 }
 0x4f5   : > { %v10294_v2 = vmax.f32 %v17360_v7, %v17358_v44  ;;  %v16164_v19 = vmax.f32 %v17364_v41, %v17363_v56  ;;  %v17368_v7 = vld [vmem:[#allocation32_spill] sm:$0xff]  ;;  %v17370_v30 = vcombine.high %v15929_v22, %v15929_v22  ;;  %v17371_v56 = vcombine.high %v17354_v26, %v17354_v26  ;;  %v17375_v26 = vld [vmem:[#allocation34_spill] sm:$0xff] }
 0x4f6   : > { %v16148_v28 = vmax.f32 %v15738_v12, %v17356_v58  ;;  %10640 = vst.msk [vmem:[#allocation4 + $0x6] sm:$0x1] %vm16127_vm1, %v10398_v46  ;;  %v17365_v12 = vcombine.high %v15920_v38, %v15920_v38  ;;  %v10288_v44 = vmax.f32 %v17368_v7, %v17367_v9  ;;  %v16174_v36 = vmax.f32 %v10286_v8, %v10335_v16  ;;  %v17369_v46 = vld [vmem:[#allocation42_spill] sm:$0xff]  ;;  %v10659_v16 = vld [vmem:[%s16892_s5 + $0x88] sm:$0xff] }
 0x4f7   : > { %v10337_v41 = vmax.f32 %v17371_v56, %v17370_v30  ;;  %v17373_v38 = vcombine.high %v17372_v6, %v17372_v6  ;;  %v10658_v8 = vld [vmem:[%s16892_s5 + $0x80] sm:$0xff]  ;;  %v16199_v22 = vmax.f32 %v10294_v2, %v10343_v57  ;;  %v17377_v47 = vcombine.high %v17367_v9, %v17367_v9  ;;  %v17380_v6 = vld [vmem:[#allocation25_spill] sm:$0xff] }
 0x4f8   : > { %v16170_v58 = vmax.f32 %v17312_v42, %v17365_v12  ;;  %v17374_v42 = vld [vmem:[#allocation14_spill] sm:$0xff]  ;;  %v17378_v57 = vcombine.high %v17368_v7, %v17368_v7  ;;  %v17385_v7 = vcombine.high %v17380_v6, %v17380_v6  ;;  %10503 = vrot.lane.b32.xlu0 %v16028_v18, %s17020_s27  ;;  %v17395_v18 = vld [vmem:[#allocation17_spill] sm:$0xff] }
 0x4f9   : > { %v16188_v12 = vmax.f32 %v17374_v42, %v17373_v38  ;;  %v10642_v56 = vld [vmem:[%s16892_s5] sm:$0xff]  ;;  %v10643_v38 = vld [vmem:[%s16892_s5 + $0x8] sm:$0xff]  ;;  %v16211_v42 = vmax.f32 %v10288_v44, %v10337_v41  ;;  %v17382_v44 = vcombine.high %v17361_v37, %v17361_v37  ;;  %v10661_v37 = vld [vmem:[%s16892_s5 + $0x98] sm:$0xff] }
 0x4fa   : > { %17366 = vst [vmem:[#allocation59_spill] sm:$0xff] %v16170_v58  ;;  %v10290_v2 = vmax.f32 %v17378_v57, %v17377_v47  ;;  %v17379_v30 = vld [vmem:[#allocation50_spill] sm:$0xff]  ;;  %v17381_v58 = vcombine.high %v15945_v11, %v15945_v11  ;;  %v10660_v11 = vld [vmem:[%s16892_s5 + $0x90] sm:$0xff]  ;;  %v11909_v27 = vpack.c.bf16 %v10643_v38, %v10642_v56  ;;  %v17390_v57 = vmax.f32 %v15465_v1, %v15851_v35  ;;  %v10663_v35 = vld [vmem:[%s16892_s5 + $0xa8] sm:$0xff] }
 0x4fb   : > { %17376 = vst [vmem:[#allocation48_spill] sm:$0xff] %v16211_v42  ;;  %v10296_v29 = vmax.f32 %v17380_v6, %v17379_v30  ;;  %v17383_v42 = vld [vmem:[#allocation13_spill] sm:$0xff]  ;;  %v17384_v9 = vcombine.high %v17379_v30, %v17379_v30  ;;  %v11907_v30 = vpack.c.bf16 %v10659_v16, %v10658_v8  ;;  %v17388_v6 = vld [vmem:[#allocation11_spill] sm:$0xff]  ;;  %v17391_v16 = vmax.f32 %v17324_v50, %v16041_v61  ;;  %v17396_v61 = vld [vmem:[#allocation40_spill] sm:$0xff] }
 0x4fc   : > { %v10345_v41 = vmax.f32 %v17382_v44, %v17381_v58  ;;  %v17387_v58 = vmax.f32 %v15747_v4, %v15923_v43  ;;  %10492 = vrot.lane.b32.xlu1 %v17390_v57, %s17022_s23  ;;  %v17392_v38 = vcombine.high %v17325_v14, %v17325_v14  ;;  %v10662_v1 = vld [vmem:[%s16892_s5 + $0xa0] sm:$0xff]  ;;  %v10260_v50 = vmax.f32 %v17396_v61, %v17395_v18  ;;  %s323_s23 = sand.u32 1, %s12141_s10  }
 0x4fd   : > { %v10298_v47 = vmax.f32 %v17385_v7, %v17384_v9  ;;  %v17389_v9 = vld [vmem:[#allocation37_spill] sm:$0xff]  ;;  %11908 = vmatprep.subr.bf16.mxu1 %v11907_v30  ;;  %v17397_v14 = vcombine.high %v15781_v39, %v15781_v39  ;;  %v11911_v57 = vpack.c.bf16 %v10661_v37, %v10660_v11  ;;  %v9981_v30 = vcombine.high %v15912_v53, %v15912_v53  ;;  %v17403_v11 = vld [vmem:[#allocation47_spill] sm:$0xff]  ;;  %s11142_s28 = scalar_lea.sflag [#allocation6], %s323_s23 }
 0x4fe   : > { %v16248_v44 = vmax.f32 %v10290_v2, %v17387_v58  ;;  %v10252_v7 = vmax.f32 %v17389_v9, %v17388_v6  ;;  %v16264_v8 = vmax.f32 %v10296_v29, %v10345_v41  ;;  %v17393_v2 = vld [vmem:[#allocation46_spill] sm:$0xff]  ;;  %v9883_v29 = vcombine.high %v15826_v40, %v15826_v40  ;;  %11910 = vmatpush3.bf16.msra.mxu1 %v11909_v27  ;;  %v17404_v37 = vld [vmem:[#allocation33_spill] sm:$0xff] }
 0x4ff   : > { %v16269_v56 = vmax.f32 %v10298_v47, %v17391_v16  ;;  %v17394_v58 = vcombine.high %v17393_v2, %v17393_v2  ;;  %v17398_v41 = vcombine.high %v15644_v0, %v15644_v0  ;;  %v9932_v9 = vcombine.high %v17339_v31, %v17339_v31  ;;  %11912 = vmatprep.subr.bf16.mxu1 %v11911_v57  ;;  %v10646_v0 = vld [vmem:[%s16892_s5 + $0x20] sm:$0xff]  ;;  %v10647_v31 = vld [vmem:[%s16892_s5 + $0x28] sm:$0xff] }
 0x500   : > { %v9587_v40 = vcombine.high %v15694_v32, %v15694_v32  ;;  %v11915_v39 = vpack.c.bf16 %v10663_v35, %v10662_v1  ;;  %v10030_v32 = vcombine.high %v15923_v43, %v15923_v43  ;;  %v17399_v53 = vmax.f32 %v17305_v20, %v15882_v34  ;;  %v10665_v43 = vld [vmem:[%s16892_s5 + $0xb8] sm:$0xff]  ;;  %v17401_v20 = vld [vmem:[#allocation27_spill] sm:$0xff] }
 0x501   : > { %v10301_v6 = vmax.f32 %v17394_v58, %v17392_v38  ;;  %v10309_v47 = vmax.f32 %v17398_v41, %v17397_v14  ;;  %v11913_v38 = vpack.c.bf16 %v10645_v21, %v10644_v51  ;;  %v9636_v51 = vcombine.high %v15718_v15, %v15718_v15  ;;  %v10664_v15 = vld [vmem:[%s16892_s5 + $0xb0] sm:$0xff]  ;;  %v10666_v41 = vld [vmem:[%s16892_s5 + $0xc0] sm:$0xff] }
 0x502   : > { %10534 = vrot.lane.b32.xlu1 %v17399_v53, %s17166_s17  ;;  %v17400_v21 = vmax.f32 %v17315_v33, %v16025_v3  ;;  %v9685_v34 = vcombine.high %v15724_v45, %v15724_v45  ;;  %v17402_v3 = vld [vmem:[#allocation43_spill] sm:$0xff]  ;;  %v10317_v27 = vmax.f32 %v9587_v40, %v9883_v29  ;;  %v9734_v58 = vcombine.high %v15747_v4, %v15747_v4  ;;  %v10648_v45 = vld [vmem:[%s16892_s5 + $0x30] sm:$0xff]  ;;  %v10649_v29 = vld [vmem:[%s16892_s5 + $0x38] sm:$0xff] }
 0x503   : > { %v10350_v16 = vmax.f32 %v10252_v7, %v10301_v6  ;;  %v10358_v2 = vmax.f32 %v10260_v50, %v10309_v47  ;;  %v10268_v33 = vmax.f32 %v17402_v3, %v17401_v20  ;;  %v10276_v7 = vmax.f32 %v17404_v37, %v17403_v11  ;;  %11914 = vmatpush3.bf16.msra.mxu1 %v11913_v38  ;;  %v10667_v47 = vld [vmem:[%s16892_s5 + $0xc8] sm:$0xff]  ;;  %v10668_v38 = vld [vmem:[%s16892_s5 + $0xd0] sm:$0xff]  ;;  %v10669_v40 = vld [vmem:[%s16892_s5 + $0xd8] sm:$0xff] }
 0x504   : > { %10508 = vrot.lane.b32.xlu0 %v17400_v21, %s17164_s14  ;;  %v11917_v6 = vpack.c.bf16 %v10647_v31, %v10646_v0  ;;  %v10325_v1 = vmax.f32 %v9636_v51, %v9932_v9  ;;  %11916 = vmatprep.subr.bf16.mxu1 %v11915_v39  ;;  %v11919_v18 = vpack.c.bf16 %v10665_v43, %v10664_v15  ;;  %v10650_v9 = vld [vmem:[%s16892_s5 + $0x40] sm:$0xff]  ;;  %v17412_v0 = vld [vmem:[#allocation45_spill] sm:$0xff]  ;;  %v17413_v31 = vld [vmem:[#allocation60_spill] sm:$0xff] }
 0x505   : > { %10403 = vst.msk [vmem:[#allocation4] sm:$0x1] %vm16127_vm1, %v10350_v16  ;;  %10460 = vst.msk [vmem:[#allocation4 + $0x1] sm:$0x1] %vm16127_vm1, %v10358_v2  ;;  %v10366_v35 = vmax.f32 %v10268_v33, %v10317_v27  ;;  %v10284_v61 = vmax.f32 %v17345_v17, %v17343_v5  ;;  %v10333_v50 = vmax.f32 %v9685_v34, %v9981_v30  ;;  %v10653_v2 = vld [vmem:[%s16892_s5 + $0x58] sm:$0xff]  ;;  %v10670_v21 = vld [vmem:[%s16892_s5 + $0xe0] sm:$0xff] }
 0x506   : > { %10539 = vrot.lane.b32.xlu1 %v16051_v24, %s17020_s27  ;;  %v17405_v4 = vmax.f32 %v17310_v63, %v17309_v13  ;;  %v10374_v14 = vmax.f32 %v10276_v7, %v10325_v1  ;;  %v10292_v17 = vmax.f32 %v17359_v23, %v17357_v48  ;;  %v10341_v5 = vmax.f32 %v9734_v58, %v10030_v32  ;;  %v10651_v48 = vld [vmem:[%s16892_s5 + $0x48] sm:$0xff]  ;;  %s17410_s27 = smov 96   ;;  %v10654_v15 = vld [vmem:[%s16892_s5 + $0x60] sm:$0xff]  ;;  %v17418_v43 = vld [vmem:[#allocation29_spill] sm:$0xff] }
 0x507   : > { %10496 = vst.msk [vmem:[#allocation4 + $0x2] sm:$0x1] %vm16127_vm1, %v10366_v35  ;;  %v10382_v24 = vmax.f32 %v10284_v61, %v10333_v50  ;;  %11918 = vmatpush3.bf16.msra.mxu1 %v11917_v6  ;;  %v11921_v13 = vpack.c.bf16 %v10649_v29, %v10648_v45  ;;  %v11923_v57 = vpack.c.bf16 %v10667_v47, %v10666_v41  ;;  %v17416_v32 = vld [vmem:[#allocation63_spill] sm:$0xff]  ;;  %v17423_v11 = vld [vmem:[#allocation64_spill] sm:$0xff]  ;;  %v10673_v6 = vld [vmem:[%s16892_s5 + $0xf8] sm:$0xff] }
 0x508   : > { %10518 = vrot.lane.b32.xlu0 %v17405_v4, %s17024_s29  ;;  %10532 = vst.msk [vmem:[#allocation4 + $0x3] sm:$0x1] %vm16127_vm1, %v10374_v14  ;;  %v10390_v63 = vmax.f32 %v10292_v17, %v10341_v5  ;;  %11920 = vmatprep.subr.bf16.mxu1 %v11919_v18  ;;  %v17406_v23 = vmax.f32 %v17317_v25, %v16038_v62  ;;  %v10652_v62 = vld [vmem:[%s16892_s5 + $0x50] sm:$0xff]  ;;  %v17407_v25 = vld [vmem:[#allocation26_spill] sm:$0xff]  ;;  %v10655_v3 = vld [vmem:[%s16892_s5 + $0x68] sm:$0xff] }
 0x509   : > { %10568 = vst.msk [vmem:[#allocation4 + $0x4] sm:$0x1] %vm16127_vm1, %v10382_v24  ;;  %v11925_v16 = vpack.c.bf16 %v10651_v48, %v10650_v9  ;;  %v11927_v30 = vpack.c.bf16 %v10669_v40, %v10668_v38  ;;  %v11929_v39 = vpack.c.bf16 %v10653_v2, %v10652_v62  ;;  %v17414_v51 = vmax.f32 %v17412_v0, %v17413_v31  ;;  %v17422_v27 = vld [vmem:[#allocation15_spill] sm:$0xff]  ;;  %v10672_v58 = vld [vmem:[%s16892_s5 + $0xf0] sm:$0xff]  ;;  %v10657_v1 = vld [vmem:[%s16892_s5 + $0x78] sm:$0xff] }
 0x50a   : > { %10544 = vrot.lane.b32.xlu1 %v17406_v23, %s17164_s14  ;;  %10604 = vst.msk [vmem:[#allocation4 + $0x5] sm:$0x1] %vm16127_vm1, %v10390_v63  ;;  %v11933_v33 = vpack.c.bf16 %v10655_v3, %v10654_v15  ;;  %v17424_v37 = vmax.f32 %v17422_v27, %v17423_v11  ;;  %v17425_v7 = vmax.f32 %v17369_v46, %v16148_v28  ;;  %v10656_v28 = vld [vmem:[%s16892_s5 + $0x70] sm:$0xff]  ;;  %v17428_v46 = vld [vmem:[#allocation59_spill] sm:$0xff] }
 0x50b   : > { %11922 = vmatpush3.bf16.msra.mxu1 %v11921_v13  ;;  %v11937_v35 = vpack.c.bf16 %v10657_v1, %v10656_v28  ;;  %v17431_v18 = vld [vmem:[#allocation19_spill] sm:$0xff] }
 0x50c   : > { %10513 = vrot.lane.b32.xlu0 %v16079_v49, %s17168_s21  ;;  %11924 = vmatprep.subr.bf16.mxu1 %v11923_v57  ;;  %v17408_v49 = vld [vmem:[#allocation61_spill] sm:$0xff]  ;;  %v17432_v45 = vmax.f32 %v16188_v12, %v17431_v18  ;;  %v10690_v29 = vld [vmem:[%s16892_s5 + $0x180] sm:$0xff]  ;;  %v10691_v12 = vld [vmem:[%s16892_s5 + $0x188] sm:$0xff] }
 0x50d   : > { %v17409_v52 = vmax.f32 %v17407_v25, %v17408_v49  ;;  %v17434_v61 = vld [vmem:[#allocation51_spill] sm:$0xff] }
 0x50e   : > { %v10674_v1 = vld [vmem:[%s16892_s5 + $0x100] sm:$0xff] }
 0x50f   : > { %10554 = vrot.lane.b32.xlu1 %v17409_v52, %s17024_s29  ;;  %11926 = vmatpush3.bf16.msra.mxu1 %v11925_v16  ;;  %s17421_s29 = smov 32   ;;  %v10678_v47 = vld [vmem:[%s16892_s5 + $0x120] sm:$0xff] }
 0x510   : > { %10523 = vrot.lane.b32.xlu0 %v16111_v54, %s17410_s27  ;;  %11928 = vmatprep.subr.bf16.mxu1 %v11927_v30  ;;  %v17415_v54 = vld [vmem:[#allocation20_spill] sm:$0xff]  ;;  %v10698_v48 = vld [vmem:[%s16892_s5 + $0x1c0] sm:$0xff] }
 0x511   : > { %v17417_v53 = vmax.f32 %v17415_v54, %v17416_v32 }
 0x513   : > { %10549 = vrot.lane.b32.xlu1 %v16133_v55, %s17168_s21  ;;  %11930 = vmatpush3.bf16.msra.mxu1 %v11929_v39  ;;  %v10671_v55 = vld [vmem:[%s16892_s5 + $0xe8] sm:$0xff] }
 0x514   : > { %10528 = vrot.lane.b32.xlu0 %v17414_v51, %s17411_s25  ;;  %v11931_v20 = vpack.c.bf16 %v10671_v55, %v10670_v21 }
 0x516   : > { %11932 = vmatprep.subr.bf16.mxu1 %v11931_v20 }
 0x517   : > { %10559 = vrot.lane.b32.xlu1 %v16138_v10, %s17410_s27  ;;  %v17419_v10 = vld [vmem:[#allocation62_spill] sm:$0xff]  ;;  %11934 = vmatpush3.bf16.msra.mxu1 %v11933_v33 }
 0x518   : > { %10570 = vrot.lane.b32.xlu0 %v17417_v53, %s17166_s17  ;;  %v17420_v34 = vmax.f32 %v17418_v43, %v17419_v10 }
 0x51b   : > { %10564 = vrot.lane.b32.xlu1 %v17420_v34, %s17411_s25 }
 0x51c   : > { %10575 = vrot.lane.b32.xlu0 %v16174_v36, %s17421_s29  ;;  %v17427_v36 = vmax.f32 %v16164_v19, %v15956_v60  ;;  %v17430_v60 = vld [vmem:[#allocation48_spill] sm:$0xff]  ;;  %v11935_v19 = vpack.c.bf16 %v10673_v6, %v10672_v58 }
 0x51e   : > { %11936 = vmatprep.subr.bf16.mxu1 %v11935_v19 }
 0x51f   : > { %10606 = vrot.lane.b32.xlu1 %v17424_v37, %s17166_s17  ;;  %11938 = vmatpush3.bf16.msra.mxu1 %v11937_v35  ;;  %v10675_v35 = vld [vmem:[%s16892_s5 + $0x108] sm:$0xff] }
 0x520   : > { %10580 = vrot.lane.b32.xlu0 %v17425_v7, %s17164_s14 }
 0x523   : > { %10611 = vrot.lane.b32.xlu1 %v16199_v22, %s17421_s29  ;;  %v17429_v22 = vmax.f32 %v17375_v26, %v17428_v46  ;;  %v17433_v26 = vmax.f32 %v17383_v42, %v15963_v59  ;;  %v17437_v59 = vlaneseq  ;;  %s12093_s29 = scalar_lea.vmem %s12092_s22, 32 }
 0x524   : > { %10590 = vrot.lane.b32.xlu0 %v17427_v36, %s17426_s26 }
 0x525   : > { %vm10408_vm2 = vcmp.ge.s32.totalorder %v17437_v59, 16  ;;  %vm10409_vm3 = vcmp.lt.s32.totalorder %v17437_v59, 32  ;;  %vm10416_vm5 = vcmp.ge.s32.totalorder %v17437_v59, 32  ;;  %vm10417_vm6 = vcmp.lt.s32.totalorder %v17437_v59, 48 }
 0x526   : > { %vm16483_vm4 = vmand %vm10408_vm2, %vm10409_vm3  ;;  %vm10424_vm8 = vcmp.ge.s32.totalorder %v17437_v59, 48  ;;  %vm10425_vm9 = vcmp.lt.s32.totalorder %v17437_v59, 64  ;;  %vm10432_vm11 = vcmp.ge.s32.totalorder %v17437_v59, 64  ;;  %vm10433_vm12 = vcmp.lt.s32.totalorder %v17437_v59, 80 }
 0x527   : > { %10616 = vrot.lane.b32.xlu1 %v17429_v22, %s17164_s14  ;;  %vm16493_vm7 = vmand %vm10416_vm5, %vm10417_vm6  ;;  %vm10440_vm14 = vcmp.ge.s32.totalorder %v17437_v59, 80  ;;  %vm10441_vm15 = vcmp.lt.s32.totalorder %v17437_v59, 96  ;;  %vm10448_vm2 = vcmp.ge.s32.totalorder %v17437_v59, 96  ;;  %vm10449_vm3 = vcmp.lt.s32.totalorder %v17437_v59, 112  ;;  %v17452_v22 = vld [vmem:[#allocation35_spill] sm:$0xff] }
 0x528   : > { %10585 = vrot.lane.b32.xlu0 %v17430_v60, %s17168_s21  ;;  %vm16501_vm10 = vmand %vm10424_vm8, %vm10425_vm9  ;;  %vm10456_vm6 = vcmp.ge.s32.totalorder %v17437_v59, 112  ;;  %vm10457_vm8 = vcmp.lt.s32.totalorder %v17437_v59, 128  ;;  %v10748_v60 = vsub.s32 1, %v17452_v22  ;;  %v10744_v19 = vsub.s32 0, %v17452_v22  ;;  %v10677_v59 = vld [vmem:[%s16892_s5 + $0x118] sm:$0xff] }
 0x529   : > { %vm16513_vm0 = vmand %vm10432_vm11, %vm10433_vm12  ;;  %v10756_v18 = vsub.s32 3, %v17452_v22 }
 0x52a   : > { %vm16517_vm1 = vmand %vm10440_vm14, %vm10441_vm15 }
 0x52b   : > { %10626 = vrot.lane.b32.xlu1 %v17432_v45, %s17426_s26  ;;  %vm16529_vm5 = vmand %vm10448_vm2, %vm10449_vm3  ;;  %v10692_v45 = vld [vmem:[%s16892_s5 + $0x190] sm:$0xff]  ;;  %s324_s26 = scalar_lea.vmem [#allocation5], %s323_s23 }
 0x52c   : > { %10595 = vrot.lane.b32.xlu0 %v16248_v44, %s17410_s27  ;;  %v11939_v44 = vpack.c.bf16 %v10691_v12, %v10690_v29  ;;  %vm16537_vm9 = vmand %vm10456_vm6, %vm10457_vm8 }
 0x52e   : > { %11940 = vmatprep.subr.bf16.mxu1 %v11939_v44 }
 0x52f   : > { %10621 = vrot.lane.b32.xlu1 %v16264_v8, %s17168_s21  ;;  %v17435_v8 = vld [vmem:[#allocation52_spill] sm:$0xff] }
 0x530   : > { %10600 = vrot.lane.b32.xlu0 %v17433_v26, %s17411_s25  ;;  %v17436_v50 = vmax.f32 %v17434_v61, %v17435_v8  ;;  %v10693_v26 = vld [vmem:[%s16892_s5 + $0x198] sm:$0xff]  ;;  %v11941_v61 = vpack.c.bf16 %v10675_v35, %v10674_v1 }
 0x531   : > { %v11943_v8 = vpack.c.bf16 %v10693_v26, %v10692_v45  ;;  %v10709_v1 = vld [vmem:[%s16892_s5 + $0x218] sm:$0xff]  ;;  %v10727_v45 = vld [vmem:[%s16892_s5 + $0x2a8] sm:$0xff] }
 0x533   : > { %10631 = vrot.lane.b32.xlu1 %v16269_v56, %s17410_s27  ;;  %s11154_s27 = sshll.u32 %s324_s26, 4  ;;  %s16847_s27 = int_to_ptr.vmem [resolvable:$true] %s11154_s27 }
 0x534   : > { %s12087_s17 = scalar_lea.vmem %s16847_s27, 16  ;;  %p12094_p0 = scmp.lt.s32.totalorder %s16847_s27, %s12092_s22 }
 0x535   : > { %p12088_p11 = scmp.ne.s32.totalorder %s16847_s27, %s12087_s17  ;;  %p12095_p1 = scmp.lt.s32.totalorder %s12093_s29, %s12087_s17 }
 0x537   : > { %10636 = vrot.lane.b32.xlu1 %v17436_v50, %s17411_s25  ;;  %v10676_v50 = vld [vmem:[%s16892_s5 + $0x110] sm:$0xff]  ;;  %p12089_p12 = pnand %p12088_p11, %p12256_p5  ;;  %p12096_p2 = por %p12095_p1, %p12094_p0 }
 0x538   : > { %v11945_v14 = vpack.c.bf16 %v10677_v59, %v10676_v50  ;;  %v10729_v50 = vld [vmem:[%s16892_s5 + $0x2b8] sm:$0xff] }
 0x539   : > { %p12090_p13 = pneg %p12089_p12 }
 0x53b   : > { %p12097_p3 = pnand %p12096_p2, %p12090_p13 }
 0x543   : > { %v10406_v56 = vpop.permute.xlu0 %10405 }
 0x544   : > { %10411 = vst.msk [vmem:[#allocation4] sm:$0x1] %vm16483_vm4, %v10406_v56  ;;  %v10694_v56 = vld [vmem:[%s16892_s5 + $0x1a0] sm:$0xff] }
 0x547   : > { %v10463_v4 = vpop.permute.xlu1 %10462 }
 0x548   : > { %10465 = vst.msk [vmem:[#allocation4 + $0x1] sm:$0x1] %vm16483_vm4, %v10463_v4  ;;  %v10695_v4 = vld [vmem:[%s16892_s5 + $0x1a8] sm:$0xff] }
 0x54a   : > { %v10414_v41 = vpop.permute.xlu0 %10413 }
 0x54b   : > { %10419 = vst.msk [vmem:[#allocation4] sm:$0x1] %vm16493_vm7, %v10414_v41  ;;  %v11947_v41 = vpack.c.bf16 %v10695_v4, %v10694_v56  ;;  %v10712_v56 = vld [vmem:[%s16892_s5 + $0x230] sm:$0xff]  ;;  %v10713_v4 = vld [vmem:[%s16892_s5 + $0x238] sm:$0xff] }
 0x54d   : > { %v10468_v5 = vpop.permute.xlu1 %10467 }
 0x54e   : > { %v10422_v17 = vpop.permute.xlu0 %10421  ;;  %10470 = vst.msk [vmem:[#allocation4 + $0x1] sm:$0x1] %vm16493_vm7, %v10468_v5  ;;  %v10696_v5 = vld [vmem:[%s16892_s5 + $0x1b0] sm:$0xff] }
 0x54f   : > { %10427 = vst.msk [vmem:[#allocation4] sm:$0x1] %vm16501_vm10, %v10422_v17  ;;  %v10679_v17 = vld [vmem:[%s16892_s5 + $0x128] sm:$0xff] }
 0x550   : > { %v11949_v13 = vpack.c.bf16 %v10679_v17, %v10678_v47  ;;  %v11985_v47 = vpack.c.bf16 %v10713_v4, %v10712_v56 }
 0x552   : > { %v10438_v24 = vpop.permute.xlu0 %10437 }
 0x559   : > { %v10473_v57 = vpop.permute.xlu1 %10472 }
 0x55a   : > { %v10430_v9 = vpop.permute.xlu0 %10429  ;;  %10475 = vst.msk [vmem:[#allocation4 + $0x1] sm:$0x1] %vm16501_vm10, %v10473_v57  ;;  %v10680_v57 = vld [vmem:[%s16892_s5 + $0x130] sm:$0xff] }
 0x55b   : > { %10435 = vst.msk [vmem:[#allocation4] sm:$0x1] %vm16513_vm0, %v10430_v9  ;;  %v10681_v9 = vld [vmem:[%s16892_s5 + $0x138] sm:$0xff] }
 0x55c   : > { %10443 = vst.msk [vmem:[#allocation4] sm:$0x1] %vm16517_vm1, %v10438_v24  ;;  %v10697_v24 = vld [vmem:[%s16892_s5 + $0x1b8] sm:$0xff] }
 0x55d   : > { %v10483_v23 = vpop.permute.xlu1 %10482  ;;  %v11951_v63 = vpack.c.bf16 %v10697_v24, %v10696_v5  ;;  %v10714_v5 = vld [vmem:[%s16892_s5 + $0x240] sm:$0xff]  ;;  %v10715_v24 = vld [vmem:[%s16892_s5 + $0x248] sm:$0xff] }
 0x55e   : > { %v10446_v16 = vpop.permute.xlu0 %10445 }
 0x55f   : > { %10451 = vst.msk [vmem:[#allocation4] sm:$0x1] %vm16529_vm5, %v10446_v16  ;;  %v11953_v16 = vpack.c.bf16 %v10681_v9, %v10680_v57  ;;  %v11989_v57 = vpack.c.bf16 %v10715_v24, %v10714_v5 }
 0x561   : > { %v10478_v40 = vpop.permute.xlu1 %10477 }
 0x562   : > { %v10454_v62 = vpop.permute.xlu0 %10453  ;;  %10480 = vst.msk [vmem:[#allocation4 + $0x1] sm:$0x1] %vm16513_vm0, %v10478_v40  ;;  %v10682_v40 = vld [vmem:[%s16892_s5 + $0x140] sm:$0xff] }
 0x563   : > { %10459 = vst.msk [vmem:[#allocation4] sm:$0x1] %vm16537_vm9, %v10454_v62  ;;  %v10683_v62 = vld [vmem:[%s16892_s5 + $0x148] sm:$0xff] }
 0x564   : > { %10485 = vst.msk [vmem:[#allocation4 + $0x1] sm:$0x1] %vm16517_vm1, %v10483_v23  ;;  %v10699_v23 = vld [vmem:[%s16892_s5 + $0x1c8] sm:$0xff] }
 0x565   : > { %v10488_v25 = vpop.permute.xlu1 %10487  ;;  %v11955_v38 = vpack.c.bf16 %v10699_v23, %v10698_v48  ;;  %v10716_v48 = vld [vmem:[%s16892_s5 + $0x250] sm:$0xff]  ;;  %v10717_v23 = vld [vmem:[%s16892_s5 + $0x258] sm:$0xff] }
 0x566   : > { %v10499_v49 = vpop.permute.xlu0 %10498  ;;  %10490 = vst.msk [vmem:[#allocation4 + $0x1] sm:$0x1] %vm16529_vm5, %v10488_v25  ;;  %v10700_v25 = vld [vmem:[%s16892_s5 + $0x1d0] sm:$0xff] }
 0x567   : > { %10501 = vst.msk [vmem:[#allocation4 + $0x2] sm:$0x1] %vm16483_vm4, %v10499_v49  ;;  %v10701_v49 = vld [vmem:[%s16892_s5 + $0x1d8] sm:$0xff] }
 0x56a   : > { %v10504_v30 = vpop.permute.xlu0 %10503 }
 0x56b   : > { %10506 = vst.msk [vmem:[#allocation4 + $0x2] sm:$0x1] %vm16493_vm7, %v10504_v30  ;;  %v11959_v30 = vpack.c.bf16 %v10701_v49, %v10700_v25  ;;  %v10718_v25 = vld [vmem:[%s16892_s5 + $0x260] sm:$0xff]  ;;  %v10719_v49 = vld [vmem:[%s16892_s5 + $0x268] sm:$0xff] }
 0x56e   : > { %v10493_v52 = vpop.permute.xlu1 %10492 }
 0x56f   : > { %10495 = vst.msk [vmem:[#allocation4 + $0x1] sm:$0x1] %vm16537_vm9, %v10493_v52  ;;  %v11957_v52 = vpack.c.bf16 %v10683_v62, %v10682_v40  ;;  %v11993_v40 = vpack.c.bf16 %v10717_v23, %v10716_v48 }
 0x574   : > { %v10535_v2 = vpop.permute.xlu1 %10534 }
 0x575   : > { %10537 = vst.msk [vmem:[#allocation4 + $0x3] sm:$0x1] %vm16483_vm4, %v10535_v2  ;;  %v10684_v2 = vld [vmem:[%s16892_s5 + $0x150] sm:$0xff] }
 0x576   : > { %v10509_v39 = vpop.permute.xlu0 %10508 }
 0x577   : > { %10511 = vst.msk [vmem:[#allocation4 + $0x2] sm:$0x1] %vm16501_vm10, %v10509_v39  ;;  %v10685_v39 = vld [vmem:[%s16892_s5 + $0x158] sm:$0xff] }
 0x578   : > { %v10540_v0 = vpop.permute.xlu1 %10539 }
 0x579   : > { %10542 = vst.msk [vmem:[#allocation4 + $0x3] sm:$0x1] %vm16493_vm7, %v10540_v0  ;;  %v10702_v0 = vld [vmem:[%s16892_s5 + $0x1e0] sm:$0xff] }
 0x57a   : > { %v10519_v31 = vpop.permute.xlu0 %10518 }
 0x57c   : > { %v10545_v51 = vpop.permute.xlu1 %10544 }
 0x57d   : > { %10547 = vst.msk [vmem:[#allocation4 + $0x3] sm:$0x1] %vm16501_vm10, %v10545_v51  ;;  %v11961_v51 = vpack.c.bf16 %v10685_v39, %v10684_v2  ;;  %v11997_v2 = vpack.c.bf16 %v10719_v49, %v10718_v25 }
 0x57e   : > { %v10514_v54 = vpop.permute.xlu0 %10513 }
 0x57f   : > { %10516 = vst.msk [vmem:[#allocation4 + $0x2] sm:$0x1] %vm16513_vm0, %v10514_v54 }
 0x580   : > { %10521 = vst.msk [vmem:[#allocation4 + $0x2] sm:$0x1] %vm16517_vm1, %v10519_v31  ;;  %v10703_v31 = vld [vmem:[%s16892_s5 + $0x1e8] sm:$0xff] }
 0x581   : > { %v10555_v32 = vpop.permute.xlu1 %10554  ;;  %v11963_v54 = vpack.c.bf16 %v10703_v31, %v10702_v0  ;;  %v10720_v0 = vld [vmem:[%s16892_s5 + $0x270] sm:$0xff]  ;;  %v10721_v31 = vld [vmem:[%s16892_s5 + $0x278] sm:$0xff] }
 0x582   : > { %v10524_v53 = vpop.permute.xlu0 %10523 }
 0x583   : > { %10526 = vst.msk [vmem:[#allocation4 + $0x2] sm:$0x1] %vm16529_vm5, %v10524_v53  ;;  %v10687_v53 = vld [vmem:[%s16892_s5 + $0x168] sm:$0xff] }
 0x585   : > { %v10550_v21 = vpop.permute.xlu1 %10549 }
 0x586   : > { %v10529_v55 = vpop.permute.xlu0 %10528  ;;  %10552 = vst.msk [vmem:[#allocation4 + $0x3] sm:$0x1] %vm16513_vm0, %v10550_v21  ;;  %v10704_v21 = vld [vmem:[%s16892_s5 + $0x1f0] sm:$0xff] }
 0x587   : > { %10531 = vst.msk [vmem:[#allocation4 + $0x2] sm:$0x1] %vm16537_vm9, %v10529_v55  ;;  %v10705_v55 = vld [vmem:[%s16892_s5 + $0x1f8] sm:$0xff] }
 0x588   : > { %10557 = vst.msk [vmem:[#allocation4 + $0x3] sm:$0x1] %vm16517_vm1, %v10555_v32  ;;  %v10686_v32 = vld [vmem:[%s16892_s5 + $0x160] sm:$0xff] }
 0x589   : > { %v10560_v15 = vpop.permute.xlu1 %10559 }
 0x58a   : > { %v10571_v43 = vpop.permute.xlu0 %10570  ;;  %10562 = vst.msk [vmem:[#allocation4 + $0x3] sm:$0x1] %vm16529_vm5, %v10560_v15  ;;  %v11965_v15 = vpack.c.bf16 %v10687_v53, %v10686_v32  ;;  %v10738_v32 = vld [vmem:[%s16892_s5 + $0x300] sm:$0xff]  ;;  %v10739_v53 = vld [vmem:[%s16892_s5 + $0x308] sm:$0xff] }
 0x58b   : > { %10573 = vst.msk [vmem:[#allocation4 + $0x4] sm:$0x1] %vm16483_vm4, %v10571_v43  ;;  %v11967_v43 = vpack.c.bf16 %v10705_v55, %v10704_v21  ;;  %v12004_v21 = vpack.c.bf16 %v10739_v53, %v10738_v32 }
 0x58d   : > { %v10565_v10 = vpop.permute.xlu1 %10564 }
 0x58e   : > { %v10576_v34 = vpop.permute.xlu0 %10575  ;;  %10567 = vst.msk [vmem:[#allocation4 + $0x3] sm:$0x1] %vm16537_vm9, %v10565_v10  ;;  %v10688_v10 = vld [vmem:[%s16892_s5 + $0x170] sm:$0xff] }
 0x58f   : > { %10578 = vst.msk [vmem:[#allocation4 + $0x4] sm:$0x1] %vm16493_vm7, %v10576_v34  ;;  %v10689_v34 = vld [vmem:[%s16892_s5 + $0x178] sm:$0xff] }
 0x591   : > { %v10607_v20 = vpop.permute.xlu1 %10606 }
 0x592   : > { %v10581_v3 = vpop.permute.xlu0 %10580  ;;  %10609 = vst.msk [vmem:[#allocation4 + $0x5] sm:$0x1] %vm16483_vm4, %v10607_v20  ;;  %v10722_v20 = vld [vmem:[%s16892_s5 + $0x280] sm:$0xff]  ;;  %vm10776_vm4 = vcmask 130048  }
 0x593   : > { %10583 = vst.msk [vmem:[#allocation4 + $0x4] sm:$0x1] %vm16501_vm10, %v10581_v3  ;;  %v10723_v3 = vld [vmem:[%s16892_s5 + $0x288] sm:$0xff] }
 0x595   : > { %v10612_v33 = vpop.permute.xlu1 %10611 }
 0x596   : > { %v10591_v27 = vpop.permute.xlu0 %10590  ;;  %10614 = vst.msk [vmem:[#allocation4 + $0x5] sm:$0x1] %vm16493_vm7, %v10612_v33  ;;  %v11969_v33 = vpack.c.bf16 %v10689_v34, %v10688_v10  ;;  %v17454_v10 = vmov 0.0   ;;  %vm11139_vm7 = vcmask 73728  }
 0x599   : > { %v10617_v11 = vpop.permute.xlu1 %10616 }
 0x59a   : > { %v10586_v37 = vpop.permute.xlu0 %10585  ;;  %10619 = vst.msk [vmem:[#allocation4 + $0x5] sm:$0x1] %vm16501_vm10, %v10617_v11  ;;  %v11971_v11 = vpack.c.bf16 %v10723_v3, %v10722_v20  ;;  %v11060_v20 = vld [vmem:[%s16894_s7] sm:$0xff] }
 0x59b   : > { %10588 = vst.msk [vmem:[#allocation4 + $0x4] sm:$0x1] %vm16513_vm0, %v10586_v37  ;;  %v10706_v37 = vld [vmem:[%s16892_s5 + $0x200] sm:$0xff] }
 0x59c   : > { %10593 = vst.msk [vmem:[#allocation4 + $0x4] sm:$0x1] %vm16517_vm1, %v10591_v27  ;;  %v10752_v27 = vsub.s32 2, %v17452_v22 }
 0x59d   : > { %v10627_v7 = vpop.permute.xlu1 %10626 }
 0x59e   : > { %v10596_v36 = vpop.permute.xlu0 %10595 }
 0x59f   : > { %10598 = vst.msk [vmem:[#allocation4 + $0x4] sm:$0x1] %vm16529_vm5, %v10596_v36  ;;  %v10764_v36 = vsub.s32 5, %v17452_v22 }
 0x5a1   : > { %v10622_v58 = vpop.permute.xlu1 %10621 }
 0x5a2   : > { %v10601_v6 = vpop.permute.xlu0 %10600  ;;  %10624 = vst.msk [vmem:[#allocation4 + $0x5] sm:$0x1] %vm16513_vm0, %v10622_v58  ;;  %v10724_v58 = vld [vmem:[%s16892_s5 + $0x290] sm:$0xff] }
 0x5a3   : > { %10603 = vst.msk [vmem:[#allocation4 + $0x4] sm:$0x1] %vm16537_vm9, %v10601_v6  ;;  %v10725_v6 = vld [vmem:[%s16892_s5 + $0x298] sm:$0xff] }
 0x5a4   : > { %10629 = vst.msk [vmem:[#allocation4 + $0x5] sm:$0x1] %vm16517_vm1, %v10627_v7  ;;  %v10707_v7 = vld [vmem:[%s16892_s5 + $0x208] sm:$0xff] }
 0x5a5   : > { %v10632_v28 = vpop.permute.xlu1 %10631 }
 0x5a6   : > { %10634 = vst.msk [vmem:[#allocation4 + $0x5] sm:$0x1] %vm16529_vm5, %v10632_v28  ;;  %v11973_v28 = vpack.c.bf16 %v10707_v7, %v10706_v37 }
 0x5a9   : > { %v10637_v46 = vpop.permute.xlu1 %10636 }
 0x5aa   : > { %10639 = vst.msk [vmem:[#allocation4 + $0x5] sm:$0x1] %vm16537_vm9, %v10637_v46 }
 0x5b1   : > { %v16622_v29 = vld [vmem:[#allocation4] sm:$0x7f] }
 0x5b2   : > { %v10749_v12 = vrot.slane %v16622_v29, %v10748_v60  ;;  %v10745_v44 = vrot.slane %v16622_v29, %v10744_v19  ;;  %v10757_v42 = vrot.slane %v16622_v29, %v10756_v18  ;;  %v10753_v46 = vrot.slane %v16622_v29, %v10752_v27  ;;  %v10708_v19 = vld [vmem:[%s16892_s5 + $0x210] sm:$0xff]  ;;  %v10726_v18 = vld [vmem:[%s16892_s5 + $0x2a0] sm:$0xff] }
 0x5b3   : > { %v11975_v60 = vpack.c.bf16 %v10725_v6, %v10724_v58  ;;  %v10765_v35 = vrot.slane %v16622_v29, %v10764_v36  ;;  %v11977_v26 = vpack.c.bf16 %v10709_v1, %v10708_v19  ;;  %v10740_v36 = vld [vmem:[%s16893_s6] sm:$0x1] }
 0x5b4   : > { %10843 = vmatprep.mubr.f32.mxu1 %v10749_v12  ;;  %v11979_v12 = vpack.c.bf16 %v10727_v45, %v10726_v18 }
 0x5b5   : > { %10844 = vmatmul.mubr.f32.vlgmr.msra.gmra.mrb[50].mxu1 %v10745_v44  ;;  %v10710_v44 = vld [vmem:[%s16892_s5 + $0x220] sm:$0xff] }
 0x5b6   : > { %11942 = vmatpush3.bf16.msra.mxu1 %v11941_v61  ;;  %10913 = vmatprep.mubr.f32.mxu1 %v10757_v42  ;;  %v10711_v61 = vld [vmem:[%s16892_s5 + $0x228] sm:$0xff] }
 0x5b7   : > { %11944 = vmatprep.subr.bf16.mxu1 %v11943_v8  ;;  %v10728_v8 = vld [vmem:[%s16892_s5 + $0x2b0] sm:$0xff]  ;;  %v11981_v59 = vpack.c.bf16 %v10711_v61, %v10710_v44  ;;  %v11064_v61 = vld [vmem:[%s16895_s8] sm:$0x1] }
 0x5b8   : > { %v11983_v42 = vpack.c.bf16 %v10729_v50, %v10728_v8 }
 0x5ba   : > { %11946 = vmatpush3.bf16.msra.mxu1 %v11945_v14  ;;  %v10730_v14 = vld [vmem:[%s16892_s5 + $0x2c0] sm:$0xff] }
 0x5bb   : > { %11948 = vmatprep.subr.bf16.mxu1 %v11947_v41  ;;  %v10731_v41 = vld [vmem:[%s16892_s5 + $0x2c8] sm:$0xff] }
 0x5bc   : > { %v11987_v17 = vpack.c.bf16 %v10731_v41, %v10730_v14 }
 0x5be   : > { %11950 = vmatpush3.bf16.msra.mxu1 %v11949_v13  ;;  %v10732_v13 = vld [vmem:[%s16892_s5 + $0x2d0] sm:$0xff] }
 0x5bf   : > { %11952 = vmatprep.subr.bf16.mxu1 %v11951_v63  ;;  %v10733_v63 = vld [vmem:[%s16892_s5 + $0x2d8] sm:$0xff] }
 0x5c0   : > { %v11991_v9 = vpack.c.bf16 %v10733_v63, %v10732_v13 }
 0x5c2   : > { %11954 = vmatpush3.bf16.msra.mxu1 %v11953_v16  ;;  %v10734_v16 = vld [vmem:[%s16892_s5 + $0x2e0] sm:$0xff] }
 0x5c3   : > { %11956 = vmatprep.subr.bf16.mxu1 %v11955_v38  ;;  %v10735_v38 = vld [vmem:[%s16892_s5 + $0x2e8] sm:$0xff] }
 0x5c4   : > { %v11995_v62 = vpack.c.bf16 %v10735_v38, %v10734_v16 }
 0x5c6   : > { %11958 = vmatpush3.bf16.msra.mxu1 %v11957_v52  ;;  %v10736_v52 = vld [vmem:[%s16892_s5 + $0x2f0] sm:$0xff] }
 0x5c7   : > { %11960 = vmatprep.subr.bf16.mxu1 %v11959_v30  ;;  %v10737_v30 = vld [vmem:[%s16892_s5 + $0x2f8] sm:$0xff] }
 0x5c8   : > { %v11999_v39 = vpack.c.bf16 %v10737_v30, %v10736_v52 }
 0x5ca   : > { %11962 = vmatpush3.bf16.msra.mxu1 %v11961_v51  ;;  %v12001_v51 = vpack.c.bf16 %v10721_v31, %v10720_v0 }
 0x5cb   : > { %11964 = vmatprep.subr.bf16.mxu1 %v11963_v54  ;;  %v10760_v54 = vsub.s32 4, %v17452_v22 }
 0x5cd   : > { %v10761_v55 = vrot.slane %v16622_v29, %v10760_v54 }
 0x5ce   : > { %11966 = vmatpush3.bf16.msra.mxu1 %v11965_v15  ;;  %v17453_v15 = vmov 0.0|0.0  }
 0x5cf   : > { %11968 = vmatprep.subr.bf16.mxu1 %v11967_v43  ;;  %v10768_v43 = vsub.s32 6, %v17452_v22  ;;  %v11061_v22 = vld [vmem:[%s16894_s7 + $0x8] sm:$0xff] }
 0x5d0   : > { %v12007_v3 = vpack.c.bf16 %v11061_v22, %v11060_v20 }
 0x5d1   : > { %v10769_v34 = vrot.slane %v16622_v29, %v10768_v43  ;;  %v11062_v29 = vld [vmem:[%s16894_s7 + $0x10] sm:$0xff] }
 0x5d2   : > { %11970 = vmatpush3.bf16.msra.mxu1 %v11969_v33  ;;  %v11063_v33 = vld [vmem:[%s16894_s7 + $0x18] sm:$0xff] }
 0x5d3   : > { %11972 = vmatprep.subr.bf16.mxu1 %v11971_v11  ;;  %v12010_v27 = vpack.c.bf16 %v11063_v33, %v11062_v29 }
 0x5d5   : > { %10914 = vmatmul.mubr.f32.vlgmr.msra.gmra.mrb[52].mxu1 %v10753_v46 }
 0x5d6   : > { %11974 = vmatpush3.bf16.msra.mxu1 %v11973_v28  ;;  %10983 = vmatprep.mubr.f32.mxu1 %v10765_v35 }
 0x5d7   : > { %11976 = vmatprep.subr.bf16.mxu1 %v11975_v60 }
 0x5da   : > { %11978 = vmatpush3.bf16.msra.mxu1 %v11977_v26 }
 0x5db   : > { %11980 = vmatprep.subr.bf16.mxu1 %v11979_v12 }
 0x5de   : > { %11982 = vmatpush3.bf16.msra.mxu1 %v11981_v59 }
 0x5df   : > { %11984 = vmatprep.subr.bf16.mxu1 %v11983_v42 }
 0x5e2   : > { %11986 = vmatpush3.bf16.msra.mxu1 %v11985_v47 }
 0x5e3   : > { %11988 = vmatprep.subr.bf16.mxu1 %v11987_v17 }
 0x5e6   : > { %11990 = vmatpush3.bf16.msra.mxu1 %v11989_v57 }
 0x5e7   : > { %11992 = vmatprep.subr.bf16.mxu1 %v11991_v9 }
 0x5ea   : > { %11994 = vmatpush3.bf16.msra.mxu1 %v11993_v40 }
 0x5eb   : > { %11996 = vmatprep.subr.bf16.mxu1 %v11995_v62 }
 0x5ee   : > { %11998 = vmatpush3.bf16.msra.mxu1 %v11997_v2 }
 0x5ef   : > { %12000 = vmatprep.subr.bf16.mxu1 %v11999_v39 }
 0x5f2   : > { %12002 = vmatpush3.bf16.msra.mxu1 %v12001_v51 }
 0x5f3   : > { %12003 = vmatprep.subr.bf16.mxu1 %v17453_v15 }
 0x5f5   : > { %10984 = vmatmul.mubr.f32.vlgmr.msra.gmra.mrb[54].mxu1 %v10761_v55 }
 0x5f6   : > { %12005 = vmatpush3.bf16.msra.mxu1 %v12004_v21  ;;  %11875 = vmatprep.mubr.msk.f32.mxu1 %vm12163_vm13, %v17454_v10 }
 0x5f7   : > { %12006 = vmatprep.subr.bf16.mxu1 %v17453_v15 }
 0x5f9   : > { %11876 = vmatmul.mubr.msk.f32.vlgmr.msra.gmra.mrb[56].mxu1 %vm10776_vm4, %v10769_v34 }
 0x5fa   : > { %11886 = vmatprep.mubr.msk.f32.mxu1 %vm12163_vm13, %v17454_v10  ;;  %12008 = vmatpush3.bf16.msra.mxu1 %v12007_v3  ;;  %vm11065_vm13 = vcmask 261120  }
 0x5fb   : > { %12009 = vmatprep.subr.bf16.mxu1 %v17453_v15 }
 0x5fe   : > { %12011 = vmatpush3.bf16.msra.mxu1 %v12010_v27 }
 0x688   : > { %v11546_v11 = vpop.f32.mrb[50].mxu1 }
 0x689   : > { %v11547_v37 = vpop.f32.mrb[51].mxu1 }
 0x68a   : > { %v11548_v7 = vadd.f32 %v11547_v37, %v11546_v11 }
 0x68c   : > { %v10846_v28 = vadd.f32 %v11548_v7, %v10740_v36 }
 0x6a8   : > { %v11581_v58 = vpop.f32.mrb[52].mxu1 }
 0x6a9   : > { %v11582_v6 = vpop.f32.mrb[53].mxu1 }
 0x6aa   : > { %v11583_v46 = vadd.f32 %v11582_v6, %v11581_v58 }
 0x6ac   : > { %v10916_v60 = vadd.f32 %v11583_v46, %v10846_v28 }
 0x6c8   : > { %v11616_v19 = vpop.f32.mrb[54].mxu1 }
 0x6c9   : > { %v11617_v1 = vpop.f32.mrb[55].mxu1 }
 0x6ca   : > { %v11618_v35 = vadd.f32 %v11617_v1, %v11616_v19 }
 0x6cc   : > { %v10986_v18 = vadd.f32 %v11618_v35, %v10916_v60  ;;  %v11055_v45 = vpop.f32.mrb[56].mxu1 }
 0x6cd   : > { %v11877_v26 = vpop.f32.mrb[57].mxu1 }
 0x6ce   : > { %v11056_v12 = vadd.f32 %v11055_v45, %v10986_v18 }
 0x6d0   : > { %v11059_v44 = vmax.f32 %v11056_v12, 0.0 }
 0x6d2   : > { %11887 = vmatmul.mubr.msk.f32.vlgmr.msra.gmra.mrb[58].mxu1 %vm11065_vm13, %v11059_v44 }
 0x7a5   : > { %v11135_v8 = vpop.f32.mrb[58].mxu1 }
 0x7a6   : > { %v11136_v50 = vadd.f32 %v11135_v8, %v11064_v61  ;;  %v11888_v59 = vpop.f32.mrb[59].mxu1 }
 0x7a8   : > { %11140 = vst.msk [vmem:[%s324_s26] sm:$0x1] %vm11139_vm7, %v11136_v50 }
 0x7a9   : > { %12100 = shalt.err (!%p12097_p3)
}
 0x7aa   : > { %s12101_s23 = scalar_lea.hbm %s16845_s24, 16  ;;  %s12105_s16 = scalar_lea.hbm %s16896_s9, 32 }
 0x7ab   : > { %p12102_p4 = scmp.ne.s32.totalorder %s16845_s24, %s12101_s23  ;;  %p12106_p9 = scmp.lt.u32.totalorder %s16845_s24, %s16896_s9 }
 0x7ac   : > { %p12107_p10 = scmp.lt.u32.totalorder %s12105_s16, %s12101_s23  ;;  %p12109_p12 = scmp.lt.u32.totalorder %s12101_s23, %s16845_s24 }
 0x7ad   : > { %p12103_p7 = pnand %p12102_p4, %p12256_p5 }
 0x7ae   : > { %p12108_p11 = por %p12107_p10, %p12106_p9 }
 0x7af   : > { %p12104_p8 = pneg %p12103_p7 }
 0x7b0   : > { %p12110_p13 = por %p12109_p12, %p12108_p11 }
 0x7b2   : > { %p12111_p0 = pnand %p12110_p13, %p12104_p8 }
 0x7b4   : > { %12114 = shalt.err (!%p12111_p0)
}
 0x7b5   : > { %12013 = dma.vmem_to_hbm [thread:$0]  (%p12256_p5), %s16847_s27, 16, %s16845_s24, %s11142_s28  }
 0x7b6 PF: > { %p12019_p1 = scmp.ge.s32.totalorder %s12149_s12, 2  ;;  %s11166_s25 = sand.u32 1, %s12137_s30  }
 0x7b7   : > { %s11167_s17 = scalar_lea.sflag [#allocation6], %s11166_s25 }
 0x7b8   : > { %p12016_p2 = pnand %p12019_p1, %p12260_p6 }
 0x7ba   : > { %12132 = dma.done.wait (!%p12016_p2), %s11167_s17, 16  }
 0x7bb   : > { %12134 = vsyncadd (!%p12016_p2), %s11167_s17, 4294967280  ;;  %p19_p3 = scmp.ge.s32.totalorder %s12243_s15, 4   ;;  %s17455_s30 = smov %s12141_s10 }
 0x7bc   : > { %s17456_s10 = smov %s12145_s11  ;;  %s17457_s11 = smov %s12254_s18 }
 0x7bd   : > { %s17458_s12 = smov %s12243_s15  ;;  %21 = sbr.rel (!%p19_p3) target bundleno = 5 (0x5), region = 102 }
 0x7c4   :  { %11171 = vsyncpa [#allocation6], 1 }
 0x7c5   :  { %11173 = vsyncpa [#allocation6 + $0x1], 1 }

</bundles_post_ra>
